<compile_context>
chip_gen: v7x
topology: tpu7x:2x2x1
jax: 0.10.0
libtpu: 0.0.40
codegen_flags: <defaults>
</compile_context>

<pallas_src>
import numpy as np
import jax
import jax.numpy as jnp
from jax import lax
from jax.experimental import pallas as pl
from jax.experimental.pallas import tpu as pltpu


IMG = 224            # conf-map spatial size baked into the module (224 x 224)
HID = 64             # ln1 hidden width
FEAT_IN = 7          # track tensor feature width
TR = 112             # rows of the 224x224 map produced per grid step
TCOL = TR * IMG      # = 25088 output columns of ln2 handled per grid step
N_MAX = 64           # fixed per-sample track padding (avoids recompiles)
POOL_SIZES = (8, 16, 32)


# ---------------------------------------------------------------------------
# Track_Block 'Encoder' branch kernel (batched over samples, int8 w2)
# ---------------------------------------------------------------------------
def _encoder_kernel(x_ref, sel_ref, valid_ref, w1_ref, b1_ref,
                    w2q_ref, w2s_ref, b2_ref, out_ref):
    # Tiny prologue (<<1% of the w2 DMA time); recomputed per column tile so
    # the grid axis stays dependency-free ("parallel").
    s = jax.nn.silu(x_ref[...])                                         # (BN, 8)
    h = jnp.dot(s, w1_ref[...], preferred_element_type=jnp.float32)     # ln1
    h = jax.nn.silu(h + b1_ref[...])                                    # (BN, 64)
    # Per-sample masked mean as a selection matmul (sel rows hold 1/n_b).
    m = jnp.dot(sel_ref[...], h, preferred_element_type=jnp.float32)    # (B, 64)
    # ln2: int8 weights -> bf16 (exact), bf16 MXU matmul (portable on v7x),
    # per-column dequant scale applied to the small (B, TCOL) result.
    q = w2q_ref[...].astype(jnp.bfloat16)                               # (64, TCOL)
    e = jnp.dot(m.astype(jnp.bfloat16), q,
                preferred_element_type=jnp.float32)                     # (B, TCOL)
    e = e * w2s_ref[...] + b2_ref[...].astype(jnp.float32)
    e = jnp.clip(jax.nn.silu(e), 0.0, 1.0)
    # Samples with zero tracks get an all-ones conf map (PyTorch fallback).
    v = valid_ref[...]                                                  # (B, 1)
    out_ref[...] = (v * e + (1.0 - v)).astype(out_ref.dtype)


def prepare_track_params(params):
    """One-time parameter prep: transpose + int8 weight-only quantization."""
    w1 = jnp.asarray(params["w1"], jnp.float32)
    w1t = jnp.zeros((8, HID), jnp.float32).at[:FEAT_IN, :].set(w1.T)
    b1 = jnp.asarray(params["b1"], jnp.float32).reshape(1, HID)

    w2t = jnp.asarray(params["w2"], jnp.float32).T                      # (64, 50176)
    amax = jnp.max(jnp.abs(w2t), axis=0, keepdims=True)                 # (1, 50176)
    w2s = jnp.maximum(amax, 1e-12) / 127.0
    w2q = jnp.clip(jnp.round(w2t / w2s), -127.0, 127.0).astype(jnp.int8)

    b2 = jnp.asarray(params["b2"], jnp.float32).reshape(1, IMG * IMG)
    return {"w1t": w1t, "b1": b1, "w2q": w2q,
            "w2s": w2s.astype(jnp.float32),
            "b2": b2.astype(jnp.bfloat16)}


def track_confidence_maps(x_list, prep):
    """x_list: list of (N_i, 7) track tensors -> (B, 224, 224) bf16 conf maps."""
    B = len(x_list)
    counts = [int(np.asarray(x).shape[0]) for x in x_list]
    max_n = max(counts + [1])
    nmax = N_MAX
    if max_n > nmax:
        nmax = ((max_n + N_MAX - 1) // N_MAX) * N_MAX
    BN = B * nmax

    if max(counts) == 0:
        return jnp.ones((B, IMG, IMG), jnp.bfloat16)

    # Host-side packing with numpy: one transfer per array, no per-sample
    # .at[].set dispatches, no recompiles when detection counts change.
    x_all = np.zeros((BN, 8), np.float32)
    sel = np.zeros((B, BN), np.float32)
    valid = np.zeros((B, 1), np.float32)
    for b, xt in enumerate(x_list):
        n = counts[b]
        if n == 0:
            continue
        x_all[b * nmax:b * nmax + n, :FEAT_IN] = np.asarray(xt, np.float32)
        # Padded rows give h = silu(b1) != 0 but carry zero sel weight, so the
        # masked mean stays exact.
        sel[b, b * nmax:b * nmax + n] = 1.0 / n
        valid[b, 0] = 1.0

    flat = pl.pallas_call(
        _encoder_kernel,
        out_shape=jax.ShapeDtypeStruct((B, IMG * IMG), jnp.bfloat16),
        grid=(IMG // TR,),
        in_specs=[
            pl.BlockSpec((BN, 8), lambda i: (0, 0)),
            pl.BlockSpec((B, BN), lambda i: (0, 0)),
            pl.BlockSpec((B, 1), lambda i: (0, 0)),
            pl.BlockSpec((8, HID), lambda i: (0, 0)),
            pl.BlockSpec((1, HID), lambda i: (0, 0)),
            pl.BlockSpec((HID, TCOL), lambda i: (0, i)),   # int8 weights
            pl.BlockSpec((1, TCOL), lambda i: (0, i)),     # per-column scales
            pl.BlockSpec((1, TCOL), lambda i: (0, i)),     # bias (bf16)
        ],
        out_specs=pl.BlockSpec((B, TCOL), lambda i: (0, i)),
        compiler_params=pltpu.CompilerParams(
            dimension_semantics=("parallel",)),
    )(jnp.asarray(x_all), jnp.asarray(sel), jnp.asarray(valid),
      prep["w1t"], prep["b1"], prep["w2q"], prep["w2s"], prep["b2"])
    return flat.reshape(B, IMG, IMG)


# ---------------------------------------------------------------------------
# Pooling kernel: conf map read once per sample; per-level mix scale via
# (1-r) + r/(p*p) * A @ conf @ A^T on the MXU.
# ---------------------------------------------------------------------------
def _make_pool_kernel(unique_pools, ratio):
    n_pools = len(unique_pools)

    def kernel(*refs):
        conf_ref = refs[0]
        a_refs = refs[1:1 + n_pools]
        out_refs = refs[1 + n_pools:]
        c = conf_ref[0].astype(jnp.float32)                             # (224, 224)
        for p, a_ref, o_ref in zip(unique_pools, a_refs, out_refs):
            a = a_ref[...]                                              # (S, 224)
            t = jnp.dot(a, c, preferred_element_type=jnp.float32)       # (S, 224)
            att = lax.dot_general(t, a, (((1,), (1,)), ((), ())),
                                  preferred_element_type=jnp.float32)   # (S, S)
            scale = (1.0 - ratio) + att * (ratio / float(p * p))
            o_ref[...] = scale[None, :, :]

    return kernel


def track_attention_scales(conf_maps, unique_pools, ratio):
    """conf_maps (B,224,224) -> {p: (B, 1, (224//p)**2) f32 mix scales}."""
    B = conf_maps.shape[0]
    a_mats = []
    for p in unique_pools:
        S = IMG // p
        rows = np.arange(S)[:, None]
        cols = np.arange(IMG)[None, :] // p
        a_mats.append(jnp.asarray((cols == rows).astype(np.float32)))    # (S, 224)

    in_specs = [pl.BlockSpec((1, IMG, IMG), lambda b: (b, 0, 0))]
    in_specs += [pl.BlockSpec((IMG // p, IMG), lambda b: (0, 0))
                 for p in unique_pools]
    out_shapes = tuple(jax.ShapeDtypeStruct((B, IMG // p, IMG // p), jnp.float32)
                       for p in unique_pools)
    out_specs = tuple(pl.BlockSpec((1, IMG // p, IMG // p), lambda b: (b, 0, 0))
                      for p in unique_pools)

    outs = pl.pallas_call(
        _make_pool_kernel(unique_pools, float(ratio)),
        out_shape=out_shapes,
        grid=(B,),
        in_specs=in_specs,
        out_specs=out_specs,
        compiler_params=pltpu.CompilerParams(
            dimension_semantics=("parallel",)),
    )(conf_maps, *a_mats)
    if not isinstance(outs, (list, tuple)):
        outs = (outs,)
    # Wrapper-side flatten of the tiny (B,S,S) scale -> lane-dense (B,1,S*S).
    return {p: o.reshape(B, 1, (IMG // p) * (IMG // p))
            for p, o in zip(unique_pools, outs)}


# ---------------------------------------------------------------------------
# Lane-dense mix kernel: flattened features (B, C, S*S) * broadcast scale.
# ---------------------------------------------------------------------------
def _make_mix_kernel(n_scales, feat_pool_idx):
    n_feats = len(feat_pool_idx)

    def kernel(*refs):
        scale_refs = refs[:n_scales]
        feat_refs = refs[n_scales:n_scales + n_feats]
        out_refs = refs[n_scales + n_feats:]
        for f_ref, o_ref, pi in zip(feat_refs, out_refs, feat_pool_idx):
            s = scale_refs[pi][...]                                     # (1, 1, S*S)
            o_ref[...] = (f_ref[...] * s).astype(o_ref.dtype)

    return kernel


def fused_mix(conf_maps, feat_list, pool_list, ratio):
    """conf_maps: (B,224,224); feat_list[i]: (B,C,S,S) with S = 224 // pool_list[i]."""
    B = conf_maps.shape[0]
    unique_pools = tuple(sorted(set(pool_list)))
    pool_idx = {p: i for i, p in enumerate(unique_pools)}

    scales = track_attention_scales(conf_maps, unique_pools, ratio)

    # Wrapper-side flatten: (B,C,S,S) -> (B,C,S*S) is a free metadata reshape
    # and makes every kernel load/store lane-dense.
    flat_feats = [f.reshape(f.shape[0], f.shape[1], f.shape[2] * f.shape[3])
                  for f in feat_list]

    in_specs = [pl.BlockSpec((1, 1, scales[p].shape[2]), lambda b: (b, 0, 0))
                for p in unique_pools]
    in_specs += [pl.BlockSpec((1, ff.shape[1], ff.shape[2]), lambda b: (b, 0, 0))
                 for ff in flat_feats]
    out_shapes = tuple(jax.ShapeDtypeStruct(ff.shape, ff.dtype) for ff in flat_feats)
    out_specs = tuple(pl.BlockSpec((1, ff.shape[1], ff.shape[2]), lambda b: (b, 0, 0))
                      for ff in flat_feats)

    feat_pool_idx = tuple(pool_idx[p] for p in pool_list)
    outs = pl.pallas_call(
        _make_mix_kernel(len(unique_pools), feat_pool_idx),
        out_shape=out_shapes,
        grid=(B,),
        in_specs=in_specs,
        out_specs=out_specs,
        compiler_params=pltpu.CompilerParams(
            dimension_semantics=("parallel",)),
    )(*[scales[p] for p in unique_pools], *flat_feats)
    if not isinstance(outs, (list, tuple)):
        outs = (outs,)
    return [o.reshape(f.shape) for o, f in zip(outs, feat_list)]


# ---------------------------------------------------------------------------
# TrackNet forward
# ---------------------------------------------------------------------------
def tracknet_forward(x_list, feats, prep_params, track_mix_ratio=0.5):
    conf_maps = track_confidence_maps(x_list, prep_params)   # (B, 224, 224) bf16

    decoupled = (len(feats) == 2 and isinstance(feats[0], (list, tuple)))
    if decoupled:
        cls_feats, reg_feats = feats
        n_lvl = len(cls_feats)
        all_feats = list(cls_feats) + list(reg_feats)
        pools = [POOL_SIZES[l] for l in range(n_lvl)] * 2
        mixed = fused_mix(conf_maps, all_feats, pools, track_mix_ratio)
        return [mixed[:n_lvl], mixed[n_lvl:]], conf_maps

    pools = [POOL_SIZES[l] for l in range(len(feats))]
    out = fused_mix(conf_maps, list(feats), pools, track_mix_ratio)
    return out, conf_maps


# ---------------------------------------------------------------------------
# Pure-JAX reference (sanity check only)
# ---------------------------------------------------------------------------
def _ref_encoder(xt, params):
    s = jax.nn.silu(xt)
    h = jax.nn.silu(s @ params["w1"].T + params["b1"])
    m = jnp.mean(h, axis=0, keepdims=True)
    e = jax.nn.silu(m @ params["w2"].T + params["b2"])
    return jnp.clip(e.reshape(IMG, IMG), 0.0, 1.0)


def _ref_mix(conf_map, feat, pool, ratio):
    S = IMG // pool
    att = conf_map.reshape(S, pool, S, pool).mean(axis=(1, 3))
    return feat * (1.0 - ratio) + feat * att[None, :, :] * ratio


if __name__ == "__main__":
    key = jax.random.PRNGKey(0)
    k1, k2, k3, k4, kx, kf1, kf2, kf3 = jax.random.split(key, 8)

    # deterministic synthetic parameters (shapes from Track_Block.__init__)
    params = {
        "w1": jax.random.normal(k1, (HID, FEAT_IN), jnp.float32) * 0.1,
        "b1": jax.random.normal(k2, (HID,), jnp.float32) * 0.1,
        "w2": jax.random.normal(k3, (IMG * IMG, HID), jnp.float32) * 0.05,
        "b2": jax.random.normal(k4, (IMG * IMG,), jnp.float32) * 0.05,
    }
    prep = prepare_track_params(params)   # one-time transpose + int8 quant

    # x: list of per-sample track tensors (N_i, 7); second sample is empty
    x_list = [jax.random.uniform(kx, (5, 7), jnp.float32),
              jnp.zeros((0, FEAT_IN), jnp.float32)]

    B, C = 2, 8
    feats = [jax.random.normal(kf1, (B, C, 28, 28), jnp.float32),
             jax.random.normal(kf2, (B, C, 14, 14), jnp.float32),
             jax.random.normal(kf3, (B, C, 7, 7), jnp.float32)]

    ratio = 0.5
    out_feats, conf_maps = tracknet_forward(x_list, feats, prep, ratio)
    jax.block_until_ready(conf_maps)
    for o in out_feats:
        jax.block_until_ready(o)

    # sanity check against pure-JAX f32 reference
    # (int8 w2 + bf16 activations / conf storage -> ~2e-2 tolerance)
    conf_f32 = np.asarray(conf_maps.astype(jnp.float32))
    conf_ref0 = np.asarray(_ref_encoder(x_list[0], params))
    assert np.allclose(conf_f32[0], conf_ref0, atol=2e-2, rtol=2e-2)
    assert np.allclose(conf_f32[1], 1.0)
    for l, p in enumerate(POOL_SIZES):
        ref = np.stack([np.asarray(_ref_mix(jnp.asarray(conf_f32[b]),
                                            feats[l][b], p, ratio))
                        for b in range(B)])
        assert np.allclose(np.asarray(out_feats[l]), ref, atol=2e-3, rtol=2e-3)

    print("KERNEL_OK")
</pallas_src>

<mosaic_0001>
module attributes {stable_mosaic.version = 11 : i64} {
  func.func @_encoder_kernel(%arg0: i32, %arg1: memref<128x8xf32, #tpu.memory_space<vmem>>, %arg2: memref<2x128xf32, #tpu.memory_space<vmem>>, %arg3: memref<2x1xf32, #tpu.memory_space<vmem>>, %arg4: memref<8x64xf32, #tpu.memory_space<vmem>>, %arg5: memref<1x64xf32, #tpu.memory_space<vmem>>, %arg6: memref<64x25088xi8, #tpu.memory_space<vmem>>, %arg7: memref<1x25088xf32, #tpu.memory_space<vmem>>, %arg8: memref<1x25088xbf16, #tpu.memory_space<vmem>>, %arg9: memref<2x25088xbf16, #tpu.memory_space<vmem>>) attributes {dimension_semantics = [#tpu.dimension_semantics<parallel>], iteration_bounds = array<i64: 2>, scalar_prefetch = 0 : i64, scratch_operands = 0 : i64, tpu.core_type = #tpu.core_type<tc>, window_params = [{pipeline_mode = #tpu.pipeline_mode<synchronous>, transform_indices = @transform_0, window_bounds = array<i64: 128, 8>}, {pipeline_mode = #tpu.pipeline_mode<synchronous>, transform_indices = @transform_1, window_bounds = array<i64: 2, 128>}, {pipeline_mode = #tpu.pipeline_mode<synchronous>, transform_indices = @transform_2, window_bounds = array<i64: 2, 1>}, {pipeline_mode = #tpu.pipeline_mode<synchronous>, transform_indices = @transform_3, window_bounds = array<i64: 8, 64>}, {pipeline_mode = #tpu.pipeline_mode<synchronous>, transform_indices = @transform_4, window_bounds = array<i64: 1, 64>}, {transform_indices = @transform_5, window_bounds = array<i64: 64, 25088>}, {transform_indices = @transform_6, window_bounds = array<i64: 1, 25088>}, {transform_indices = @transform_7, window_bounds = array<i64: 1, 25088>}, {transform_indices = @transform_8, window_bounds = array<i64: 2, 25088>}]} {
    %c0 = arith.constant 0 : index
    %c0_0 = arith.constant 0 : index
    %0 = vector.load %arg1[%c0, %c0_0] : memref<128x8xf32, #tpu.memory_space<vmem>>, vector<128x8xf32>
    %1 = arith.negf %0 : vector<128x8xf32>
    %2 = math.exp %1 : vector<128x8xf32>
    %cst = arith.constant 1.000000e+00 : f32
    %3 = vector.broadcast %cst : f32 to vector<128x8xf32>
    %4 = arith.addf %3, %2 : vector<128x8xf32>
    %5 = arith.divf %3, %4 : vector<128x8xf32>
    %6 = arith.mulf %0, %5 : vector<128x8xf32>
    %c0_1 = arith.constant 0 : index
    %c0_2 = arith.constant 0 : index
    %7 = vector.load %arg4[%c0_1, %c0_2] : memref<8x64xf32, #tpu.memory_space<vmem>>, vector<8x64xf32>
    %cst_3 = arith.constant dense<0.000000e+00> : vector<128x64xf32>
    %8 = tpu.matmul %6, %7, %cst_3 {dimension_numbers = #tpu.dot_dimension_numbers<[1], [0], [0], [1], [0, 0, 1, 1], [], []>} : vector<128x8xf32>, vector<8x64xf32>, vector<128x64xf32> -> vector<128x64xf32>
    %c0_4 = arith.constant 0 : index
    %c0_5 = arith.constant 0 : index
    %9 = vector.load %arg5[%c0_4, %c0_5] : memref<1x64xf32, #tpu.memory_space<vmem>>, vector<1x64xf32>
    %10 = vector.broadcast %9 : vector<1x64xf32> to vector<128x64xf32>
    %11 = arith.addf %8, %10 : vector<128x64xf32>
    %12 = arith.negf %11 : vector<128x64xf32>
    %13 = math.exp %12 : vector<128x64xf32>
    %cst_6 = arith.constant 1.000000e+00 : f32
    %14 = vector.broadcast %cst_6 : f32 to vector<128x64xf32>
    %15 = arith.addf %14, %13 : vector<128x64xf32>
    %16 = arith.divf %14, %15 : vector<128x64xf32>
    %17 = arith.mulf %11, %16 : vector<128x64xf32>
    %c0_7 = arith.constant 0 : index
    %c0_8 = arith.constant 0 : index
    %18 = vector.load %arg2[%c0_7, %c0_8] : memref<2x128xf32, #tpu.memory_space<vmem>>, vector<2x128xf32>
    %cst_9 = arith.constant dense<0.000000e+00> : vector<2x64xf32>
    %19 = tpu.matmul %18, %17, %cst_9 {dimension_numbers = #tpu.dot_dimension_numbers<[1], [0], [0], [1], [0, 0, 1, 1], [], []>} : vector<2x128xf32>, vector<128x64xf32>, vector<2x64xf32> -> vector<2x64xf32>
    %c0_10 = arith.constant 0 : index
    %c0_11 = arith.constant 0 : index
    %20 = vector.load %arg6[%c0_10, %c0_11] : memref<64x25088xi8, #tpu.memory_space<vmem>>, vector<64x25088xi8>
    %21 = arith.sitofp %20 : vector<64x25088xi8> to vector<64x25088xbf16>
    %22 = arith.truncf %19 : vector<2x64xf32> to vector<2x64xbf16>
    %cst_12 = arith.constant dense<0.000000e+00> : vector<2x25088xf32>
    %23 = tpu.matmul %22, %21, %cst_12 {dimension_numbers = #tpu.dot_dimension_numbers<[1], [0], [0], [1], [0, 0, 1, 1], [], []>} : vector<2x64xbf16>, vector<64x25088xbf16>, vector<2x25088xf32> -> vector<2x25088xf32>
    %c0_13 = arith.constant 0 : index
    %c0_14 = arith.constant 0 : index
    %24 = vector.load %arg7[%c0_13, %c0_14] : memref<1x25088xf32, #tpu.memory_space<vmem>>, vector<1x25088xf32>
    %25 = vector.broadcast %24 : vector<1x25088xf32> to vector<2x25088xf32>
    %26 = arith.mulf %23, %25 : vector<2x25088xf32>
    %c0_15 = arith.constant 0 : index
    %c0_16 = arith.constant 0 : index
    %27 = vector.load %arg8[%c0_15, %c0_16] : memref<1x25088xbf16, #tpu.memory_space<vmem>>, vector<1x25088xbf16>
    %28 = arith.extf %27 : vector<1x25088xbf16> to vector<1x25088xf32>
    %29 = vector.broadcast %28 : vector<1x25088xf32> to vector<2x25088xf32>
    %30 = arith.addf %26, %29 : vector<2x25088xf32>
    %31 = arith.negf %30 : vector<2x25088xf32>
    %32 = math.exp %31 : vector<2x25088xf32>
    %cst_17 = arith.constant 1.000000e+00 : f32
    %33 = vector.broadcast %cst_17 : f32 to vector<2x25088xf32>
    %34 = arith.addf %33, %32 : vector<2x25088xf32>
    %35 = arith.divf %33, %34 : vector<2x25088xf32>
    %36 = arith.mulf %30, %35 : vector<2x25088xf32>
    %cst_18 = arith.constant 0.000000e+00 : f32
    %cst_19 = arith.constant 1.000000e+00 : f32
    %37 = vector.broadcast %cst_18 : f32 to vector<2x25088xf32>
    %38 = arith.maximumf %37, %36 : vector<2x25088xf32>
    %39 = vector.broadcast %cst_19 : f32 to vector<2x25088xf32>
    %40 = arith.minimumf %39, %38 : vector<2x25088xf32>
    %c0_20 = arith.constant 0 : index
    %c0_21 = arith.constant 0 : index
    %41 = vector.load %arg3[%c0_20, %c0_21] : memref<2x1xf32, #tpu.memory_space<vmem>>, vector<2x1xf32>
    %42 = vector.broadcast %41 : vector<2x1xf32> to vector<2x25088xf32>
    %43 = arith.mulf %42, %40 : vector<2x25088xf32>
    %cst_22 = arith.constant 1.000000e+00 : f32
    %44 = vector.broadcast %cst_22 : f32 to vector<2x1xf32>
    %45 = arith.subf %44, %41 : vector<2x1xf32>
    %46 = vector.broadcast %45 : vector<2x1xf32> to vector<2x25088xf32>
    %47 = arith.addf %43, %46 : vector<2x25088xf32>
    %48 = arith.truncf %47 : vector<2x25088xf32> to vector<2x25088xbf16>
    %c0_23 = arith.constant 0 : index
    %c0_24 = arith.constant 0 : index
    %49 = vector.load %arg9[%c0_23, %c0_24] : memref<2x25088xbf16, #tpu.memory_space<vmem>>, vector<2x25088xbf16>
    tpu.vector_store %arg9[%c0_23, %c0_24], %48 {strides = array<i32>} : memref<2x25088xbf16, #tpu.memory_space<vmem>>, vector<2x25088xbf16>,
    return
  }
  func.func @transform_0(%arg0: i32) -> (i32, i32) {
    %c0_i32 = arith.constant 0 : i32
    %c0_i32_0 = arith.constant 0 : i32
    %c0_i32_1 = arith.constant 0 : i32
    return %c0_i32, %c0_i32_0 : i32, i32
  }
  func.func @transform_1(%arg0: i32) -> (i32, i32) {
    %c0_i32 = arith.constant 0 : i32
    %c0_i32_0 = arith.constant 0 : i32
    %c0_i32_1 = arith.constant 0 : i32
    return %c0_i32, %c0_i32_0 : i32, i32
  }
  func.func @transform_2(%arg0: i32) -> (i32, i32) {
    %c0_i32 = arith.constant 0 : i32
    %c0_i32_0 = arith.constant 0 : i32
    %c0_i32_1 = arith.constant 0 : i32
    return %c0_i32, %c0_i32_0 : i32, i32
  }
  func.func @transform_3(%arg0: i32) -> (i32, i32) {
    %c0_i32 = arith.constant 0 : i32
    %c0_i32_0 = arith.constant 0 : i32
    %c0_i32_1 = arith.constant 0 : i32
    return %c0_i32, %c0_i32_0 : i32, i32
  }
  func.func @transform_4(%arg0: i32) -> (i32, i32) {
    %c0_i32 = arith.constant 0 : i32
    %c0_i32_0 = arith.constant 0 : i32
    %c0_i32_1 = arith.constant 0 : i32
    return %c0_i32, %c0_i32_0 : i32, i32
  }
  func.func @transform_5(%arg0: i32) -> (i32, i32) {
    %c0_i32 = arith.constant 0 : i32
    %c0_i32_0 = arith.constant 0 : i32
    return %c0_i32, %arg0 : i32, i32
  }
  func.func @transform_6(%arg0: i32) -> (i32, i32) {
    %c0_i32 = arith.constant 0 : i32
    %c0_i32_0 = arith.constant 0 : i32
    return %c0_i32, %arg0 : i32, i32
  }
  func.func @transform_7(%arg0: i32) -> (i32, i32) {
    %c0_i32 = arith.constant 0 : i32
    %c0_i32_0 = arith.constant 0 : i32
    return %c0_i32, %arg0 : i32, i32
  }
  func.func @transform_8(%arg0: i32) -> (i32, i32) {
    %c0_i32 = arith.constant 0 : i32
    %c0_i32_0 = arith.constant 0 : i32
    return %c0_i32, %arg0 : i32, i32
  }
}

</mosaic_0001>

<bundles_post_ra>
// kernel: tpu_custom_call.1
= control target key start
LH: loop header
LB: loop body
LE: loop exit
PB: predicated region body
PF: predicated region fallthrough
CT: control target
= control target key end

     0   :  { %s21833_s0 = inlined_call_operand.vmem [shape: f32[128,8], index: 0, kind: input, shape index: {}]   ;;  %s21834_s1 = inlined_call_operand.hbm [shape: f32[2,128], index: 1, kind: input, shape index: {}]   ;;  %s21835_s2 = inlined_call_operand.vmem [shape: f32[2,1], index: 2, kind: input, shape index: {}]   ;;  %s21836_s3 = inlined_call_operand.hbm [shape: f32[8,64], index: 3, kind: input, shape index: {}]   ;;  %s21837_s4 = inlined_call_operand.hbm [shape: f32[1,64], index: 4, kind: input, shape index: {}]   ;;  %s21838_s5 = inlined_call_operand.hbm [shape: s8[64,50176], index: 5, kind: input, shape index: {}]   ;;  %s21839_s6 = inlined_call_operand.hbm [shape: f32[1,50176], index: 6, kind: input, shape index: {}]   ;;  %s21840_s7 = inlined_call_operand.hbm [shape: bf16[1,50176], index: 7, kind: input, shape index: {}]   ;;  %s21841_s8 = inlined_call_operand.hbm [shape: bf16[2,50176], index: 8, kind: output, shape index: {}]  }
   0x1   :  { %22031 = sst [smem:[#allocation112_spill]] %s21835_s2 }
   0x2   :  { %22032 = sst [smem:[#allocation113_spill]] %s21836_s3 }
   0x3   :  { %22033 = sst [smem:[#allocation114_spill]] %s21838_s5 }
   0x4   :  { %22034 = sst [smem:[#allocation115_spill]] %s21841_s8 }
   0x5   :  { %13 = vsyncpa [#allocation3], 0 }
   0x6   :  { %14 = vsyncpa [#allocation6], 0 }
   0x7   :  { %15 = vsyncpa [#allocation9], 0 }
   0x8   :  { %17 = vsyncpa [#allocation9 + $0x1], 0 }
   0x9   :  { %18 = vsyncpa [#allocation12], 0 }
   0xa   :  { %20 = vsyncpa [#allocation12 + $0x1], 0 }
   0xb   :  { %21 = vsyncpa [#allocation4], 0 }
   0xc   :  { %23 = vsyncpa [#allocation4 + $0x1], 0  ;;  %s15338_s27 = smov 0   ;;  %s15340_s28 = smov 0  }
   0xd   :  { %s15342_s29 = smov 0   ;;  %s15344_s30 = smov 0  }
   0xe LB: > { %22035 = sst [smem:[#allocation19_spill]] %s15264_s27  ;;  %s15359_s9 = sadd.s32 4294967295, %s15276_s30   ;;  %s15276_s30 = sphi %s15344_s30, %s22755_s30   ;;  %s15272_s29 = sphi %s15342_s29, %s22757_s29   ;;  %s15268_s28 = sphi %s15340_s28, %s22759_s28   ;;  %s15264_s27 = sphi %s15338_s27, %s22758_s27  }
   0xf   : > { %22036 = sst [smem:[#allocation20_spill]] %s15272_s29  ;;  %s13430_s10 = sadd.s32 4294967294, %s15276_s30  }
  0x10   : > { %s15363_s11 = sadd.s32 1, %s15276_s30   ;;  %s141_s12 = sadd.s32 1, %s15272_s29 }
  0x11   : > { %22037 = sst [smem:[#allocation21_spill]] %s15363_s11  ;;  %s138_s13 = ssub.s32 %s15276_s30, %s15363_s11 }
  0x12   : > { %p148_p0 = scmp.ne.s32.totalorder %s15272_s29, %s15268_s28  ;;  %p139_p1 = scmp.eq.s32.totalorder %s138_s13, 0 }
  0x13   : > { %p149_p2 = scmp.eq.s32.totalorder %s15276_s30, 0  ;;  %p154_p3 = scmp.ne.s32.totalorder %s15268_s28, %s15264_s27 }
  0x14   : > { %p21842_p4 = scmp.eq.s32.totalorder %s15359_s9, 0  ;;  %p230_p7 = scmp.eq.s32.totalorder %s15359_s9, 1 }
  0x15   : > { %s15375_s14 = scalar_select %p139_p1, %s15272_s29, %s141_s12  }
  0x16   : > { %p15377_p5 = por %p149_p2, %p148_p0  ;;  %p15383_p6 = por %p21842_p4, %p154_p3 }
  0x17   : > { %22038 = sst [smem:[#allocation22_spill]] %s15375_s14  ;;  %p236_p8 = scmp.eq.s32.totalorder %s13430_s10, 1 }
  0x18   : > { %s22040_s16 = scalar_select %p15383_p6, 1, 0 }
  0x19   : > { %p13431_p9 = scmp.ge.s32.totalorder %s15276_s30, 1  ;;  %p243_p10 = scmp.lt.s32.totalorder %s15276_s30, 3 }
  0x1a   : > { %p15390_p11 = por %p230_p7, %p148_p0  ;;  %p15394_p12 = por %p236_p8, %p154_p3 }
  0x1b   : > { %p15398_p13 = pnand %p13431_p9, %p243_p10  ;;  %s15278_s20 = smov [#allocation5]  }
  0x1c   : > { %s22041_s17 = scalar_select %p15390_p11, 1, 0 }
  0x1d   : > { %s22043_s18 = scalar_select %p15394_p12, 1, 0 }
  0x1e   : > { %22042 = sst [smem:[#allocation23_spill]] %s22041_s17  ;;  %p14036_p2 = pneg %p15398_p13 }
  0x1f   : > { %22044 = sst [smem:[#allocation24_spill]] %s22043_s18  ;;  %s273_s21 = sshll.u32 %s15278_s20, 4  ;;  %s274_s21 = int_to_ptr.vmem [resolvable:$true] %s273_s21 }
  0x20   : > { %s22045_s19 = scalar_select %p15398_p13, 1, 0 }
  0x21   : > { %p14063_p4 = scmp.lt.s32.totalorder %s15276_s30, 2  ;;  %p22046_p0 = scmp.eq.s32.totalorder %s15359_s9, 0 }
  0x22   : > { %s295_s23 = sand.u32 1, %s15276_s30   ;;  %s15420_s25 = sand.u32 1, %s15272_s29  }
  0x23   : > { %p15408_p7 = pnand %p14036_p2, %p22046_p0  ;;  %p15415_p3 = pnand %p14063_p4, %p15377_p5 }
  0x24   : > { %s22049_s3 = sld [smem:[#allocation113_spill]] }
  0x25   : > { %s22047_s22 = scalar_select %p15408_p7, 1, 0 }
  0x26   : > { %s22048_s24 = scalar_select %p15415_p3, 1, 0 }
  0x27   : > { %p15430_p9 = pneg %p15408_p7 }
  0x29   : > { %s22050_s14 = scalar_select %p15430_p9, 1, 0 }
  0x2a   : > { %s15024_s12 = scalar_lea.hbm %s22049_s3, 128 }
  0x2b   : > { %p15025_p8 = scmp.ne.s32.totalorder %s22049_s3, %s15024_s12  ;;  %p15031_p10 = scmp.lt.u32.totalorder %s15024_s12, %s22049_s3 }
  0x2d   : > { %p15027_p4 = pnand %p15430_p9, %p15025_p8 }
  0x2f   : > { %p15028_p5 = pneg %p15027_p4 }
  0x31   : > { %p15033_p2 = pnand %p15031_p10, %p15028_p5 }
  0x33   : > { %15036 = shalt.err (!%p15033_p2)
}
  0x34   : > { %s15037_s26 = scalar_lea.vmem %s274_s21, 128  ;;  %p15045_p11 = scmp.lt.s32.totalorder %s274_s21, %s274_s21 }
  0x35   : > { %p15038_p0 = scmp.ne.s32.totalorder %s274_s21, %s15037_s26  ;;  %p15046_p6 = scmp.lt.s32.totalorder %s15037_s26, %s15037_s26 }
  0x37   : > { %p15040_p1 = pnand %p15038_p0, %p15430_p9  ;;  %p15047_p13 = por %p15046_p6, %p15045_p11 }
  0x39   : > { %p15041_p12 = pneg %p15040_p1 }
  0x3b   : > { %p15048_p3 = pnand %p15047_p13, %p15041_p12 }
  0x3d   : > { %15051 = shalt.err (!%p15048_p3)
}
  0x3e   : > { %14042 = dma.hbm_to_vmem [thread:$0]  (!%p15408_p7), %s22049_s3, 128, %s274_s21, [#allocation6]  }
  0x3f   : > { %s14011_s29 = smul.u32 3136, %s15420_s25  ;;  %s22051_s5 = sld [smem:[#allocation114_spill]] }
  0x40   : > { %s13888_s12 = smul.u32 25088, %s15276_s30  ;;  %s15455_s10 = scalar_lea.sflag [#allocation9], %s295_s23 }
  0x41   : > { %s299_s26 = scalar_lea.vmem [#allocation8], %s14011_s29  ;;  %p22052_p11 = scmp.ne.s32.totalorder %s22048_s24, 0 }
  0x42   : > { %s306_s18 = sshll.u32 %s299_s26, 4  ;;  %s15453_s18 = int_to_ptr.vmem [resolvable:$true] %s306_s18 }
  0x43   : > { %p15461_p12 = pneg %p22052_p11 }
  0x45   : > { %s15451_s11 = scalar_lea.hbm %s22051_s5, %s13888_s12  ;;  %s15057_s29 = scalar_lea.hbm %s22051_s5, 100352 }
  0x46   : > { %s15052_s13 = scalar_lea.hbm %s15451_s11, 50176  ;;  %p15058_p3 = scmp.lt.u32.totalorder %s15451_s11, %s22051_s5 }
  0x47   : > { %p15053_p6 = scmp.ne.s32.totalorder %s15451_s11, %s15052_s13  ;;  %p15059_p8 = scmp.lt.u32.totalorder %s15057_s29, %s15052_s13 }
  0x48   : > { %p15061_p5 = scmp.lt.u32.totalorder %s15052_s13, %s15451_s11 }
  0x49   : > { %p15055_p13 = pnand %p15461_p12, %p15053_p6  ;;  %p15060_p4 = por %p15059_p8, %p15058_p3 }
  0x4b   : > { %p15056_p1 = pneg %p15055_p13  ;;  %p15062_p10 = por %p15061_p5, %p15060_p4 }
  0x4d   : > { %p15063_p2 = pnand %p15062_p10, %p15056_p1 }
  0x4f   : > { %15066 = shalt.err (!%p15063_p2)
}
  0x50   : > { %s15067_s23 = scalar_lea.vmem %s15453_s18, 50176  ;;  %s15279_s12 = smov [#allocation8]  }
  0x51   : > { %p15068_p0 = scmp.ne.s32.totalorder %s15453_s18, %s15067_s23  ;;  %s15072_s20 = sshll.u32 %s15279_s12, 4  ;;  %s15073_s20 = int_to_ptr.vmem [resolvable:$false] %s15072_s20 }
  0x52   : > { %s15074_s15 = scalar_lea.vmem %s15073_s20, 100352  ;;  %p15075_p7 = scmp.lt.s32.totalorder %s15453_s18, %s15073_s20 }
  0x53   : > { %p15070_p6 = pnand %p15068_p0, %p15461_p12  ;;  %p15076_p9 = scmp.lt.s32.totalorder %s15074_s15, %s15067_s23 }
  0x55   : > { %p15071_p13 = pneg %p15070_p6  ;;  %p15077_p3 = por %p15076_p9, %p15075_p7 }
  0x57   : > { %p15078_p8 = pnand %p15077_p3, %p15071_p13 }
  0x59   : > { %15081 = shalt.err (!%p15078_p8)
}
  0x5a   : > { %s15280_s13 = smov 50176   ;;  %s15281_s29 = smov 25088  }
  0x5b   : > { %s15282_s26 = smov 1568   ;;  %s15283_s3 = smov [#allocation2]  }
  0x5c   : > { %14049 = dma.hbm_to_vmem [thread:$0]  (!%p22052_p11), %s15451_s11, 50176, %s15453_s18, %s15455_s10, %s15280_s13, %s15281_s29, %s15282_s26  }
  0x5d   : > { %s259_s5 = sshll.u32 %s15283_s3, 4  ;;  %s15284_s12 = smov [#allocation7]   ;;  %s260_s5 = int_to_ptr.vmem [resolvable:$true] %s259_s5 }
  0x5e   : > { %s284_s27 = sshll.u32 %s15284_s12, 4  ;;  %s15082_s15 = scalar_lea.hbm %s21834_s1, 32  ;;  %s15485_s27 = int_to_ptr.vmem [resolvable:$true] %s284_s27 }
  0x5f   : > { %p15083_p7 = scmp.ne.s32.totalorder %s21834_s1, %s15082_s15  ;;  %p22054_p9 = scmp.ne.s32.totalorder %s22050_s14, 0 }
  0x60   : > { %p15089_p5 = scmp.lt.u32.totalorder %s15082_s15, %s21834_s1 }
  0x61   : > { %p15085_p1 = pnand %p15083_p7, %p22054_p9 }
  0x63   : > { %p15086_p4 = pneg %p15085_p1 }
  0x65   : > { %p15091_p10 = pnand %p15089_p5, %p15086_p4 }
  0x67   : > { %15094 = shalt.err (!%p15091_p10)
}
  0x68   : > { %s15095_s3 = scalar_lea.vmem %s260_s5, 32  ;;  %p15103_p13 = scmp.lt.s32.totalorder %s260_s5, %s260_s5 }
  0x69   : > { %p15096_p2 = scmp.ne.s32.totalorder %s260_s5, %s15095_s3  ;;  %p15104_p3 = scmp.lt.s32.totalorder %s15095_s3, %s15095_s3 }
  0x6b   : > { %p15098_p0 = pnand %p15096_p2, %p22054_p9  ;;  %p15105_p8 = por %p15104_p3, %p15103_p13 }
  0x6d   : > { %p15099_p6 = pneg %p15098_p0 }
  0x6f   : > { %p15106_p11 = pnand %p15105_p8, %p15099_p6 }
  0x71   : > { %15109 = shalt.err (!%p15106_p11)
}
  0x72   : > { %p22055_p7 = scmp.ne.s32.totalorder %s22047_s22, 0  ;;  %s15110_s13 = scalar_lea.hbm %s21837_s4, 16 }
  0x73   : > { %p15111_p1 = scmp.ne.s32.totalorder %s21837_s4, %s15110_s13  ;;  %p15117_p11 = scmp.lt.u32.totalorder %s15110_s13, %s21837_s4 }
  0x74   : > { %14039 = dma.hbm_to_vmem [thread:$0]  (!%p22055_p7), %s21834_s1, 32, %s260_s5, [#allocation3]  }
  0x75   : > { %p15113_p4 = pnand %p15111_p1, %p22054_p9 }
  0x77   : > { %p15114_p5 = pneg %p15113_p4 }
  0x79   : > { %p15119_p10 = pnand %p15117_p11, %p15114_p5 }
  0x7b   : > { %15122 = shalt.err (!%p15119_p10)
}
  0x7c   : > { %s15123_s5 = scalar_lea.vmem %s15485_s27, 16  ;;  %s15130_s20 = scalar_lea.vmem %s15485_s27, 32 }
  0x7d   : > { %p15124_p2 = scmp.ne.s32.totalorder %s15485_s27, %s15123_s5  ;;  %p15131_p13 = scmp.lt.s32.totalorder %s15485_s27, %s15485_s27 }
  0x7e   : > { %p15132_p3 = scmp.lt.s32.totalorder %s15130_s20, %s15123_s5 }
  0x7f   : > { %p15126_p0 = pnand %p15124_p2, %p22054_p9 }
  0x80   : > { %p15133_p8 = por %p15132_p3, %p15131_p13 }
  0x81   : > { %p15127_p6 = pneg %p15126_p0 }
  0x83   : > { %p15134_p1 = pnand %p15133_p8, %p15127_p6 }
  0x85   : > { %15137 = shalt.err (!%p15134_p1)
}
  0x86   : > { %14045 = dma.hbm_to_vmem [thread:$0]  (!%p22055_p7), %s21837_s4, 16, %s15485_s27, [#allocation6]  }
  0x87   : > { %s14012_s14 = smul.u32 196, %s15420_s25  ;;  %s15143_s5 = scalar_lea.hbm %s21839_s6, 6272 }
  0x88   : > { %s13889_s3 = smul.u32 3136, %s15276_s30 }
  0x89   : > { %s320_s22 = scalar_lea.vmem [#allocation10], %s14012_s14 }
  0x8a   : > { %s15534_s2 = scalar_lea.hbm %s21839_s6, %s13889_s3  ;;  %s328_s18 = sshll.u32 %s320_s22, 4  ;;  %s329_s18 = int_to_ptr.vmem [resolvable:$true] %s328_s18 }
  0x8b   : > { %s15541_s26 = scalar_lea.hbm %s21840_s7, %s13889_s3  ;;  %s15138_s27 = scalar_lea.hbm %s15534_s2, 3136 }
  0x8c   : > { %p15139_p9 = scmp.ne.s32.totalorder %s15534_s2, %s15138_s27  ;;  %p15144_p5 = scmp.lt.u32.totalorder %s15534_s2, %s21839_s6 }
  0x8d   : > { %p15145_p11 = scmp.lt.u32.totalorder %s15143_s5, %s15138_s27  ;;  %p15147_p2 = scmp.lt.u32.totalorder %s15138_s27, %s15534_s2 }
  0x8e   : > { %p15141_p7 = pnand %p15139_p9, %p15461_p12 }
  0x8f   : > { %p15146_p10 = por %p15145_p11, %p15144_p5 }
  0x90   : > { %p15142_p4 = pneg %p15141_p7 }
  0x91   : > { %p15148_p0 = por %p15147_p2, %p15146_p10 }
  0x93   : > { %p15149_p6 = pnand %p15148_p0, %p15142_p4 }
  0x95   : > { %15152 = shalt.err (!%p15149_p6)
}
  0x96   : > { %s15153_s11 = scalar_lea.vmem %s329_s18, 3136  ;;  %s15285_s3 = smov [#allocation10]  }
  0x97   : > { %p15154_p13 = scmp.ne.s32.totalorder %s329_s18, %s15153_s11  ;;  %s15158_s8 = sshll.u32 %s15285_s3, 4  ;;  %s15159_s8 = int_to_ptr.vmem [resolvable:$false] %s15158_s8 }
  0x98   : > { %s15160_s17 = scalar_lea.vmem %s15159_s8, 6272  ;;  %p15161_p1 = scmp.lt.s32.totalorder %s329_s18, %s15159_s8 }
  0x99   : > { %p15156_p3 = pnand %p15154_p13, %p15461_p12  ;;  %p15162_p9 = scmp.lt.s32.totalorder %s15160_s17, %s15153_s11 }
  0x9b   : > { %p15157_p8 = pneg %p15156_p3  ;;  %p15163_p7 = por %p15162_p9, %p15161_p1 }
  0x9d   : > { %p15164_p5 = pnand %p15163_p7, %p15157_p8 }
  0x9f   : > { %15167 = shalt.err (!%p15164_p5)
}
  0xa0   : > { %p22056_p11 = scmp.ne.s32.totalorder %s22048_s24, 0  ;;  %s339_s22 = scalar_lea.vmem [#allocation11], %s14012_s14 }
  0xa1   : > { %s347_s13 = sshll.u32 %s339_s22, 4  ;;  %s336_s29 = scalar_lea.sflag [#allocation12], %s15420_s25  ;;  %s348_s13 = int_to_ptr.vmem [resolvable:$true] %s347_s13 }
  0xa2   : > { %14052 = dma.hbm_to_vmem [thread:$0]  (!%p22056_p11), %s15534_s2, 3136, %s329_s18, %s15455_s10  }
  0xa3   : > { %s15168_s27 = scalar_lea.hbm %s15541_s26, 3136  ;;  %s15173_s5 = scalar_lea.hbm %s21840_s7, 6272 }
  0xa4   : > { %p15169_p4 = scmp.ne.s32.totalorder %s15541_s26, %s15168_s27  ;;  %p15174_p0 = scmp.lt.u32.totalorder %s15541_s26, %s21840_s7 }
  0xa5   : > { %p15175_p6 = scmp.lt.u32.totalorder %s15173_s5, %s15168_s27  ;;  %p15177_p3 = scmp.lt.u32.totalorder %s15168_s27, %s15541_s26 }
  0xa6   : > { %p15171_p10 = pnand %p15169_p4, %p15461_p12 }
  0xa7   : > { %p15176_p13 = por %p15175_p6, %p15174_p0 }
  0xa8   : > { %p15172_p2 = pneg %p15171_p10 }
  0xa9   : > { %p15178_p8 = por %p15177_p3, %p15176_p13 }
  0xab   : > { %p15179_p1 = pnand %p15178_p8, %p15172_p2 }
  0xad   : > { %15182 = shalt.err (!%p15179_p1)
}
  0xae   : > { %s15183_s25 = scalar_lea.vmem %s348_s13, 3136  ;;  %s15286_s10 = smov [#allocation11]  }
  0xaf   : > { %p15184_p9 = scmp.ne.s32.totalorder %s348_s13, %s15183_s25  ;;  %s15188_s14 = sshll.u32 %s15286_s10, 4  ;;  %s15189_s14 = int_to_ptr.vmem [resolvable:$false] %s15188_s14 }
  0xb0   : > { %s15190_s2 = scalar_lea.vmem %s15189_s14, 6272  ;;  %p15191_p4 = scmp.lt.s32.totalorder %s348_s13, %s15189_s14 }
  0xb1   : > { %p15186_p7 = pnand %p15184_p9, %p15461_p12  ;;  %p15192_p10 = scmp.lt.s32.totalorder %s15190_s2, %s15183_s25 }
  0xb3   : > { %p15187_p5 = pneg %p15186_p7  ;;  %p15193_p11 = por %p15192_p10, %p15191_p4 }
  0xb5   : > { %p15194_p0 = pnand %p15193_p11, %p15187_p5 }
  0xb7   : > { %15197 = shalt.err (!%p15194_p0)
}
  0xb8   : > { %p22057_p6 = scmp.ne.s32.totalorder %s22048_s24, 0  ;;  %p22058_p2 = scmp.ne.s32.totalorder %s22045_s19, 0 }
  0xba   : > { %14055 = dma.hbm_to_vmem [thread:$0]  (!%p22057_p6), %s15541_s26, 3136, %s348_s13, %s336_s29  }
  0xbb   : > { %356 = sbr.rel (%p22058_p2) target bundleno = 1900 (0x76c), region = 52 }
  0xc2   : > { %p22059_p13 = scmp.eq.s32.totalorder %s15359_s9, 0 }
  0xc4   : > { %15243 = dma.done.wait (%p22059_p13), [#allocation3], 32   ;;  %p22060_p12 = pmov %p22059_p13 }
  0xc6   : > { %15245 = vsyncadd (%p22060_p12), [#allocation3], 4294967264  ;;  %p22061_p3 = pmov %p22060_p12 }
  0xc8   : > { %15247 = dma.done.wait (%p22061_p3), [#allocation6], 144   ;;  %p22062_p8 = pmov %p22061_p3 }
  0xc9   : > { %s370_s24 = sand.u32 1, %s15359_s9   ;;  %s15593_s21 = sand.u32 1, %s15268_s28  }
  0xca   : > { %15249 = vsyncadd (%p22062_p8), [#allocation6], 4294967152  ;;  %s14014_s19 = smul.u32 3136, %s15593_s21  ;;  %s371_s18 = scalar_lea.sflag [#allocation9], %s370_s24 }
  0xcb   : > { %p22063_p11 = scmp.ne.s32.totalorder %s22040_s16, 0 }
  0xcc   : > { %s15596_s26 = scalar_lea.vmem [#allocation8], %s14014_s19 }
  0xcd   : > { %15251 = dma.done.wait (%p22063_p11), %s371_s18, 53312  }
  0xce   : > { %15253 = vsyncadd (%p22063_p11), %s371_s18, 4294913984  ;;  %s15603_s11 = smul.u32 196, %s15593_s21  ;;  %s389_s8 = scalar_lea.sflag [#allocation12], %s15593_s21 }
  0xd0   : > { %s15606_s3 = scalar_lea.vmem [#allocation10], %s15603_s11  ;;  %s15610_s17 = scalar_lea.vmem [#allocation11], %s15603_s11 }
  0xd1   : > { %15255 = dma.done.wait (%p22063_p11), %s389_s8, 3136  }
  0xd2   : > { %15257 = vsyncadd (%p22063_p11), %s389_s8, 4294964160  ;;  %v568_v0 = vld [vmem:[#allocation5] sm:$0xff]  ;;  %v15631_v5 = vld [vmem:[%s21833_s0 + $0x10] sm:$0xff]  ;;  %vm576_vm0 = vcmask 64512   ;;  %vm15288_vm1 = vmmov 0   ;;  %s22064_s18 = sld [smem:[#allocation112_spill]] }
  0xd3   : > { %v15619_v1 = vld [vmem:[%s21833_s0] sm:$0xff]  ;;  %v15624_v2 = vld [vmem:[%s21833_s0 + $0x8] sm:$0xff]  ;;  %13926 = vmatprep.subr.mxu0 %v568_v0  ;;  %v15636_v6 = vld [vmem:[%s21833_s0 + $0x18] sm:$0xff]  ;;  %v13445_v7 = vmul.f32 -1.442695, %v15631_v5  ;;  %vm2130_vm2 = vcmask 523264  }
  0xd4   : > { %v13443_v3 = vmul.f32 -1.442695, %v15619_v1  ;;  %v13444_v4 = vmul.f32 -1.442695, %v15624_v2  ;;  %13927 = vmatpush3.msra.mxu0 %v568_v0  ;;  %v13446_v8 = vmul.f32 -1.442695, %v15636_v6 }
  0xd5   : > { %v15643_v9 = vld [vmem:[%s21833_s0 + $0x20] sm:$0xff]  ;;  %v15648_v10 = vld [vmem:[%s21833_s0 + $0x28] sm:$0xff]  ;;  %v15654_v12 = vld [vmem:[%s21833_s0 + $0x30] sm:$0xff]  ;;  %s17723_s8 = scalar_lea.vmem [#allocation13], %s15603_s11  ;;  %s13891_s11 = smul.u32 3136, %s15359_s9 }
  0xd6   : > { %14112 = vpow2.f32 %v13443_v3  ;;  %v13447_v11 = vmul.f32 -1.442695, %v15643_v9  ;;  %v15659_v13 = vld [vmem:[%s21833_s0 + $0x38] sm:$0xff]  ;;  %v13448_v14 = vmul.f32 -1.442695, %v15648_v10  ;;  %v15665_v15 = vld [vmem:[%s21833_s0 + $0x40] sm:$0xff] }
  0xd7   : > { %14114 = vpow2.f32 %v13444_v4  ;;  %v13449_v16 = vmul.f32 -1.442695, %v15654_v12  ;;  %v15671_v17 = vld [vmem:[%s21833_s0 + $0x48] sm:$0xff]  ;;  %v13450_v18 = vmul.f32 -1.442695, %v15659_v13  ;;  %v15677_v19 = vld [vmem:[%s21833_s0 + $0x50] sm:$0xff] }
  0xd8   : > { %14116 = vpow2.f32 %v13445_v7  ;;  %v13451_v20 = vmul.f32 -1.442695, %v15665_v15  ;;  %v15683_v21 = vld [vmem:[%s21833_s0 + $0x58] sm:$0xff]  ;;  %v13452_v22 = vmul.f32 -1.442695, %v15671_v17  ;;  %v15689_v23 = vld [vmem:[%s21833_s0 + $0x60] sm:$0xff] }
  0xd9   : > { %14118 = vpow2.f32 %v13446_v8  ;;  %v13453_v24 = vmul.f32 -1.442695, %v15677_v19  ;;  %v13454_v25 = vmul.f32 -1.442695, %v15683_v21  ;;  %v13455_v26 = vmul.f32 -1.442695, %v15689_v23 }
  0xda   : > { %14120 = vpow2.f32 %v13447_v11  ;;  %v15697_v46 = vld [vmem:[%s21833_s0 + $0x68] sm:$0xff]  ;;  %v15702_v49 = vld [vmem:[%s21833_s0 + $0x70] sm:$0xff]  ;;  %v15707_v52 = vld [vmem:[%s21833_s0 + $0x78] sm:$0xff]  ;;  %s22749_s13 = sld [smem:[#allocation115_spill]]  ;;  %s13272_s27 = scalar_lea.sflag [#allocation4], %s15593_s21 }
  0xdb   : > { %14122 = vpow2.f32 %v13448_v14  ;;  %v13456_v54 = vmul.f32 -1.442695, %v15697_v46  ;;  %v13457_v56 = vmul.f32 -1.442695, %v15702_v49  ;;  %v13458_v59 = vmul.f32 -1.442695, %v15707_v52 }
  0xdc   : > { %14124 = vpow2.f32 %v13449_v16  ;;  %s15292_s9 = smov [#allocation13]  }
  0xdd   : > { %14126 = vpow2.f32 %v13450_v18  ;;  %s15202_s23 = sshll.u32 %s15292_s9, 4  ;;  %s15203_s23 = int_to_ptr.vmem [resolvable:$false] %s15202_s23 }
  0xde   : > { %14128 = vpow2.f32 %v13451_v20  ;;  %s15204_s16 = scalar_lea.vmem %s15203_s23, 6272 }
  0xdf   : > { %14130 = vpow2.f32 %v13452_v22 }
  0xe0   : > { %v14113_v27 = vpop.eup %14112  ;;  %14132 = vpow2.f32 %v13453_v24  ;;  %s21788_s29 = scalar_lea.hbm %s22749_s13, %s13891_s11 }
  0xe1   : > { %v14115_v28 = vpop.eup %14114  ;;  %v504_v29 = vadd.f32 1.0, %v14113_v27  ;;  %14134 = vpow2.f32 %v13454_v25 }
  0xe2   : > { %v14117_v30 = vpop.eup %14116  ;;  %v505_v31 = vadd.f32 1.0, %v14115_v28  ;;  %14136 = vpow2.f32 %v13455_v26 }
  0xe3   : > { %v14119_v32 = vpop.eup %14118  ;;  %14138 = vrcp.f32 %v504_v29  ;;  %v506_v33 = vadd.f32 1.0, %v14117_v30 }
  0xe4   : > { %v14121_v34 = vpop.eup %14120  ;;  %14140 = vrcp.f32 %v505_v31  ;;  %v507_v35 = vadd.f32 1.0, %v14119_v32 }
  0xe5   : > { %v14123_v36 = vpop.eup %14122  ;;  %14142 = vrcp.f32 %v506_v33  ;;  %v508_v37 = vadd.f32 1.0, %v14121_v34  ;;  %v15289_v34 = vmov 0.0  }
  0xe6   : > { %v14125_v38 = vpop.eup %14124  ;;  %14144 = vrcp.f32 %v507_v35  ;;  %v509_v39 = vadd.f32 1.0, %v14123_v36  ;;  %13984 = vmatprep.mubr.msk.f32.mxu1 %vm15288_vm1, %v15289_v34  ;;  %v954_v35 = vld [vmem:[%s15596_s26 + $0x8] sm:$0xff]  ;;  %v953_v36 = vld [vmem:[%s15596_s26] sm:$0xff] }
  0xe7   : > { %v14127_v40 = vpop.eup %14126  ;;  %14146 = vrcp.f32 %v508_v37  ;;  %v510_v41 = vadd.f32 1.0, %v14125_v38  ;;  %v1346_v37 = vunpack.c.l.s8.bf16 %v954_v35  ;;  %v1345_v38 = vunpack.c.l.s8.bf16 %v953_v36 }
  0xe8   : > { %v14129_v42 = vpop.eup %14128  ;;  %14148 = vrcp.f32 %v509_v39  ;;  %v511_v43 = vadd.f32 1.0, %v14127_v40  ;;  %v1542_v39 = vunpack.c.h.s8.bf16 %v954_v35  ;;  %v1150_v40 = vld [vmem:[%s15596_s26 + $0x628] sm:$0xff] }
  0xe9   : > { %v14131_v44 = vpop.eup %14130  ;;  %14150 = vrcp.f32 %v510_v41  ;;  %v512_v45 = vadd.f32 1.0, %v14129_v42  ;;  %2134 = vmatprep.subr.bf16.mxu0 %v1346_v37  ;;  %v1541_v41 = vunpack.c.h.s8.bf16 %v953_v36  ;;  %v1738_v42 = vunpack.c.l.s8.bf16 %v1150_v40 }
  0xea   : > { %v14133_v47 = vpop.eup %14132  ;;  %v513_v48 = vadd.f32 1.0, %v14131_v44  ;;  %14152 = vrcp.f32 %v511_v43  ;;  %v1149_v43 = vld [vmem:[%s15596_s26 + $0x620] sm:$0xff] }
  0xeb   : > { %v14135_v50 = vpop.eup %14134  ;;  %v514_v51 = vadd.f32 1.0, %v14133_v47  ;;  %14154 = vrcp.f32 %v512_v45  ;;  %v1737_v44 = vunpack.c.l.s8.bf16 %v1149_v43  ;;  %v1934_v45 = vunpack.c.h.s8.bf16 %v1150_v40  ;;  %v15749_v47 = vld [vmem:[#allocation7] ss:$0 sm:$0xff] }
  0xec   : > { %v14137_v53 = vpop.eup %14136  ;;  %14156 = vrcp.f32 %v513_v48  ;;  %v515_v0 = vadd.f32 1.0, %v14135_v50 }
  0xed   : > { %v14139_v55 = vpop.eup %14138  ;;  %14158 = vrcp.f32 %v514_v51 }
  0xee   : > { %v14141_v57 = vpop.eup %14140  ;;  %v552_v58 = vmul.f32 %v14139_v55, %v15619_v1  ;;  %14160 = vpow2.f32 %v13456_v54  ;;  %v516_v1 = vadd.f32 1.0, %v14137_v53 }
  0xef   : > { %v14143_v60 = vpop.eup %14142  ;;  %v553_v61 = vmul.f32 %v14141_v57, %v15624_v2  ;;  %14162 = vpow2.f32 %v13457_v56 }
  0xf0   : > { %v14145_v62 = vpop.eup %14144  ;;  %13928 = vmatprep.mubr.msk.f32.mxu0 %vm576_vm0, %v552_v58  ;;  %v554_v63 = vmul.f32 %v14143_v60, %v15631_v5  ;;  %14164 = vpow2.f32 %v13458_v59 }
  0xf1   : > { %v14147_v3 = vpop.eup %14146  ;;  %13929 = vmatmul.mubr.msk.f32.vlgmr.msra.gmra.mrb[0].mxu0 %vm576_vm0, %v553_v61  ;;  %v555_v4 = vmul.f32 %v14145_v62, %v15636_v6  ;;  %14166 = vrcp.f32 %v515_v0 }
  0xf2   : > { %v14149_v7 = vpop.eup %14148  ;;  %13931 = vmatprep.mubr.msk.f32.mxu0 %vm576_vm0, %v554_v63  ;;  %v556_v2 = vmul.f32 %v14147_v3, %v15643_v9  ;;  %14168 = vrcp.f32 %v516_v1  ;;  %2135 = vmatpush1.bf16.msra.mxu0 %v1345_v38 }
  0xf3   : > { %v14151_v8 = vpop.eup %14150  ;;  %v557_v5 = vmul.f32 %v14149_v7, %v15648_v10  ;;  %2136 = vmatprep.subr.bf16.mxu0 %v1542_v39 }
  0xf4   : > { %v14153_v11 = vpop.eup %14152  ;;  %v558_v6 = vmul.f32 %v14151_v8, %v15654_v12 }
  0xf5   : > { %13932 = vmatmul.mubr.msk.f32.gmra.mrb[2].mxu0 %vm576_vm0, %v555_v4  ;;  %v14155_v14 = vpop.eup %14154  ;;  %v559_v9 = vmul.f32 %v14153_v11, %v15659_v13 }
  0xf6   : > { %13934 = vmatprep.mubr.msk.f32.mxu0 %vm576_vm0, %v556_v2  ;;  %v14157_v16 = vpop.eup %14156  ;;  %v560_v22 = vmul.f32 %v14155_v14, %v15665_v15  ;;  %2137 = vmatpush1.bf16.msra.mxu0 %v1541_v41 }
  0xf7   : > { %v14159_v18 = vpop.eup %14158  ;;  %v561_v12 = vmul.f32 %v14157_v16, %v15671_v17  ;;  %2138 = vmatprep.subr.bf16.mxu0 %v1738_v42 }
  0xf8   : > { %v14161_v20 = vpop.eup %14160  ;;  %v562_v13 = vmul.f32 %v14159_v18, %v15677_v19 }
  0xf9   : > { %13935 = vmatmul.mubr.msk.f32.gmra.mrb[4].mxu0 %vm576_vm0, %v557_v5  ;;  %v14163_v24 = vpop.eup %14162  ;;  %v517_v10 = vadd.f32 1.0, %v14161_v20 }
  0xfa   : > { %13937 = vmatprep.mubr.msk.f32.mxu0 %vm576_vm0, %v558_v6  ;;  %v14165_v25 = vpop.eup %14164  ;;  %v518_v26 = vadd.f32 1.0, %v14163_v24  ;;  %2139 = vmatpush1.bf16.msra.mxu0 %v1737_v44 }
  0xfb   : > { %14170 = vrcp.f32 %v517_v10  ;;  %v519_v27 = vadd.f32 1.0, %v14165_v25  ;;  %v14167_v28 = vpop.eup %14166  ;;  %2140 = vmatprep.subr.bf16.mxu0 %v1934_v45 }
  0xfc   : > { %14172 = vrcp.f32 %v518_v26  ;;  %v14169_v29 = vpop.eup %14168  ;;  %v563_v15 = vmul.f32 %v14167_v28, %v15683_v21 }
  0xfd   : > { %13938 = vmatmul.mubr.msk.f32.gmra.mrb[6].mxu0 %vm576_vm0, %v559_v9  ;;  %14174 = vrcp.f32 %v519_v27  ;;  %v564_v30 = vmul.f32 %v14169_v29, %v15689_v23  ;;  %v15287_v23 = vmov 0.0|0.0  }
  0xfe   : > { %13940 = vmatprep.mubr.msk.f32.mxu0 %vm576_vm0, %v560_v22  ;;  %13987 = vmatprep.subr.bf16.mxu1 %v15287_v23 }
 0x101   : > { %13941 = vmatmul.mubr.msk.f32.gmra.mrb[8].mxu0 %vm576_vm0, %v561_v12 }
 0x102   : > { %13943 = vmatprep.mubr.msk.f32.mxu0 %vm576_vm0, %v562_v13 }
 0x105   : > { %13944 = vmatmul.mubr.msk.f32.gmra.mrb[10].mxu0 %vm576_vm0, %v563_v15  ;;  %v14171_v17 = vpop.eup %14170 }
 0x106   : > { %13946 = vmatprep.mubr.msk.f32.mxu0 %vm576_vm0, %v564_v30  ;;  %v14173_v31 = vpop.eup %14172  ;;  %v565_v19 = vmul.f32 %v14171_v17, %v15697_v46  ;;  %v1933_v46 = vunpack.c.h.s8.bf16 %v1149_v43 }
 0x107   : > { %v14175_v32 = vpop.eup %14174  ;;  %v566_v33 = vmul.f32 %v14173_v31, %v15702_v49 }
 0x108   : > { %v567_v21 = vmul.f32 %v14175_v32, %v15707_v52  ;;  %2141 = vmatpush1.bf16.msra.mxu0 %v1933_v46 }
 0x109   : > { %13947 = vmatmul.mubr.msk.f32.gmra.mrb[12].mxu0 %vm576_vm0, %v565_v19 }
 0x10a   : > { %13949 = vmatprep.mubr.msk.f32.mxu0 %vm576_vm0, %v566_v33 }
 0x10d   : > { %13950 = vmatmul.mubr.msk.f32.gmra.mrb[14].mxu0 %vm576_vm0, %v567_v21 }
 0x1c4   : > { %v13930_v48 = vpop.f32.mrb[0].mxu0 }
 0x1c5   : > { %v15752_v49 = vadd.f32 %v13930_v48, %v15749_v47  ;;  %v691_v50 = vpop.f32.mrb[1].mxu0 }
 0x1c6   : > { %v15755_v51 = vadd.f32 %v15749_v47, %v691_v50 }
 0x1c7   : > { %v13477_v52 = vmul.f32 -1.442695, %v15752_v49 }
 0x1c8   : > { %v13476_v53 = vmul.f32 -1.442695, %v15755_v51  ;;  %v13933_v54 = vpop.f32.mrb[2].mxu0 }
 0x1c9   : > { %14176 = vpow2.f32 %v13477_v52  ;;  %v15760_v55 = vadd.f32 %v13933_v54, %v15749_v47  ;;  %v701_v56 = vpop.f32.mrb[3].mxu0 }
 0x1ca   : > { %14178 = vpow2.f32 %v13476_v53  ;;  %v15763_v57 = vadd.f32 %v15749_v47, %v701_v56 }
 0x1cb   : > { %v13479_v58 = vmul.f32 -1.442695, %v15760_v55 }
 0x1cc   : > { %v13478_v59 = vmul.f32 -1.442695, %v15763_v57  ;;  %v13936_v60 = vpop.f32.mrb[4].mxu0 }
 0x1cd   : > { %14180 = vpow2.f32 %v13479_v58  ;;  %v15768_v61 = vadd.f32 %v13936_v60, %v15749_v47  ;;  %v711_v62 = vpop.f32.mrb[5].mxu0 }
 0x1ce   : > { %14182 = vpow2.f32 %v13478_v59  ;;  %v15771_v63 = vadd.f32 %v15749_v47, %v711_v62 }
 0x1cf   : > { %v13481_v0 = vmul.f32 -1.442695, %v15768_v61 }
 0x1d0   : > { %v13480_v3 = vmul.f32 -1.442695, %v15771_v63  ;;  %v13939_v4 = vpop.f32.mrb[6].mxu0 }
 0x1d1   : > { %14184 = vpow2.f32 %v13481_v0  ;;  %v15776_v1 = vadd.f32 %v13939_v4, %v15749_v47  ;;  %v721_v7 = vpop.f32.mrb[7].mxu0 }
 0x1d2   : > { %14186 = vpow2.f32 %v13480_v3  ;;  %v15779_v2 = vadd.f32 %v15749_v47, %v721_v7 }
 0x1d3   : > { %v14177_v8 = vpop.eup %14176  ;;  %v13483_v5 = vmul.f32 -1.442695, %v15776_v1 }
 0x1d4   : > { %v14179_v11 = vpop.eup %14178  ;;  %v819_v6 = vadd.f32 1.0, %v14177_v8  ;;  %v13482_v14 = vmul.f32 -1.442695, %v15779_v2  ;;  %v13942_v16 = vpop.f32.mrb[8].mxu0 }
 0x1d5   : > { %v818_v18 = vadd.f32 1.0, %v14179_v11  ;;  %14188 = vpow2.f32 %v13483_v5  ;;  %v15784_v9 = vadd.f32 %v13942_v16, %v15749_v47  ;;  %v731_v20 = vpop.f32.mrb[9].mxu0 }
 0x1d6   : > { %14190 = vrcp.f32 %v819_v6  ;;  %v15787_v22 = vadd.f32 %v15749_v47, %v731_v20 }
 0x1d7   : > { %v14181_v24 = vpop.eup %14180  ;;  %14192 = vrcp.f32 %v818_v18  ;;  %v13485_v10 = vmul.f32 -1.442695, %v15784_v9 }
 0x1d8   : > { %v14183_v25 = vpop.eup %14182  ;;  %v821_v26 = vadd.f32 1.0, %v14181_v24  ;;  %14194 = vpow2.f32 %v13482_v14  ;;  %v13484_v12 = vmul.f32 -1.442695, %v15787_v22  ;;  %v13945_v27 = vpop.f32.mrb[10].mxu0 }
 0x1d9   : > { %v820_v28 = vadd.f32 1.0, %v14183_v25  ;;  %14196 = vpow2.f32 %v13485_v10  ;;  %v15792_v13 = vadd.f32 %v13945_v27, %v15749_v47  ;;  %v741_v29 = vpop.f32.mrb[11].mxu0 }
 0x1da   : > { %14198 = vrcp.f32 %v821_v26  ;;  %v15795_v15 = vadd.f32 %v15749_v47, %v741_v29 }
 0x1db   : > { %v14185_v30 = vpop.eup %14184  ;;  %14200 = vrcp.f32 %v820_v28  ;;  %v13487_v17 = vmul.f32 -1.442695, %v15792_v13 }
 0x1dc   : > { %v14187_v31 = vpop.eup %14186  ;;  %v823_v19 = vadd.f32 1.0, %v14185_v30  ;;  %14202 = vpow2.f32 %v13484_v12  ;;  %v13486_v32 = vmul.f32 -1.442695, %v15795_v15  ;;  %v13948_v21 = vpop.f32.mrb[12].mxu0 }
 0x1dd   : > { %v822_v33 = vadd.f32 1.0, %v14187_v31  ;;  %14204 = vpow2.f32 %v13487_v17  ;;  %v15800_v34 = vadd.f32 %v13948_v21, %v15749_v47  ;;  %v751_v35 = vpop.f32.mrb[13].mxu0 }
 0x1de   : > { %14206 = vrcp.f32 %v823_v19  ;;  %v15803_v37 = vadd.f32 %v15749_v47, %v751_v35 }
 0x1df   : > { %v14189_v36 = vpop.eup %14188  ;;  %14208 = vrcp.f32 %v822_v33  ;;  %v13489_v40 = vmul.f32 -1.442695, %v15800_v34 }
 0x1e0   : > { %v14191_v38 = vpop.eup %14190  ;;  %v825_v39 = vadd.f32 1.0, %v14189_v36  ;;  %14210 = vpow2.f32 %v13486_v32  ;;  %v13488_v43 = vmul.f32 -1.442695, %v15803_v37  ;;  %v13951_v44 = vpop.f32.mrb[14].mxu0 }
 0x1e1   : > { %v14193_v41 = vpop.eup %14192  ;;  %v867_v42 = vmul.f32 %v14191_v38, %v15752_v49  ;;  %v15810_v48 = vadd.f32 %v13951_v44, %v15749_v47  ;;  %v761_v50 = vpop.f32.mrb[15].mxu0 }
 0x1e2   : > { %v14195_v45 = vpop.eup %14194  ;;  %v866_v46 = vmul.f32 %v14193_v41, %v15755_v51  ;;  %14212 = vrcp.f32 %v825_v39  ;;  %v15813_v54 = vadd.f32 %v15749_v47, %v761_v50  ;;  %v956_v41 = vld [vmem:[%s15596_s26 + $0x18] sm:$0xff] }
 0x1e3   : > { %v14197_v52 = vpop.eup %14196  ;;  %v824_v53 = vadd.f32 1.0, %v14195_v45  ;;  %14214 = vpow2.f32 %v13489_v40  ;;  %v13491_v49 = vmul.f32 -1.442695, %v15810_v48  ;;  %v1348_v44 = vunpack.c.l.s8.bf16 %v956_v41 }
 0x1e4   : > { %v14199_v56 = vpop.eup %14198  ;;  %v827_v58 = vadd.f32 1.0, %v14197_v52  ;;  %14216 = vpow2.f32 %v13488_v43  ;;  %v13988_v59 = vpack.c.bf16 %v867_v42, %v866_v46  ;;  %v13490_v62 = vmul.f32 -1.442695, %v15813_v54  ;;  %v1152_v52 = vld [vmem:[%s15596_s26 + $0x638] sm:$0xff] }
 0x1e5   : > { %v14201_v60 = vpop.eup %14200  ;;  %v869_v51 = vmul.f32 %v14199_v56, %v15760_v55  ;;  %14218 = vrcp.f32 %v824_v53  ;;  %v1544_v50 = vunpack.c.h.s8.bf16 %v956_v41  ;;  %v1740_v53 = vunpack.c.l.s8.bf16 %v1152_v52  ;;  %v1159_v41 = vld [vmem:[%s15596_s26 + $0x670] sm:$0xff] }
 0x1e6   : > { %v14203_v0 = vpop.eup %14202  ;;  %v868_v3 = vmul.f32 %v14201_v60, %v15763_v57  ;;  %14220 = vrcp.f32 %v827_v58  ;;  %13989 = vmatpush3.bf16.msra.mxu1 %v13988_v59  ;;  %v960_v59 = vld [vmem:[%s15596_s26 + $0x38] sm:$0xff] }
 0x1e7   : > { %v14205_v4 = vpop.eup %14204  ;;  %v826_v47 = vadd.f32 1.0, %v14203_v0  ;;  %14222 = vpow2.f32 %v13491_v49  ;;  %13990 = vmatprep.subr.bf16.mxu1 %v15287_v23  ;;  %v958_v49 = vld [vmem:[%s15596_s26 + $0x28] sm:$0xff]  ;;  %v11225_v0 = vld [vmem:[%s22064_s18] sm:$0x3] }
 0x1e8   : > { %v14207_v7 = vpop.eup %14206  ;;  %v829_v8 = vadd.f32 1.0, %v14205_v4  ;;  %14224 = vpow2.f32 %v13490_v62  ;;  %v13991_v5 = vpack.c.bf16 %v869_v51, %v868_v3  ;;  %v1350_v60 = vunpack.c.l.s8.bf16 %v958_v49  ;;  %v957_v4 = vld [vmem:[%s15596_s26 + $0x20] sm:$0xff] }
 0x1e9   : > { %v14209_v11 = vpop.eup %14208  ;;  %v871_v55 = vmul.f32 %v14207_v7, %v15768_v61  ;;  %14226 = vrcp.f32 %v826_v47  ;;  %v1352_v51 = vunpack.c.l.s8.bf16 %v960_v59  ;;  %v21860_v62 = vmov 0   ;;  %v959_v47 = vld [vmem:[%s15596_s26 + $0x30] sm:$0xff] }
 0x1ea   : > { %v14211_v6 = vpop.eup %14210  ;;  %v870_v14 = vmul.f32 %v14209_v11, %v15771_v63  ;;  %14228 = vrcp.f32 %v829_v8  ;;  %13992 = vmatpush3.bf16.msra.mxu1 %v13991_v5  ;;  %2166 = vmatprep.mubr.bf16.mxu0 %v21860_v62  ;;  %v11427_v3 = vsub.f32 1.0, %v11225_v0  ;;  %v1349_v8 = vunpack.c.l.s8.bf16 %v957_v4 }
 0x1eb   : > { %v828_v57 = vadd.f32 1.0, %v14211_v6  ;;  %13993 = vmatprep.subr.bf16.mxu1 %v15287_v23  ;;  %2216 = vmatprep.subr.bf16.mxu0 %v1350_v60  ;;  %v1351_v5 = vunpack.c.l.s8.bf16 %v959_v47  ;;  %v1546_v6 = vunpack.c.h.s8.bf16 %v958_v49  ;;  %v1162_v49 = vld [vmem:[%s15596_s26 + $0x688] sm:$0xff] }
 0x1ec   : > { %v14213_v16 = vpop.eup %14212  ;;  %v13994_v18 = vpack.c.bf16 %v871_v55, %v870_v14  ;;  %14111 = vset.pattern.permute.xlu0 %v21860_v62  ;;  %v1548_v14 = vunpack.c.h.s8.bf16 %v960_v59  ;;  %v1164_v59 = vld [vmem:[%s15596_s26 + $0x698] sm:$0xff] }
 0x1ed   : > { %v14215_v20 = vpop.eup %14214  ;;  %14230 = vrcp.f32 %v828_v57  ;;  %v873_v10 = vmul.f32 %v14213_v16, %v15776_v1  ;;  %11228 = vperm.xlu0 %14111, %v11225_v0   ;;  %v1154_v57 = vld [vmem:[%s15596_s26 + $0x648] sm:$0xff]  ;;  %v1156_v16 = vld [vmem:[%s15596_s26 + $0x658] sm:$0xff]  ;;  %v1750_v0 = vunpack.c.l.s8.bf16 %v1162_v49 }
 0x1ee   : > { %v14217_v24 = vpop.eup %14216  ;;  %v831_v25 = vadd.f32 1.0, %v14215_v20  ;;  %13995 = vmatpush3.bf16.msra.mxu1 %v13994_v18  ;;  %v1545_v18 = vunpack.c.h.s8.bf16 %v957_v4  ;;  %v1547_v20 = vunpack.c.h.s8.bf16 %v959_v47  ;;  %v1161_v4 = vld [vmem:[%s15596_s26 + $0x680] sm:$0xff]  ;;  %v1163_v47 = vld [vmem:[%s15596_s26 + $0x690] sm:$0xff] }
 0x1ef   : > { %v14219_v26 = vpop.eup %14218  ;;  %v830_v61 = vadd.f32 1.0, %v14217_v24  ;;  %13996 = vmatprep.subr.bf16.mxu1 %v15287_v23  ;;  %v1742_v24 = vunpack.c.l.s8.bf16 %v1154_v57 }
 0x1f0   : > { %v14221_v12 = vpop.eup %14220  ;;  %v872_v63 = vmul.f32 %v14219_v26, %v15779_v2  ;;  %14232 = vrcp.f32 %v831_v25  ;;  %v1153_v25 = vld [vmem:[%s15596_s26 + $0x640] sm:$0xff]  ;;  %v1155_v26 = vld [vmem:[%s15596_s26 + $0x650] sm:$0xff] }
 0x1f1   : > { %v14223_v27 = vpop.eup %14222  ;;  %14234 = vrcp.f32 %v830_v61  ;;  %v875_v29 = vmul.f32 %v14221_v12, %v15784_v9  ;;  %11430 = vperm.xlu0 %14111, %v11427_v3   ;;  %v1741_v61 = vunpack.c.l.s8.bf16 %v1153_v25  ;;  %v1743_v12 = vunpack.c.l.s8.bf16 %v1155_v26 }
 0x1f2   : > { %v14225_v28 = vpop.eup %14224  ;;  %v833_v30 = vadd.f32 1.0, %v14223_v27  ;;  %v13997_v17 = vpack.c.bf16 %v873_v10, %v872_v63  ;;  %v1744_v10 = vunpack.c.l.s8.bf16 %v1156_v16  ;;  %v1938_v63 = vunpack.c.h.s8.bf16 %v1154_v57 }
 0x1f3   : > { %v14227_v31 = vpop.eup %14226  ;;  %v832_v19 = vadd.f32 1.0, %v14225_v28  ;;  %v1940_v27 = vunpack.c.h.s8.bf16 %v1156_v16  ;;  %v962_v28 = vld [vmem:[%s15596_s26 + $0x48] sm:$0xff]  ;;  %v1752_v3 = vunpack.c.l.s8.bf16 %v1164_v59  ;;  %v1945_v57 = vunpack.c.h.s8.bf16 %v1161_v4 }
 0x1f4   : > { %v14229_v1 = vpop.eup %14228  ;;  %v874_v32 = vmul.f32 %v14227_v31, %v15787_v22  ;;  %14236 = vrcp.f32 %v833_v30  ;;  %13998 = vmatpush3.bf16.msra.mxu1 %v13997_v17  ;;  %v1937_v30 = vunpack.c.h.s8.bf16 %v1153_v25  ;;  %v1939_v17 = vunpack.c.h.s8.bf16 %v1155_v26 }
 0x1f5   : > { %14238 = vrcp.f32 %v832_v19  ;;  %13999 = vmatprep.subr.bf16.mxu1 %v15287_v23  ;;  %v877_v2 = vmul.f32 %v14229_v1, %v15792_v13  ;;  %v1354_v31 = vunpack.c.l.s8.bf16 %v962_v28  ;;  %v961_v1 = vld [vmem:[%s15596_s26 + $0x40] sm:$0xff]  ;;  %v1947_v16 = vunpack.c.h.s8.bf16 %v1163_v47 }
 0x1f6   : > { %v14000_v33 = vpack.c.bf16 %v875_v29, %v874_v32  ;;  %v964_v29 = vld [vmem:[%s15596_s26 + $0x58] sm:$0xff]  ;;  %v963_v32 = vld [vmem:[%s15596_s26 + $0x50] sm:$0xff] }
 0x1f7   : > { %v14231_v21 = vpop.eup %14230  ;;  %v1356_v19 = vunpack.c.l.s8.bf16 %v964_v29 }
 0x1f8   : > { %v876_v35 = vmul.f32 %v14231_v21, %v15795_v15  ;;  %14001 = vmatpush3.bf16.msra.mxu1 %v14000_v33  ;;  %v1355_v33 = vunpack.c.l.s8.bf16 %v963_v32  ;;  %v1550_v21 = vunpack.c.h.s8.bf16 %v962_v28 }
 0x1f9   : > { %14002 = vmatprep.subr.bf16.mxu1 %v15287_v23 }
 0x1fa   : > { %v14233_v9 = vpop.eup %14232  ;;  %v14003_v36 = vpack.c.bf16 %v877_v2, %v876_v35  ;;  %v1353_v2 = vunpack.c.l.s8.bf16 %v961_v1  ;;  %v1552_v35 = vunpack.c.h.s8.bf16 %v964_v29 }
 0x1fb   : > { %v14235_v38 = vpop.eup %14234  ;;  %v879_v22 = vmul.f32 %v14233_v9, %v15800_v34  ;;  %v955_v34 = vld [vmem:[%s15596_s26 + $0x10] sm:$0xff]  ;;  %v1158_v9 = vld [vmem:[%s15596_s26 + $0x668] sm:$0xff] }
 0x1fc   : > { %v878_v39 = vmul.f32 %v14235_v38, %v15803_v37  ;;  %14004 = vmatpush3.bf16.msra.mxu1 %v14003_v36  ;;  %v882_v37 = vld [vmem:[#allocation2] sm:$0x3]  ;;  %v1347_v46 = vunpack.c.l.s8.bf16 %v955_v34  ;;  %v1160_v36 = vld [vmem:[%s15596_s26 + $0x678] sm:$0xff]  ;;  %v1549_v38 = vunpack.c.h.s8.bf16 %v961_v1 }
 0x1fd   : > { %14005 = vmatprep.subr.bf16.mxu1 %v15287_v23 }
 0x1fe   : > { %v14237_v40 = vpop.eup %14236  ;;  %v14006_v13 = vpack.c.bf16 %v879_v22, %v878_v39  ;;  %v1551_v22 = vunpack.c.h.s8.bf16 %v963_v32  ;;  %v1746_v39 = vunpack.c.l.s8.bf16 %v1158_v9 }
 0x1ff   : > { %v14239_v42 = vpop.eup %14238  ;;  %v881_v15 = vmul.f32 %v14237_v40, %v15810_v48  ;;  %v1543_v48 = vunpack.c.h.s8.bf16 %v955_v34  ;;  %v1748_v40 = vunpack.c.l.s8.bf16 %v1160_v36  ;;  %v966_v34 = vld [vmem:[%s15596_s26 + $0x68] sm:$0xff] }
 0x200   : > { %v880_v43 = vmul.f32 %v14239_v42, %v15813_v54  ;;  %14007 = vmatpush3.bf16.msra.mxu1 %v14006_v13  ;;  %v1151_v54 = vld [vmem:[%s15596_s26 + $0x630] sm:$0xff]  ;;  %v1157_v13 = vld [vmem:[%s15596_s26 + $0x660] sm:$0xff] }
 0x201   : > { %14008 = vmatprep.subr.bf16.mxu1 %v15287_v23  ;;  %v1739_v56 = vunpack.c.l.s8.bf16 %v1151_v54  ;;  %v1936_v23 = vunpack.c.h.s8.bf16 %v1152_v52  ;;  %v1935_v58 = vunpack.c.h.s8.bf16 %v1151_v54  ;;  %v1745_v42 = vunpack.c.l.s8.bf16 %v1157_v13 }
 0x202   : > { %v14009_v45 = vpack.c.bf16 %v881_v15, %v880_v43  ;;  %v1747_v15 = vunpack.c.l.s8.bf16 %v1159_v41  ;;  %v1942_v43 = vunpack.c.h.s8.bf16 %v1158_v9 }
 0x204   : > { %14010 = vmatpush3.bf16.msra.mxu1 %v14009_v45  ;;  %v968_v45 = vld [vmem:[%s15596_s26 + $0x78] sm:$0xff] }
 0x205   : > { %2175 = vmatprep.subr.bf16.mxu1 %v1348_v44  ;;  %v1944_v44 = vunpack.c.h.s8.bf16 %v1160_v36  ;;  %v1360_v52 = vunpack.c.l.s8.bf16 %v968_v45 }
 0x207   : > { %13985 = vmatmul.mubr.f32.vlgmr.msra.gmra.mrb[0].mxu1 %v882_v37  ;;  %v1941_v37 = vunpack.c.h.s8.bf16 %v1157_v13 }
 0x208   : > { %2176 = vmatpush1.bf16.msra.mxu1 %v1347_v46  ;;  %2207 = vmatprep.mubr.bf16.mxu1 %v21860_v62  ;;  %v1943_v46 = vunpack.c.h.s8.bf16 %v1159_v41 }
 0x209   : > { %2177 = vmatprep.subr.bf16.mxu1 %v1544_v50  ;;  %v1358_v50 = vunpack.c.l.s8.bf16 %v966_v34 }
 0x20c   : > { %2178 = vmatpush1.bf16.msra.mxu1 %v1543_v48  ;;  %v965_v48 = vld [vmem:[%s15596_s26 + $0x60] sm:$0xff] }
 0x20d   : > { %2179 = vmatprep.subr.bf16.mxu1 %v1740_v53  ;;  %v967_v53 = vld [vmem:[%s15596_s26 + $0x70] sm:$0xff]  ;;  %v1357_v54 = vunpack.c.l.s8.bf16 %v965_v48  ;;  %v1553_v60 = vunpack.c.h.s8.bf16 %v965_v48 }
 0x210   : > { %2180 = vmatpush1.bf16.msra.mxu1 %v1739_v56  ;;  %v1359_v56 = vunpack.c.l.s8.bf16 %v967_v53 }
 0x211   : > { %2181 = vmatprep.subr.bf16.mxu1 %v1936_v23  ;;  %v1554_v23 = vunpack.c.h.s8.bf16 %v966_v34 }
 0x214   : > { %2182 = vmatpush1.bf16.msra.mxu1 %v1935_v58  ;;  %v1556_v58 = vunpack.c.h.s8.bf16 %v968_v45 }
 0x215   : > { %2257 = vmatprep.subr.bf16.mxu1 %v1352_v51  ;;  %v1555_v51 = vunpack.c.h.s8.bf16 %v967_v53 }
 0x2da   : > { %v949_v7 = vpop.f32.mrb[0].mxu1 }
 0x2db   : > { %v15852_v11 = vpack.c.bf16 %v949_v7, %v949_v7  ;;  %v13986_v55 = vpop.f32.mrb[1].mxu1  ;;  %v1749_v7 = vunpack.c.l.s8.bf16 %v1161_v4 }
 0x2dc   : > { %v1948_v55 = vunpack.c.h.s8.bf16 %v1164_v59 }
 0x2dd   : > { %13492 = vmatmul.mubr.msk.bf16.vlgmr.msra.gmra.mrb[16].mxu0 %vm2130_vm2, %v15852_v11  ;;  %13493 = vmatmul.mubr.msk.bf16.vlgmr.msra.gmra.mrb[4].mxu1 %vm2130_vm2, %v15852_v11 }
 0x2de   : > { %2217 = vmatpush1.bf16.msra.mxu0 %v1349_v8  ;;  %2258 = vmatpush1.bf16.msra.mxu1 %v1351_v5  ;;  %v1751_v8 = vunpack.c.l.s8.bf16 %v1163_v47  ;;  %v1946_v5 = vunpack.c.h.s8.bf16 %v1162_v49 }
 0x2df   : > { %2218 = vmatprep.subr.bf16.mxu0 %v1546_v6  ;;  %2259 = vmatprep.subr.bf16.mxu1 %v1548_v14  ;;  %v970_v6 = vld [vmem:[%s15596_s26 + $0x88] sm:$0xff]  ;;  %v972_v14 = vld [vmem:[%s15596_s26 + $0x98] sm:$0xff] }
 0x2e0   : > { %2248 = vmatprep.mubr.bf16.mxu0 %v21860_v62  ;;  %2289 = vmatprep.mubr.bf16.mxu1 %v21860_v62 }
 0x2e2   : > { %2219 = vmatpush1.bf16.msra.mxu0 %v1545_v18  ;;  %2260 = vmatpush1.bf16.msra.mxu1 %v1547_v20  ;;  %v1362_v18 = vunpack.c.l.s8.bf16 %v970_v6  ;;  %v1364_v20 = vunpack.c.l.s8.bf16 %v972_v14 }
 0x2e3   : > { %2220 = vmatprep.subr.bf16.mxu0 %v1742_v24  ;;  %2261 = vmatprep.subr.bf16.mxu1 %v1744_v10  ;;  %v969_v24 = vld [vmem:[%s15596_s26 + $0x80] sm:$0xff]  ;;  %v971_v10 = vld [vmem:[%s15596_s26 + $0x90] sm:$0xff] }
 0x2e4   : > { %v1361_v25 = vunpack.c.l.s8.bf16 %v969_v24  ;;  %v1363_v26 = vunpack.c.l.s8.bf16 %v971_v10  ;;  %v1557_v28 = vunpack.c.h.s8.bf16 %v969_v24  ;;  %v1559_v29 = vunpack.c.h.s8.bf16 %v971_v10 }
 0x2e6   : > { %2221 = vmatpush1.bf16.msra.mxu0 %v1741_v61  ;;  %2262 = vmatpush1.bf16.msra.mxu1 %v1743_v12  ;;  %v1558_v61 = vunpack.c.h.s8.bf16 %v970_v6  ;;  %v1560_v12 = vunpack.c.h.s8.bf16 %v972_v14 }
 0x2e7   : > { %2222 = vmatprep.subr.bf16.mxu0 %v1938_v63  ;;  %2263 = vmatprep.subr.bf16.mxu1 %v1940_v27  ;;  %v1166_v63 = vld [vmem:[%s15596_s26 + $0x6a8] sm:$0xff]  ;;  %v1168_v27 = vld [vmem:[%s15596_s26 + $0x6b8] sm:$0xff] }
 0x2ea   : > { %2223 = vmatpush1.bf16.msra.mxu0 %v1937_v30  ;;  %2264 = vmatpush1.bf16.msra.mxu1 %v1939_v17  ;;  %v1754_v30 = vunpack.c.l.s8.bf16 %v1166_v63  ;;  %v1756_v17 = vunpack.c.l.s8.bf16 %v1168_v27 }
 0x2eb   : > { %2298 = vmatprep.subr.bf16.mxu0 %v1354_v31  ;;  %2339 = vmatprep.subr.bf16.mxu1 %v1356_v19  ;;  %v1165_v31 = vld [vmem:[%s15596_s26 + $0x6a0] sm:$0xff]  ;;  %v1167_v19 = vld [vmem:[%s15596_s26 + $0x6b0] sm:$0xff] }
 0x2ec   : > { %v1753_v1 = vunpack.c.l.s8.bf16 %v1165_v31  ;;  %v1755_v32 = vunpack.c.l.s8.bf16 %v1167_v19  ;;  %v1949_v9 = vunpack.c.h.s8.bf16 %v1165_v31  ;;  %v1951_v36 = vunpack.c.h.s8.bf16 %v1167_v19 }
 0x2ed   : > { %13494 = vmatmul.mubr.msk.bf16.vlgmr.msra.gmra.mrb[20].mxu0 %vm2130_vm2, %v15852_v11  ;;  %13495 = vmatmul.mubr.msk.bf16.vlgmr.msra.gmra.mrb[8].mxu1 %vm2130_vm2, %v15852_v11 }
 0x2ee   : > { %2299 = vmatpush1.bf16.msra.mxu0 %v1353_v2  ;;  %2340 = vmatpush1.bf16.msra.mxu1 %v1355_v33  ;;  %v1950_v2 = vunpack.c.h.s8.bf16 %v1166_v63  ;;  %v1952_v33 = vunpack.c.h.s8.bf16 %v1168_v27 }
 0x2ef   : > { %2300 = vmatprep.subr.bf16.mxu0 %v1550_v21  ;;  %2341 = vmatprep.subr.bf16.mxu1 %v1552_v35  ;;  %v974_v21 = vld [vmem:[%s15596_s26 + $0xa8] sm:$0xff]  ;;  %v976_v35 = vld [vmem:[%s15596_s26 + $0xb8] sm:$0xff] }
 0x2f0   : > { %2330 = vmatprep.mubr.bf16.mxu0 %v21860_v62  ;;  %2371 = vmatprep.mubr.bf16.mxu1 %v21860_v62 }
 0x2f2   : > { %2301 = vmatpush1.bf16.msra.mxu0 %v1549_v38  ;;  %2342 = vmatpush1.bf16.msra.mxu1 %v1551_v22  ;;  %v1366_v38 = vunpack.c.l.s8.bf16 %v974_v21  ;;  %v1368_v22 = vunpack.c.l.s8.bf16 %v976_v35 }
 0x2f3   : > { %2302 = vmatprep.subr.bf16.mxu0 %v1746_v39  ;;  %2343 = vmatprep.subr.bf16.mxu1 %v1748_v40  ;;  %v973_v39 = vld [vmem:[%s15596_s26 + $0xa0] sm:$0xff]  ;;  %v975_v40 = vld [vmem:[%s15596_s26 + $0xb0] sm:$0xff] }
 0x2f4   : > { %v1365_v13 = vunpack.c.l.s8.bf16 %v973_v39  ;;  %v1367_v41 = vunpack.c.l.s8.bf16 %v975_v40  ;;  %v1561_v34 = vunpack.c.h.s8.bf16 %v973_v39  ;;  %v1563_v45 = vunpack.c.h.s8.bf16 %v975_v40 }
 0x2f6   : > { %2303 = vmatpush1.bf16.msra.mxu0 %v1745_v42  ;;  %2344 = vmatpush1.bf16.msra.mxu1 %v1747_v15  ;;  %v1562_v42 = vunpack.c.h.s8.bf16 %v974_v21  ;;  %v1564_v15 = vunpack.c.h.s8.bf16 %v976_v35 }
 0x2f7   : > { %2304 = vmatprep.subr.bf16.mxu0 %v1942_v43  ;;  %2345 = vmatprep.subr.bf16.mxu1 %v1944_v44  ;;  %v1170_v43 = vld [vmem:[%s15596_s26 + $0x6c8] sm:$0xff]  ;;  %v1172_v44 = vld [vmem:[%s15596_s26 + $0x6d8] sm:$0xff] }
 0x2fa   : > { %2305 = vmatpush1.bf16.msra.mxu0 %v1941_v37  ;;  %2346 = vmatpush1.bf16.msra.mxu1 %v1943_v46  ;;  %v1758_v37 = vunpack.c.l.s8.bf16 %v1170_v43  ;;  %v1760_v46 = vunpack.c.l.s8.bf16 %v1172_v44 }
 0x2fb   : > { %2380 = vmatprep.subr.bf16.mxu0 %v1358_v50  ;;  %2421 = vmatprep.subr.bf16.mxu1 %v1360_v52  ;;  %v1169_v50 = vld [vmem:[%s15596_s26 + $0x6c0] sm:$0xff]  ;;  %v1171_v52 = vld [vmem:[%s15596_s26 + $0x6d0] sm:$0xff] }
 0x2fc   : > { %v1757_v48 = vunpack.c.l.s8.bf16 %v1169_v50  ;;  %v1759_v53 = vunpack.c.l.s8.bf16 %v1171_v52  ;;  %v1953_v49 = vunpack.c.h.s8.bf16 %v1169_v50  ;;  %v1955_v59 = vunpack.c.h.s8.bf16 %v1171_v52 }
 0x2fd   : > { %13496 = vmatmul.mubr.msk.bf16.vlgmr.msra.gmra.mrb[24].mxu0 %vm2130_vm2, %v15852_v11  ;;  %13497 = vmatmul.mubr.msk.bf16.vlgmr.msra.gmra.mrb[12].mxu1 %vm2130_vm2, %v15852_v11 }
 0x2fe   : > { %2381 = vmatpush1.bf16.msra.mxu0 %v1357_v54  ;;  %2422 = vmatpush1.bf16.msra.mxu1 %v1359_v56  ;;  %v1954_v54 = vunpack.c.h.s8.bf16 %v1170_v43  ;;  %v1956_v56 = vunpack.c.h.s8.bf16 %v1172_v44 }
 0x2ff   : > { %2382 = vmatprep.subr.bf16.mxu0 %v1554_v23  ;;  %2423 = vmatprep.subr.bf16.mxu1 %v1556_v58  ;;  %v978_v23 = vld [vmem:[%s15596_s26 + $0xc8] sm:$0xff]  ;;  %v980_v58 = vld [vmem:[%s15596_s26 + $0xd8] sm:$0xff] }
 0x300   : > { %2412 = vmatprep.mubr.bf16.mxu0 %v21860_v62  ;;  %2453 = vmatprep.mubr.bf16.mxu1 %v21860_v62 }
 0x302   : > { %2383 = vmatpush1.bf16.msra.mxu0 %v1553_v60  ;;  %2424 = vmatpush1.bf16.msra.mxu1 %v1555_v51  ;;  %v1370_v60 = vunpack.c.l.s8.bf16 %v978_v23  ;;  %v1372_v51 = vunpack.c.l.s8.bf16 %v980_v58 }
 0x303   : > { %2384 = vmatprep.subr.bf16.mxu0 %v1750_v0  ;;  %2425 = vmatprep.subr.bf16.mxu1 %v1752_v3  ;;  %v977_v0 = vld [vmem:[%s15596_s26 + $0xc0] sm:$0xff]  ;;  %v979_v3 = vld [vmem:[%s15596_s26 + $0xd0] sm:$0xff] }
 0x304   : > { %v1369_v4 = vunpack.c.l.s8.bf16 %v977_v0  ;;  %v1371_v47 = vunpack.c.l.s8.bf16 %v979_v3  ;;  %v1565_v6 = vunpack.c.h.s8.bf16 %v977_v0  ;;  %v1567_v14 = vunpack.c.h.s8.bf16 %v979_v3 }
 0x306   : > { %2385 = vmatpush1.bf16.msra.mxu0 %v1749_v7  ;;  %2426 = vmatpush1.bf16.msra.mxu1 %v1751_v8  ;;  %v1566_v7 = vunpack.c.h.s8.bf16 %v978_v23  ;;  %v1568_v8 = vunpack.c.h.s8.bf16 %v980_v58 }
 0x307   : > { %2386 = vmatprep.subr.bf16.mxu0 %v1946_v5  ;;  %2427 = vmatprep.subr.bf16.mxu1 %v1948_v55  ;;  %v1174_v5 = vld [vmem:[%s15596_s26 + $0x6e8] sm:$0xff]  ;;  %v1176_v55 = vld [vmem:[%s15596_s26 + $0x6f8] sm:$0xff] }
 0x30a   : > { %2387 = vmatpush1.bf16.msra.mxu0 %v1945_v57  ;;  %2428 = vmatpush1.bf16.msra.mxu1 %v1947_v16  ;;  %v1762_v57 = vunpack.c.l.s8.bf16 %v1174_v5  ;;  %v1764_v16 = vunpack.c.l.s8.bf16 %v1176_v55 }
 0x30b   : > { %2462 = vmatprep.subr.bf16.mxu0 %v1362_v18  ;;  %2503 = vmatprep.subr.bf16.mxu1 %v1364_v20  ;;  %v1173_v18 = vld [vmem:[%s15596_s26 + $0x6e0] sm:$0xff]  ;;  %v1175_v20 = vld [vmem:[%s15596_s26 + $0x6f0] sm:$0xff] }
 0x30c   : > { %v1761_v24 = vunpack.c.l.s8.bf16 %v1173_v18  ;;  %v1763_v10 = vunpack.c.l.s8.bf16 %v1175_v20  ;;  %v1957_v63 = vunpack.c.h.s8.bf16 %v1173_v18  ;;  %v1959_v27 = vunpack.c.h.s8.bf16 %v1175_v20 }
 0x30d   : > { %13498 = vmatmul.mubr.msk.bf16.vlgmr.msra.gmra.mrb[28].mxu0 %vm2130_vm2, %v15852_v11  ;;  %13499 = vmatmul.mubr.msk.bf16.vlgmr.msra.gmra.mrb[16].mxu1 %vm2130_vm2, %v15852_v11 }
 0x30e   : > { %2463 = vmatpush1.bf16.msra.mxu0 %v1361_v25  ;;  %2504 = vmatpush1.bf16.msra.mxu1 %v1363_v26  ;;  %v1958_v25 = vunpack.c.h.s8.bf16 %v1174_v5  ;;  %v1960_v26 = vunpack.c.h.s8.bf16 %v1176_v55 }
 0x30f   : > { %2464 = vmatprep.subr.bf16.mxu0 %v1558_v61  ;;  %2505 = vmatprep.subr.bf16.mxu1 %v1560_v12  ;;  %v982_v61 = vld [vmem:[%s15596_s26 + $0xe8] sm:$0xff]  ;;  %v984_v12 = vld [vmem:[%s15596_s26 + $0xf8] sm:$0xff] }
 0x310   : > { %2494 = vmatprep.mubr.bf16.mxu0 %v21860_v62  ;;  %2535 = vmatprep.mubr.bf16.mxu1 %v21860_v62 }
 0x312   : > { %2465 = vmatpush1.bf16.msra.mxu0 %v1557_v28  ;;  %2506 = vmatpush1.bf16.msra.mxu1 %v1559_v29  ;;  %v1374_v28 = vunpack.c.l.s8.bf16 %v982_v61  ;;  %v1376_v29 = vunpack.c.l.s8.bf16 %v984_v12 }
 0x313   : > { %2466 = vmatprep.subr.bf16.mxu0 %v1754_v30  ;;  %2507 = vmatprep.subr.bf16.mxu1 %v1756_v17  ;;  %v981_v30 = vld [vmem:[%s15596_s26 + $0xe0] sm:$0xff]  ;;  %v983_v17 = vld [vmem:[%s15596_s26 + $0xf0] sm:$0xff] }
 0x314   : > { %v1373_v31 = vunpack.c.l.s8.bf16 %v981_v30  ;;  %v1375_v19 = vunpack.c.l.s8.bf16 %v983_v17  ;;  %v1569_v21 = vunpack.c.h.s8.bf16 %v981_v30  ;;  %v1571_v35 = vunpack.c.h.s8.bf16 %v983_v17 }
 0x316   : > { %2467 = vmatpush1.bf16.msra.mxu0 %v1753_v1  ;;  %2508 = vmatpush1.bf16.msra.mxu1 %v1755_v32  ;;  %v1570_v1 = vunpack.c.h.s8.bf16 %v982_v61  ;;  %v1572_v32 = vunpack.c.h.s8.bf16 %v984_v12 }
 0x317   : > { %2468 = vmatprep.subr.bf16.mxu0 %v1950_v2  ;;  %2509 = vmatprep.subr.bf16.mxu1 %v1952_v33  ;;  %v1178_v2 = vld [vmem:[%s15596_s26 + $0x708] sm:$0xff]  ;;  %v1180_v33 = vld [vmem:[%s15596_s26 + $0x718] sm:$0xff] }
 0x31a   : > { %2469 = vmatpush1.bf16.msra.mxu0 %v1949_v9  ;;  %2510 = vmatpush1.bf16.msra.mxu1 %v1951_v36  ;;  %v1766_v9 = vunpack.c.l.s8.bf16 %v1178_v2  ;;  %v1768_v36 = vunpack.c.l.s8.bf16 %v1180_v33 }
 0x31b   : > { %2544 = vmatprep.subr.bf16.mxu0 %v1366_v38  ;;  %2585 = vmatprep.subr.bf16.mxu1 %v1368_v22  ;;  %v1177_v38 = vld [vmem:[%s15596_s26 + $0x700] sm:$0xff]  ;;  %v1179_v22 = vld [vmem:[%s15596_s26 + $0x710] sm:$0xff] }
 0x31c   : > { %v1765_v39 = vunpack.c.l.s8.bf16 %v1177_v38  ;;  %v1767_v40 = vunpack.c.l.s8.bf16 %v1179_v22  ;;  %v1961_v43 = vunpack.c.h.s8.bf16 %v1177_v38  ;;  %v1963_v44 = vunpack.c.h.s8.bf16 %v1179_v22 }
 0x31d   : > { %13500 = vmatmul.mubr.msk.bf16.vlgmr.msra.gmra.mrb[32].mxu0 %vm2130_vm2, %v15852_v11  ;;  %13501 = vmatmul.mubr.msk.bf16.vlgmr.msra.gmra.mrb[20].mxu1 %vm2130_vm2, %v15852_v11 }
 0x31e   : > { %2545 = vmatpush1.bf16.msra.mxu0 %v1365_v13  ;;  %2586 = vmatpush1.bf16.msra.mxu1 %v1367_v41  ;;  %v1962_v13 = vunpack.c.h.s8.bf16 %v1178_v2  ;;  %v1964_v41 = vunpack.c.h.s8.bf16 %v1180_v33 }
 0x31f   : > { %2546 = vmatprep.subr.bf16.mxu0 %v1562_v42  ;;  %2587 = vmatprep.subr.bf16.mxu1 %v1564_v15  ;;  %v986_v42 = vld [vmem:[%s15596_s26 + $0x108] sm:$0xff]  ;;  %v988_v15 = vld [vmem:[%s15596_s26 + $0x118] sm:$0xff] }
 0x320   : > { %2576 = vmatprep.mubr.bf16.mxu0 %v21860_v62  ;;  %2617 = vmatprep.mubr.bf16.mxu1 %v21860_v62 }
 0x322   : > { %2547 = vmatpush1.bf16.msra.mxu0 %v1561_v34  ;;  %2588 = vmatpush1.bf16.msra.mxu1 %v1563_v45  ;;  %v1378_v34 = vunpack.c.l.s8.bf16 %v986_v42  ;;  %v1380_v45 = vunpack.c.l.s8.bf16 %v988_v15 }
 0x323   : > { %2548 = vmatprep.subr.bf16.mxu0 %v1758_v37  ;;  %2589 = vmatprep.subr.bf16.mxu1 %v1760_v46  ;;  %v985_v37 = vld [vmem:[%s15596_s26 + $0x100] sm:$0xff]  ;;  %v987_v46 = vld [vmem:[%s15596_s26 + $0x110] sm:$0xff] }
 0x324   : > { %v1377_v50 = vunpack.c.l.s8.bf16 %v985_v37  ;;  %v1379_v52 = vunpack.c.l.s8.bf16 %v987_v46  ;;  %v1573_v23 = vunpack.c.h.s8.bf16 %v985_v37  ;;  %v1575_v58 = vunpack.c.h.s8.bf16 %v987_v46 }
 0x326   : > { %2549 = vmatpush1.bf16.msra.mxu0 %v1757_v48  ;;  %2590 = vmatpush1.bf16.msra.mxu1 %v1759_v53  ;;  %v1574_v48 = vunpack.c.h.s8.bf16 %v986_v42  ;;  %v1576_v53 = vunpack.c.h.s8.bf16 %v988_v15  ;;  %v15990_v15 = vld [vmem:[%s15596_s26 + $0x770] sm:$0xff] }
 0x327   : > { %2550 = vmatprep.subr.bf16.mxu0 %v1954_v54  ;;  %2591 = vmatprep.subr.bf16.mxu1 %v1956_v56  ;;  %v1182_v54 = vld [vmem:[%s15596_s26 + $0x728] sm:$0xff]  ;;  %v1184_v56 = vld [vmem:[%s15596_s26 + $0x738] sm:$0xff] }
 0x32a   : > { %2551 = vmatpush1.bf16.msra.mxu0 %v1953_v49  ;;  %2592 = vmatpush1.bf16.msra.mxu1 %v1955_v59  ;;  %v1770_v49 = vunpack.c.l.s8.bf16 %v1182_v54  ;;  %v1772_v59 = vunpack.c.l.s8.bf16 %v1184_v56 }
 0x32b   : > { %2626 = vmatprep.subr.bf16.mxu0 %v1370_v60  ;;  %2667 = vmatprep.subr.bf16.mxu1 %v1372_v51  ;;  %v1181_v60 = vld [vmem:[%s15596_s26 + $0x720] sm:$0xff]  ;;  %v1183_v51 = vld [vmem:[%s15596_s26 + $0x730] sm:$0xff] }
 0x32c   : > { %v1769_v0 = vunpack.c.l.s8.bf16 %v1181_v60  ;;  %v1771_v3 = vunpack.c.l.s8.bf16 %v1183_v51  ;;  %v1965_v5 = vunpack.c.h.s8.bf16 %v1181_v60  ;;  %v1967_v55 = vunpack.c.h.s8.bf16 %v1183_v51 }
 0x32d   : > { %13502 = vmatmul.mubr.msk.bf16.vlgmr.msra.gmra.mrb[36].mxu0 %vm2130_vm2, %v15852_v11  ;;  %13503 = vmatmul.mubr.msk.bf16.vlgmr.msra.gmra.mrb[24].mxu1 %vm2130_vm2, %v15852_v11 }
 0x32e   : > { %2627 = vmatpush1.bf16.msra.mxu0 %v1369_v4  ;;  %2668 = vmatpush1.bf16.msra.mxu1 %v1371_v47  ;;  %v1966_v4 = vunpack.c.h.s8.bf16 %v1182_v54  ;;  %v1968_v47 = vunpack.c.h.s8.bf16 %v1184_v56 }
 0x32f   : > { %2628 = vmatprep.subr.bf16.mxu0 %v1566_v7  ;;  %2669 = vmatprep.subr.bf16.mxu1 %v1568_v8  ;;  %v990_v7 = vld [vmem:[%s15596_s26 + $0x128] sm:$0xff]  ;;  %v992_v8 = vld [vmem:[%s15596_s26 + $0x138] sm:$0xff] }
 0x330   : > { %2658 = vmatprep.mubr.bf16.mxu0 %v21860_v62  ;;  %2699 = vmatprep.mubr.bf16.mxu1 %v21860_v62 }
 0x332   : > { %2629 = vmatpush1.bf16.msra.mxu0 %v1565_v6  ;;  %2670 = vmatpush1.bf16.msra.mxu1 %v1567_v14  ;;  %v1382_v6 = vunpack.c.l.s8.bf16 %v990_v7  ;;  %v1384_v14 = vunpack.c.l.s8.bf16 %v992_v8 }
 0x333   : > { %2630 = vmatprep.subr.bf16.mxu0 %v1762_v57  ;;  %2671 = vmatprep.subr.bf16.mxu1 %v1764_v16  ;;  %v989_v57 = vld [vmem:[%s15596_s26 + $0x120] sm:$0xff]  ;;  %v991_v16 = vld [vmem:[%s15596_s26 + $0x130] sm:$0xff] }
 0x334   : > { %v1381_v18 = vunpack.c.l.s8.bf16 %v989_v57  ;;  %v1383_v20 = vunpack.c.l.s8.bf16 %v991_v16  ;;  %v1577_v61 = vunpack.c.h.s8.bf16 %v989_v57  ;;  %v1579_v12 = vunpack.c.h.s8.bf16 %v991_v16 }
 0x336   : > { %2631 = vmatpush1.bf16.msra.mxu0 %v1761_v24  ;;  %2672 = vmatpush1.bf16.msra.mxu1 %v1763_v10  ;;  %v1578_v24 = vunpack.c.h.s8.bf16 %v990_v7  ;;  %v1580_v10 = vunpack.c.h.s8.bf16 %v992_v8 }
 0x337   : > { %2632 = vmatprep.subr.bf16.mxu0 %v1958_v25  ;;  %2673 = vmatprep.subr.bf16.mxu1 %v1960_v26  ;;  %v1186_v25 = vld [vmem:[%s15596_s26 + $0x748] sm:$0xff]  ;;  %v1188_v26 = vld [vmem:[%s15596_s26 + $0x758] sm:$0xff] }
 0x33a   : > { %2633 = vmatpush1.bf16.msra.mxu0 %v1957_v63  ;;  %2674 = vmatpush1.bf16.msra.mxu1 %v1959_v27  ;;  %v1774_v63 = vunpack.c.l.s8.bf16 %v1186_v25  ;;  %v1776_v27 = vunpack.c.l.s8.bf16 %v1188_v26 }
 0x33b   : > { %2708 = vmatprep.subr.bf16.mxu0 %v1374_v28  ;;  %2749 = vmatprep.subr.bf16.mxu1 %v1376_v29  ;;  %v1185_v28 = vld [vmem:[%s15596_s26 + $0x740] sm:$0xff]  ;;  %v1187_v29 = vld [vmem:[%s15596_s26 + $0x750] sm:$0xff] }
 0x33c   : > { %v1773_v30 = vunpack.c.l.s8.bf16 %v1185_v28  ;;  %v1775_v17 = vunpack.c.l.s8.bf16 %v1187_v29  ;;  %v1969_v2 = vunpack.c.h.s8.bf16 %v1185_v28  ;;  %v1971_v33 = vunpack.c.h.s8.bf16 %v1187_v29  ;;  %v16334_v28 = vld [vmem:[%s15596_s26 + $0x218] sm:$0xff] }
 0x33d   : > { %13504 = vmatmul.mubr.msk.bf16.vlgmr.msra.gmra.mrb[40].mxu0 %vm2130_vm2, %v15852_v11  ;;  %13505 = vmatmul.mubr.msk.bf16.vlgmr.msra.gmra.mrb[28].mxu1 %vm2130_vm2, %v15852_v11 }
 0x33e   : > { %2709 = vmatpush1.bf16.msra.mxu0 %v1373_v31  ;;  %2750 = vmatpush1.bf16.msra.mxu1 %v1375_v19  ;;  %v1970_v31 = vunpack.c.h.s8.bf16 %v1186_v25  ;;  %v1972_v19 = vunpack.c.h.s8.bf16 %v1188_v26 }
 0x33f   : > { %2710 = vmatprep.subr.bf16.mxu0 %v1570_v1  ;;  %2751 = vmatprep.subr.bf16.mxu1 %v1572_v32  ;;  %v994_v1 = vld [vmem:[%s15596_s26 + $0x148] sm:$0xff]  ;;  %v996_v32 = vld [vmem:[%s15596_s26 + $0x158] sm:$0xff] }
 0x340   : > { %2740 = vmatprep.mubr.bf16.mxu0 %v21860_v62  ;;  %2781 = vmatprep.mubr.bf16.mxu1 %v21860_v62  ;;  %v1584_v42 = vunpack.c.h.s8.bf16 %v996_v32 }
 0x342   : > { %2711 = vmatpush1.bf16.msra.mxu0 %v1569_v21  ;;  %2752 = vmatpush1.bf16.msra.mxu1 %v1571_v35  ;;  %v1386_v21 = vunpack.c.l.s8.bf16 %v994_v1  ;;  %v1388_v35 = vunpack.c.l.s8.bf16 %v996_v32  ;;  %v16192_v32 = vld [vmem:[%s15596_s26 + $0x7e8] sm:$0xff] }
 0x343   : > { %2712 = vmatprep.subr.bf16.mxu0 %v1766_v9  ;;  %2753 = vmatprep.subr.bf16.mxu1 %v1768_v36  ;;  %v993_v9 = vld [vmem:[%s15596_s26 + $0x140] sm:$0xff]  ;;  %v995_v36 = vld [vmem:[%s15596_s26 + $0x150] sm:$0xff] }
 0x344   : > { %v1385_v38 = vunpack.c.l.s8.bf16 %v993_v9  ;;  %v1387_v22 = vunpack.c.l.s8.bf16 %v995_v36  ;;  %v1583_v37 = vunpack.c.h.s8.bf16 %v995_v36  ;;  %v16083_v36 = vld [vmem:[%s15596_s26 + $0x1b8] sm:$0xff] }
 0x346   : > { %2713 = vmatpush1.bf16.msra.mxu0 %v1765_v39  ;;  %2754 = vmatpush1.bf16.msra.mxu1 %v1767_v40  ;;  %v15981_v39 = vld [vmem:[%s15596_s26 + $0x768] sm:$0xff]  ;;  %v15984_v40 = vld [vmem:[%s15596_s26 + $0x778] sm:$0xff] }
 0x347   : > { %2714 = vmatprep.subr.bf16.mxu0 %v1962_v13  ;;  %2755 = vmatprep.subr.bf16.mxu1 %v1964_v41  ;;  %v15987_v13 = vld [vmem:[%s15596_s26 + $0x760] sm:$0xff]  ;;  %v1582_v41 = vunpack.c.h.s8.bf16 %v994_v1  ;;  %v1778_v46 = vunpack.c.l.s8.bf16 %v15981_v39  ;;  %v1974_v54 = vunpack.c.h.s8.bf16 %v15981_v39  ;;  %v1976_v56 = vunpack.c.h.s8.bf16 %v15984_v40 }
 0x34a   : > { %2715 = vmatpush1.bf16.msra.mxu0 %v1961_v43  ;;  %2756 = vmatpush1.bf16.msra.mxu1 %v1963_v44  ;;  %v1581_v43 = vunpack.c.h.s8.bf16 %v993_v9  ;;  %v15993_v44 = vld [vmem:[%s15596_s26 + $0x168] sm:$0xff] }
 0x34b   : > { %2790 = vmatprep.subr.bf16.mxu0 %v1378_v34  ;;  %2831 = vmatprep.subr.bf16.mxu1 %v1380_v45  ;;  %v15996_v34 = vld [vmem:[%s15596_s26 + $0x178] sm:$0xff]  ;;  %v15999_v45 = vld [vmem:[%s15596_s26 + $0x160] sm:$0xff]  ;;  %v1390_v60 = vunpack.c.l.s8.bf16 %v15993_v44  ;;  %v1586_v7 = vunpack.c.h.s8.bf16 %v15993_v44 }
 0x34c   : > { %v1392_v51 = vunpack.c.l.s8.bf16 %v15996_v34  ;;  %v1588_v8 = vunpack.c.h.s8.bf16 %v15996_v34  ;;  %v16170_v9 = vld [vmem:[%s15606_s3] sm:$0xff]  ;;  %v16256_v34 = vld [vmem:[%s15596_s26 + $0x1f0] sm:$0xff] }
 0x34d   : > { %13506 = vmatmul.mubr.msk.bf16.vlgmr.msra.gmra.mrb[44].mxu0 %vm2130_vm2, %v15852_v11  ;;  %13507 = vmatmul.mubr.msk.bf16.vlgmr.msra.gmra.mrb[32].mxu1 %vm2130_vm2, %v15852_v11 }
 0x34e   : > { %2791 = vmatpush1.bf16.msra.mxu0 %v1377_v50  ;;  %2832 = vmatpush1.bf16.msra.mxu1 %v1379_v52  ;;  %v1780_v50 = vunpack.c.l.s8.bf16 %v15984_v40  ;;  %v1777_v52 = vunpack.c.l.s8.bf16 %v15987_v13 }
 0x34f   : > { %2792 = vmatprep.subr.bf16.mxu0 %v1574_v48  ;;  %2833 = vmatprep.subr.bf16.mxu1 %v1576_v53  ;;  %v16009_v48 = vld [vmem:[%s15596_s26 + $0x170] sm:$0xff]  ;;  %v1779_v53 = vunpack.c.l.s8.bf16 %v15990_v15 }
 0x350   : > { %2822 = vmatprep.mubr.bf16.mxu0 %v21860_v62  ;;  %2863 = vmatprep.mubr.bf16.mxu1 %v21860_v62 }
 0x352   : > { %2793 = vmatpush1.bf16.msra.mxu0 %v1573_v23  ;;  %2834 = vmatpush1.bf16.msra.mxu1 %v1575_v58  ;;  %v1973_v23 = vunpack.c.h.s8.bf16 %v15987_v13  ;;  %v16016_v58 = vld [vmem:[%s15596_s26 + $0x788] sm:$0xff] }
 0x353   : > { %2794 = vmatprep.subr.bf16.mxu0 %v1770_v49  ;;  %2835 = vmatprep.subr.bf16.mxu1 %v1772_v59  ;;  %v16019_v49 = vld [vmem:[%s15596_s26 + $0x798] sm:$0xff]  ;;  %v1975_v59 = vunpack.c.h.s8.bf16 %v15990_v15  ;;  %v1782_v57 = vunpack.c.l.s8.bf16 %v16016_v58  ;;  %v1978_v26 = vunpack.c.h.s8.bf16 %v16016_v58  ;;  %v16209_v15 = vld [vmem:[%s15596_s26 + $0x7e0] sm:$0xff] }
 0x354   : > { %v1784_v16 = vunpack.c.l.s8.bf16 %v16019_v49 }
 0x356   : > { %2795 = vmatpush1.bf16.msra.mxu0 %v1769_v0  ;;  %2836 = vmatpush1.bf16.msra.mxu1 %v1771_v3  ;;  %v1389_v0 = vunpack.c.l.s8.bf16 %v15999_v45  ;;  %v16026_v3 = vld [vmem:[%s15596_s26 + $0x780] sm:$0xff] }
 0x357   : > { %2796 = vmatprep.subr.bf16.mxu0 %v1966_v4  ;;  %2837 = vmatprep.subr.bf16.mxu1 %v1968_v47  ;;  %v16029_v4 = vld [vmem:[%s15596_s26 + $0x790] sm:$0xff]  ;;  %v1391_v47 = vunpack.c.l.s8.bf16 %v16009_v48 }
 0x358   : > { %v1783_v25 = vunpack.c.l.s8.bf16 %v16029_v4 }
 0x35a   : > { %2797 = vmatpush1.bf16.msra.mxu0 %v1965_v5  ;;  %2838 = vmatpush1.bf16.msra.mxu1 %v1967_v55  ;;  %v1585_v5 = vunpack.c.h.s8.bf16 %v15999_v45  ;;  %v16038_v55 = vld [vmem:[%s15596_s26 + $0x188] sm:$0xff] }
 0x35b   : > { %2872 = vmatprep.subr.bf16.mxu0 %v1382_v6  ;;  %2913 = vmatprep.subr.bf16.mxu1 %v1384_v14  ;;  %v16041_v6 = vld [vmem:[%s15596_s26 + $0x198] sm:$0xff]  ;;  %v1587_v14 = vunpack.c.h.s8.bf16 %v16009_v48 }
 0x35d   : > { %13508 = vmatmul.mubr.msk.bf16.vlgmr.msra.gmra.mrb[48].mxu0 %vm2130_vm2, %v15852_v11  ;;  %13509 = vmatmul.mubr.msk.bf16.vlgmr.msra.gmra.mrb[36].mxu1 %vm2130_vm2, %v15852_v11 }
 0x35e   : > { %2873 = vmatpush1.bf16.msra.mxu0 %v1381_v18  ;;  %2914 = vmatpush1.bf16.msra.mxu1 %v1383_v20  ;;  %v16047_v18 = vld [vmem:[%s15596_s26 + $0x180] sm:$0xff]  ;;  %v16050_v20 = vld [vmem:[%s15596_s26 + $0x190] sm:$0xff] }
 0x35f   : > { %2874 = vmatprep.subr.bf16.mxu0 %v1578_v24  ;;  %2915 = vmatprep.subr.bf16.mxu1 %v1580_v10  ;;  %v6202_v24 = vlaneseq  ;;  %v1781_v10 = vunpack.c.l.s8.bf16 %v16026_v3 }
 0x360   : > { %2904 = vmatprep.mubr.bf16.mxu0 %v21860_v62  ;;  %2945 = vmatprep.mubr.bf16.mxu1 %v21860_v62 }
 0x361   : > { %v16091_v39 = vshrl.u32 %v6202_v24, 7  ;;  %v16103_v24 = vld [vmem:[%s15596_s26 + $0x7c8] sm:$0xff] }
 0x362   : > { %2875 = vmatpush1.bf16.msra.mxu0 %v1577_v61  ;;  %2916 = vmatpush1.bf16.msra.mxu1 %v1579_v12  ;;  %v1980_v61 = vunpack.c.h.s8.bf16 %v16019_v49  ;;  %v16057_v12 = vld [vmem:[%s15596_s26 + $0x7a8] sm:$0xff]  ;;  %v22074_v49 = vunpack.c.l.s8.bf16 %v16047_v18 }
 0x363   : > { %2876 = vmatprep.subr.bf16.mxu0 %v1774_v63  ;;  %2917 = vmatprep.subr.bf16.mxu1 %v1776_v27  ;;  %v1977_v63 = vunpack.c.h.s8.bf16 %v16026_v3  ;;  %v1979_v27 = vunpack.c.h.s8.bf16 %v16029_v4  ;;  %v16121_v40 = vsub.s32 0, %v16091_v39  ;;  %v16161_v13 = vsub.s32 1, %v16091_v39 }
 0x364   : > { %v22072_v3 = vunpack.c.l.s8.bf16 %v16038_v55  ;;  %v22073_v4 = vunpack.c.l.s8.bf16 %v16041_v6 }
 0x366   : > { %2877 = vmatpush1.bf16.msra.mxu0 %v1773_v30  ;;  %2918 = vmatpush1.bf16.msra.mxu1 %v1775_v17  ;;  %v16064_v30 = vld [vmem:[%s15596_s26 + $0x7b8] sm:$0xff]  ;;  %v16067_v17 = vld [vmem:[%s15596_s26 + $0x7a0] sm:$0xff] }
 0x367   : > { %2878 = vmatprep.subr.bf16.mxu0 %v1970_v31  ;;  %2919 = vmatprep.subr.bf16.mxu1 %v1972_v19  ;;  %v16070_v31 = vld [vmem:[%s15596_s26 + $0x7b0] sm:$0xff] }
 0x36a   : > { %2879 = vmatpush1.bf16.msra.mxu0 %v1969_v2  ;;  %2920 = vmatpush1.bf16.msra.mxu1 %v1971_v33  ;;  %v16077_v33 = vld [vmem:[%s15596_s26 + $0x1a8] sm:$0xff] }
 0x36b   : > { %2954 = vmatprep.subr.bf16.mxu0 %v1386_v21  ;;  %2995 = vmatprep.subr.bf16.mxu1 %v1388_v35  ;;  %v16155_v21 = vld [vmem:[%s15596_s26 + $0x1c0] sm:$0xff] }
 0x36d   : > { %13510 = vmatmul.mubr.msk.bf16.vlgmr.msra.gmra.mrb[52].mxu0 %vm2130_vm2, %v15852_v11  ;;  %13511 = vmatmul.mubr.msk.bf16.vlgmr.msra.gmra.mrb[40].mxu1 %vm2130_vm2, %v15852_v11 }
 0x36e   : > { %2955 = vmatpush1.bf16.msra.mxu0 %v1385_v38  ;;  %2996 = vmatpush1.bf16.msra.mxu1 %v1387_v22  ;;  %v16086_v38 = vld [vmem:[%s15596_s26 + $0x1a0] sm:$0xff]  ;;  %v16089_v22 = vld [vmem:[%s15596_s26 + $0x1b0] sm:$0xff] }
 0x36f   : > { %2956 = vmatprep.subr.bf16.mxu0 %v1582_v41  ;;  %2997 = vmatprep.subr.bf16.mxu1 %v1584_v42  ;;  %v16138_v42 = vsub.s32 6, %v16091_v39 }
 0x370   : > { %2986 = vmatprep.mubr.bf16.mxu0 %v21860_v62  ;;  %3027 = vmatprep.mubr.bf16.mxu1 %v21860_v62 }
 0x372   : > { %2957 = vmatpush1.bf16.msra.mxu0 %v1581_v43  ;;  %2998 = vmatpush1.bf16.msra.mxu1 %v1583_v37  ;;  %v7378_v37 = vld [vmem:[%s15610_s17] sm:$0xff] }
 0x373   : > { %2958 = vmatprep.subr.bf16.mxu0 %v1778_v46  ;;  %2999 = vmatprep.subr.bf16.mxu1 %v1780_v50  ;;  %v16113_v46 = vld [vmem:[%s15596_s26 + $0x7c0] sm:$0xff]  ;;  %v16116_v50 = vld [vmem:[%s15596_s26 + $0x7d0] sm:$0xff]  ;;  %v7403_v41 = vunpack.c.l.bf16 %v7378_v37  ;;  %v16129_v43 = vld [vmem:[%s15596_s26 + $0x1c8] sm:$0xff]  ;;  %v16194_v1 = vunpack.c.h.bf16 %v7378_v37 }
 0x374   : > { %v16212_v37 = vld [vmem:[%s15596_s26 + $0x7f0] sm:$0xff] }
 0x375   : > { %v7516_v2 = vrot.slane %v7403_v41, %v16138_v42  ;;  %v7532_v19 = vrot.slane %v16194_v1, %v16138_v42 }
 0x376   : > { %2959 = vmatpush1.bf16.msra.mxu0 %v1777_v52  ;;  %3000 = vmatpush1.bf16.msra.mxu1 %v1779_v53  ;;  %v16132_v52 = vsub.s32 2, %v16091_v39  ;;  %v16135_v53 = vsub.s32 4, %v16091_v39 }
 0x377   : > { %2960 = vmatprep.subr.bf16.mxu0 %v1974_v54  ;;  %3001 = vmatprep.subr.bf16.mxu1 %v1976_v56  ;;  %v16110_v56 = vld [vmem:[%s15596_s26 + $0x7d8] sm:$0xff]  ;;  %v16232_v44 = vrot.slane %v7516_v2, %v16121_v40  ;;  %v16249_v2 = vld [vmem:[%s15596_s26 + $0x1e0] sm:$0xff] }
 0x378   : > { %v16149_v54 = vld [vmem:[%s15596_s26 + $0x1d8] sm:$0xff]  ;;  %v7508_v35 = vrot.slane %v7403_v41, %v16132_v52  ;;  %v7528_v48 = vrot.slane %v16194_v1, %v16135_v53 }
 0x37a   : > { %2961 = vmatpush1.bf16.msra.mxu0 %v1973_v23  ;;  %3002 = vmatpush1.bf16.msra.mxu1 %v1975_v59  ;;  %v16174_v23 = vsub.s32 3, %v16091_v39  ;;  %v7512_v59 = vrot.slane %v7403_v41, %v16135_v53  ;;  %v16301_v58 = vrot.slane %v7528_v48, %v16121_v40  ;;  %v16347_v48 = vld [vmem:[%s15596_s26 + $0x210] sm:$0xff] }
 0x37b   : > { %3036 = vmatprep.subr.bf16.mxu0 %v1390_v60  ;;  %3077 = vmatprep.subr.bf16.mxu1 %v1392_v51  ;;  %v16158_v51 = vld [vmem:[%s15596_s26 + $0x1d0] sm:$0xff]  ;;  %v7504_v60 = vrot.slane %v7403_v41, %v16121_v40  ;;  %v16206_v41 = vld [vmem:[%s15596_s26 + $0x7f8] sm:$0xff] }
 0x37d   : > { %13512 = vmatmul.mubr.msk.bf16.vlgmr.msra.gmra.mrb[56].mxu0 %vm2130_vm2, %v15852_v11  ;;  %13513 = vmatmul.mubr.msk.bf16.vlgmr.msra.gmra.mrb[44].mxu1 %vm2130_vm2, %v15852_v11 }
 0x37e   : > { %3037 = vmatpush1.bf16.msra.mxu0 %v1389_v0  ;;  %3078 = vmatpush1.bf16.msra.mxu1 %v1391_v47  ;;  %v16215_v47 = vrot.slane %v7504_v60, %v16121_v40  ;;  %v16229_v60 = vrot.slane %v7508_v35, %v16121_v40  ;;  %v16246_v35 = vld [vmem:[%s15596_s26 + $0x1f8] sm:$0xff]  ;;  %v7524_v0 = vrot.slane %v16194_v1, %v16132_v52 }
 0x37f   : > { %3038 = vmatprep.subr.bf16.mxu0 %v1586_v7  ;;  %3079 = vmatprep.subr.bf16.mxu1 %v1588_v8  ;;  %v16226_v8 = vrot.slane %v7512_v59, %v16121_v40  ;;  %v7520_v59 = vrot.slane %v16194_v1, %v16121_v40  ;;  %v16295_v7 = vld [vmem:[%s15596_s26 + $0x808] sm:$0xff]  ;;  %v16298_v1 = vld [vmem:[%s15596_s26 + $0x818] sm:$0xff] }
 0x380   : > { %3068 = vmatprep.mubr.bf16.mxu0 %v21860_v62  ;;  %3109 = vmatprep.mubr.bf16.mxu1 %v21860_v62  ;;  %22065 = vst [vmem:[#allocation25_spill] sm:$0xff] %v16295_v7  ;;  %22066 = vst [vmem:[#allocation26_spill] sm:$0xff] %v16298_v1  ;;  %v22076_v1 = vunpack.c.h.s8.bf16 %v16038_v55  ;;  %v22077_v7 = vunpack.c.h.s8.bf16 %v16041_v6  ;;  %v22080_v55 = vmov 0  }
 0x381   : > { %v16290_v45 = vrot.slane %v7520_v59, %v16121_v40  ;;  %v16310_v59 = vld [vmem:[%s15596_s26 + $0x810] sm:$0xff] }
 0x382   : > { %3039 = vmatpush1.bf16.msra.mxu0 %v1585_v5  ;;  %3080 = vmatpush1.bf16.msra.mxu1 %v1587_v14  ;;  %v16243_v14 = vld [vmem:[%s15596_s26 + $0x1e8] sm:$0xff]  ;;  %v16261_v5 = vsub.s32 5, %v16091_v39  ;;  %22068 = vst [vmem:[#allocation28_spill] sm:$0xff] %v16310_v59 }
 0x383   : > { %3040 = vmatprep.subr.bf16.mxu0 %v1782_v57  ;;  %3081 = vmatprep.subr.bf16.mxu1 %v1784_v16  ;;  %v16268_v57 = vsub.s32 7, %v16091_v39  ;;  %v16271_v16 = vld [vmem:[%s15610_s17 + $0x8] sm:$0xff]  ;;  %v16383_v59 = vld [vmem:[%s15596_s26 + $0x828] sm:$0xff] }
 0x384   : > { %v7405_v62 = vunpack.c.l.bf16 %v16271_v16  ;;  %22078 = vst [vmem:[#allocation32_spill] sm:$0xff] %v16383_v59  ;;  %v16463_v59 = vld [vmem:[%s15596_s26 + $0x848] sm:$0xff] }
 0x385   : > { %22095 = vst [vmem:[#allocation42_spill] sm:$0xff] %v16463_v59  ;;  %v22115_v59 = vunpack.c.h.s8.bf16 %v16077_v33 }
 0x386   : > { %3041 = vmatpush1.bf16.msra.mxu0 %v1781_v10  ;;  %3082 = vmatpush1.bf16.msra.mxu1 %v1783_v25  ;;  %v16314_v25 = vrot.slane %v7524_v0, %v16121_v40  ;;  %v16331_v10 = vld [vmem:[%s15596_s26 + $0x208] sm:$0xff]  ;;  %v16344_v0 = vld [vmem:[%s15596_s26 + $0x200] sm:$0xff]  ;;  %v7544_v29 = vrot.slane %v7405_v62, %v16135_v53 }
 0x387   : > { %3042 = vmatprep.subr.bf16.mxu0 %v1978_v26  ;;  %3083 = vmatprep.subr.bf16.mxu1 %v1980_v61  ;;  %v16307_v61 = vld [vmem:[%s15596_s26 + $0x800] sm:$0xff]  ;;  %v16325_v26 = vrot.slane %v7532_v19, %v16121_v40  ;;  %22071 = vst [vmem:[#allocation31_spill] sm:$0xff] %v16331_v10  ;;  %v7548_v19 = vrot.slane %v7405_v62, %v16138_v42 }
 0x388   : > { %22067 = vst [vmem:[#allocation27_spill] sm:$0xff] %v16307_v61  ;;  %22069 = vst [vmem:[#allocation29_spill] sm:$0xff] %v16314_v25  ;;  %v16397_v61 = vld [vmem:[%s15596_s26 + $0x820] sm:$0xff] }
 0x389   : > { %22070 = vst [vmem:[#allocation30_spill] sm:$0xff] %v16325_v26  ;;  %v7540_v26 = vrot.slane %v7405_v62, %v16132_v52  ;;  %22082 = vst [vmem:[#allocation35_spill] sm:$0xff] %v16397_v61 }
 0x38a   : > { %3043 = vmatpush1.bf16.msra.mxu0 %v1977_v63  ;;  %3084 = vmatpush1.bf16.msra.mxu1 %v1979_v27  ;;  %v22075_v63 = vunpack.c.l.s8.bf16 %v16050_v20  ;;  %v15291_v27 = vmov 1966171168  }
 0x38b   : > { %3118 = vmatprep.subr.bf16.mxu0 %v22072_v3  ;;  %3159 = vmatprep.subr.bf16.mxu1 %v22073_v4  ;;  %v16353_v3 = vld [vmem:[%s15606_s3 + $0x8] sm:$0xff]  ;;  %v7536_v4 = vrot.slane %v7405_v62, %v16121_v40  ;;  %v12026_v25 = vunpack.c.l.s4 %v15291_v27  ;;  %v16386_v27 = vld [vmem:[%s15596_s26 + $0x838] sm:$0xff]  ;;  %v16404_v62 = vrot.slane %v7544_v29, %v16121_v40  ;;  %v16407_v10 = vrot.slane %v7540_v26, %v16121_v40  ;;  %v16435_v29 = vld [vmem:[%s15596_s26 + $0x220] sm:$0xff] }
 0x38c   : > { %22079 = vst [vmem:[#allocation33_spill] sm:$0xff] %v16386_v27 }
 0x38d   : > { %13514 = vmatmul.mubr.msk.bf16.vlgmr.msra.gmra.mrb[60].mxu0 %vm2130_vm2, %v15852_v11  ;;  %13515 = vmatmul.mubr.msk.bf16.vlgmr.msra.gmra.mrb[48].mxu1 %vm2130_vm2, %v15852_v11  ;;  %v16391_v6 = vrot.slane %v7536_v4, %v16121_v40  ;;  %22084 = vst [vmem:[#allocation37_spill] sm:$0xff] %v16404_v62  ;;  %22085 = vst [vmem:[#allocation38_spill] sm:$0xff] %v16407_v10  ;;  %v16421_v10 = vld [vmem:[%s15596_s26 + $0x228] sm:$0xff]  ;;  %v16424_v4 = vld [vmem:[%s15596_s26 + $0x238] sm:$0xff] }
 0x38e   : > { %3119 = vmatpush1.bf16.msra.mxu0 %v22074_v49  ;;  %3160 = vmatpush1.bf16.msra.mxu1 %v22075_v63  ;;  %v16400_v63 = vld [vmem:[%s15596_s26 + $0x830] sm:$0xff]  ;;  %v7406_v49 = vunpack.c.h.bf16 %v16271_v16  ;;  %v16416_v16 = vrot.slane %v7548_v19, %v16121_v40  ;;  %v16558_v19 = vld [vmem:[%s15596_s26 + $0x878] sm:$0xff] }
 0x38f   : > { %3120 = vmatprep.subr.bf16.mxu0 %v22076_v1  ;;  %3161 = vmatprep.subr.bf16.mxu1 %v22077_v7  ;;  %22081 = vst [vmem:[#allocation34_spill] sm:$0xff] %v16391_v6  ;;  %22083 = vst [vmem:[#allocation36_spill] sm:$0xff] %v16400_v63  ;;  %v22086_v7 = vunpack.c.h.s8.bf16 %v16047_v18  ;;  %v22087_v1 = vunpack.c.h.s8.bf16 %v16050_v20  ;;  %v12027_v6 = vunpack.c.0.s8 %v12026_v25  ;;  %v22089_v18 = vunpack.c.l.s8.bf16 %v16057_v12  ;;  %v16445_v20 = vld [vmem:[%s15610_s17 + $0x10] sm:$0xff]  ;;  %v16482_v63 = vld [vmem:[%s15596_s26 + $0x850] sm:$0xff] }
 0x390   : > { %3150 = vmatprep.mubr.bf16.mxu0 %v22080_v55  ;;  %3191 = vmatprep.mubr.bf16.mxu1 %v22080_v55  ;;  %22088 = vst [vmem:[#allocation39_spill] sm:$0xff] %v16416_v16  ;;  %v16438_v16 = vld [vmem:[%s15596_s26 + $0x230] sm:$0xff]  ;;  %v7552_v62 = vrot.slane %v7406_v49, %v16121_v40  ;;  %v7564_v27 = vrot.slane %v7406_v49, %v16138_v42  ;;  %v22092_v25 = vunpack.c.l.s8.bf16 %v16067_v17  ;;  %22100 = vst [vmem:[#allocation45_spill] sm:$0xff] %v16482_v63 }
 0x391   : > { %22091 = vst [vmem:[#allocation40_spill] sm:$0xff] %v16438_v16  ;;  %v16460_v26 = vsub.s32 %v12027_v6, %v16091_v39  ;;  %v16476_v39 = vld [vmem:[%s15596_s26 + $0x858] sm:$0xff]  ;;  %v16479_v6 = vld [vmem:[%s15596_s26 + $0x840] sm:$0xff]  ;;  %22113 = vst [vmem:[#allocation52_spill] sm:$0xff] %v16558_v19  ;;  %v22128_v19 = vunpack.c.l.s8.bf16 %v16113_v46 }
 0x392   : > { %3121 = vmatpush1.bf16.msra.mxu0 %v22086_v7  ;;  %3162 = vmatpush1.bf16.msra.mxu1 %v22087_v1  ;;  %v22090_v7 = vunpack.c.l.s8.bf16 %v16064_v30  ;;  %v7556_v1 = vrot.slane %v7406_v49, %v16132_v52  ;;  %22098 = vst [vmem:[#allocation43_spill] sm:$0xff] %v16476_v39  ;;  %22099 = vst [vmem:[#allocation44_spill] sm:$0xff] %v16479_v6  ;;  %v16561_v6 = vld [vmem:[%s15596_s26 + $0x860] sm:$0xff]  ;;  %v16578_v16 = vld [vmem:[%s15596_s26 + $0x870] sm:$0xff] }
 0x393   : > { %3122 = vmatprep.subr.bf16.mxu0 %v22089_v18  ;;  %v22093_v18 = vunpack.c.l.s8.bf16 %v16070_v31  ;;  %22094 = vst [vmem:[#allocation41_spill] sm:$0xff] %v16460_v26  ;;  %v16513_v26 = vld [vmem:[%s15596_s26 + $0x258] sm:$0xff]  ;;  %22114 = vst [vmem:[#allocation53_spill] sm:$0xff] %v16561_v6 }
 0x394   : > { %3163 = vmatprep.subr.bf16.mxu1 %v22090_v7  ;;  %v7560_v7 = vrot.slane %v7406_v49, %v16135_v53  ;;  %v22096_v49 = vunpack.c.h.s8.bf16 %v16057_v12  ;;  %v7407_v12 = vunpack.c.l.bf16 %v16445_v20  ;;  %v16494_v61 = vrot.slane %v7556_v1, %v16121_v40  ;;  %v16528_v1 = vld [vmem:[%s15606_s3 + $0x10] sm:$0xff]  ;;  %22119 = vst [vmem:[#allocation56_spill] sm:$0xff] %v16578_v16  ;;  %v16635_v16 = vld [vmem:[%s15596_s26 + $0x888] sm:$0xff] }
 0x395   : > { %22126 = vst [vmem:[#allocation59_spill] sm:$0xff] %v16635_v16  ;;  %v16638_v6 = vld [vmem:[%s15596_s26 + $0x898] sm:$0xff] }
 0x396   : > { %3123 = vmatpush1.bf16.msra.mxu0 %v22092_v25  ;;  %3164 = vmatpush1.bf16.msra.mxu1 %v22093_v18  ;;  %v22097_v25 = vunpack.c.h.s8.bf16 %v16064_v30  ;;  %v16486_v30 = vrot.slane %v7552_v62, %v16121_v40  ;;  %22103 = vst [vmem:[#allocation48_spill] sm:$0xff] %v16494_v61  ;;  %v16497_v18 = vrot.slane %v7564_v27, %v16121_v40  ;;  %v16516_v61 = vld [vmem:[%s15596_s26 + $0x240] sm:$0xff]  ;;  %v16519_v62 = vld [vmem:[%s15596_s26 + $0x250] sm:$0xff]  ;;  %22127 = vst [vmem:[#allocation60_spill] sm:$0xff] %v16638_v6 }
 0x397   : > { %3124 = vmatprep.subr.bf16.mxu0 %v22096_v49  ;;  %v16489_v49 = vrot.slane %v7560_v7, %v16121_v40  ;;  %v22105_v7 = vunpack.c.h.s8.bf16 %v16067_v17  ;;  %22107 = vst [vmem:[#allocation50_spill] sm:$0xff] %v16519_v62  ;;  %v22108_v17 = vunpack.c.l.s8.bf16 %v16077_v33  ;;  %v7576_v27 = vrot.slane %v7407_v12, %v16135_v53  ;;  %v16659_v62 = vld [vmem:[%s15596_s26 + $0x890] sm:$0xff] }
 0x398   : > { %3165 = vmatprep.subr.bf16.mxu1 %v22097_v25  ;;  %22101 = vst [vmem:[#allocation46_spill] sm:$0xff] %v16486_v30  ;;  %22104 = vst [vmem:[#allocation49_spill] sm:$0xff] %v16497_v18  ;;  %v16502_v30 = vld [vmem:[%s15596_s26 + $0x248] sm:$0xff]  ;;  %v22106_v25 = vunpack.c.h.s8.bf16 %v16070_v31  ;;  %v22109_v31 = vunpack.c.l.s8.bf16 %v16083_v36  ;;  %v7568_v18 = vrot.slane %v7407_v12, %v16121_v40  ;;  %v22151_v6 = vunpack.c.l.s8.bf16 %v16158_v51 }
 0x399   : > { %22102 = vst [vmem:[#allocation47_spill] sm:$0xff] %v16489_v49  ;;  %v22110_v49 = vunpack.c.l.s8.bf16 %v16086_v38  ;;  %22132 = vst [vmem:[#allocation63_spill] sm:$0xff] %v16659_v62  ;;  %v16728_v62 = vld [vmem:[%s15596_s26 + $0x8b8] sm:$0xff] }
 0x39a   : > { %3125 = vmatpush1.bf16.msra.mxu0 %v22105_v7  ;;  %3166 = vmatpush1.bf16.msra.mxu1 %v22106_v25  ;;  %v16555_v7 = vld [vmem:[%s15596_s26 + $0x868] sm:$0xff]  ;;  %v16569_v39 = vrot.slane %v7568_v18, %v16121_v40  ;;  %v16572_v25 = vrot.slane %v7576_v27, %v16121_v40  ;;  %v16611_v18 = vld [vmem:[%s15596_s26 + $0x270] sm:$0xff]  ;;  %22147 = vst [vmem:[#allocation72_spill] sm:$0xff] %v16728_v62 }
 0x39b   : > { %3200 = vmatprep.subr.bf16.mxu0 %v22108_v17  ;;  %3241 = vmatprep.subr.bf16.mxu1 %v22109_v31  ;;  %v7572_v17 = vrot.slane %v7407_v12, %v16132_v52  ;;  %v7580_v31 = vrot.slane %v7407_v12, %v16138_v42  ;;  %v22111_v12 = vunpack.c.l.s8.bf16 %v16089_v22  ;;  %22112 = vst [vmem:[#allocation51_spill] sm:$0xff] %v16555_v7  ;;  %v16689_v7 = vld [vmem:[%s15596_s26 + $0x280] sm:$0xff] }
 0x39c   : > { %22117 = vst [vmem:[#allocation54_spill] sm:$0xff] %v16569_v39  ;;  %22118 = vst [vmem:[#allocation55_spill] sm:$0xff] %v16572_v25  ;;  %v16595_v25 = vld [vmem:[%s15596_s26 + $0x268] sm:$0xff]  ;;  %v16656_v39 = vld [vmem:[%s15596_s26 + $0x880] sm:$0xff] }
 0x39d   : > { %13516 = vmatmul.mubr.msk.bf16.vlgmr.msra.gmra.mrb[64].mxu0 %vm2130_vm2, %v15852_v11  ;;  %13517 = vmatmul.mubr.msk.bf16.vlgmr.msra.gmra.mrb[52].mxu1 %vm2130_vm2, %v15852_v11  ;;  %v16583_v33 = vrot.slane %v7572_v17, %v16121_v40  ;;  %v16598_v17 = vld [vmem:[%s15596_s26 + $0x278] sm:$0xff]  ;;  %22131 = vst [vmem:[#allocation62_spill] sm:$0xff] %v16656_v39  ;;  %22140 = vst [vmem:[#allocation69_spill] sm:$0xff] %v16689_v7 }
 0x39e   : > { %3201 = vmatpush1.bf16.msra.mxu0 %v22110_v49  ;;  %3242 = vmatpush1.bf16.msra.mxu1 %v22111_v12  ;;  %v7408_v49 = vunpack.c.h.bf16 %v16445_v20  ;;  %v22116_v12 = vunpack.c.h.s8.bf16 %v16083_v36  ;;  %v16586_v36 = vrot.slane %v7580_v31, %v16121_v40  ;;  %v22122_v31 = vunpack.c.h.s8.bf16 %v16086_v38 }
 0x39f   : > { %3202 = vmatprep.subr.bf16.mxu0 %v22115_v59  ;;  %3232 = vmatprep.mubr.bf16.mxu0 %v22080_v55  ;;  %22120 = vst [vmem:[#allocation57_spill] sm:$0xff] %v16583_v33  ;;  %v16601_v33 = vld [vmem:[%s15596_s26 + $0x260] sm:$0xff]  ;;  %v22123_v59 = vunpack.c.h.s8.bf16 %v16089_v22  ;;  %v22124_v38 = vunpack.c.l.s8.bf16 %v16103_v24  ;;  %v22125_v22 = vunpack.c.l.s8.bf16 %v16110_v56 }
 0x3a0   : > { %3243 = vmatprep.subr.bf16.mxu1 %v22116_v12  ;;  %3273 = vmatprep.mubr.bf16.mxu1 %v22080_v55  ;;  %22121 = vst [vmem:[#allocation58_spill] sm:$0xff] %v16586_v36  ;;  %v7584_v20 = vrot.slane %v7408_v49, %v16121_v40  ;;  %v16615_v36 = vld [vmem:[%s15610_s17 + $0x18] sm:$0xff]  ;;  %v7592_v63 = vrot.slane %v7408_v49, %v16135_v53 }
 0x3a1   : > { %v7588_v12 = vrot.slane %v7408_v49, %v16132_v52  ;;  %v16641_v27 = vunpack.c.l.bf16 %v16615_v36 }
 0x3a2   : > { %3203 = vmatpush1.bf16.msra.mxu0 %v22122_v31  ;;  %3244 = vmatpush1.bf16.msra.mxu1 %v22123_v59 }
 0x3a3   : > { %3204 = vmatprep.subr.bf16.mxu0 %v22124_v38  ;;  %3245 = vmatprep.subr.bf16.mxu1 %v22125_v22  ;;  %v7596_v38 = vrot.slane %v7408_v49, %v16138_v42  ;;  %v22129_v49 = vunpack.c.l.s8.bf16 %v16116_v50  ;;  %v16648_v22 = vrot.slane %v7584_v20, %v16121_v40  ;;  %v22134_v20 = vunpack.c.h.s8.bf16 %v16110_v56 }
 0x3a4   : > { %v16669_v59 = vrot.slane %v7588_v12, %v16121_v40  ;;  %v7600_v56 = vrot.slane %v16641_v27, %v16121_v40  ;;  %v7608_v12 = vrot.slane %v16641_v27, %v16135_v53  ;;  %v7604_v16 = vrot.slane %v16641_v27, %v16132_v52 }
 0x3a5   : > { %22130 = vst [vmem:[#allocation61_spill] sm:$0xff] %v16648_v22  ;;  %v16674_v22 = vrot.slane %v7596_v38, %v16121_v40  ;;  %v16692_v38 = vld [vmem:[%s15596_s26 + $0x290] sm:$0xff]  ;;  %v7612_v31 = vrot.slane %v16641_v27, %v16138_v42 }
 0x3a6   : > { %3205 = vmatpush1.bf16.msra.mxu0 %v22128_v19  ;;  %3246 = vmatpush1.bf16.msra.mxu1 %v22129_v49  ;;  %v22133_v19 = vunpack.c.h.s8.bf16 %v16103_v24  ;;  %v16666_v49 = vrot.slane %v7592_v63, %v16121_v40  ;;  %22136 = vst [vmem:[#allocation65_spill] sm:$0xff] %v16669_v59  ;;  %v16683_v63 = vld [vmem:[%s15596_s26 + $0x298] sm:$0xff]  ;;  %22141 = vst [vmem:[#allocation70_spill] sm:$0xff] %v16692_v38  ;;  %v22143_v24 = vunpack.c.h.s8.bf16 %v16116_v50  ;;  %v16725_v50 = vld [vmem:[%s15596_s26 + $0x8a8] sm:$0xff] }
 0x3a7   : > { %3247 = vmatprep.subr.bf16.mxu1 %v22134_v20  ;;  %22137 = vst [vmem:[#allocation66_spill] sm:$0xff] %v16674_v22  ;;  %v16680_v20 = vld [vmem:[%s15596_s26 + $0x288] sm:$0xff]  ;;  %22139 = vst [vmem:[#allocation68_spill] sm:$0xff] %v16683_v63  ;;  %v16695_v22 = vld [vmem:[%s15606_s3 + $0x18] sm:$0xff]  ;;  %v16735_v27 = vrot.slane %v7600_v56, %v16121_v40  ;;  %v16753_v56 = vrot.slane %v7608_v12, %v16121_v40  ;;  %v16756_v39 = vrot.slane %v7604_v16, %v16121_v40 }
 0x3a8   : > { %3206 = vmatprep.subr.bf16.mxu0 %v22133_v19  ;;  %22135 = vst [vmem:[#allocation64_spill] sm:$0xff] %v16666_v49  ;;  %22138 = vst [vmem:[#allocation67_spill] sm:$0xff] %v16680_v20  ;;  %v22142_v19 = vunpack.c.h.s8.bf16 %v16113_v46  ;;  %v22144_v49 = vunpack.c.l.s8.bf16 %v16129_v43  ;;  %v22145_v46 = vunpack.c.l.s8.bf16 %v16149_v54  ;;  %v16743_v59 = vld [vmem:[%s15596_s26 + $0x8a0] sm:$0xff]  ;;  %v22157_v16 = vrot.slane %v16170_v9, %v16121_v40 }
 0x3a9   : > { %22146 = vst [vmem:[#allocation71_spill] sm:$0xff] %v16725_v50  ;;  %22148 = vst [vmem:[#allocation73_spill] sm:$0xff] %v16735_v27  ;;  %v22154_v27 = vunpack.c.h.s8.bf16 %v16129_v43  ;;  %v16794_v50 = vld [vmem:[%s15596_s26 + $0x2b0] sm:$0xff]  ;;  %v22159_v63 = vrot.slane %v16170_v9, %v16161_v13  ;;  %v22160_v20 = vrot.slane %v16170_v9, %v16174_v23 }
 0x3aa   : > { %3207 = vmatpush1.bf16.msra.mxu0 %v22142_v19  ;;  %3248 = vmatpush1.bf16.msra.mxu1 %v22143_v24  ;;  %22149 = vst [vmem:[#allocation74_spill] sm:$0xff] %v16743_v59  ;;  %v16746_v19 = vld [vmem:[%s15596_s26 + $0x8b0] sm:$0xff]  ;;  %v22150_v24 = vunpack.c.l.s8.bf16 %v16155_v21  ;;  %22152 = vst [vmem:[#allocation75_spill] sm:$0xff] %v16753_v56  ;;  %v22186_v59 = vunpack.c.h.s8.bf16 %v16243_v14 }
 0x3ab   : > { %3282 = vmatprep.subr.bf16.mxu0 %v22144_v49  ;;  %3323 = vmatprep.subr.bf16.mxu1 %v22145_v46  ;;  %22153 = vst [vmem:[#allocation76_spill] sm:$0xff] %v16756_v39  ;;  %v16771_v49 = vld [vmem:[%s15596_s26 + $0x2a8] sm:$0xff]  ;;  %v7410_v39 = vunpack.c.h.bf16 %v16615_v36 }
 0x3ad   : > { %13518 = vmatmul.mubr.msk.bf16.vlgmr.msra.gmra.mrb[68].mxu0 %vm2130_vm2, %v15852_v11  ;;  %13519 = vmatmul.mubr.msk.bf16.vlgmr.msra.gmra.mrb[56].mxu1 %vm2130_vm2, %v15852_v11 }
 0x3ae   : > { %3283 = vmatpush1.bf16.msra.mxu0 %v22150_v24  ;;  %3324 = vmatpush1.bf16.msra.mxu1 %v22151_v6  ;;  %v22155_v24 = vunpack.c.h.s8.bf16 %v16149_v54  ;;  %v16765_v6 = vrot.slane %v7612_v31, %v16121_v40 }
 0x3af   : > { %3284 = vmatprep.subr.bf16.mxu0 %v22154_v27  ;;  %3314 = vmatprep.mubr.bf16.mxu0 %v22080_v55  ;;  %v16779_v27 = vld [vmem:[%s15596_s26 + $0x2b8] sm:$0xff] }
 0x3b0   : > { %3325 = vmatprep.subr.bf16.mxu1 %v22155_v24  ;;  %22156 = vst [vmem:[#allocation77_spill] sm:$0xff] %v16765_v6  ;;  %v2168_v56 = vpop.f32.mrb[16].mxu0  ;;  %v2209_v46 = vpop.f32.mrb[4].mxu1  ;;  %3355 = vmatprep.mubr.bf16.mxu1 %v22080_v55  ;;  %v16782_v24 = vld [vmem:[%s15596_s26 + $0x2a0] sm:$0xff]  ;;  %v22158_v6 = vrot.slane %v16170_v9, %v16132_v52 }
 0x3b1   : > { %v7182_v12 = vmul.f32 %v22157_v16, %v2168_v56  ;;  %v2170_v7 = vpop.f32.mrb[17].mxu0  ;;  %v2211_v43 = vpop.f32.mrb[5].mxu1  ;;  %v22161_v16 = vunpack.c.h.s8.bf16 %v16155_v21  ;;  %v22163_v21 = vunpack.c.l.s8.bf16 %v16192_v32 }
 0x3b2   : > { %v7184_v38 = vmul.f32 %v22158_v6, %v2209_v46  ;;  %v7183_v36 = vmul.f32 %v22159_v63, %v2170_v7  ;;  %v7185_v56 = vmul.f32 %v22160_v20, %v2211_v43  ;;  %v22162_v46 = vunpack.c.h.s8.bf16 %v16158_v51  ;;  %v2172_v6 = vpop.f32.mrb[18].mxu0  ;;  %v2213_v54 = vpop.f32.mrb[6].mxu1 }
 0x3b3   : > { %3285 = vmatpush1.bf16.msra.mxu0 %v22161_v16  ;;  %v16809_v62 = vadd.f32 %v16215_v47, %v7182_v12  ;;  %v2173_v20 = vpop.f32.mrb[19].mxu0  ;;  %v2214_v63 = vpop.f32.mrb[7].mxu1  ;;  %v22164_v51 = vunpack.c.l.s8.bf16 %v16206_v41  ;;  %v16829_v12 = vld [vmem:[%s15610_s17 + $0x20] sm:$0xff]  ;;  %v22168_v54 = vunpack.c.h.s8.bf16 %v16206_v41 }
 0x3b4   : > { %3326 = vmatpush1.bf16.msra.mxu1 %v22162_v46  ;;  %v16812_v7 = vadd.f32 %v16226_v8, %v7184_v38  ;;  %3286 = vmatprep.subr.bf16.mxu0 %v22163_v21  ;;  %v16821_v16 = vadd.f32 %v16229_v60, %v7183_v36  ;;  %v16824_v47 = vadd.f32 %v16232_v44, %v7185_v56  ;;  %v22165_v36 = vunpack.c.l.s8.bf16 %v16209_v15  ;;  %v16890_v41 = vld [vmem:[%s15596_s26 + $0x2c8] sm:$0xff] }
 0x3b5   : > { %3327 = vmatprep.subr.bf16.mxu1 %v22164_v51  ;;  %v7616_v38 = vrot.slane %v7410_v39, %v16121_v40  ;;  %v13590_v46 = vmul.f32 -1.442695, %v16809_v62  ;;  %v7624_v20 = vrot.slane %v7410_v39, %v16135_v53  ;;  %v7620_v63 = vrot.slane %v7410_v39, %v16132_v52  ;;  %22178 = vst [vmem:[#allocation85_spill] sm:$0xff] %v16890_v41 }
 0x3b6   : > { %v13592_v6 = vmul.f32 -1.442695, %v16812_v7  ;;  %v13591_v60 = vmul.f32 -1.442695, %v16821_v16  ;;  %v13593_v44 = vmul.f32 -1.442695, %v16824_v47  ;;  %v22166_v56 = vunpack.c.l.s8.bf16 %v16212_v37 }
 0x3b7   : > { %3287 = vmatpush1.bf16.msra.mxu0 %v22165_v36  ;;  %v7628_v51 = vrot.slane %v7410_v39, %v16138_v42  ;;  %14240 = vpow2.f32 %v13590_v46  ;;  %v22167_v8 = vunpack.c.h.s8.bf16 %v16192_v32  ;;  %v16856_v39 = vrot.slane %v7616_v38, %v16121_v40  ;;  %v16868_v46 = vld [vmem:[%s15596_s26 + $0x8c0] sm:$0xff]  ;;  %v16878_v32 = vld [vmem:[%s15596_s26 + $0x8d0] sm:$0xff] }
 0x3b8   : > { %3328 = vmatpush1.bf16.msra.mxu1 %v22166_v56  ;;  %v16853_v56 = vunpack.c.l.bf16 %v16829_v12  ;;  %14242 = vpow2.f32 %v13592_v6  ;;  %22171 = vst [vmem:[#allocation80_spill] sm:$0xff] %v16868_v46  ;;  %v16871_v43 = vrot.slane %v7624_v20, %v16121_v40  ;;  %v16874_v38 = vrot.slane %v7620_v63, %v16121_v40  ;;  %22174 = vst [vmem:[#allocation83_spill] sm:$0xff] %v16878_v32  ;;  %v16906_v63 = vld [vmem:[%s15606_s3 + $0x20] sm:$0xff] }
 0x3b9   : > { %3288 = vmatprep.subr.bf16.mxu0 %v22167_v8  ;;  %3329 = vmatprep.subr.bf16.mxu1 %v22168_v54  ;;  %22169 = vst [vmem:[#allocation78_spill] sm:$0xff] %v16856_v39  ;;  %v16862_v54 = vld [vmem:[%s15596_s26 + $0x8c8] sm:$0xff]  ;;  %v16865_v8 = vld [vmem:[%s15596_s26 + $0x8d8] sm:$0xff]  ;;  %14244 = vpow2.f32 %v13591_v60  ;;  %v22175_v36 = vunpack.c.h.s8.bf16 %v16209_v15  ;;  %v22176_v21 = vunpack.c.h.s8.bf16 %v16212_v37  ;;  %v16885_v20 = vrot.slane %v7628_v51, %v16121_v40  ;;  %v17036_v46 = vld [vmem:[%s15596_s26 + $0x2e0] sm:$0xff] }
 0x3ba   : > { %22170 = vst [vmem:[#allocation79_spill] sm:$0xff] %v16862_v54  ;;  %22172 = vst [vmem:[#allocation81_spill] sm:$0xff] %v16871_v43  ;;  %14246 = vpow2.f32 %v13593_v44  ;;  %v22179_v6 = vunpack.c.l.s8.bf16 %v16243_v14  ;;  %v22180_v44 = vunpack.c.l.s8.bf16 %v16246_v35  ;;  %v16900_v51 = vld [vmem:[%s15596_s26 + $0x2d8] sm:$0xff]  ;;  %v7632_v60 = vrot.slane %v16853_v56, %v16121_v40 }
 0x3bb   : > { %22173 = vst [vmem:[#allocation82_spill] sm:$0xff] %v16874_v38  ;;  %3289 = vmatpush1.bf16.msra.mxu0 %v22175_v36  ;;  %22177 = vst [vmem:[#allocation84_spill] sm:$0xff] %v16885_v20  ;;  %v16903_v36 = vld [vmem:[%s15596_s26 + $0x2c0] sm:$0xff]  ;;  %v7640_v37 = vrot.slane %v16853_v56, %v16135_v53  ;;  %v7644_v31 = vrot.slane %v16853_v56, %v16138_v42  ;;  %v22184_v20 = vunpack.c.l.s8.bf16 %v16249_v2  ;;  %v22185_v38 = vunpack.c.l.s8.bf16 %v16256_v34 }
 0x3bc   : > { %3330 = vmatpush1.bf16.msra.mxu1 %v22176_v21  ;;  %3364 = vmatprep.subr.bf16.mxu0 %v22179_v6  ;;  %22181 = vst [vmem:[#allocation86_spill] sm:$0xff] %v16900_v51  ;;  %22182 = vst [vmem:[#allocation87_spill] sm:$0xff] %v16903_v36  ;;  %v7636_v21 = vrot.slane %v16853_v56, %v16132_v52  ;;  %v22187_v56 = vunpack.c.h.s8.bf16 %v16246_v35  ;;  %v16943_v15 = vrot.slane %v7632_v60, %v16121_v40  ;;  %v17033_v51 = vld [vmem:[%s15596_s26 + $0x2f8] sm:$0xff] }
 0x3bd   : > { %3405 = vmatprep.subr.bf16.mxu1 %v22180_v44  ;;  %v16913_v44 = vld [vmem:[%s15596_s26 + $0x2d0] sm:$0xff]  ;;  %v16952_v14 = vrot.slane %v7640_v37, %v16121_v40  ;;  %v22191_v39 = vrot.slane %v16170_v9, %v16135_v53  ;;  %v22192_v6 = vrot.slane %v16170_v9, %v16138_v42  ;;  %v22194_v60 = vrot.slane %v16170_v9, %v16261_v5 }
 0x3be   : > { %22183 = vst [vmem:[#allocation88_spill] sm:$0xff] %v16913_v44  ;;  %13520 = vmatmul.mubr.msk.bf16.vlgmr.msra.gmra.mrb[72].mxu0 %vm2130_vm2, %v15852_v11  ;;  %22188 = vst [vmem:[#allocation89_spill] sm:$0xff] %v16943_v15  ;;  %v16955_v35 = vrot.slane %v7636_v21, %v16121_v40  ;;  %v22196_v32 = vunpack.c.h.s8.bf16 %v16249_v2  ;;  %v22200_v2 = vld [vmem:[#allocation26_spill] sm:$0xff] }
 0x3bf   : > { %13521 = vmatmul.mubr.msk.bf16.vlgmr.msra.gmra.mrb[60].mxu1 %vm2130_vm2, %v15852_v11  ;;  %3365 = vmatpush1.bf16.msra.mxu0 %v22184_v20  ;;  %22189 = vst [vmem:[#allocation90_spill] sm:$0xff] %v16952_v14  ;;  %v16967_v14 = vrot.slane %v7644_v31, %v16121_v40  ;;  %v22197_v31 = vunpack.c.h.s8.bf16 %v16256_v34  ;;  %v22201_v34 = vunpack.c.l.s8.bf16 %v22200_v2  ;;  %v22212_v36 = vunpack.c.h.s8.bf16 %v22200_v2 }
 0x3c0   : > { %3406 = vmatpush1.bf16.msra.mxu1 %v22185_v38  ;;  %3366 = vmatprep.subr.bf16.mxu0 %v22186_v59  ;;  %v2250_v43 = vpop.f32.mrb[20].mxu0  ;;  %v2291_v54 = vpop.f32.mrb[8].mxu1  ;;  %22190 = vst [vmem:[#allocation91_spill] sm:$0xff] %v16955_v35 }
 0x3c1   : > { %3407 = vmatprep.subr.bf16.mxu1 %v22187_v56  ;;  %3396 = vmatprep.mubr.bf16.mxu0 %v22080_v55  ;;  %v14241_v56 = vpop.eup %14240  ;;  %v7186_v38 = vmul.f32 %v22191_v39, %v2250_v43  ;;  %v7188_v20 = vmul.f32 %v22192_v6, %v2291_v54  ;;  %v2252_v15 = vpop.f32.mrb[21].mxu0  ;;  %22193 = vst [vmem:[#allocation92_spill] sm:$0xff] %v16967_v14 }
 0x3c2   : > { %3437 = vmatprep.mubr.bf16.mxu1 %v22080_v55  ;;  %v2293_v37 = vpop.f32.mrb[9].mxu1  ;;  %v14243_v35 = vpop.eup %14242  ;;  %v10049_v59 = vadd.f32 1.0, %v14241_v56  ;;  %v7187_v41 = vmul.f32 %v22194_v60, %v2252_v15  ;;  %v22195_v43 = vrot.slane %v16170_v9, %v16268_v57  ;;  %v17010_v56 = vld [vmem:[%s15596_s26 + $0x8f0] sm:$0xff] }
 0x3c3   : > { %v2254_v54 = vpop.f32.mrb[22].mxu0  ;;  %v2295_v6 = vpop.f32.mrb[10].mxu1  ;;  %3367 = vmatpush1.bf16.msra.mxu0 %v22196_v32  ;;  %v10051_v14 = vadd.f32 1.0, %v14243_v35  ;;  %v16982_v15 = vadd.f32 %v16290_v45, %v7186_v38  ;;  %v16985_v9 = vadd.f32 %v16301_v58, %v7188_v20  ;;  %v16996_v35 = vld [vmem:[%s15596_s26 + $0x8f8] sm:$0xff]  ;;  %22205 = vst [vmem:[#allocation26_spill] sm:$0xff] %v17010_v56  ;;  %v22226_v56 = vunpack.c.l.s8.bf16 %v16347_v48 }
 0x3c4   : > { %v7189_v39 = vmul.f32 %v22195_v43, %v2293_v37  ;;  %3408 = vmatpush1.bf16.msra.mxu1 %v22197_v31  ;;  %v14245_v21 = vpop.eup %14244  ;;  %v2255_v60 = vpop.f32.mrb[23].mxu0  ;;  %v22198_v43 = vld [vmem:[#allocation25_spill] sm:$0xff]  ;;  %v16993_v6 = vld [vmem:[%s15596_s26 + $0x8e8] sm:$0xff]  ;;  %14248 = vrcp.f32 %v10049_v59  ;;  %v22203_v31 = vld [vmem:[#allocation30_spill] sm:$0xff] }
 0x3c5   : > { %v2296_v37 = vpop.f32.mrb[11].mxu1  ;;  %v22199_v54 = vunpack.c.l.s8.bf16 %v22198_v43  ;;  %3409 = vmatprep.subr.bf16.mxu1 %v22201_v34  ;;  %v14247_v45 = vpop.eup %14246  ;;  %v10050_v58 = vadd.f32 1.0, %v14245_v21  ;;  %v22202_v20 = vld [vmem:[#allocation29_spill] sm:$0xff]  ;;  %14250 = vrcp.f32 %v10051_v14  ;;  %v13594_v34 = vmul.f32 -1.442695, %v16982_v15  ;;  %v22206_v21 = vld [vmem:[#allocation27_spill] sm:$0xff] }
 0x3c6   : > { %v16999_v38 = vadd.f32 %v22202_v20, %v7187_v41  ;;  %v17002_v60 = vadd.f32 %v22203_v31, %v7189_v39  ;;  %v17005_v37 = vld [vmem:[%s15596_s26 + $0x8e0] sm:$0xff]  ;;  %v13596_v32 = vmul.f32 -1.442695, %v16985_v9  ;;  %v22207_v44 = vunpack.c.l.s8.bf16 %v22206_v21  ;;  %v22208_v41 = vld [vmem:[#allocation28_spill] sm:$0xff]  ;;  %v17020_v20 = vld [vmem:[%s15596_s26 + $0x2e8] sm:$0xff]  ;;  %22213 = vst [vmem:[#allocation30_spill] sm:$0xff] %v17033_v51 }
 0x3c7   : > { %3368 = vmatprep.subr.bf16.mxu0 %v22199_v54  ;;  %22204 = vst [vmem:[#allocation25_spill] sm:$0xff] %v17005_v37  ;;  %v10052_v54 = vadd.f32 1.0, %v14247_v45  ;;  %14252 = vrcp.f32 %v10050_v58  ;;  %v22209_v39 = vunpack.c.l.s8.bf16 %v22208_v41  ;;  %22210 = vst [vmem:[#allocation29_spill] sm:$0xff] %v17020_v20  ;;  %v22211_v31 = vunpack.c.h.s8.bf16 %v22198_v43  ;;  %v17069_v14 = vld [vmem:[%s15596_s26 + $0x918] sm:$0xff] }
 0x3c8   : > { %v13595_v59 = vmul.f32 -1.442695, %v16999_v38  ;;  %3369 = vmatpush1.bf16.msra.mxu0 %v22207_v44  ;;  %v13597_v58 = vmul.f32 -1.442695, %v17002_v60  ;;  %22214 = vst [vmem:[#allocation27_spill] sm:$0xff] %v17036_v46  ;;  %22222 = vst [vmem:[#allocation93_spill] sm:$0xff] %v17069_v14  ;;  %v22225_v44 = vunpack.c.l.s8.bf16 %v16344_v0 }
 0x3c9   : > { %3410 = vmatpush1.bf16.msra.mxu1 %v22209_v39  ;;  %14254 = vrcp.f32 %v10052_v54  ;;  %3370 = vmatprep.subr.bf16.mxu0 %v22211_v31  ;;  %v7412_v39 = vunpack.c.h.bf16 %v16829_v12  ;;  %v17042_v31 = vld [vmem:[%s15596_s26 + $0x2f0] sm:$0xff]  ;;  %v22216_v12 = vunpack.c.h.s8.bf16 %v22206_v21 }
 0x3ca   : > { %3411 = vmatprep.subr.bf16.mxu1 %v22212_v36  ;;  %14256 = vpow2.f32 %v13594_v34  ;;  %22215 = vst [vmem:[#allocation28_spill] sm:$0xff] %v17042_v31  ;;  %v22217_v34 = vunpack.c.h.s8.bf16 %v22208_v41  ;;  %v22218_v36 = vld [vmem:[#allocation31_spill] sm:$0xff]  ;;  %v17084_v41 = vld [vmem:[%s15596_s26 + $0x910] sm:$0xff] }
 0x3cb   : > { %14258 = vpow2.f32 %v13596_v32  ;;  %v7648_v54 = vrot.slane %v7412_v39, %v16121_v40  ;;  %v7656_v32 = vrot.slane %v7412_v39, %v16135_v53  ;;  %v7652_v43 = vrot.slane %v7412_v39, %v16132_v52  ;;  %22224 = vst [vmem:[#allocation95_spill] sm:$0xff] %v17084_v41  ;;  %v17174_v41 = vld [vmem:[%s15596_s26 + $0x300] sm:$0xff]  ;;  %v17180_v14 = vld [vmem:[%s15610_s17 + $0x28] sm:$0xff] }
 0x3cc   : > { %14260 = vpow2.f32 %v13595_v59  ;;  %3371 = vmatpush1.bf16.msra.mxu0 %v22216_v12  ;;  %v22219_v2 = vunpack.c.l.s8.bf16 %v22218_v36  ;;  %v22220_v59 = vunpack.c.l.s8.bf16 %v16334_v28  ;;  %v7660_v12 = vrot.slane %v7412_v39, %v16138_v42 }
 0x3cd   : > { %3412 = vmatpush1.bf16.msra.mxu1 %v22217_v34  ;;  %14262 = vpow2.f32 %v13597_v58  ;;  %v17091_v37 = vrot.slane %v7648_v54, %v16121_v40  ;;  %v17094_v39 = vrot.slane %v7656_v32, %v16121_v40  ;;  %v17097_v58 = vrot.slane %v7652_v43, %v16121_v40 }
 0x3ce   : > { %3446 = vmatprep.subr.bf16.mxu0 %v22219_v2  ;;  %3487 = vmatprep.subr.bf16.mxu1 %v22220_v59  ;;  %v17066_v59 = vld [vmem:[%s15596_s26 + $0x908] sm:$0xff]  ;;  %v17081_v2 = vld [vmem:[%s15596_s26 + $0x900] sm:$0xff]  ;;  %v14249_v21 = vpop.eup %14248  ;;  %v22230_v51 = vunpack.c.h.s8.bf16 %v22218_v36 }
 0x3cf   : > { %22221 = vst [vmem:[#allocation31_spill] sm:$0xff] %v17066_v59  ;;  %13522 = vmatmul.mubr.msk.bf16.vlgmr.msra.gmra.mrb[76].mxu0 %vm2130_vm2, %v15852_v11  ;;  %22223 = vst [vmem:[#allocation94_spill] sm:$0xff] %v17081_v2  ;;  %v14251_v45 = vpop.eup %14250  ;;  %v10637_v46 = vmul.f32 %v14249_v21, %v16809_v62 }
 0x3d0   : > { %13523 = vmatmul.mubr.msk.bf16.vlgmr.msra.gmra.mrb[64].mxu1 %vm2130_vm2, %v15852_v11  ;;  %3447 = vmatpush1.bf16.msra.mxu0 %v22225_v44  ;;  %22227 = vst [vmem:[#allocation96_spill] sm:$0xff] %v17091_v37  ;;  %22228 = vst [vmem:[#allocation97_spill] sm:$0xff] %v17094_v39  ;;  %v22231_v44 = vunpack.c.h.s8.bf16 %v16334_v28  ;;  %v2332_v34 = vpop.f32.mrb[24].mxu0  ;;  %v2373_v39 = vpop.f32.mrb[12].mxu1 }
 0x3d1   : > { %3488 = vmatpush1.bf16.msra.mxu1 %v22226_v56  ;;  %22229 = vst [vmem:[#allocation98_spill] sm:$0xff] %v17097_v58  ;;  %3448 = vmatprep.subr.bf16.mxu0 %v22230_v51  ;;  %v17106_v56 = vrot.slane %v7660_v12, %v16121_v40  ;;  %v14253_v43 = vpop.eup %14252  ;;  %v10639_v58 = vmul.f32 %v14251_v45, %v16812_v7  ;;  %v2334_v32 = vpop.f32.mrb[25].mxu0  ;;  %v10833_v37 = vmax.f32 %v10637_v46, 0.0 }
 0x3d2   : > { %3489 = vmatprep.subr.bf16.mxu1 %v22231_v44  ;;  %3478 = vmatprep.mubr.bf16.mxu0 %v22080_v55  ;;  %v10638_v21 = vmul.f32 %v14253_v43, %v16821_v16  ;;  %v22233_v12 = vrot.slane %v16353_v3, %v16121_v40  ;;  %v22234_v7 = vrot.slane %v16353_v3, %v16132_v52  ;;  %v2375_v54 = vpop.f32.mrb[13].mxu1  ;;  %v2336_v59 = vpop.f32.mrb[26].mxu0  ;;  %v22235_v16 = vunpack.c.h.s8.bf16 %v16344_v0 }
 0x3d3   : > { %22232 = vst [vmem:[#allocation99_spill] sm:$0xff] %v17106_v56  ;;  %3519 = vmatprep.mubr.bf16.mxu1 %v22080_v55  ;;  %v14255_v36 = vpop.eup %14254  ;;  %v10835_v28 = vmax.f32 %v10639_v58, 0.0  ;;  %v2377_v31 = vpop.f32.mrb[14].mxu1  ;;  %v22238_v46 = vrot.slane %v16353_v3, %v16161_v13  ;;  %v22244_v56 = vld [vmem:[#allocation37_spill] sm:$0xff] }
 0x3d4   : > { %v7190_v44 = vmul.f32 %v22233_v12, %v2332_v34  ;;  %v7192_v45 = vmul.f32 %v22234_v7, %v2373_v39  ;;  %v14257_v62 = vpop.eup %14256  ;;  %v10640_v51 = vmul.f32 %v14255_v36, %v16824_v47  ;;  %3449 = vmatpush1.bf16.msra.mxu0 %v22235_v16  ;;  %v22236_v34 = vunpack.c.h.s8.bf16 %v16347_v48  ;;  %v22237_v7 = vld [vmem:[#allocation34_spill] sm:$0xff]  ;;  %v2337_v31 = vpop.f32.mrb[27].mxu0  ;;  %v22240_v48 = vld [vmem:[#allocation32_spill] sm:$0xff]  ;;  %v22242_v16 = vld [vmem:[#allocation33_spill] sm:$0xff] }
 0x3d5   : > { %v14259_v39 = vpop.eup %14258  ;;  %v10053_v12 = vadd.f32 1.0, %v14257_v62  ;;  %v7191_v58 = vmul.f32 %v22238_v46, %v2334_v32  ;;  %v22239_v47 = vrot.slane %v16353_v3, %v16174_v23  ;;  %v2378_v59 = vpop.f32.mrb[15].mxu1  ;;  %v22241_v36 = vunpack.c.l.s8.bf16 %v22240_v48  ;;  %v17149_v31 = vld [vmem:[%s15596_s26 + $0x308] sm:$0xff] }
 0x3d6   : > { %3490 = vmatpush1.bf16.msra.mxu1 %v22236_v34  ;;  %v17131_v20 = vadd.f32 %v22237_v7, %v7190_v44  ;;  %v22243_v34 = vunpack.c.l.s8.bf16 %v22242_v16  ;;  %v14261_v62 = vpop.eup %14260  ;;  %v10834_v44 = vmax.f32 %v10638_v21, 0.0  ;;  %v10836_v7 = vmax.f32 %v10640_v51, 0.0 }
 0x3d7   : > { %v7193_v0 = vmul.f32 %v22239_v47, %v2375_v54  ;;  %3450 = vmatprep.subr.bf16.mxu0 %v22241_v36  ;;  %v10055_v43 = vadd.f32 1.0, %v14259_v39  ;;  %v17144_v32 = vadd.f32 %v22244_v56, %v7192_v45  ;;  %v14263_v46 = vpop.eup %14262  ;;  %14264 = vrcp.f32 %v10053_v12  ;;  %v22245_v56 = vld [vmem:[#allocation35_spill] sm:$0xff]  ;;  %v22247_v39 = vld [vmem:[#allocation36_spill] sm:$0xff]  ;;  %v17159_v36 = vld [vmem:[%s15596_s26 + $0x318] sm:$0xff] }
 0x3d8   : > { %3491 = vmatprep.subr.bf16.mxu1 %v22243_v34  ;;  %v10054_v2 = vadd.f32 1.0, %v14261_v62  ;;  %v13598_v54 = vmul.f32 -1.442695, %v17131_v20  ;;  %v17151_v59 = vmin.f32 %v10833_v37, 1.0  ;;  %v10056_v51 = vadd.f32 1.0, %v14263_v46  ;;  %22249 = vst [vmem:[#allocation34_spill] sm:$0xff] %v17159_v36 }
 0x3d9   : > { %14266 = vrcp.f32 %v10055_v43  ;;  %v13600_v21 = vmul.f32 -1.442695, %v17144_v32  ;;  %v22246_v45 = vunpack.c.l.s8.bf16 %v22245_v56  ;;  %v22248_v12 = vunpack.c.l.s8.bf16 %v22247_v39  ;;  %v22251_v62 = vld [vmem:[#allocation38_spill] sm:$0xff]  ;;  %v22252_v37 = vld [vmem:[#allocation39_spill] sm:$0xff] }
 0x3da   : > { %v17161_v34 = vmin.f32 %v10835_v28, 1.0  ;;  %14268 = vrcp.f32 %v10054_v2  ;;  %v17164_v47 = vadd.f32 %v22251_v62, %v7191_v58  ;;  %v17167_v43 = vadd.f32 %v22252_v37, %v7193_v0  ;;  %v17188_v0 = vld [vmem:[%s15606_s3 + $0x28] sm:$0xff] }
 0x3db   : > { %3451 = vmatpush1.bf16.msra.mxu0 %v22246_v45  ;;  %3492 = vmatpush1.bf16.msra.mxu1 %v22248_v12  ;;  %v22253_v46 = vunpack.c.h.s8.bf16 %v22240_v48  ;;  %v22254_v45 = vunpack.c.h.s8.bf16 %v22242_v16  ;;  %v17177_v12 = vld [vmem:[%s15596_s26 + $0x310] sm:$0xff]  ;;  %v17182_v28 = vmin.f32 %v10834_v44, 1.0  ;;  %v17184_v2 = vmin.f32 %v10836_v7, 1.0 }
 0x3dc   : > { %22250 = vst [vmem:[#allocation32_spill] sm:$0xff] %v17161_v34  ;;  %22255 = vst [vmem:[#allocation33_spill] sm:$0xff] %v17177_v12  ;;  %14270 = vrcp.f32 %v10056_v51  ;;  %v13599_v48 = vmul.f32 -1.442695, %v17164_v47  ;;  %v13601_v16 = vmul.f32 -1.442695, %v17167_v43  ;;  %v22258_v37 = vunpack.c.h.s8.bf16 %v22245_v56 }
 0x3dd   : > { %3452 = vmatprep.subr.bf16.mxu0 %v22253_v46  ;;  %3493 = vmatprep.subr.bf16.mxu1 %v22254_v45  ;;  %22256 = vst [vmem:[#allocation37_spill] sm:$0xff] %v17182_v28  ;;  %22257 = vst [vmem:[#allocation35_spill] sm:$0xff] %v17184_v2  ;;  %14272 = vpow2.f32 %v13598_v54  ;;  %v22259_v44 = vunpack.c.h.s8.bf16 %v22247_v39  ;;  %v7413_v54 = vunpack.c.l.bf16 %v17180_v14  ;;  %v22260_v46 = vunpack.c.l.s8.bf16 %v16421_v10  ;;  %v17229_v51 = vld [vmem:[%s15596_s26 + $0x920] sm:$0xff]  ;;  %v17232_v7 = vld [vmem:[%s15596_s26 + $0x930] sm:$0xff] }
 0x3de   : > { %14274 = vpow2.f32 %v13600_v21  ;;  %v22261_v45 = vunpack.c.l.s8.bf16 %v16424_v4  ;;  %22264 = vst [vmem:[#allocation39_spill] sm:$0xff] %v17229_v51  ;;  %22265 = vst [vmem:[#allocation100_spill] sm:$0xff] %v17232_v7  ;;  %v22266_v62 = vunpack.c.l.s8.bf16 %v16435_v29  ;;  %v22267_v58 = vld [vmem:[#allocation40_spill] sm:$0xff]  ;;  %v22270_v28 = vunpack.c.h.s8.bf16 %v16421_v10  ;;  %v17720_v51 = vld [vmem:[%s15596_s26 + $0x360] sm:$0xff] }
 0x3df   : > { %3453 = vmatpush1.bf16.msra.mxu0 %v22258_v37  ;;  %3494 = vmatpush1.bf16.msra.mxu1 %v22259_v44  ;;  %14276 = vpow2.f32 %v13599_v48  ;;  %v17211_v37 = vld [vmem:[%s15596_s26 + $0x928] sm:$0xff]  ;;  %v7664_v48 = vrot.slane %v7413_v54, %v16121_v40  ;;  %v7672_v44 = vrot.slane %v7413_v54, %v16135_v53  ;;  %v7676_v56 = vrot.slane %v7413_v54, %v16138_v42 }
 0x3e0   : > { %3528 = vmatprep.subr.bf16.mxu0 %v22260_v46  ;;  %3569 = vmatprep.subr.bf16.mxu1 %v22261_v45  ;;  %22262 = vst [vmem:[#allocation36_spill] sm:$0xff] %v17211_v37  ;;  %14278 = vpow2.f32 %v13601_v16  ;;  %v7668_v46 = vrot.slane %v7413_v54, %v16132_v52  ;;  %v17217_v45 = vld [vmem:[%s15596_s26 + $0x938] sm:$0xff]  ;;  %v22268_v2 = vunpack.c.l.s8.bf16 %v22267_v58  ;;  %v22271_v36 = vunpack.c.h.s8.bf16 %v16424_v4  ;;  %v2455_v10 = vpop.f32.mrb[16].mxu1 }
 0x3e1   : > { %22263 = vst [vmem:[#allocation38_spill] sm:$0xff] %v17217_v45  ;;  %v17239_v34 = vrot.slane %v7664_v48, %v16121_v40  ;;  %v14265_v21 = vpop.eup %14264  ;;  %v17255_v48 = vrot.slane %v7676_v56, %v16121_v40  ;;  %v22283_v45 = vld [vmem:[#allocation47_spill] sm:$0xff] }
 0x3e2   : > { %13524 = vmatmul.mubr.msk.bf16.vlgmr.msra.gmra.mrb[80].mxu0 %vm2130_vm2, %v15852_v11  ;;  %13525 = vmatmul.mubr.msk.bf16.vlgmr.msra.gmra.mrb[68].mxu1 %vm2130_vm2, %v15852_v11  ;;  %v10641_v16 = vmul.f32 %v14265_v21, %v16982_v15  ;;  %v22276_v15 = vrot.slane %v16353_v3, %v16138_v42 }
 0x3e3   : > { %3529 = vmatpush1.bf16.msra.mxu0 %v22266_v62  ;;  %3570 = vmatpush1.bf16.msra.mxu1 %v22268_v2  ;;  %22269 = vst [vmem:[#allocation40_spill] sm:$0xff] %v17239_v34  ;;  %v17249_v62 = vrot.slane %v7672_v44, %v16121_v40  ;;  %v17252_v2 = vrot.slane %v7668_v46, %v16121_v40  ;;  %22274 = vst [vmem:[#allocation103_spill] sm:$0xff] %v17255_v48  ;;  %v14267_v39 = vpop.eup %14266  ;;  %v2414_v34 = vpop.f32.mrb[28].mxu0 }
 0x3e4   : > { %3530 = vmatprep.subr.bf16.mxu0 %v22270_v28  ;;  %3571 = vmatprep.subr.bf16.mxu1 %v22271_v36  ;;  %v14269_v44 = vpop.eup %14268  ;;  %v10643_v56 = vmul.f32 %v14267_v39, %v16985_v9  ;;  %v22275_v46 = vrot.slane %v16353_v3, %v16135_v53  ;;  %v7196_v21 = vmul.f32 %v22276_v15, %v2455_v10  ;;  %v2416_v48 = vpop.f32.mrb[29].mxu0  ;;  %v10837_v12 = vmax.f32 %v10641_v16, 0.0 }
 0x3e5   : > { %22272 = vst [vmem:[#allocation101_spill] sm:$0xff] %v17249_v62  ;;  %22273 = vst [vmem:[#allocation102_spill] sm:$0xff] %v17252_v2  ;;  %3560 = vmatprep.mubr.bf16.mxu0 %v22080_v55  ;;  %3601 = vmatprep.mubr.bf16.mxu1 %v22080_v55  ;;  %v2457_v2 = vpop.f32.mrb[17].mxu1  ;;  %v17273_v36 = vmul.f32 %v14269_v44, %v16999_v38  ;;  %v22278_v9 = vrot.slane %v16353_v3, %v16261_v5  ;;  %v2418_v28 = vpop.f32.mrb[30].mxu0  ;;  %v22280_v10 = vunpack.c.h.s8.bf16 %v22267_v58  ;;  %v22282_v38 = vld [vmem:[#allocation46_spill] sm:$0xff] }
 0x3e6   : > { %v7194_v54 = vmul.f32 %v22275_v46, %v2414_v34  ;;  %v14271_v4 = vpop.eup %14270  ;;  %v2459_v37 = vpop.f32.mrb[18].mxu1  ;;  %v22279_v34 = vunpack.c.h.s8.bf16 %v16435_v29  ;;  %v10839_v62 = vmax.f32 %v10643_v56, 0.0  ;;  %v22284_v28 = vld [vmem:[#allocation42_spill] sm:$0xff]  ;;  %v17312_v46 = vld [vmem:[%s15596_s26 + $0x338] sm:$0xff] }
 0x3e7   : > { %22277 = vst [vmem:[#allocation104_spill] sm:$0xff] %v17273_v36  ;;  %v7195_v39 = vmul.f32 %v22278_v9, %v2416_v48  ;;  %3572 = vmatpush1.bf16.msra.mxu1 %v22280_v10  ;;  %v14273_v15 = vpop.eup %14272  ;;  %v17284_v16 = vmul.f32 %v14271_v4, %v17002_v60  ;;  %v17290_v48 = vadd.f32 %v22283_v45, %v7196_v21  ;;  %v2419_v29 = vpop.f32.mrb[31].mxu0  ;;  %v22285_v58 = vunpack.c.l.s8.bf16 %v22284_v28  ;;  %v22286_v9 = vld [vmem:[#allocation43_spill] sm:$0xff]  ;;  %v22288_v4 = vld [vmem:[#allocation48_spill] sm:$0xff] }
 0x3e8   : > { %3531 = vmatpush1.bf16.msra.mxu0 %v22279_v34  ;;  %v17287_v44 = vadd.f32 %v22282_v38, %v7194_v54  ;;  %v2460_v37 = vpop.f32.mrb[19].mxu1  ;;  %v22287_v34 = vunpack.c.l.s8.bf16 %v22286_v9  ;;  %v14275_v56 = vpop.eup %14274  ;;  %v10057_v10 = vadd.f32 1.0, %v14273_v15  ;;  %v22289_v45 = vrot.slane %v16353_v3, %v16268_v57  ;;  %v17309_v15 = vld [vmem:[%s15596_s26 + $0x328] sm:$0xff]  ;;  %22292 = vst [vmem:[#allocation42_spill] sm:$0xff] %v17312_v46  ;;  %v17329_v36 = vld [vmem:[%s15596_s26 + $0x330] sm:$0xff] }
 0x3e9   : > { %22281 = vst [vmem:[#allocation105_spill] sm:$0xff] %v17284_v16  ;;  %3532 = vmatprep.subr.bf16.mxu0 %v22285_v58  ;;  %v17296_v60 = vpop.permute.xlu0 %11228  ;;  %v17299_v54 = vadd.f32 %v22288_v4, %v7195_v39  ;;  %v14277_v29 = vpop.eup %14276  ;;  %v17305_v37 = vmin.f32 %v10837_v12, 1.0  ;;  %22291 = vst [vmem:[#allocation47_spill] sm:$0xff] %v17309_v15  ;;  %v22295_v12 = vld [vmem:[#allocation44_spill] sm:$0xff]  ;;  %v22297_v58 = vld [vmem:[#allocation45_spill] sm:$0xff] }
 0x3ea   : > { %3573 = vmatprep.subr.bf16.mxu1 %v22287_v34  ;;  %v7197_v21 = vmul.f32 %v22289_v45, %v2457_v2  ;;  %v10059_v34 = vadd.f32 1.0, %v14275_v56  ;;  %v17316_v39 = vmul.f32 %v17296_v60, %v17151_v59  ;;  %v14279_v3 = vpop.eup %14278  ;;  %v17318_v2 = vmin.f32 %v10839_v62, 1.0  ;;  %22300 = vst [vmem:[#allocation45_spill] sm:$0xff] %v17329_v36 }
 0x3eb   : > { %22290 = vst [vmem:[#allocation46_spill] sm:$0xff] %v17305_v37  ;;  %14280 = vrcp.f32 %v10057_v10  ;;  %v10058_v4 = vadd.f32 1.0, %v14277_v29  ;;  %v13602_v45 = vmul.f32 -1.442695, %v17287_v44  ;;  %v22296_v38 = vunpack.c.l.s8.bf16 %v22295_v12  ;;  %v17326_v37 = vld [vmem:[%s15596_s26 + $0x320] sm:$0xff] }
 0x3ec   : > { %22293 = vst [vmem:[#allocation43_spill] sm:$0xff] %v17316_v39  ;;  %22294 = vst [vmem:[#allocation48_spill] sm:$0xff] %v17318_v2  ;;  %v22298_v56 = vunpack.c.l.s8.bf16 %v22297_v58  ;;  %14282 = vrcp.f32 %v10059_v34  ;;  %v10060_v39 = vadd.f32 1.0, %v14279_v3  ;;  %v13604_v62 = vmul.f32 -1.442695, %v17290_v48 }
 0x3ed   : > { %3533 = vmatpush1.bf16.msra.mxu0 %v22296_v38  ;;  %22299 = vst [vmem:[#allocation44_spill] sm:$0xff] %v17326_v37  ;;  %v22301_v10 = vunpack.c.h.s8.bf16 %v22284_v28  ;;  %v22302_v29 = vunpack.c.h.s8.bf16 %v22286_v9  ;;  %14284 = vrcp.f32 %v10058_v4  ;;  %v13603_v38 = vmul.f32 -1.442695, %v17299_v54 }
 0x3ee   : > { %3574 = vmatpush1.bf16.msra.mxu1 %v22298_v56  ;;  %v22303_v56 = vld [vmem:[#allocation49_spill] sm:$0xff]  ;;  %14286 = vrcp.f32 %v10060_v39  ;;  %v22304_v9 = vunpack.c.h.s8.bf16 %v22295_v12  ;;  %v7414_v4 = vunpack.c.h.bf16 %v17180_v14  ;;  %v22312_v12 = vunpack.c.l.s8.bf16 %v16516_v61 }
 0x3ef   : > { %3534 = vmatprep.subr.bf16.mxu0 %v22301_v10  ;;  %3575 = vmatprep.subr.bf16.mxu1 %v22302_v29  ;;  %v17339_v2 = vadd.f32 %v22303_v56, %v7197_v21  ;;  %14288 = vpow2.f32 %v13602_v45  ;;  %v22305_v21 = vunpack.c.h.s8.bf16 %v22297_v58  ;;  %v22306_v10 = vunpack.c.l.s8.bf16 %v16502_v30  ;;  %v17380_v29 = vld [vmem:[%s15596_s26 + $0x940] sm:$0xff]  ;;  %v17383_v58 = vld [vmem:[%s15596_s26 + $0x950] sm:$0xff] }
 0x3f0   : > { %14290 = vpow2.f32 %v13604_v62  ;;  %v22307_v45 = vunpack.c.l.s8.bf16 %v16513_v26  ;;  %v7680_v14 = vrot.slane %v7414_v4, %v16121_v40  ;;  %v7688_v62 = vrot.slane %v7414_v4, %v16135_v53  ;;  %22310 = vst [vmem:[#allocation107_spill] sm:$0xff] %v17380_v29  ;;  %22311 = vst [vmem:[#allocation108_spill] sm:$0xff] %v17383_v58  ;;  %v2537_v16 = vpop.f32.mrb[20].mxu1  ;;  %v22327_v29 = vld [vmem:[#allocation54_spill] sm:$0xff] }
 0x3f1   : > { %v13605_v28 = vmul.f32 -1.442695, %v17339_v2  ;;  %3535 = vmatpush1.bf16.msra.mxu0 %v22304_v9  ;;  %14292 = vpow2.f32 %v13603_v38  ;;  %v7684_v56 = vrot.slane %v7414_v4, %v16132_v52  ;;  %v17367_v9 = vld [vmem:[%s15596_s26 + $0x948] sm:$0xff]  ;;  %v22318_v38 = vunpack.c.h.s8.bf16 %v16502_v30 }
 0x3f2   : > { %3576 = vmatpush1.bf16.msra.mxu1 %v22305_v21  ;;  %3610 = vmatprep.subr.bf16.mxu0 %v22306_v10  ;;  %22308 = vst [vmem:[#allocation49_spill] sm:$0xff] %v17367_v9  ;;  %v17370_v21 = vld [vmem:[%s15596_s26 + $0x958] sm:$0xff]  ;;  %v7692_v10 = vrot.slane %v7414_v4, %v16138_v42  ;;  %v17390_v59 = vrot.slane %v7680_v14, %v16121_v40  ;;  %v22319_v34 = vunpack.c.h.s8.bf16 %v16513_v26  ;;  %v22325_v9 = vunpack.c.h.s8.bf16 %v16516_v61 }
 0x3f3   : > { %3651 = vmatprep.subr.bf16.mxu1 %v22307_v45  ;;  %22309 = vst [vmem:[#allocation106_spill] sm:$0xff] %v17370_v21  ;;  %14294 = vpow2.f32 %v13605_v28  ;;  %v22313_v28 = vld [vmem:[#allocation50_spill] sm:$0xff]  ;;  %v17393_v3 = vrot.slane %v7688_v62, %v16121_v40  ;;  %v17396_v4 = vrot.slane %v7684_v56, %v16121_v40  ;;  %v2496_v56 = vpop.f32.mrb[32].mxu0  ;;  %v22321_v62 = vrot.slane %v16528_v1, %v16121_v40 }
 0x3f4   : > { %13526 = vmatmul.mubr.msk.bf16.vlgmr.msra.gmra.mrb[84].mxu0 %vm2130_vm2, %v15852_v11  ;;  %v22314_v39 = vunpack.c.l.s8.bf16 %v22313_v28  ;;  %22315 = vst [vmem:[#allocation50_spill] sm:$0xff] %v17390_v59  ;;  %v22322_v45 = vrot.slane %v16528_v1, %v16132_v52 }
 0x3f5   : > { %13527 = vmatmul.mubr.msk.bf16.vlgmr.msra.gmra.mrb[72].mxu1 %vm2130_vm2, %v15852_v11  ;;  %3611 = vmatpush1.bf16.msra.mxu0 %v22312_v12  ;;  %22316 = vst [vmem:[#allocation109_spill] sm:$0xff] %v17393_v3  ;;  %22317 = vst [vmem:[#allocation110_spill] sm:$0xff] %v17396_v4  ;;  %v17404_v12 = vrot.slane %v7692_v10, %v16121_v40  ;;  %v14281_v7 = vpop.eup %14280  ;;  %v2498_v4 = vpop.f32.mrb[33].mxu0  ;;  %v22323_v10 = vrot.slane %v16528_v1, %v16161_v13 }
 0x3f6   : > { %3652 = vmatpush1.bf16.msra.mxu1 %v22314_v39  ;;  %3612 = vmatprep.subr.bf16.mxu0 %v22318_v38  ;;  %v14283_v38 = vpop.eup %14282  ;;  %v10645_v14 = vmul.f32 %v14281_v7, %v17131_v20  ;;  %v7198_v39 = vmul.f32 %v22321_v62, %v2496_v56  ;;  %v2539_v3 = vpop.f32.mrb[21].mxu1  ;;  %v22324_v20 = vrot.slane %v16528_v1, %v16174_v23 }
 0x3f7   : > { %3653 = vmatprep.subr.bf16.mxu1 %v22319_v34  ;;  %22320 = vst [vmem:[#allocation111_spill] sm:$0xff] %v17404_v12  ;;  %3642 = vmatprep.mubr.bf16.mxu0 %v22080_v55  ;;  %v7200_v12 = vmul.f32 %v22322_v45, %v2537_v16  ;;  %v14285_v26 = vpop.eup %14284  ;;  %v10647_v34 = vmul.f32 %v14283_v38, %v17144_v32  ;;  %v2500_v62 = vpop.f32.mrb[34].mxu0  ;;  %v22326_v16 = vunpack.c.h.s8.bf16 %v22313_v28  ;;  %v22333_v45 = vld [vmem:[#allocation57_spill] sm:$0xff] }
 0x3f8   : > { %3683 = vmatprep.mubr.bf16.mxu1 %v22080_v55  ;;  %v7199_v21 = vmul.f32 %v22323_v10, %v2498_v4  ;;  %v7201_v7 = vmul.f32 %v22324_v20, %v2539_v3  ;;  %v2541_v56 = vpop.f32.mrb[22].mxu1  ;;  %v14287_v30 = vpop.eup %14286  ;;  %v10841_v32 = vmax.f32 %v10645_v14, 0.0  ;;  %v10646_v38 = vmul.f32 %v14285_v26, %v17164_v47  ;;  %v22328_v10 = vld [vmem:[#allocation55_spill] sm:$0xff] }
 0x3f9   : > { %3613 = vmatpush1.bf16.msra.mxu0 %v22325_v9  ;;  %v17437_v4 = vadd.f32 %v22327_v29, %v7198_v39  ;;  %v17440_v59 = vadd.f32 %v22328_v10, %v7200_v12  ;;  %v2501_v3 = vpop.f32.mrb[35].mxu0  ;;  %v2542_v20 = vpop.f32.mrb[23].mxu1  ;;  %v22329_v62 = vld [vmem:[#allocation51_spill] sm:$0xff]  ;;  %v22331_v9 = vld [vmem:[#allocation52_spill] sm:$0xff]  ;;  %v10648_v14 = vmul.f32 %v14287_v30, %v17167_v43  ;;  %v22334_v29 = vld [vmem:[#allocation58_spill] sm:$0xff] }
 0x3fa   : > { %3654 = vmatpush1.bf16.msra.mxu1 %v22326_v16  ;;  %v22330_v61 = vunpack.c.l.s8.bf16 %v22329_v62  ;;  %v22332_v28 = vunpack.c.l.s8.bf16 %v22331_v9  ;;  %v14289_v56 = vpop.eup %14288  ;;  %v10843_v16 = vmax.f32 %v10647_v34, 0.0  ;;  %v17448_v47 = vadd.f32 %v22333_v45, %v7199_v21  ;;  %v22335_v43 = vld [vmem:[#allocation53_spill] sm:$0xff]  ;;  %v22337_v21 = vld [vmem:[#allocation56_spill] sm:$0xff] }
 0x3fb   : > { %v17451_v39 = vadd.f32 %v22334_v29, %v7201_v7  ;;  %v14291_v12 = vpop.eup %14290  ;;  %v11037_v26 = vmin.f32 %v10841_v32, 1.0  ;;  %v10842_v10 = vmax.f32 %v10646_v38, 0.0  ;;  %v10061_v3 = vadd.f32 1.0, %v14289_v56 }
 0x3fc   : > { %3614 = vmatprep.subr.bf16.mxu0 %v22330_v61  ;;  %3655 = vmatprep.subr.bf16.mxu1 %v22332_v28  ;;  %v13606_v20 = vmul.f32 -1.442695, %v17437_v4  ;;  %v14293_v61 = vpop.eup %14292  ;;  %v11039_v58 = vmin.f32 %v10843_v16, 1.0  ;;  %v10844_v36 = vmax.f32 %v10648_v14, 0.0  ;;  %v10063_v28 = vadd.f32 1.0, %v14291_v12  ;;  %v17464_v12 = vpop.permute.xlu0 %11430 }
 0x3fd   : > { %v13608_v34 = vmul.f32 -1.442695, %v17440_v59  ;;  %v22336_v30 = vunpack.c.l.s8.bf16 %v22335_v43  ;;  %v22338_v7 = vunpack.c.l.s8.bf16 %v22337_v21  ;;  %v14295_v45 = vpop.eup %14294  ;;  %v11038_v32 = vmin.f32 %v10842_v10, 1.0 }
 0x3fe   : > { %14296 = vrcp.f32 %v10061_v3  ;;  %v10062_v38 = vadd.f32 1.0, %v14293_v61  ;;  %v11239_v56 = vmul.f32 %v17296_v60, %v11037_v26  ;;  %v22339_v16 = vunpack.c.h.s8.bf16 %v22329_v62  ;;  %v17468_v3 = vld [vmem:[%s15596_s26 + $0x348] sm:$0xff]  ;;  %v17471_v61 = vld [vmem:[%s15596_s26 + $0x358] sm:$0xff] }
 0x3ff   : > { %3615 = vmatpush1.bf16.msra.mxu0 %v22336_v30  ;;  %3656 = vmatpush1.bf16.msra.mxu1 %v22338_v7  ;;  %v22340_v14 = vunpack.c.h.s8.bf16 %v22331_v9  ;;  %v11040_v29 = vmin.f32 %v10844_v36, 1.0  ;;  %14298 = vrcp.f32 %v10063_v28  ;;  %v10064_v30 = vadd.f32 1.0, %v14295_v45  ;;  %22341 = vst [vmem:[#allocation54_spill] sm:$0xff] %v17468_v3  ;;  %22342 = vst [vmem:[#allocation55_spill] sm:$0xff] %v17471_v61  ;;  %v17477_v36 = vld [vmem:[%s15596_s26 + $0x340] sm:$0xff]  ;;  %v17480_v7 = vld [vmem:[%s15596_s26 + $0x350] sm:$0xff] }
 0x400   : > { %3616 = vmatprep.subr.bf16.mxu0 %v22339_v16  ;;  %v11241_v10 = vmul.f32 %v17296_v60, %v11039_v58  ;;  %14300 = vrcp.f32 %v10062_v38  ;;  %v11240_v62 = vmul.f32 %v17296_v60, %v11038_v32  ;;  %v11441_v26 = vadd.f32 %v17464_v12, %v11239_v56  ;;  %22343 = vst [vmem:[#allocation51_spill] sm:$0xff] %v17477_v36  ;;  %v17490_v38 = vld [vmem:[%s15606_s3 + $0x30] sm:$0xff]  ;;  %v17493_v56 = vld [vmem:[%s15610_s17 + $0x30] sm:$0xff] }
 0x401   : > { %3657 = vmatprep.subr.bf16.mxu1 %v22340_v14  ;;  %v13607_v9 = vmul.f32 -1.442695, %v17448_v47  ;;  %22344 = vst [vmem:[#allocation52_spill] sm:$0xff] %v17480_v7  ;;  %14302 = vrcp.f32 %v10064_v30  ;;  %v11242_v28 = vmul.f32 %v17296_v60, %v11040_v29  ;;  %v13609_v45 = vmul.f32 -1.442695, %v17451_v39  ;;  %v22401_v7 = vld [vmem:[#allocation75_spill] sm:$0xff] }
 0x402   : > { %v11443_v58 = vadd.f32 %v17464_v12, %v11241_v10  ;;  %v22345_v16 = vunpack.c.h.s8.bf16 %v22335_v43  ;;  %v22346_v32 = vunpack.c.h.s8.bf16 %v22337_v21  ;;  %v11442_v14 = vadd.f32 %v17464_v12, %v11240_v62 }
 0x403   : > { %14304 = vpow2.f32 %v13606_v20  ;;  %v22347_v30 = vunpack.c.l.s8.bf16 %v16595_v25  ;;  %v22348_v29 = vunpack.c.l.s8.bf16 %v16598_v17  ;;  %v11444_v21 = vadd.f32 %v17464_v12, %v11242_v28 }
 0x404   : > { %3617 = vmatpush1.bf16.msra.mxu0 %v22345_v16  ;;  %3658 = vmatpush1.bf16.msra.mxu1 %v22346_v32  ;;  %14306 = vpow2.f32 %v13608_v34  ;;  %v13790_v37 = vpack.c.bf16 %v11442_v14, %v11441_v26  ;;  %v17512_v62 = vunpack.c.l.bf16 %v17493_v56  ;;  %v22349_v34 = vunpack.c.l.s8.bf16 %v16601_v33  ;;  %v2619_v14 = vpop.f32.mrb[24].mxu1 }
 0x405   : > { %3692 = vmatprep.subr.bf16.mxu0 %v22347_v30  ;;  %3733 = vmatprep.subr.bf16.mxu1 %v22348_v29  ;;  %14308 = vpow2.f32 %v13607_v9  ;;  %v13791_v28 = vpack.c.bf16 %v11444_v21, %v11443_v58  ;;  %v22350_v26 = vunpack.c.l.s8.bf16 %v16611_v18  ;;  %v22351_v30 = vld [vmem:[#allocation41_spill] sm:$0xff]  ;;  %v22352_v20 = vunpack.c.h.s8.bf16 %v16595_v25  ;;  %v2578_v9 = vpop.f32.mrb[36].mxu0  ;;  %v2621_v43 = vpop.f32.mrb[25].mxu1 }
 0x406   : > { %14310 = vpow2.f32 %v13609_v45  ;;  %v12080_v29 = vrot.slane %v13790_v37, %v22351_v30  ;;  %v22353_v58 = vunpack.c.h.s8.bf16 %v16598_v17  ;;  %v7696_v45 = vrot.slane %v17512_v62, %v16121_v40  ;;  %v2580_v16 = vpop.f32.mrb[37].mxu0  ;;  %v2623_v46 = vpop.f32.mrb[26].mxu1 }
 0x407   : > { %13528 = vmatmul.mubr.msk.bf16.vlgmr.msra.gmra.mrb[88].mxu0 %vm2130_vm2, %v15852_v11  ;;  %13529 = vmatmul.mubr.msk.bf16.vlgmr.msra.gmra.mrb[76].mxu1 %vm2130_vm2, %v15852_v11  ;;  %v7704_v21 = vrot.slane %v17512_v62, %v16135_v53  ;;  %v22358_v3 = vrot.slane %v16528_v1, %v16261_v5 }
 0x408   : > { %3693 = vmatpush1.bf16.msra.mxu0 %v22349_v34  ;;  %3734 = vmatpush1.bf16.msra.mxu1 %v22350_v26  ;;  %v12087_v26 = vrot.slane %v13791_v28, %v22351_v30  ;;  %v22355_v28 = vrot.slane %v16528_v1, %v16138_v42  ;;  %v17547_v10 = vrot.slane %v7696_v45, %v16121_v40  ;;  %v22360_v45 = vunpack.c.h.s8.bf16 %v16601_v33 }
 0x409   : > { %3694 = vmatprep.subr.bf16.mxu0 %v22352_v20  ;;  %3735 = vmatprep.subr.bf16.mxu1 %v22353_v58  ;;  %v14297_v20 = vpop.eup %14296  ;;  %v22354_v58 = vrot.slane %v16528_v1, %v16135_v53  ;;  %v17550_v25 = vrot.slane %v7704_v21, %v16121_v40 }
 0x40a   : > { %3724 = vmatprep.mubr.bf16.mxu0 %v22080_v55  ;;  %3765 = vmatprep.mubr.bf16.mxu1 %v22080_v55  ;;  %v7204_v32 = vmul.f32 %v22355_v28, %v2619_v14  ;;  %22356 = vst [vmem:[#allocation57_spill] sm:$0xff] %v17547_v10  ;;  %v14299_v17 = vpop.eup %14298  ;;  %v10649_v37 = vmul.f32 %v14297_v20, %v17287_v44  ;;  %v2582_v28 = vpop.f32.mrb[38].mxu0  ;;  %v22362_v44 = vld [vmem:[#allocation64_spill] sm:$0xff] }
 0x40b   : > { %v7202_v34 = vmul.f32 %v22354_v58, %v2578_v9  ;;  %22357 = vst [vmem:[#allocation58_spill] sm:$0xff] %v17550_v25  ;;  %v12102_v61 = vcombine.low %v12080_v29, %v12087_v26  ;;  %v7203_v9 = vmul.f32 %v22358_v3, %v2580_v16  ;;  %v22359_v58 = vrot.slane %v16528_v1, %v16268_v57  ;;  %v14301_v10 = vpop.eup %14300  ;;  %v22361_v25 = vld [vmem:[#allocation61_spill] sm:$0xff]  ;;  %v2583_v16 = vpop.f32.mrb[39].mxu0 }
 0x40c   : > { %3695 = vmatpush1.bf16.msra.mxu0 %v22360_v45  ;;  %v10651_v21 = vmul.f32 %v14299_v17, %v17290_v48  ;;  %v17566_v29 = vadd.f32 %v22362_v44, %v7204_v32  ;;  %v22363_v3 = vunpack.c.h.s8.bf16 %v16611_v18  ;;  %v2624_v1 = vpop.f32.mrb[27].mxu1  ;;  %v14303_v46 = vpop.eup %14302  ;;  %v10845_v20 = vmax.f32 %v10649_v37, 0.0  ;;  %v22367_v17 = vld [vmem:[#allocation60_spill] sm:$0xff] }
 0x40d   : > { %v7205_v14 = vmul.f32 %v22359_v58, %v2621_v43  ;;  %v17563_v15 = vadd.f32 %v22361_v25, %v7202_v34  ;;  %v22364_v43 = vld [vmem:[#allocation59_spill] sm:$0xff]  ;;  %v10650_v48 = vmul.f32 %v14301_v10, %v17299_v54  ;;  %v17575_v34 = vrot.slane %v12102_v61, %v22351_v30  ;;  %v22366_v25 = vld [vmem:[#allocation65_spill] sm:$0xff]  ;;  %v14305_v58 = vpop.eup %14304  ;;  %v22369_v1 = vld [vmem:[#allocation62_spill] sm:$0xff] }
 0x40e   : > { %3736 = vmatpush1.bf16.msra.mxu1 %v22363_v3  ;;  %v22365_v26 = vunpack.c.l.s8.bf16 %v22364_v43  ;;  %v17578_v32 = vadd.f32 %v22366_v25, %v7203_v9  ;;  %v22368_v18 = vunpack.c.l.s8.bf16 %v22367_v17  ;;  %v10847_v28 = vmax.f32 %v10651_v21, 0.0  ;;  %v14307_v37 = vpop.eup %14306  ;;  %v22371_v21 = vld [vmem:[#allocation63_spill] sm:$0xff] }
 0x40f   : > { %v10652_v45 = vmul.f32 %v14303_v46, %v17339_v2  ;;  %v13610_v44 = vmul.f32 -1.442695, %v17563_v15  ;;  %v13612_v3 = vmul.f32 -1.442695, %v17566_v29  ;;  %v11041_v16 = vmin.f32 %v10845_v20, 1.0 }
 0x410   : > { %3696 = vmatprep.subr.bf16.mxu0 %v22365_v26  ;;  %3737 = vmatprep.subr.bf16.mxu1 %v22368_v18  ;;  %v10846_v54 = vmax.f32 %v10650_v48, 0.0  ;;  %v10065_v10 = vadd.f32 1.0, %v14305_v58  ;;  %v13611_v61 = vmul.f32 -1.442695, %v17578_v32  ;;  %v22370_v9 = vunpack.c.l.s8.bf16 %v22369_v1  ;;  %v14309_v26 = vpop.eup %14308 }
 0x411   : > { %v11043_v25 = vmin.f32 %v10847_v28, 1.0  ;;  %v10848_v18 = vmax.f32 %v10652_v45, 0.0  ;;  %v10067_v33 = vadd.f32 1.0, %v14307_v37  ;;  %14312 = vpow2.f32 %v13610_v44  ;;  %v14311_v20 = vpop.eup %14310 }
 0x412   : > { %3697 = vmatpush1.bf16.msra.mxu0 %v22370_v9  ;;  %v22372_v2 = vunpack.c.l.s8.bf16 %v22371_v21  ;;  %v22373_v46 = vunpack.c.h.s8.bf16 %v22364_v43  ;;  %v11243_v48 = vmul.f32 %v17296_v60, %v11041_v16  ;;  %v11042_v58 = vmin.f32 %v10846_v54, 1.0 }
 0x413   : > { %14314 = vrcp.f32 %v10065_v10  ;;  %v10066_v36 = vadd.f32 1.0, %v14309_v26  ;;  %v22374_v9 = vunpack.c.h.s8.bf16 %v22367_v17  ;;  %v11245_v28 = vmul.f32 %v17296_v60, %v11043_v25  ;;  %v17604_v17 = vld [vmem:[%s15596_s26 + $0x968] sm:$0xff] }
 0x414   : > { %3738 = vmatpush1.bf16.msra.mxu1 %v22372_v2  ;;  %3698 = vmatprep.subr.bf16.mxu0 %v22373_v46  ;;  %v11044_v45 = vmin.f32 %v10848_v18, 1.0  ;;  %14316 = vrcp.f32 %v10067_v33  ;;  %v10068_v44 = vadd.f32 1.0, %v14311_v20  ;;  %v11445_v37 = vadd.f32 %v17464_v12, %v11243_v48  ;;  %v22375_v2 = vld [vmem:[#allocation66_spill] sm:$0xff]  ;;  %22377 = vst [vmem:[#allocation53_spill] sm:$0xff] %v17604_v17  ;;  %v22379_v25 = vld [vmem:[#allocation67_spill] sm:$0xff]  ;;  %v17619_v18 = vld [vmem:[%s15596_s26 + $0x978] sm:$0xff] }
 0x415   : > { %3739 = vmatprep.subr.bf16.mxu1 %v22374_v9  ;;  %v11244_v43 = vmul.f32 %v17296_v60, %v11042_v58  ;;  %14318 = vrcp.f32 %v10066_v36  ;;  %v17599_v16 = vadd.f32 %v22375_v2, %v7205_v14  ;;  %v22376_v54 = vunpack.c.h.s8.bf16 %v22369_v1  ;;  %22383 = vst [vmem:[#allocation41_spill] sm:$0xff] %v17619_v18  ;;  %v22384_v48 = vld [vmem:[#allocation68_spill] sm:$0xff]  ;;  %v17628_v9 = vld [vmem:[%s15596_s26 + $0x960] sm:$0xff] }
 0x416   : > { %v11447_v10 = vadd.f32 %v17464_v12, %v11245_v28  ;;  %v11246_v33 = vmul.f32 %v17296_v60, %v11044_v45  ;;  %14320 = vrcp.f32 %v10068_v44  ;;  %v22378_v26 = vunpack.c.h.s8.bf16 %v22371_v21  ;;  %22386 = vst [vmem:[#allocation61_spill] sm:$0xff] %v17628_v9  ;;  %v17631_v28 = vld [vmem:[%s15596_s26 + $0x970] sm:$0xff]  ;;  %v2701_v44 = vpop.f32.mrb[28].mxu1 }
 0x417   : > { %3699 = vmatpush1.bf16.msra.mxu0 %v22376_v54  ;;  %v22380_v36 = vunpack.c.l.s8.bf16 %v22379_v25  ;;  %v22381_v14 = vrot.slane %v17512_v62, %v16132_v52  ;;  %v11446_v46 = vadd.f32 %v17464_v12, %v11244_v43  ;;  %14322 = vpow2.f32 %v13612_v3  ;;  %22387 = vst [vmem:[#allocation64_spill] sm:$0xff] %v17631_v28  ;;  %v2703_v3 = vpop.f32.mrb[29].mxu1 }
 0x418   : > { %3740 = vmatpush1.bf16.msra.mxu1 %v22378_v26  ;;  %v13613_v20 = vmul.f32 -1.442695, %v17599_v16  ;;  %v22385_v58 = vunpack.c.l.s8.bf16 %v22384_v48  ;;  %v7708_v21 = vrot.slane %v17512_v62, %v16138_v42  ;;  %v11448_v45 = vadd.f32 %v17464_v12, %v11246_v33  ;;  %v22388_v62 = vld [vmem:[#allocation69_spill] sm:$0xff]  ;;  %v17647_v33 = vld [vmem:[%s15596_s26 + $0x368] sm:$0xff]  ;;  %v2705_v18 = vpop.f32.mrb[30].mxu1 }
 0x419   : > { %3774 = vmatprep.subr.bf16.mxu0 %v22380_v36  ;;  %v17616_v1 = vrot.slane %v22381_v14, %v16121_v40  ;;  %14324 = vpow2.f32 %v13611_v61  ;;  %v13792_v43 = vpack.c.bf16 %v11446_v46, %v11445_v37  ;;  %v22389_v2 = vunpack.c.l.s8.bf16 %v22388_v62  ;;  %v22391_v36 = vld [vmem:[#allocation70_spill] sm:$0xff]  ;;  %v2660_v61 = vpop.f32.mrb[40].mxu0  ;;  %v2706_v18 = vpop.f32.mrb[31].mxu1 }
 0x41a   : > { %3815 = vmatprep.subr.bf16.mxu1 %v22385_v58  ;;  %13530 = vmatmul.mubr.msk.bf16.vlgmr.msra.gmra.mrb[92].mxu0 %vm2130_vm2, %v15852_v11  ;;  %14326 = vpow2.f32 %v13613_v20  ;;  %v17643_v54 = vrot.slane %v7708_v21, %v16121_v40  ;;  %v13793_v26 = vpack.c.bf16 %v11448_v45, %v11447_v10  ;;  %v22392_v14 = vunpack.c.l.s8.bf16 %v22391_v36  ;;  %v22409_v18 = vld [vmem:[#allocation74_spill] sm:$0xff] }
 0x41b   : > { %22382 = vst [vmem:[#allocation56_spill] sm:$0xff] %v17616_v1  ;;  %13531 = vmatmul.mubr.msk.bf16.vlgmr.msra.gmra.mrb[80].mxu1 %vm2130_vm2, %v15852_v11  ;;  %3775 = vmatpush1.bf16.msra.mxu0 %v22389_v2  ;;  %v22393_v37 = vunpack.c.h.s8.bf16 %v22379_v25  ;;  %v17657_v2 = vld [vmem:[%s15596_s26 + $0x378] sm:$0xff]  ;;  %v12094_v21 = vrot.slane %v13792_v43, %v22351_v30  ;;  %v22394_v10 = vunpack.c.h.s8.bf16 %v22384_v48  ;;  %v22395_v20 = vrot.slane %v16695_v22, %v16121_v40 }
 0x41c   : > { %22390 = vst [vmem:[#allocation59_spill] sm:$0xff] %v17643_v54  ;;  %3816 = vmatpush1.bf16.msra.mxu1 %v22392_v14  ;;  %3806 = vmatprep.mubr.bf16.mxu0 %v22080_v55  ;;  %v12101_v58 = vrot.slane %v13793_v26, %v22351_v30  ;;  %v22396_v46 = vrot.slane %v16695_v22, %v16132_v52 }
 0x41d   : > { %3776 = vmatprep.subr.bf16.mxu0 %v22393_v37  ;;  %3817 = vmatprep.subr.bf16.mxu1 %v22394_v10  ;;  %v14313_v37 = vpop.eup %14312  ;;  %v7206_v43 = vmul.f32 %v22395_v20, %v2660_v61  ;;  %v2662_v10 = vpop.f32.mrb[41].mxu0  ;;  %v22397_v14 = vrot.slane %v16695_v22, %v16161_v13  ;;  %v22398_v28 = vrot.slane %v16695_v22, %v16174_v23 }
 0x41e   : > { %v7208_v48 = vmul.f32 %v22396_v46, %v2701_v44  ;;  %3847 = vmatprep.mubr.bf16.mxu1 %v22080_v55  ;;  %v14315_v45 = vpop.eup %14314  ;;  %v10069_v9 = vadd.f32 1.0, %v14313_v37  ;;  %v2664_v20 = vpop.f32.mrb[42].mxu0  ;;  %v22399_v44 = vunpack.c.h.s8.bf16 %v22388_v62  ;;  %v12103_v1 = vcombine.low %v12094_v21, %v12101_v58  ;;  %v22400_v37 = vld [vmem:[#allocation73_spill] sm:$0xff]  ;;  %v22405_v21 = vld [vmem:[#allocation71_spill] sm:$0xff] }
 0x41f   : > { %v7207_v26 = vmul.f32 %v22397_v14, %v2662_v10  ;;  %v7209_v61 = vmul.f32 %v22398_v28, %v2703_v3  ;;  %v14317_v54 = vpop.eup %14316  ;;  %v10653_v25 = vmul.f32 %v14315_v45, %v17437_v4  ;;  %v17686_v17 = vadd.f32 %v22400_v37, %v7206_v43  ;;  %v2665_v28 = vpop.f32.mrb[43].mxu0  ;;  %v22403_v20 = vld [vmem:[#allocation76_spill] sm:$0xff]  ;;  %v22404_v58 = vld [vmem:[#allocation77_spill] sm:$0xff] }
 0x420   : > { %3777 = vmatpush1.bf16.msra.mxu0 %v22399_v44  ;;  %v17689_v14 = vadd.f32 %v22401_v7, %v7208_v48  ;;  %v22402_v10 = vunpack.c.h.s8.bf16 %v22391_v36  ;;  %v14319_v3 = vpop.eup %14318  ;;  %v10655_v62 = vmul.f32 %v14317_v54, %v17440_v59  ;;  %14328 = vrcp.f32 %v10069_v9  ;;  %v22407_v7 = vld [vmem:[#allocation72_spill] sm:$0xff] }
 0x421   : > { %v17695_v44 = vadd.f32 %v22403_v20, %v7207_v26  ;;  %v17698_v4 = vadd.f32 %v22404_v58, %v7209_v61  ;;  %v22406_v45 = vunpack.c.l.s8.bf16 %v22405_v21  ;;  %v22408_v43 = vunpack.c.l.s8.bf16 %v22407_v7  ;;  %v14321_v36 = vpop.eup %14320 }
 0x422   : > { %3818 = vmatpush1.bf16.msra.mxu1 %v22402_v10  ;;  %v12117_v48 = vrot.slane %v12103_v1, %v22351_v30  ;;  %v10849_v37 = vmax.f32 %v10653_v25, 0.0  ;;  %v10654_v10 = vmul.f32 %v14319_v3, %v17448_v47  ;;  %v13614_v59 = vmul.f32 -1.442695, %v17686_v17  ;;  %v14323_v9 = vpop.eup %14322 }
 0x423   : > { %3778 = vmatprep.subr.bf16.mxu0 %v22406_v45  ;;  %3819 = vmatprep.subr.bf16.mxu1 %v22408_v43  ;;  %v10851_v54 = vmax.f32 %v10655_v62, 0.0  ;;  %v10656_v26 = vmul.f32 %v14321_v36, %v17451_v39  ;;  %v13616_v61 = vmul.f32 -1.442695, %v17689_v14  ;;  %v13615_v28 = vmul.f32 -1.442695, %v17695_v44  ;;  %v14325_v58 = vpop.eup %14324 }
 0x424   : > { %v22410_v20 = vunpack.c.l.s8.bf16 %v22409_v18  ;;  %v12118_v1 = vcombine.low %v17575_v34, %v12117_v48  ;;  %v11045_v25 = vmin.f32 %v10849_v37, 1.0  ;;  %v10850_v47 = vmax.f32 %v10654_v10, 0.0  ;;  %v14327_v62 = vpop.eup %14326  ;;  %v17728_v37 = vld [vmem:[%s15596_s26 + $0x370] sm:$0xff] }
 0x425   : > { %v10071_v3 = vadd.f32 1.0, %v14323_v9  ;;  %v22411_v45 = vunpack.c.l.s8.bf16 %v16746_v19  ;;  %v22412_v39 = vunpack.c.h.s8.bf16 %v22405_v21  ;;  %v11047_v43 = vmin.f32 %v10851_v54, 1.0 }
 0x426   : > { %3779 = vmatpush1.bf16.msra.mxu0 %v22410_v20  ;;  %v10852_v36 = vmax.f32 %v10656_v26, 0.0  ;;  %v10070_v46 = vadd.f32 1.0, %v14325_v58  ;;  %14330 = vpow2.f32 %v13614_v59  ;;  %v22413_v20 = vunpack.c.h.s8.bf16 %v22407_v7  ;;  %13247 = vst [vmem:[%s17723_s8 + $0x8] sm:$0xff] %v12118_v1 }
 0x427   : > { %3820 = vmatpush1.bf16.msra.mxu1 %v22411_v45  ;;  %3780 = vmatprep.subr.bf16.mxu0 %v22412_v39  ;;  %v11247_v34 = vmul.f32 %v17296_v60, %v11045_v25  ;;  %v11046_v48 = vmin.f32 %v10850_v47, 1.0  ;;  %14332 = vrcp.f32 %v10071_v3  ;;  %v10072_v21 = vadd.f32 1.0, %v14327_v62  ;;  %v22459_v3 = vld [vmem:[#allocation89_spill] sm:$0xff] }
 0x428   : > { %3821 = vmatprep.subr.bf16.mxu1 %v22413_v20  ;;  %v11249_v10 = vmul.f32 %v17296_v60, %v11047_v43  ;;  %v11048_v9 = vmin.f32 %v10852_v36, 1.0  ;;  %14334 = vrcp.f32 %v10070_v46  ;;  %v13617_v7 = vmul.f32 -1.442695, %v17698_v4 }
 0x429   : > { %v22414_v59 = vunpack.c.h.s8.bf16 %v22409_v18  ;;  %v11449_v54 = vadd.f32 %v17464_v12, %v11247_v34  ;;  %v11248_v26 = vmul.f32 %v17296_v60, %v11046_v48  ;;  %14336 = vrcp.f32 %v10072_v21 }
 0x42a   : > { %v22415_v58 = vunpack.c.h.s8.bf16 %v16746_v19  ;;  %v22416_v1 = vunpack.c.l.s8.bf16 %v16771_v49  ;;  %v11451_v46 = vadd.f32 %v17464_v12, %v11249_v10  ;;  %v11250_v47 = vmul.f32 %v17296_v60, %v11048_v9  ;;  %v14329_v62 = vpop.eup %14328 }
 0x42b   : > { %3781 = vmatpush1.bf16.msra.mxu0 %v22414_v59  ;;  %14338 = vpow2.f32 %v13616_v61  ;;  %v22417_v18 = vunpack.c.l.s8.bf16 %v16779_v27  ;;  %v11450_v45 = vadd.f32 %v17464_v12, %v11248_v26  ;;  %v17752_v39 = vunpack.c.h.bf16 %v17493_v56  ;;  %v2783_v59 = vpop.f32.mrb[32].mxu1 }
 0x42c   : > { %3822 = vmatpush1.bf16.msra.mxu1 %v22415_v58  ;;  %3856 = vmatprep.subr.bf16.mxu0 %v22416_v1  ;;  %14340 = vpow2.f32 %v13615_v28  ;;  %v11452_v61 = vadd.f32 %v17464_v12, %v11250_v47  ;;  %v22418_v43 = vunpack.c.l.s8.bf16 %v16782_v24  ;;  %v10657_v56 = vmul.f32 %v14329_v62, %v17563_v15  ;;  %v2785_v62 = vpop.f32.mrb[33].mxu1 }
 0x42d   : > { %3897 = vmatprep.subr.bf16.mxu1 %v22417_v18  ;;  %14342 = vpow2.f32 %v13617_v7  ;;  %v13794_v20 = vpack.c.bf16 %v11450_v45, %v11449_v54  ;;  %v22419_v34 = vunpack.c.l.s8.bf16 %v16794_v50  ;;  %v22420_v48 = vunpack.c.h.s8.bf16 %v16771_v49  ;;  %v2742_v7 = vpop.f32.mrb[44].mxu0  ;;  %v22428_v54 = vld [vmem:[#allocation81_spill] sm:$0xff] }
 0x42e   : > { %13532 = vmatmul.mubr.msk.bf16.vlgmr.msra.gmra.mrb[96].mxu0 %vm2130_vm2, %v15852_v11  ;;  %v7712_v21 = vrot.slane %v17752_v39, %v16121_v40  ;;  %v13795_v9 = vpack.c.bf16 %v11452_v61, %v11451_v46  ;;  %v22421_v26 = vunpack.c.h.s8.bf16 %v16779_v27  ;;  %v7720_v15 = vrot.slane %v17752_v39, %v16135_v53  ;;  %v2744_v45 = vpop.f32.mrb[45].mxu0 }
 0x42f   : > { %13533 = vmatmul.mubr.msk.bf16.vlgmr.msra.gmra.mrb[84].mxu1 %vm2130_vm2, %v15852_v11  ;;  %3857 = vmatpush1.bf16.msra.mxu0 %v22418_v43  ;;  %v7716_v49 = vrot.slane %v17752_v39, %v16132_v52  ;;  %v12129_v58 = vrot.slane %v13794_v20, %v22351_v30  ;;  %v10853_v1 = vmax.f32 %v10657_v56, 0.0  ;;  %v22422_v46 = vrot.slane %v16695_v22, %v16135_v53 }
 0x430   : > { %3898 = vmatpush1.bf16.msra.mxu1 %v22419_v34  ;;  %3858 = vmatprep.subr.bf16.mxu0 %v22420_v48  ;;  %v22423_v27 = vrot.slane %v16695_v22, %v16138_v42  ;;  %v14331_v61 = vpop.eup %14330  ;;  %v12136_v43 = vrot.slane %v13795_v9, %v22351_v30  ;;  %v22424_v34 = vrot.slane %v16695_v22, %v16261_v5  ;;  %v22427_v9 = vld [vmem:[#allocation78_spill] sm:$0xff] }
 0x431   : > { %3899 = vmatprep.subr.bf16.mxu1 %v22421_v26  ;;  %3888 = vmatprep.mubr.bf16.mxu0 %v22080_v55  ;;  %v7210_v47 = vmul.f32 %v22422_v46, %v2742_v7  ;;  %v22425_v56 = vrot.slane %v16695_v22, %v16268_v57  ;;  %v2746_v7 = vpop.f32.mrb[46].mxu0  ;;  %v2787_v26 = vpop.f32.mrb[34].mxu1  ;;  %v22426_v46 = vunpack.c.h.s8.bf16 %v16782_v24  ;;  %v11049_v36 = vmin.f32 %v10853_v1, 1.0  ;;  %v22432_v1 = vld [vmem:[#allocation82_spill] sm:$0xff] }
 0x432   : > { %v7212_v18 = vmul.f32 %v22423_v27, %v2783_v59  ;;  %3929 = vmatprep.mubr.bf16.mxu1 %v22080_v55  ;;  %v7211_v20 = vmul.f32 %v22424_v34, %v2744_v45  ;;  %v17797_v59 = vrot.slane %v7712_v21, %v16121_v40  ;;  %v14333_v27 = vpop.eup %14332  ;;  %v10073_v28 = vadd.f32 1.0, %v14331_v61  ;;  %v2788_v34 = vpop.f32.mrb[35].mxu1 }
 0x433   : > { %v7213_v48 = vmul.f32 %v22425_v56, %v2785_v62  ;;  %3859 = vmatpush1.bf16.msra.mxu0 %v22426_v46  ;;  %v17800_v19 = vadd.f32 %v22427_v9, %v7210_v47  ;;  %v22429_v22 = vunpack.c.h.s8.bf16 %v16794_v50  ;;  %v2747_v62 = vpop.f32.mrb[47].mxu0  ;;  %v22430_v56 = vld [vmem:[#allocation79_spill] sm:$0xff]  ;;  %v14335_v7 = vpop.eup %14334  ;;  %v12151_v21 = vcombine.low %v12129_v58, %v12136_v43  ;;  %v22433_v47 = vld [vmem:[#allocation84_spill] sm:$0xff] }
 0x434   : > { %v17803_v45 = vadd.f32 %v22428_v54, %v7212_v18  ;;  %v22431_v24 = vunpack.c.l.s8.bf16 %v22430_v56  ;;  %v10659_v26 = vmul.f32 %v14333_v27, %v17566_v29  ;;  %v17811_v61 = vadd.f32 %v22432_v1, %v7211_v20  ;;  %v14337_v50 = vpop.eup %14336  ;;  %v22435_v27 = vld [vmem:[#allocation80_spill] sm:$0xff] }
 0x435   : > { %3900 = vmatpush1.bf16.msra.mxu1 %v22429_v22  ;;  %v17814_v46 = vadd.f32 %v22433_v47, %v7213_v48  ;;  %v22434_v54 = vunpack.c.l.s8.bf16 %v16865_v8  ;;  %v11251_v18 = vmul.f32 %v17296_v60, %v11049_v36  ;;  %v10658_v9 = vmul.f32 %v14335_v7, %v17578_v32  ;;  %v14339_v58 = vpop.eup %14338 }
 0x436   : > { %3860 = vmatprep.subr.bf16.mxu0 %v22431_v24  ;;  %14344 = vrcp.f32 %v10073_v28  ;;  %v13618_v22 = vmul.f32 -1.442695, %v17800_v19  ;;  %v17822_v29 = vrot.slane %v12151_v21, %v22351_v30  ;;  %v10855_v43 = vmax.f32 %v10659_v26, 0.0  ;;  %v14341_v34 = vpop.eup %14340  ;;  %v22437_v24 = vld [vmem:[#allocation83_spill] sm:$0xff] }
 0x437   : > { %3901 = vmatprep.subr.bf16.mxu1 %v22434_v54  ;;  %v10660_v20 = vmul.f32 %v14337_v50, %v17599_v16  ;;  %v13620_v48 = vmul.f32 -1.442695, %v17803_v45  ;;  %v22436_v62 = vunpack.c.l.s8.bf16 %v22435_v27  ;;  %v17829_v36 = vadd.f32 %v17464_v12, %v11251_v18  ;;  %v14343_v26 = vpop.eup %14342 }
 0x438   : > { %v10854_v32 = vmax.f32 %v10658_v9, 0.0  ;;  %v10075_v28 = vadd.f32 1.0, %v14339_v58  ;;  %14346 = vpow2.f32 %v13618_v22  ;;  %v22438_v7 = vunpack.c.l.s8.bf16 %v22437_v24 }
 0x439   : > { %3861 = vmatpush1.bf16.msra.mxu0 %v22436_v62  ;;  %v22439_v21 = vunpack.c.h.s8.bf16 %v22430_v56  ;;  %v11051_v16 = vmin.f32 %v10855_v43, 1.0  ;;  %v10856_v1 = vmax.f32 %v10660_v20, 0.0  ;;  %v10074_v47 = vadd.f32 1.0, %v14341_v34 }
 0x43a   : > { %3902 = vmatpush1.bf16.msra.mxu1 %v22438_v7  ;;  %14348 = vpow2.f32 %v13620_v48  ;;  %v22440_v54 = vunpack.c.h.s8.bf16 %v16865_v8  ;;  %v11050_v50 = vmin.f32 %v10854_v32, 1.0  ;;  %v10076_v18 = vadd.f32 1.0, %v14343_v26  ;;  %v22443_v48 = vld [vmem:[#allocation85_spill] sm:$0xff]  ;;  %v17860_v32 = vld [vmem:[%s15596_s26 + $0x988] sm:$0xff] }
 0x43b   : > { %3862 = vmatprep.subr.bf16.mxu0 %v22439_v21  ;;  %14350 = vrcp.f32 %v10075_v28  ;;  %v13619_v9 = vmul.f32 -1.442695, %v17811_v61  ;;  %v11253_v22 = vmul.f32 %v17296_v60, %v11051_v16  ;;  %v11052_v58 = vmin.f32 %v10856_v1, 1.0  ;;  %v17863_v28 = vld [vmem:[%s15596_s26 + $0x998] sm:$0xff]  ;;  %v22445_v21 = vld [vmem:[#allocation86_spill] sm:$0xff]  ;;  %v17875_v1 = vld [vmem:[%s15596_s26 + $0x990] sm:$0xff] }
 0x43c   : > { %3903 = vmatprep.subr.bf16.mxu1 %v22440_v54  ;;  %14352 = vrcp.f32 %v10074_v47  ;;  %v13621_v56 = vmul.f32 -1.442695, %v17814_v46  ;;  %v22441_v43 = vunpack.c.h.s8.bf16 %v22435_v27  ;;  %v11252_v8 = vmul.f32 %v17296_v60, %v11050_v50  ;;  %v17872_v16 = vld [vmem:[%s15596_s26 + $0x980] sm:$0xff]  ;;  %22448 = vst [vmem:[#allocation60_spill] sm:$0xff] %v17875_v1  ;;  %v2865_v54 = vpop.f32.mrb[36].mxu1 }
 0x43d   : > { %14354 = vrcp.f32 %v10076_v18  ;;  %v22442_v20 = vunpack.c.h.s8.bf16 %v22437_v24  ;;  %v22444_v62 = vunpack.c.l.s8.bf16 %v22443_v48  ;;  %v17851_v34 = vrot.slane %v7720_v15, %v16121_v40  ;;  %22447 = vst [vmem:[#allocation65_spill] sm:$0xff] %v17872_v16  ;;  %v22449_v18 = vld [vmem:[#allocation87_spill] sm:$0xff] }
 0x43e   : > { %3863 = vmatpush1.bf16.msra.mxu0 %v22441_v43  ;;  %v17857_v27 = vrot.slane %v7716_v49, %v16121_v40  ;;  %v11455_v24 = vadd.f32 %v17464_v12, %v11253_v22  ;;  %v11254_v7 = vmul.f32 %v17296_v60, %v11052_v58  ;;  %14356 = vpow2.f32 %v13619_v9 }
 0x43f   : > { %3904 = vmatpush1.bf16.msra.mxu1 %v22442_v20  ;;  %3938 = vmatprep.subr.bf16.mxu0 %v22444_v62  ;;  %v22446_v26 = vunpack.c.l.s8.bf16 %v22445_v21  ;;  %v11454_v49 = vadd.f32 %v17464_v12, %v11252_v8  ;;  %14358 = vpow2.f32 %v13621_v56  ;;  %v7724_v47 = vrot.slane %v17752_v39, %v16138_v42  ;;  %v22451_v39 = vld [vmem:[#allocation88_spill] sm:$0xff]  ;;  %v2824_v56 = vpop.f32.mrb[48].mxu0 }
 0x440   : > { %v11456_v50 = vadd.f32 %v17464_v12, %v11254_v7  ;;  %v22450_v9 = vunpack.c.l.s8.bf16 %v22449_v18  ;;  %v14345_v43 = vpop.eup %14344  ;;  %v22452_v20 = vunpack.c.l.s8.bf16 %v22451_v39  ;;  %v22453_v62 = vunpack.c.h.s8.bf16 %v22443_v48 }
 0x441   : > { %3979 = vmatprep.subr.bf16.mxu1 %v22446_v26  ;;  %13534 = vmatmul.mubr.msk.bf16.vlgmr.msra.gmra.mrb[100].mxu0 %vm2130_vm2, %v15852_v11  ;;  %v13796_v8 = vpack.c.bf16 %v11454_v49, %v17829_v36  ;;  %v17897_v7 = vrot.slane %v7724_v47, %v16121_v40  ;;  %v10661_v58 = vmul.f32 %v14345_v43, %v17686_v17  ;;  %v22454_v36 = vunpack.c.h.s8.bf16 %v22445_v21  ;;  %v2826_v43 = vpop.f32.mrb[49].mxu0  ;;  %v2867_v21 = vpop.f32.mrb[37].mxu1 }
 0x442   : > { %13535 = vmatmul.mubr.msk.bf16.vlgmr.msra.gmra.mrb[88].mxu1 %vm2130_vm2, %v15852_v11  ;;  %3939 = vmatpush1.bf16.msra.mxu0 %v22450_v9  ;;  %v13797_v22 = vpack.c.bf16 %v11456_v50, %v11455_v24  ;;  %v14347_v47 = vpop.eup %14346  ;;  %v22456_v17 = vrot.slane %v16906_v63, %v16132_v52  ;;  %v22458_v10 = vunpack.c.h.s8.bf16 %v22449_v18  ;;  %v22463_v18 = vunpack.c.l.s8.bf16 %v16993_v6 }
 0x443   : > { %3980 = vmatpush1.bf16.msra.mxu1 %v22452_v20  ;;  %3940 = vmatprep.subr.bf16.mxu0 %v22453_v62  ;;  %v12143_v20 = vrot.slane %v13796_v8, %v22351_v30  ;;  %v22455_v62 = vrot.slane %v16906_v63, %v16121_v40  ;;  %v10857_v9 = vmax.f32 %v10661_v58, 0.0  ;;  %v10077_v26 = vadd.f32 1.0, %v14347_v47 }
 0x444   : > { %3981 = vmatprep.subr.bf16.mxu1 %v22454_v36  ;;  %3970 = vmatprep.mubr.bf16.mxu0 %v22080_v55  ;;  %v7216_v50 = vmul.f32 %v22456_v17, %v2865_v54  ;;  %v14349_v48 = vpop.eup %14348  ;;  %v12150_v49 = vrot.slane %v13797_v22, %v22351_v30  ;;  %v22457_v8 = vrot.slane %v16906_v63, %v16161_v13  ;;  %v22460_v36 = vld [vmem:[#allocation90_spill] sm:$0xff]  ;;  %v22462_v47 = vunpack.c.h.s8.bf16 %v22451_v39 }
 0x445   : > { %v7214_v24 = vmul.f32 %v22455_v62, %v2824_v56  ;;  %4011 = vmatprep.mubr.bf16.mxu1 %v22080_v55  ;;  %v2828_v56 = vpop.f32.mrb[50].mxu0  ;;  %v2869_v62 = vpop.f32.mrb[38].mxu1  ;;  %v10079_v17 = vadd.f32 1.0, %v14349_v48  ;;  %v22461_v22 = vrot.slane %v16906_v63, %v16174_v23  ;;  %14360 = vrcp.f32 %v10077_v26  ;;  %v22465_v26 = vld [vmem:[#allocation25_spill] sm:$0xff] }
 0x446   : > { %v7215_v15 = vmul.f32 %v22457_v8, %v2826_v43  ;;  %3941 = vmatpush1.bf16.msra.mxu0 %v22458_v10  ;;  %v14351_v54 = vpop.eup %14350  ;;  %v17926_v16 = vadd.f32 %v22460_v36, %v7216_v50  ;;  %v2829_v43 = vpop.f32.mrb[51].mxu0  ;;  %v12152_v48 = vcombine.low %v12143_v20, %v12150_v49  ;;  %v11053_v56 = vmin.f32 %v10857_v9, 1.0 }
 0x447   : > { %v17923_v25 = vadd.f32 %v22459_v3, %v7214_v24  ;;  %v7217_v58 = vmul.f32 %v22461_v22, %v2867_v21  ;;  %3982 = vmatpush1.bf16.msra.mxu1 %v22462_v47  ;;  %v2870_v8 = vpop.f32.mrb[39].mxu1  ;;  %3942 = vmatprep.subr.bf16.mxu0 %v22463_v18  ;;  %v14353_v10 = vpop.eup %14352  ;;  %v10663_v3 = vmul.f32 %v14351_v54, %v17689_v14  ;;  %v22464_v24 = vunpack.c.l.s8.bf16 %v16996_v35 }
 0x448   : > { %v14355_v50 = vpop.eup %14354  ;;  %v10662_v21 = vmul.f32 %v14353_v10, %v17695_v44  ;;  %14362 = vrcp.f32 %v10079_v17  ;;  %v13624_v36 = vmul.f32 -1.442695, %v17926_v16  ;;  %v12166_v22 = vrot.slane %v12152_v48, %v22351_v30  ;;  %v22467_v17 = vld [vmem:[#allocation91_spill] sm:$0xff]  ;;  %v22468_v8 = vld [vmem:[#allocation26_spill] sm:$0xff] }
 0x449   : > { %3983 = vmatprep.subr.bf16.mxu1 %v22464_v24  ;;  %v13622_v39 = vmul.f32 -1.442695, %v17923_v25  ;;  %v14357_v62 = vpop.eup %14356  ;;  %v11255_v49 = vmul.f32 %v17296_v60, %v11053_v56  ;;  %v10859_v9 = vmax.f32 %v10663_v3, 0.0  ;;  %v10664_v14 = vmul.f32 %v14355_v50, %v17698_v4 }
 0x44a   : > { %v22466_v20 = vunpack.c.l.s8.bf16 %v22465_v26  ;;  %v14359_v54 = vpop.eup %14358  ;;  %v10858_v47 = vmax.f32 %v10662_v21, 0.0  ;;  %v10078_v44 = vadd.f32 1.0, %v14357_v62  ;;  %v17947_v43 = vadd.f32 %v22467_v17, %v7215_v15  ;;  %v17958_v15 = vld [vmem:[%s15596_s26 + $0x388] sm:$0xff]  ;;  %v22473_v62 = vld [vmem:[#allocation92_spill] sm:$0xff] }
 0x44b   : > { %14364 = vpow2.f32 %v13622_v39  ;;  %v22469_v18 = vunpack.c.l.s8.bf16 %v22468_v8  ;;  %v22470_v10 = vunpack.c.h.s8.bf16 %v16993_v6  ;;  %v12167_v48 = vcombine.low %v17822_v29, %v12166_v22  ;;  %22472 = vst [vmem:[#allocation62_spill] sm:$0xff] %v17958_v15  ;;  %v17988_v17 = vld [vmem:[%s15610_s17 + $0x38] sm:$0xff]  ;;  %v22494_v15 = vld [vmem:[#allocation97_spill] sm:$0xff] }
 0x44c   : > { %3943 = vmatpush1.bf16.msra.mxu0 %v22466_v20  ;;  %v11457_v4 = vadd.f32 %v17464_v12, %v11255_v49  ;;  %v11055_v56 = vmin.f32 %v10859_v9, 1.0  ;;  %v10860_v3 = vmax.f32 %v10664_v14, 0.0  ;;  %v22471_v24 = vunpack.c.h.s8.bf16 %v16996_v35  ;;  %v17969_v49 = vld [vmem:[%s15596_s26 + $0x398] sm:$0xff]  ;;  %v17972_v9 = vld [vmem:[%s15596_s26 + $0x380] sm:$0xff]  ;;  %v17975_v14 = vld [vmem:[%s15596_s26 + $0x390] sm:$0xff] }
 0x44d   : > { %3984 = vmatpush1.bf16.msra.mxu1 %v22469_v18  ;;  %3944 = vmatprep.subr.bf16.mxu0 %v22470_v10  ;;  %v11054_v50 = vmin.f32 %v10858_v47, 1.0  ;;  %14366 = vrcp.f32 %v10078_v44  ;;  %v10080_v21 = vadd.f32 1.0, %v14359_v54  ;;  %v13623_v6 = vmul.f32 -1.442695, %v17947_v43  ;;  %13248 = vst [vmem:[%s17723_s8 + $0x10] sm:$0xff] %v12167_v48  ;;  %22475 = vst [vmem:[#allocation63_spill] sm:$0xff] %v17969_v49 }
 0x44e   : > { %3985 = vmatprep.subr.bf16.mxu1 %v22471_v24  ;;  %v11257_v29 = vmul.f32 %v17296_v60, %v11055_v56  ;;  %v11056_v39 = vmin.f32 %v10860_v3, 1.0  ;;  %14368 = vpow2.f32 %v13624_v36  ;;  %v17964_v22 = vadd.f32 %v22473_v62, %v7217_v58  ;;  %22476 = vst [vmem:[#allocation66_spill] sm:$0xff] %v17972_v9  ;;  %22477 = vst [vmem:[#allocation67_spill] sm:$0xff] %v17975_v14  ;;  %v22479_v47 = vld [vmem:[#allocation29_spill] sm:$0xff]  ;;  %v2947_v58 = vpop.f32.mrb[40].mxu1  ;;  %v22533_v14 = vld [vmem:[#allocation40_spill] sm:$0xff] }
 0x44f   : > { %v22474_v35 = vunpack.c.h.s8.bf16 %v22465_v26  ;;  %v11256_v20 = vmul.f32 %v17296_v60, %v11054_v50  ;;  %14370 = vrcp.f32 %v10080_v21  ;;  %v22478_v54 = vunpack.c.h.s8.bf16 %v22468_v8  ;;  %v17985_v44 = vld [vmem:[%s15606_s3 + $0x38] sm:$0xff]  ;;  %v22485_v21 = vld [vmem:[#allocation28_spill] sm:$0xff]  ;;  %v2906_v26 = vpop.f32.mrb[52].mxu0 }
 0x450   : > { %v22480_v36 = vunpack.c.l.s8.bf16 %v22479_v47  ;;  %v11459_v18 = vadd.f32 %v17464_v12, %v11257_v29  ;;  %v11258_v10 = vmul.f32 %v17296_v60, %v11056_v39  ;;  %14372 = vpow2.f32 %v13623_v6  ;;  %v22481_v8 = vld [vmem:[#allocation30_spill] sm:$0xff]  ;;  %v14361_v29 = vpop.eup %14360  ;;  %v22483_v6 = vld [vmem:[#allocation27_spill] sm:$0xff] }
 0x451   : > { %3945 = vmatpush1.bf16.msra.mxu0 %v22474_v35  ;;  %3986 = vmatpush1.bf16.msra.mxu1 %v22478_v54  ;;  %v13625_v48 = vmul.f32 -1.442695, %v17964_v22  ;;  %v22482_v56 = vunpack.c.l.s8.bf16 %v22481_v8  ;;  %v11458_v3 = vadd.f32 %v17464_v12, %v11256_v20  ;;  %v22484_v62 = vunpack.c.l.s8.bf16 %v22483_v6 }
 0x452   : > { %4020 = vmatprep.subr.bf16.mxu0 %v22480_v36  ;;  %v11460_v39 = vadd.f32 %v17464_v12, %v11258_v10  ;;  %v18009_v20 = vunpack.c.l.bf16 %v17988_v17  ;;  %v14363_v54 = vpop.eup %14362  ;;  %v22486_v50 = vunpack.c.l.s8.bf16 %v22485_v21  ;;  %v22487_v10 = vunpack.c.h.s8.bf16 %v22479_v47 }
 0x453   : > { %4061 = vmatprep.subr.bf16.mxu1 %v22482_v56  ;;  %14374 = vpow2.f32 %v13625_v48  ;;  %v13798_v36 = vpack.c.bf16 %v11458_v3, %v11457_v4  ;;  %v10665_v56 = vmul.f32 %v14361_v29, %v17800_v19  ;;  %v10667_v35 = vmul.f32 %v14363_v54, %v17803_v45  ;;  %v2908_v54 = vpop.f32.mrb[53].mxu0 }
 0x454   : > { %13536 = vmatmul.mubr.msk.bf16.vlgmr.msra.gmra.mrb[104].mxu0 %vm2130_vm2, %v15852_v11  ;;  %13537 = vmatmul.mubr.msk.bf16.vlgmr.msra.gmra.mrb[92].mxu1 %vm2130_vm2, %v15852_v11  ;;  %v13799_v24 = vpack.c.bf16 %v11460_v39, %v11459_v18  ;;  %v22488_v4 = vunpack.c.h.s8.bf16 %v22481_v8  ;;  %v22489_v18 = vrot.slane %v16906_v63, %v16135_v53  ;;  %v22490_v39 = vrot.slane %v16906_v63, %v16138_v42 }
 0x455   : > { %4021 = vmatpush1.bf16.msra.mxu0 %v22484_v62  ;;  %4062 = vmatpush1.bf16.msra.mxu1 %v22486_v50  ;;  %v14365_v3 = vpop.eup %14364  ;;  %v12178_v50 = vrot.slane %v13798_v36, %v22351_v30  ;;  %v10861_v29 = vmax.f32 %v10665_v56, 0.0  ;;  %v10863_v48 = vmax.f32 %v10667_v35, 0.0  ;;  %v22491_v36 = vrot.slane %v16906_v63, %v16261_v5  ;;  %v2910_v62 = vpop.f32.mrb[54].mxu0 }
 0x456   : > { %4022 = vmatprep.subr.bf16.mxu0 %v22487_v10  ;;  %4063 = vmatprep.subr.bf16.mxu1 %v22488_v4  ;;  %v7218_v45 = vmul.f32 %v22489_v18, %v2906_v26  ;;  %v7220_v8 = vmul.f32 %v22490_v39, %v2947_v58  ;;  %v2949_v10 = vpop.f32.mrb[41].mxu1  ;;  %v12185_v4 = vrot.slane %v13799_v24, %v22351_v30  ;;  %v10081_v47 = vadd.f32 1.0, %v14365_v3  ;;  %v22493_v58 = vld [vmem:[#allocation96_spill] sm:$0xff]  ;;  %v2911_v62 = vpop.f32.mrb[55].mxu0 }
 0x457   : > { %4052 = vmatprep.mubr.bf16.mxu0 %v22080_v55  ;;  %4093 = vmatprep.mubr.bf16.mxu1 %v22080_v55  ;;  %v7219_v56 = vmul.f32 %v22491_v36, %v2908_v54  ;;  %v2951_v19 = vpop.f32.mrb[42].mxu1  ;;  %v22492_v26 = vunpack.c.h.s8.bf16 %v22483_v6  ;;  %v14367_v18 = vpop.eup %14366  ;;  %v11057_v49 = vmin.f32 %v10861_v29, 1.0  ;;  %v22495_v24 = vrot.slane %v16906_v63, %v16268_v57  ;;  %v22497_v54 = vld [vmem:[#allocation31_spill] sm:$0xff] }
 0x458   : > { %v18041_v39 = vadd.f32 %v22493_v58, %v7218_v45  ;;  %v18044_v1 = vadd.f32 %v22494_v15, %v7220_v8  ;;  %v22496_v3 = vunpack.c.h.s8.bf16 %v22485_v21  ;;  %v2952_v19 = vpop.f32.mrb[43].mxu1  ;;  %v22498_v6 = vunpack.c.l.s8.bf16 %v22497_v54  ;;  %v14369_v36 = vpop.eup %14368  ;;  %v22499_v15 = vld [vmem:[#allocation93_spill] sm:$0xff] }
 0x459   : > { %4023 = vmatpush1.bf16.msra.mxu0 %v22492_v26  ;;  %v7221_v35 = vmul.f32 %v22495_v24, %v2949_v10  ;;  %v12200_v29 = vcombine.low %v12178_v50, %v12185_v4  ;;  %v11059_v26 = vmin.f32 %v10863_v48, 1.0  ;;  %v10666_v45 = vmul.f32 %v14367_v18, %v17811_v61  ;;  %v14371_v58 = vpop.eup %14370  ;;  %v22503_v19 = vld [vmem:[#allocation98_spill] sm:$0xff] }
 0x45a   : > { %4064 = vmatpush1.bf16.msra.mxu1 %v22496_v3  ;;  %4024 = vmatprep.subr.bf16.mxu0 %v22498_v6  ;;  %14376 = vrcp.f32 %v10081_v47  ;;  %v22500_v8 = vunpack.c.l.s8.bf16 %v22499_v15  ;;  %v11259_v63 = vmul.f32 %v17296_v60, %v11057_v49  ;;  %v10083_v10 = vadd.f32 1.0, %v14369_v36  ;;  %v14373_v3 = vpop.eup %14372  ;;  %v22501_v47 = vld [vmem:[#allocation94_spill] sm:$0xff]  ;;  %v22504_v36 = vld [vmem:[#allocation95_spill] sm:$0xff] }
 0x45b   : > { %v13626_v21 = vmul.f32 -1.442695, %v18041_v39  ;;  %v13628_v24 = vmul.f32 -1.442695, %v18044_v1  ;;  %v18060_v62 = vrot.slane %v12200_v29, %v22351_v30  ;;  %v11261_v48 = vmul.f32 %v17296_v60, %v11059_v26 }
 0x45c   : > { %4065 = vmatprep.subr.bf16.mxu1 %v22500_v8  ;;  %v10862_v50 = vmax.f32 %v10666_v45, 0.0  ;;  %v10668_v61 = vmul.f32 %v14371_v58, %v17814_v46  ;;  %v22502_v4 = vunpack.c.l.s8.bf16 %v22501_v47  ;;  %v11461_v18 = vadd.f32 %v17464_v12, %v11259_v63 }
 0x45d   : > { %14378 = vrcp.f32 %v10083_v10  ;;  %v10082_v49 = vadd.f32 1.0, %v14373_v3  ;;  %v18068_v6 = vadd.f32 %v22503_v19, %v7219_v56  ;;  %v22505_v8 = vunpack.c.l.s8.bf16 %v22504_v36  ;;  %v14375_v26 = vpop.eup %14374  ;;  %v22508_v3 = vld [vmem:[#allocation99_spill] sm:$0xff] }
 0x45e   : > { %4025 = vmatpush1.bf16.msra.mxu0 %v22502_v4  ;;  %v22506_v29 = vunpack.c.h.s8.bf16 %v22497_v54  ;;  %v18075_v45 = vadd.f32 %v17464_v12, %v11261_v48  ;;  %v11058_v46 = vmin.f32 %v10862_v50, 1.0  ;;  %v10864_v58 = vmax.f32 %v10668_v61, 0.0 }
 0x45f   : > { %4066 = vmatpush1.bf16.msra.mxu1 %v22505_v8  ;;  %14380 = vpow2.f32 %v13626_v21  ;;  %v22507_v63 = vunpack.c.h.s8.bf16 %v22499_v15  ;;  %v10084_v10 = vadd.f32 1.0, %v14375_v26  ;;  %v13627_v56 = vmul.f32 -1.442695, %v18068_v6 }
 0x460   : > { %4026 = vmatprep.subr.bf16.mxu0 %v22506_v29  ;;  %14382 = vrcp.f32 %v10082_v49  ;;  %v18081_v4 = vadd.f32 %v22508_v3, %v7221_v35  ;;  %v11260_v54 = vmul.f32 %v17296_v60, %v11058_v46  ;;  %v11060_v19 = vmin.f32 %v10864_v58, 1.0  ;;  %v22514_v29 = vld [vmem:[#allocation34_spill] sm:$0xff]  ;;  %v18108_v46 = vld [vmem:[%s15596_s26 + $0x9a8] sm:$0xff] }
 0x461   : > { %4067 = vmatprep.subr.bf16.mxu1 %v22507_v63  ;;  %14384 = vpow2.f32 %v13628_v24  ;;  %v22509_v48 = vunpack.c.h.s8.bf16 %v22501_v47  ;;  %v22510_v15 = vrot.slane %v18009_v20, %v16121_v40  ;;  %v22512_v35 = vunpack.c.h.s8.bf16 %v22504_v36  ;;  %22516 = vst [vmem:[#allocation69_spill] sm:$0xff] %v18108_v46  ;;  %v18123_v3 = vld [vmem:[%s15596_s26 + $0x9a0] sm:$0xff]  ;;  %v3029_v47 = vpop.f32.mrb[44].mxu1 }
 0x462   : > { %14386 = vrcp.f32 %v10084_v10  ;;  %v13629_v50 = vmul.f32 -1.442695, %v18081_v4  ;;  %v22513_v61 = vunpack.c.l.s8.bf16 %v17149_v31  ;;  %v7736_v24 = vrot.slane %v18009_v20, %v16135_v53  ;;  %22519 = vst [vmem:[#allocation75_spill] sm:$0xff] %v18123_v3 }
 0x463   : > { %4027 = vmatpush1.bf16.msra.mxu0 %v22509_v48  ;;  %v18090_v21 = vrot.slane %v22510_v15, %v16121_v40  ;;  %4068 = vmatpush1.bf16.msra.mxu1 %v22512_v35  ;;  %v11462_v49 = vadd.f32 %v17464_v12, %v11260_v54  ;;  %v11262_v8 = vmul.f32 %v17296_v60, %v11060_v19  ;;  %14388 = vpow2.f32 %v13627_v56  ;;  %v18120_v56 = vld [vmem:[%s15596_s26 + $0x9b8] sm:$0xff]  ;;  %v2988_v35 = vpop.f32.mrb[56].mxu0 }
 0x464   : > { %4102 = vmatprep.subr.bf16.mxu0 %v22513_v61  ;;  %v22515_v26 = vunpack.c.l.s8.bf16 %v22514_v29  ;;  %v7732_v36 = vrot.slane %v18009_v20, %v16132_v52  ;;  %14390 = vpow2.f32 %v13629_v50  ;;  %v18113_v58 = vrot.slane %v7736_v24, %v16121_v40  ;;  %22518 = vst [vmem:[#allocation73_spill] sm:$0xff] %v18120_v56  ;;  %v14377_v54 = vpop.eup %14376  ;;  %v22523_v24 = vld [vmem:[#allocation33_spill] sm:$0xff] }
 0x465   : > { %22511 = vst [vmem:[#allocation68_spill] sm:$0xff] %v18090_v21  ;;  %v7740_v10 = vrot.slane %v18009_v20, %v16138_v42  ;;  %v13800_v19 = vpack.c.bf16 %v11462_v49, %v11461_v18  ;;  %v11464_v48 = vadd.f32 %v17464_v12, %v11262_v8  ;;  %v22520_v15 = vunpack.c.l.s8.bf16 %v17174_v41  ;;  %v18135_v20 = vld [vmem:[%s15596_s26 + $0x9b0] sm:$0xff]  ;;  %v3031_v8 = vpop.f32.mrb[45].mxu1 }
 0x466   : > { %4143 = vmatprep.subr.bf16.mxu1 %v22515_v26  ;;  %13538 = vmatmul.mubr.msk.bf16.vlgmr.msra.gmra.mrb[108].mxu0 %vm2130_vm2, %v15852_v11  ;;  %22517 = vst [vmem:[#allocation70_spill] sm:$0xff] %v18113_v58  ;;  %v18131_v50 = vrot.slane %v7732_v36, %v16121_v40  ;;  %22522 = vst [vmem:[#allocation77_spill] sm:$0xff] %v18135_v20  ;;  %v10669_v61 = vmul.f32 %v14377_v54, %v17923_v25  ;;  %v22524_v26 = vunpack.c.l.s8.bf16 %v22523_v24  ;;  %v22567_v20 = vld [vmem:[#allocation109_spill] sm:$0xff] }
 0x467   : > { %13539 = vmatmul.mubr.msk.bf16.vlgmr.msra.gmra.mrb[96].mxu1 %vm2130_vm2, %v15852_v11  ;;  %4103 = vmatpush1.bf16.msra.mxu0 %v22520_v15  ;;  %v22525_v18 = vunpack.c.h.s8.bf16 %v17149_v31  ;;  %v18143_v49 = vrot.slane %v7740_v10, %v16121_v40  ;;  %v12192_v15 = vrot.slane %v13800_v19, %v22351_v30  ;;  %v13801_v63 = vpack.c.bf16 %v11464_v48, %v18075_v45  ;;  %v14379_v54 = vpop.eup %14378  ;;  %v2990_v48 = vpop.f32.mrb[57].mxu0 }
 0x468   : > { %22521 = vst [vmem:[#allocation76_spill] sm:$0xff] %v18131_v50  ;;  %4144 = vmatpush1.bf16.msra.mxu1 %v22524_v26  ;;  %v22527_v25 = vunpack.c.h.s8.bf16 %v22514_v29  ;;  %4134 = vmatprep.mubr.bf16.mxu0 %v22080_v55  ;;  %v10865_v26 = vmax.f32 %v10669_v61, 0.0  ;;  %v22529_v45 = vrot.slane %v17188_v0, %v16132_v52  ;;  %v10671_v10 = vmul.f32 %v14379_v54, %v17926_v16  ;;  %v22534_v16 = vld [vmem:[#allocation101_spill] sm:$0xff] }
 0x469   : > { %4104 = vmatprep.subr.bf16.mxu0 %v22525_v18  ;;  %22526 = vst [vmem:[#allocation71_spill] sm:$0xff] %v18143_v49  ;;  %v22528_v18 = vrot.slane %v17188_v0, %v16121_v40  ;;  %4175 = vmatprep.mubr.bf16.mxu1 %v22080_v55  ;;  %v12199_v31 = vrot.slane %v13801_v63, %v22351_v30  ;;  %v22532_v50 = vunpack.c.h.s8.bf16 %v17174_v41 }
 0x46a   : > { %4145 = vmatprep.subr.bf16.mxu1 %v22527_v25  ;;  %v7224_v19 = vmul.f32 %v22529_v45, %v3029_v47  ;;  %v14381_v25 = vpop.eup %14380  ;;  %v22530_v61 = vrot.slane %v17188_v0, %v16161_v13  ;;  %v2992_v47 = vpop.f32.mrb[58].mxu0  ;;  %v11061_v29 = vmin.f32 %v10865_v26, 1.0 }
 0x46b   : > { %v7222_v36 = vmul.f32 %v22528_v18, %v2988_v35  ;;  %v22531_v35 = vrot.slane %v17188_v0, %v16174_v23  ;;  %v3033_v45 = vpop.f32.mrb[46].mxu1  ;;  %4105 = vmatpush1.bf16.msra.mxu0 %v22532_v50  ;;  %v14383_v58 = vpop.eup %14382  ;;  %v10085_v21 = vadd.f32 1.0, %v14381_v25  ;;  %v12201_v41 = vcombine.low %v12192_v15, %v12199_v31  ;;  %v22538_v25 = vld [vmem:[#allocation102_spill] sm:$0xff] }
 0x46c   : > { %v7223_v49 = vmul.f32 %v22530_v61, %v2990_v48  ;;  %v18176_v54 = vadd.f32 %v22534_v16, %v7224_v19  ;;  %v22535_v48 = vunpack.c.h.s8.bf16 %v22523_v24  ;;  %v2993_v61 = vpop.f32.mrb[59].mxu0  ;;  %v3034_v9 = vpop.f32.mrb[47].mxu1  ;;  %v10867_v50 = vmax.f32 %v10671_v10, 0.0 }
 0x46d   : > { %v7225_v18 = vmul.f32 %v22531_v35, %v3031_v8  ;;  %v18173_v63 = vadd.f32 %v22533_v14, %v7222_v36  ;;  %v22536_v8 = vld [vmem:[#allocation36_spill] sm:$0xff]  ;;  %v14385_v47 = vpop.eup %14384  ;;  %v10670_v26 = vmul.f32 %v14383_v58, %v17947_v43  ;;  %v22539_v14 = vld [vmem:[#allocation38_spill] sm:$0xff]  ;;  %v11263_v24 = vmul.f32 %v17296_v60, %v11061_v29  ;;  %v22541_v58 = vld [vmem:[#allocation39_spill] sm:$0xff] }
 0x46e   : > { %4146 = vmatpush1.bf16.msra.mxu1 %v22535_v48  ;;  %v22537_v35 = vunpack.c.l.s8.bf16 %v22536_v8  ;;  %v18184_v45 = vadd.f32 %v22538_v25, %v7223_v49  ;;  %v22540_v36 = vunpack.c.l.s8.bf16 %v22539_v14  ;;  %v14387_v19 = vpop.eup %14386  ;;  %14392 = vrcp.f32 %v10085_v21 }
 0x46f   : > { %v10087_v16 = vadd.f32 1.0, %v14385_v47  ;;  %v13630_v9 = vmul.f32 -1.442695, %v18173_v63  ;;  %v14389_v48 = vpop.eup %14388  ;;  %v12215_v61 = vrot.slane %v12201_v41, %v22351_v30  ;;  %v11063_v15 = vmin.f32 %v10867_v50, 1.0  ;;  %v22543_v47 = vld [vmem:[#allocation100_spill] sm:$0xff] }
 0x470   : > { %4106 = vmatprep.subr.bf16.mxu0 %v22537_v35  ;;  %4147 = vmatprep.subr.bf16.mxu1 %v22540_v36  ;;  %v10866_v31 = vmax.f32 %v10670_v26, 0.0  ;;  %v10672_v43 = vmul.f32 %v14387_v19, %v17964_v22  ;;  %v22542_v49 = vunpack.c.l.s8.bf16 %v22541_v58  ;;  %v14391_v10 = vpop.eup %14390  ;;  %v11465_v35 = vadd.f32 %v17464_v12, %v11263_v24 }
 0x471   : > { %14394 = vrcp.f32 %v10087_v16  ;;  %v10086_v29 = vadd.f32 1.0, %v14389_v48  ;;  %v13632_v21 = vmul.f32 -1.442695, %v18176_v54  ;;  %v22544_v25 = vunpack.c.l.s8.bf16 %v22543_v47  ;;  %v22547_v48 = vld [vmem:[#allocation103_spill] sm:$0xff] }
 0x472   : > { %4107 = vmatpush1.bf16.msra.mxu0 %v22542_v49  ;;  %v22545_v41 = vunpack.c.h.s8.bf16 %v22536_v8  ;;  %v12216_v22 = vcombine.low %v18060_v62, %v12215_v61  ;;  %v11265_v50 = vmul.f32 %v17296_v60, %v11063_v15  ;;  %v11062_v26 = vmin.f32 %v10866_v31, 1.0  ;;  %v18217_v31 = vld [vmem:[%s15596_s26 + $0x3b8] sm:$0xff] }
 0x473   : > { %4148 = vmatpush1.bf16.msra.mxu1 %v22544_v25  ;;  %v10868_v36 = vmax.f32 %v10672_v43, 0.0  ;;  %v22546_v19 = vunpack.c.h.s8.bf16 %v22539_v14  ;;  %14396 = vrcp.f32 %v10086_v29  ;;  %v10088_v24 = vadd.f32 1.0, %v14391_v10  ;;  %v18214_v14 = vld [vmem:[%s15596_s26 + $0x3a8] sm:$0xff]  ;;  %22550 = vst [vmem:[#allocation74_spill] sm:$0xff] %v18217_v31  ;;  %v22566_v25 = vld [vmem:[#allocation50_spill] sm:$0xff] }
 0x474   : > { %4108 = vmatprep.subr.bf16.mxu0 %v22545_v41  ;;  %v13631_v16 = vmul.f32 -1.442695, %v18184_v45  ;;  %v18206_v49 = vadd.f32 %v22547_v48, %v7225_v18  ;;  %13249 = vst [vmem:[%s17723_s8 + $0x18] sm:$0xff] %v12216_v22  ;;  %v11467_v8 = vadd.f32 %v17464_v12, %v11265_v50  ;;  %v11264_v62 = vmul.f32 %v17296_v60, %v11062_v26  ;;  %v22552_v10 = vld [vmem:[#allocation47_spill] sm:$0xff]  ;;  %v22554_v50 = vld [vmem:[#allocation42_spill] sm:$0xff] }
 0x475   : > { %4149 = vmatprep.subr.bf16.mxu1 %v22546_v19  ;;  %v11064_v61 = vmin.f32 %v10868_v36, 1.0  ;;  %14398 = vpow2.f32 %v13630_v9  ;;  %v22548_v15 = vunpack.c.h.s8.bf16 %v22541_v58  ;;  %22549 = vst [vmem:[#allocation72_spill] sm:$0xff] %v18214_v14  ;;  %v22551_v18 = vunpack.c.h.s8.bf16 %v22543_v47  ;;  %v18227_v58 = vld [vmem:[%s15596_s26 + $0x3a0] sm:$0xff]  ;;  %v18235_v36 = vld [vmem:[%s15596_s26 + $0x3b0] sm:$0xff]  ;;  %v3111_v19 = vpop.f32.mrb[48].mxu1 }
 0x476   : > { %14400 = vrcp.f32 %v10088_v24  ;;  %v13633_v43 = vmul.f32 -1.442695, %v18206_v49  ;;  %v22553_v29 = vunpack.c.l.s8.bf16 %v22552_v10  ;;  %v11466_v41 = vadd.f32 %v17464_v12, %v11264_v62 }
 0x477   : > { %4109 = vmatpush1.bf16.msra.mxu0 %v22548_v15  ;;  %4150 = vmatpush1.bf16.msra.mxu1 %v22551_v18  ;;  %v11266_v22 = vmul.f32 %v17296_v60, %v11064_v61  ;;  %14402 = vpow2.f32 %v13632_v21  ;;  %v22555_v26 = vunpack.c.l.s8.bf16 %v22554_v50  ;;  %v22556_v61 = vld [vmem:[#allocation44_spill] sm:$0xff]  ;;  %v22560_v24 = vunpack.c.h.s8.bf16 %v22552_v10 }
 0x478   : > { %4184 = vmatprep.subr.bf16.mxu0 %v22553_v29  ;;  %14404 = vpow2.f32 %v13631_v16  ;;  %v13802_v62 = vpack.c.bf16 %v11466_v41, %v11465_v35  ;;  %v22557_v15 = vunpack.c.l.s8.bf16 %v22556_v61  ;;  %v14393_v18 = vpop.eup %14392  ;;  %v22558_v29 = vld [vmem:[#allocation45_spill] sm:$0xff]  ;;  %v18256_v41 = vunpack.c.h.bf16 %v17988_v17 }
 0x479   : > { %4225 = vmatprep.subr.bf16.mxu1 %v22555_v26  ;;  %v11468_v21 = vadd.f32 %v17464_v12, %v11266_v22  ;;  %14406 = vpow2.f32 %v13633_v43  ;;  %v22559_v26 = vunpack.c.l.s8.bf16 %v22558_v29  ;;  %v10673_v48 = vmul.f32 %v14393_v18, %v18041_v39  ;;  %v3113_v39 = vpop.f32.mrb[49].mxu1 }
 0x47a   : > { %13540 = vmatmul.mubr.msk.bf16.vlgmr.msra.gmra.mrb[112].mxu0 %vm2130_vm2, %v15852_v11  ;;  %13541 = vmatmul.mubr.msk.bf16.vlgmr.msra.gmra.mrb[100].mxu1 %vm2130_vm2, %v15852_v11  ;;  %v22561_v10 = vunpack.c.h.s8.bf16 %v22554_v50  ;;  %v22562_v17 = vrot.slane %v17188_v0, %v16135_v53  ;;  %v7744_v50 = vrot.slane %v18256_v41, %v16121_v40  ;;  %v7752_v18 = vrot.slane %v18256_v41, %v16135_v53 }
 0x47b   : > { %4185 = vmatpush1.bf16.msra.mxu0 %v22557_v15  ;;  %4226 = vmatpush1.bf16.msra.mxu1 %v22559_v26  ;;  %v12227_v15 = vrot.slane %v13802_v62, %v22351_v30  ;;  %v13803_v16 = vpack.c.bf16 %v11468_v21, %v11467_v8  ;;  %v3070_v26 = vpop.f32.mrb[60].mxu0  ;;  %v14395_v43 = vpop.eup %14394  ;;  %v22563_v62 = vrot.slane %v17188_v0, %v16138_v42  ;;  %v10869_v22 = vmax.f32 %v10673_v48, 0.0 }
 0x47c   : > { %4186 = vmatprep.subr.bf16.mxu0 %v22560_v24  ;;  %4227 = vmatprep.subr.bf16.mxu1 %v22561_v10  ;;  %v7226_v35 = vmul.f32 %v22562_v17, %v3070_v26  ;;  %v3072_v21 = vpop.f32.mrb[61].mxu0  ;;  %v10675_v24 = vmul.f32 %v14395_v43, %v18044_v1  ;;  %v22564_v26 = vrot.slane %v17188_v0, %v16261_v5  ;;  %v22565_v47 = vunpack.c.h.s8.bf16 %v22556_v61 }
 0x47d   : > { %4216 = vmatprep.mubr.bf16.mxu0 %v22080_v55  ;;  %v7228_v8 = vmul.f32 %v22563_v62, %v3111_v19  ;;  %4257 = vmatprep.mubr.bf16.mxu1 %v22080_v55  ;;  %v12234_v10 = vrot.slane %v13803_v16, %v22351_v30  ;;  %v3074_v19 = vpop.f32.mrb[62].mxu0  ;;  %v3115_v62 = vpop.f32.mrb[50].mxu1  ;;  %v22568_v48 = vrot.slane %v17188_v0, %v16268_v57  ;;  %v22569_v16 = vunpack.c.h.s8.bf16 %v22558_v29 }
 0x47e   : > { %v7227_v17 = vmul.f32 %v22564_v26, %v3072_v21  ;;  %v14397_v9 = vpop.eup %14396  ;;  %v18285_v14 = vadd.f32 %v22566_v25, %v7226_v35  ;;  %v3075_v43 = vpop.f32.mrb[63].mxu0  ;;  %v22570_v26 = vld [vmem:[#allocation49_spill] sm:$0xff]  ;;  %v11065_v35 = vmin.f32 %v10869_v22, 1.0  ;;  %v10871_v62 = vmax.f32 %v10675_v24, 0.0 }
 0x47f   : > { %4187 = vmatpush1.bf16.msra.mxu0 %v22565_v47  ;;  %v18288_v3 = vadd.f32 %v22567_v20, %v7228_v8  ;;  %v7229_v1 = vmul.f32 %v22568_v48, %v3113_v39  ;;  %4228 = vmatpush1.bf16.msra.mxu1 %v22569_v16  ;;  %v3116_v21 = vpop.f32.mrb[51].mxu1  ;;  %v22571_v19 = vunpack.c.l.s8.bf16 %v22570_v26  ;;  %v14399_v61 = vpop.eup %14398  ;;  %v12249_v25 = vcombine.low %v12227_v15, %v12234_v10  ;;  %v22572_v8 = vld [vmem:[#allocation106_spill] sm:$0xff] }
 0x480   : > { %v10674_v20 = vmul.f32 %v14397_v9, %v18068_v6  ;;  %v22573_v56 = vunpack.c.l.s8.bf16 %v22572_v8  ;;  %v14401_v0 = vpop.eup %14400  ;;  %v10089_v39 = vadd.f32 1.0, %v14399_v61  ;;  %v13634_v29 = vmul.f32 -1.442695, %v18285_v14  ;;  %v22574_v16 = vld [vmem:[#allocation110_spill] sm:$0xff]  ;;  %v22575_v9 = vld [vmem:[#allocation107_spill] sm:$0xff] }
 0x481   : > { %4188 = vmatprep.subr.bf16.mxu0 %v22571_v19  ;;  %v13636_v48 = vmul.f32 -1.442695, %v18288_v3  ;;  %v18304_v43 = vadd.f32 %v22574_v16, %v7227_v17  ;;  %v14403_v21 = vpop.eup %14402  ;;  %v18307_v19 = vrot.slane %v12249_v25, %v22351_v30  ;;  %v11267_v22 = vmul.f32 %v17296_v60, %v11065_v35  ;;  %v22577_v17 = vld [vmem:[#allocation108_spill] sm:$0xff] }
 0x482   : > { %4229 = vmatprep.subr.bf16.mxu1 %v22573_v56  ;;  %v11067_v15 = vmin.f32 %v10871_v62, 1.0  ;;  %v10870_v6 = vmax.f32 %v10674_v20, 0.0  ;;  %v22576_v24 = vunpack.c.l.s8.bf16 %v22575_v9  ;;  %v14405_v56 = vpop.eup %14404  ;;  %v10676_v10 = vmul.f32 %v14401_v0, %v18081_v4 }
 0x483   : > { %14408 = vrcp.f32 %v10089_v39  ;;  %v10091_v61 = vadd.f32 1.0, %v14403_v21  ;;  %v13635_v47 = vmul.f32 -1.442695, %v18304_v43  ;;  %v22578_v16 = vunpack.c.l.s8.bf16 %v22577_v17  ;;  %v14407_v31 = vpop.eup %14406  ;;  %v22581_v39 = vld [vmem:[#allocation111_spill] sm:$0xff] }
 0x484   : > { %4189 = vmatpush1.bf16.msra.mxu0 %v22576_v24  ;;  %v22579_v25 = vunpack.c.h.s8.bf16 %v22570_v26  ;;  %v11469_v35 = vadd.f32 %v17464_v12, %v11267_v22  ;;  %v11269_v62 = vmul.f32 %v17296_v60, %v11067_v15  ;;  %v11066_v20 = vmin.f32 %v10870_v6, 1.0 }
 0x485   : > { %4230 = vmatpush1.bf16.msra.mxu1 %v22578_v16  ;;  %v10090_v24 = vadd.f32 1.0, %v14405_v56  ;;  %v22580_v46 = vunpack.c.h.s8.bf16 %v22572_v8  ;;  %v10872_v4 = vmax.f32 %v10676_v10, 0.0  ;;  %14410 = vrcp.f32 %v10091_v61 }
 0x486   : > { %4190 = vmatprep.subr.bf16.mxu0 %v22579_v25  ;;  %v10092_v0 = vadd.f32 1.0, %v14407_v31  ;;  %v18323_v21 = vadd.f32 %v22581_v39, %v7229_v1  ;;  %v11471_v16 = vadd.f32 %v17464_v12, %v11269_v62  ;;  %v11268_v26 = vmul.f32 %v17296_v60, %v11066_v20  ;;  %v22584_v1 = vld [vmem:[#allocation54_spill] sm:$0xff]  ;;  %v18355_v62 = vld [vmem:[%s15596_s26 + $0x9c8] sm:$0xff]  ;;  %v18358_v20 = vld [vmem:[%s15596_s26 + $0x9d8] sm:$0xff] }
 0x487   : > { %4231 = vmatprep.subr.bf16.mxu1 %v22580_v46  ;;  %14412 = vrcp.f32 %v10090_v24  ;;  %v22582_v22 = vunpack.c.h.s8.bf16 %v22575_v9  ;;  %v18330_v15 = vrot.slane %v7744_v50, %v16121_v40  ;;  %v11068_v6 = vmin.f32 %v10872_v4, 1.0  ;;  %v22587_v50 = vld [vmem:[#allocation55_spill] sm:$0xff]  ;;  %22589 = vst [vmem:[#allocation81_spill] sm:$0xff] %v18355_v62  ;;  %22590 = vst [vmem:[#allocation79_spill] sm:$0xff] %v18358_v20  ;;  %v18361_v24 = vld [vmem:[%s15596_s26 + $0x9c0] sm:$0xff] }
 0x488   : > { %14414 = vrcp.f32 %v10092_v0  ;;  %v13637_v46 = vmul.f32 -1.442695, %v18323_v21  ;;  %v22583_v31 = vunpack.c.h.s8.bf16 %v22577_v17  ;;  %v22585_v8 = vunpack.c.l.s8.bf16 %v22584_v1 }
 0x489   : > { %4191 = vmatpush1.bf16.msra.mxu0 %v22582_v22  ;;  %v18338_v56 = vrot.slane %v7752_v18, %v16121_v40  ;;  %v11470_v9 = vadd.f32 %v17464_v12, %v11268_v26  ;;  %14416 = vpow2.f32 %v13634_v29  ;;  %v22588_v10 = vunpack.c.l.s8.bf16 %v22587_v50 }
 0x48a   : > { %4232 = vmatpush1.bf16.msra.mxu1 %v22583_v31  ;;  %4266 = vmatprep.subr.bf16.mxu0 %v22585_v8  ;;  %v7748_v17 = vrot.slane %v18256_v41, %v16132_v52  ;;  %v11270_v25 = vmul.f32 %v17296_v60, %v11068_v6  ;;  %14418 = vpow2.f32 %v13636_v48  ;;  %v7756_v29 = vrot.slane %v18256_v41, %v16138_v42  ;;  %v22591_v48 = vld [vmem:[#allocation51_spill] sm:$0xff]  ;;  %v18372_v41 = vld [vmem:[%s15596_s26 + $0x9d0] sm:$0xff] }
 0x48b   : > { %22586 = vst [vmem:[#allocation78_spill] sm:$0xff] %v18338_v56  ;;  %4307 = vmatprep.subr.bf16.mxu1 %v22588_v10  ;;  %v13804_v4 = vpack.c.bf16 %v11470_v9, %v11469_v35  ;;  %14420 = vpow2.f32 %v13635_v47  ;;  %v22592_v0 = vunpack.c.l.s8.bf16 %v22591_v48  ;;  %v22594_v6 = vld [vmem:[#allocation52_spill] sm:$0xff]  ;;  %v22596_v47 = vunpack.c.h.s8.bf16 %v22584_v1  ;;  %v3152_v10 = vpop.f32.mrb[64].mxu0 }
 0x48c   : > { %13542 = vmatmul.mubr.msk.bf16.vlgmr.msra.gmra.mrb[116].mxu0 %vm2130_vm2, %v15852_v11  ;;  %v18368_v39 = vrot.slane %v7748_v17, %v16121_v40  ;;  %v11472_v22 = vadd.f32 %v17464_v12, %v11270_v25  ;;  %14422 = vpow2.f32 %v13637_v46  ;;  %v22595_v31 = vunpack.c.l.s8.bf16 %v22594_v6  ;;  %v3193_v17 = vpop.f32.mrb[52].mxu1 }
 0x48d   : > { %13543 = vmatmul.mubr.msk.bf16.vlgmr.msra.gmra.mrb[104].mxu1 %vm2130_vm2, %v15852_v11  ;;  %4267 = vmatpush1.bf16.msra.mxu0 %v22592_v0  ;;  %v18380_v35 = vrot.slane %v7756_v29, %v16121_v40  ;;  %v12241_v9 = vrot.slane %v13804_v4, %v22351_v30  ;;  %v22598_v0 = vunpack.c.h.s8.bf16 %v22587_v50  ;;  %v22600_v4 = vrot.slane %v17490_v38, %v16132_v52  ;;  %v3154_v50 = vpop.f32.mrb[65].mxu0 }
 0x48e   : > { %22593 = vst [vmem:[#allocation82_spill] sm:$0xff] %v18368_v39  ;;  %4308 = vmatpush1.bf16.msra.mxu1 %v22595_v31  ;;  %4268 = vmatprep.subr.bf16.mxu0 %v22596_v47  ;;  %v14409_v31 = vpop.eup %14408  ;;  %v13805_v29 = vpack.c.bf16 %v11472_v22, %v11471_v16  ;;  %v22599_v47 = vrot.slane %v17490_v38, %v16121_v40 }
 0x48f   : > { %22597 = vst [vmem:[#allocation84_spill] sm:$0xff] %v18380_v35  ;;  %4309 = vmatprep.subr.bf16.mxu1 %v22598_v0  ;;  %4298 = vmatprep.mubr.bf16.mxu0 %v22080_v55  ;;  %v7232_v8 = vmul.f32 %v22600_v4, %v3193_v17  ;;  %v3195_v0 = vpop.f32.mrb[53].mxu1  ;;  %v10677_v25 = vmul.f32 %v14409_v31, %v18173_v63  ;;  %v22603_v17 = vunpack.c.h.s8.bf16 %v22591_v48  ;;  %v14411_v61 = vpop.eup %14410  ;;  %v22604_v35 = vld [vmem:[#allocation57_spill] sm:$0xff]  ;;  %v22605_v31 = vld [vmem:[#allocation58_spill] sm:$0xff]  ;;  %v22609_v4 = vld [vmem:[#allocation56_spill] sm:$0xff] }
 0x490   : > { %v7230_v18 = vmul.f32 %v22599_v47, %v3152_v10  ;;  %4339 = vmatprep.mubr.bf16.mxu1 %v22080_v55  ;;  %v22601_v1 = vrot.slane %v17490_v38, %v16161_v13  ;;  %v22602_v22 = vrot.slane %v17490_v38, %v16174_v23  ;;  %v3156_v47 = vpop.f32.mrb[66].mxu0  ;;  %v3197_v26 = vpop.f32.mrb[54].mxu1  ;;  %v12248_v46 = vrot.slane %v13805_v29, %v22351_v30 }
 0x491   : > { %4269 = vmatpush1.bf16.msra.mxu0 %v22603_v17  ;;  %v18413_v39 = vadd.f32 %v22605_v31, %v7232_v8  ;;  %v22607_v26 = vld [vmem:[#allocation53_spill] sm:$0xff]  ;;  %v14413_v47 = vpop.eup %14412  ;;  %v10873_v17 = vmax.f32 %v10677_v25, 0.0  ;;  %v10679_v29 = vmul.f32 %v14411_v61, %v18176_v54 }
 0x492   : > { %v7231_v16 = vmul.f32 %v22601_v1, %v3154_v50  ;;  %v7233_v10 = vmul.f32 %v22602_v22, %v3195_v0  ;;  %v18410_v63 = vadd.f32 %v22604_v35, %v7230_v18  ;;  %v22606_v1 = vunpack.c.h.s8.bf16 %v22594_v6  ;;  %v3157_v50 = vpop.f32.mrb[67].mxu0  ;;  %v3198_v0 = vpop.f32.mrb[55].mxu1  ;;  %v22610_v35 = vld [vmem:[#allocation59_spill] sm:$0xff]  ;;  %v22611_v31 = vld [vmem:[#allocation41_spill] sm:$0xff] }
 0x493   : > { %v22608_v22 = vunpack.c.l.s8.bf16 %v22607_v26  ;;  %v22612_v6 = vunpack.c.l.s8.bf16 %v22611_v31  ;;  %v12250_v50 = vcombine.low %v12241_v9, %v12248_v46  ;;  %v10678_v0 = vmul.f32 %v14413_v47, %v18184_v45  ;;  %v22615_v45 = vld [vmem:[#allocation64_spill] sm:$0xff] }
 0x494   : > { %4310 = vmatpush1.bf16.msra.mxu1 %v22606_v1  ;;  %v18422_v18 = vadd.f32 %v22609_v4, %v7231_v16  ;;  %v18425_v8 = vadd.f32 %v22610_v35, %v7233_v10  ;;  %v14415_v1 = vpop.eup %14414  ;;  %v13640_v48 = vmul.f32 -1.442695, %v18413_v39  ;;  %v11069_v20 = vmin.f32 %v10873_v17, 1.0  ;;  %v22613_v10 = vld [vmem:[#allocation61_spill] sm:$0xff] }
 0x495   : > { %4270 = vmatprep.subr.bf16.mxu0 %v22608_v22  ;;  %4311 = vmatprep.subr.bf16.mxu1 %v22612_v6  ;;  %v13638_v22 = vmul.f32 -1.442695, %v18410_v63  ;;  %v14417_v25 = vpop.eup %14416  ;;  %v10875_v54 = vmax.f32 %v10679_v29, 0.0  ;;  %v10680_v61 = vmul.f32 %v14415_v1, %v18206_v49  ;;  %v22614_v4 = vunpack.c.l.s8.bf16 %v22613_v10 }
 0x496   : > { %v13639_v16 = vmul.f32 -1.442695, %v18422_v18  ;;  %v14419_v35 = vpop.eup %14418  ;;  %v12264_v6 = vrot.slane %v12250_v50, %v22351_v30  ;;  %v10874_v9 = vmax.f32 %v10678_v0, 0.0  ;;  %v10093_v46 = vadd.f32 1.0, %v14417_v25 }
 0x497   : > { %4271 = vmatpush1.bf16.msra.mxu0 %v22614_v4  ;;  %14424 = vpow2.f32 %v13638_v22  ;;  %v22616_v47 = vunpack.c.l.s8.bf16 %v22615_v45  ;;  %v22617_v62 = vunpack.c.h.s8.bf16 %v22607_v26  ;;  %v14421_v17 = vpop.eup %14420  ;;  %v11271_v49 = vmul.f32 %v17296_v60, %v11069_v20 }
 0x498   : > { %v11071_v29 = vmin.f32 %v10875_v54, 1.0  ;;  %v10876_v1 = vmax.f32 %v10680_v61, 0.0  ;;  %v10095_v4 = vadd.f32 1.0, %v14419_v35  ;;  %v22618_v56 = vunpack.c.h.s8.bf16 %v22611_v31  ;;  %v14423_v50 = vpop.eup %14422  ;;  %v18450_v31 = vld [vmem:[%s15596_s26 + $0x3c8] sm:$0xff] }
 0x499   : > { %4312 = vmatpush1.bf16.msra.mxu1 %v22616_v47  ;;  %4272 = vmatprep.subr.bf16.mxu0 %v22617_v62  ;;  %v12265_v0 = vcombine.low %v18307_v19, %v12264_v6  ;;  %v11070_v22 = vmin.f32 %v10874_v9, 1.0  ;;  %14426 = vrcp.f32 %v10093_v46  ;;  %v10094_v26 = vadd.f32 1.0, %v14421_v17  ;;  %v18463_v9 = vld [vmem:[%s15596_s26 + $0x3c0] sm:$0xff] }
 0x49a   : > { %4313 = vmatprep.subr.bf16.mxu1 %v22618_v56  ;;  %v11473_v62 = vadd.f32 %v17464_v12, %v11271_v49  ;;  %v11273_v25 = vmul.f32 %v17296_v60, %v11071_v29  ;;  %v11072_v20 = vmin.f32 %v10876_v1, 1.0  ;;  %14428 = vrcp.f32 %v10095_v4  ;;  %v18474_v29 = vld [vmem:[%s15606_s3 + $0x40] sm:$0xff]  ;;  %v22659_v49 = vld [vmem:[#allocation68_spill] sm:$0xff] }
 0x49b   : > { %v22619_v54 = vunpack.c.h.s8.bf16 %v22613_v10  ;;  %13250 = vst [vmem:[%s17723_s8 + $0x20] sm:$0xff] %v12265_v0  ;;  %v11272_v19 = vmul.f32 %v17296_v60, %v11070_v22  ;;  %14430 = vrcp.f32 %v10094_v26  ;;  %v10096_v56 = vadd.f32 1.0, %v14423_v50  ;;  %v18460_v10 = vld [vmem:[%s15596_s26 + $0x3d8] sm:$0xff] }
 0x49c   : > { %v13641_v61 = vmul.f32 -1.442695, %v18425_v8  ;;  %v22620_v35 = vunpack.c.h.s8.bf16 %v22615_v45  ;;  %v22621_v6 = vunpack.c.l.s8.bf16 %v17647_v33  ;;  %v11475_v46 = vadd.f32 %v17464_v12, %v11273_v25  ;;  %v18471_v45 = vld [vmem:[%s15596_s26 + $0x3d0] sm:$0xff] }
 0x49d   : > { %4273 = vmatpush1.bf16.msra.mxu0 %v22619_v54  ;;  %v11274_v47 = vmul.f32 %v17296_v60, %v11072_v20  ;;  %14432 = vpow2.f32 %v13640_v48  ;;  %v22622_v17 = vunpack.c.l.s8.bf16 %v17657_v2  ;;  %v11474_v1 = vadd.f32 %v17464_v12, %v11272_v19  ;;  %v18482_v48 = vld [vmem:[%s15610_s17 + $0x40] sm:$0xff] }
 0x49e   : > { %4314 = vmatpush1.bf16.msra.mxu1 %v22620_v35  ;;  %4348 = vmatprep.subr.bf16.mxu0 %v22621_v6  ;;  %14434 = vrcp.f32 %v10096_v56  ;;  %v22623_v22 = vunpack.c.l.s8.bf16 %v17720_v51  ;;  %v22624_v54 = vunpack.c.l.s8.bf16 %v17728_v37  ;;  %v22625_v19 = vunpack.c.h.s8.bf16 %v17647_v33  ;;  %v3234_v6 = vpop.f32.mrb[68].mxu0 }
 0x49f   : > { %4389 = vmatprep.subr.bf16.mxu1 %v22622_v17  ;;  %v11476_v0 = vadd.f32 %v17464_v12, %v11274_v47  ;;  %14436 = vpow2.f32 %v13639_v16  ;;  %v13806_v20 = vpack.c.bf16 %v11474_v1, %v11473_v62  ;;  %v3275_v47 = vpop.f32.mrb[56].mxu1  ;;  %v22626_v17 = vunpack.c.h.s8.bf16 %v17657_v2 }
 0x4a0   : > { %13544 = vmatmul.mubr.msk.bf16.vlgmr.msra.gmra.mrb[120].mxu0 %vm2130_vm2, %v15852_v11  ;;  %14438 = vpow2.f32 %v13641_v61  ;;  %v18502_v62 = vunpack.c.l.bf16 %v18482_v48  ;;  %v22628_v2 = vrot.slane %v17490_v38, %v16138_v42 }
 0x4a1   : > { %13545 = vmatmul.mubr.msk.bf16.vlgmr.msra.gmra.mrb[108].mxu1 %vm2130_vm2, %v15852_v11  ;;  %4349 = vmatpush1.bf16.msra.mxu0 %v22623_v22  ;;  %v13807_v35 = vpack.c.bf16 %v11476_v0, %v11475_v46  ;;  %v14425_v1 = vpop.eup %14424  ;;  %v12276_v22 = vrot.slane %v13806_v20, %v22351_v30  ;;  %v22627_v46 = vrot.slane %v17490_v38, %v16135_v53 }
 0x4a2   : > { %4390 = vmatpush1.bf16.msra.mxu1 %v22624_v54  ;;  %4350 = vmatprep.subr.bf16.mxu0 %v22625_v19  ;;  %v7236_v54 = vmul.f32 %v22628_v2, %v3275_v47  ;;  %v3236_v19 = vpop.f32.mrb[69].mxu0  ;;  %v10097_v56 = vadd.f32 1.0, %v14425_v1  ;;  %v22629_v20 = vrot.slane %v17490_v38, %v16261_v5  ;;  %v22631_v2 = vunpack.c.h.s8.bf16 %v17720_v51 }
 0x4a3   : > { %4391 = vmatprep.subr.bf16.mxu1 %v22626_v17  ;;  %4380 = vmatprep.mubr.bf16.mxu0 %v22080_v55  ;;  %v7234_v0 = vmul.f32 %v22627_v46, %v3234_v6  ;;  %v3277_v17 = vpop.f32.mrb[57].mxu1  ;;  %v12283_v61 = vrot.slane %v13807_v35, %v22351_v30  ;;  %v22630_v6 = vrot.slane %v17490_v38, %v16268_v57  ;;  %v3238_v25 = vpop.f32.mrb[70].mxu0  ;;  %v22632_v1 = vunpack.c.h.s8.bf16 %v17728_v37 }
 0x4a4   : > { %4421 = vmatprep.mubr.bf16.mxu1 %v22080_v55  ;;  %v7235_v16 = vmul.f32 %v22629_v20, %v3236_v19  ;;  %v3279_v47 = vpop.f32.mrb[58].mxu1  ;;  %v14427_v26 = vpop.eup %14426  ;;  %v18531_v35 = vadd.f32 %v17851_v34, %v7236_v54  ;;  %v22633_v38 = vunpack.c.l.s8.bf16 %v17860_v32  ;;  %v7760_v25 = vrot.slane %v18502_v62, %v16121_v40 }
 0x4a5   : > { %v7237_v46 = vmul.f32 %v22630_v6, %v3277_v17  ;;  %4351 = vmatpush1.bf16.msra.mxu0 %v22631_v2  ;;  %v18528_v50 = vadd.f32 %v17797_v59, %v7234_v0  ;;  %v3239_v19 = vpop.f32.mrb[71].mxu0  ;;  %v3280_v20 = vpop.f32.mrb[59].mxu1  ;;  %v12298_v6 = vcombine.low %v12276_v22, %v12283_v61  ;;  %v10681_v59 = vmul.f32 %v14427_v26, %v18285_v14 }
 0x4a6   : > { %4392 = vmatpush1.bf16.msra.mxu1 %v22632_v1  ;;  %4352 = vmatprep.subr.bf16.mxu0 %v22633_v38  ;;  %v14429_v17 = vpop.eup %14428  ;;  %14440 = vrcp.f32 %v10097_v56  ;;  %v18542_v34 = vadd.f32 %v17857_v27, %v7235_v16  ;;  %v22634_v37 = vunpack.c.l.s8.bf16 %v17863_v28  ;;  %v13644_v2 = vmul.f32 -1.442695, %v18531_v35  ;;  %v22635_v56 = vld [vmem:[#allocation65_spill] sm:$0xff] }
 0x4a7   : > { %v14431_v0 = vpop.eup %14430  ;;  %v10683_v54 = vmul.f32 %v14429_v17, %v18288_v3  ;;  %v13642_v47 = vmul.f32 -1.442695, %v18528_v50  ;;  %v18550_v1 = vadd.f32 %v17897_v7, %v7237_v46  ;;  %v18553_v14 = vrot.slane %v12298_v6, %v22351_v30  ;;  %v22637_v7 = vld [vmem:[#allocation60_spill] sm:$0xff] }
 0x4a8   : > { %4393 = vmatprep.subr.bf16.mxu1 %v22634_v37  ;;  %v14433_v61 = vpop.eup %14432  ;;  %v10877_v26 = vmax.f32 %v10681_v59, 0.0  ;;  %v10682_v27 = vmul.f32 %v14431_v0, %v18304_v43  ;;  %v13643_v16 = vmul.f32 -1.442695, %v18542_v34  ;;  %v22636_v22 = vunpack.c.l.s8.bf16 %v22635_v56 }
 0x4a9   : > { %v14435_v3 = vpop.eup %14434  ;;  %v10879_v19 = vmax.f32 %v10683_v54, 0.0  ;;  %v10099_v20 = vadd.f32 1.0, %v14433_v61  ;;  %14442 = vpow2.f32 %v13642_v47  ;;  %v13645_v38 = vmul.f32 -1.442695, %v18550_v1 }
 0x4aa   : > { %4353 = vmatpush1.bf16.msra.mxu0 %v22636_v22  ;;  %v22638_v46 = vunpack.c.l.s8.bf16 %v22637_v7  ;;  %v22639_v17 = vunpack.c.h.s8.bf16 %v17860_v32  ;;  %v14437_v6 = vpop.eup %14436  ;;  %v11073_v59 = vmin.f32 %v10877_v26, 1.0  ;;  %v10878_v43 = vmax.f32 %v10682_v27, 0.0 }
 0x4ab   : > { %v10684_v37 = vmul.f32 %v14435_v3, %v18323_v21  ;;  %14444 = vpow2.f32 %v13644_v2  ;;  %v22640_v0 = vunpack.c.h.s8.bf16 %v17863_v28  ;;  %v14439_v54 = vpop.eup %14438  ;;  %v11075_v61 = vmin.f32 %v10879_v19, 1.0  ;;  %v22643_v2 = vld [vmem:[#allocation62_spill] sm:$0xff] }
 0x4ac   : > { %4394 = vmatpush1.bf16.msra.mxu1 %v22638_v46  ;;  %4354 = vmatprep.subr.bf16.mxu0 %v22639_v17  ;;  %14446 = vrcp.f32 %v10099_v20  ;;  %v10098_v47 = vadd.f32 1.0, %v14437_v6  ;;  %v18568_v22 = vrot.slane %v7760_v25, %v16121_v40  ;;  %v11275_v46 = vmul.f32 %v17296_v60, %v11073_v59  ;;  %v22645_v6 = vld [vmem:[#allocation63_spill] sm:$0xff] }
 0x4ad   : > { %4395 = vmatprep.subr.bf16.mxu1 %v22640_v0  ;;  %v11074_v32 = vmin.f32 %v10878_v43, 1.0  ;;  %v10880_v17 = vmax.f32 %v10684_v37, 0.0  ;;  %v10100_v33 = vadd.f32 1.0, %v14439_v54  ;;  %v22641_v26 = vunpack.c.h.s8.bf16 %v22635_v56  ;;  %v18596_v0 = vld [vmem:[%s15596_s26 + $0x9e8] sm:$0xff] }
 0x4ae   : > { %v11277_v21 = vmul.f32 %v17296_v60, %v11075_v61  ;;  %14448 = vrcp.f32 %v10098_v47  ;;  %v22642_v28 = vunpack.c.h.s8.bf16 %v22637_v7  ;;  %v22644_v27 = vunpack.c.l.s8.bf16 %v22643_v2 }
 0x4af   : > { %4355 = vmatpush1.bf16.msra.mxu0 %v22641_v26  ;;  %v7768_v25 = vrot.slane %v18502_v62, %v16135_v53  ;;  %v7764_v3 = vrot.slane %v18502_v62, %v16132_v52  ;;  %v11477_v19 = vadd.f32 %v17464_v12, %v11275_v46  ;;  %v11276_v56 = vmul.f32 %v17296_v60, %v11074_v32  ;;  %v18607_v32 = vld [vmem:[%s15596_s26 + $0x9f8] sm:$0xff]  ;;  %v22650_v26 = vld [vmem:[#allocation67_spill] sm:$0xff] }
 0x4b0   : > { %4396 = vmatpush1.bf16.msra.mxu1 %v22642_v28  ;;  %4430 = vmatprep.subr.bf16.mxu0 %v22644_v27  ;;  %v11076_v20 = vmin.f32 %v10880_v17, 1.0  ;;  %14450 = vrcp.f32 %v10100_v33  ;;  %v22646_v59 = vunpack.c.l.s8.bf16 %v22645_v6  ;;  %v11479_v7 = vadd.f32 %v17464_v12, %v11277_v21  ;;  %v14441_v54 = vpop.eup %14440 }
 0x4b1   : > { %14452 = vpow2.f32 %v13643_v16  ;;  %v18590_v43 = vrot.slane %v7768_v25, %v16121_v40  ;;  %v18593_v37 = vrot.slane %v7764_v3, %v16121_v40  ;;  %v11478_v33 = vadd.f32 %v17464_v12, %v11276_v56  ;;  %v22648_v16 = vld [vmem:[#allocation66_spill] sm:$0xff] }
 0x4b2   : > { %4471 = vmatprep.subr.bf16.mxu1 %v22646_v59  ;;  %13546 = vmatmul.mubr.msk.bf16.vlgmr.msra.gmra.mrb[124].mxu0 %vm2130_vm2, %v15852_v11  ;;  %v11278_v61 = vmul.f32 %v17296_v60, %v11076_v20  ;;  %14454 = vpow2.f32 %v13645_v38  ;;  %v22649_v47 = vunpack.c.l.s8.bf16 %v22648_v16  ;;  %v7772_v46 = vrot.slane %v18502_v62, %v16138_v42  ;;  %v3316_v62 = vpop.f32.mrb[72].mxu0  ;;  %v3357_v20 = vpop.f32.mrb[60].mxu1 }
 0x4b3   : > { %22647 = vst [vmem:[#allocation80_spill] sm:$0xff] %v18593_v37  ;;  %13547 = vmatmul.mubr.msk.bf16.vlgmr.msra.gmra.mrb[112].mxu1 %vm2130_vm2, %v15852_v11  ;;  %v10685_v17 = vmul.f32 %v14441_v54, %v18410_v63  ;;  %v22651_v21 = vunpack.c.l.s8.bf16 %v22650_v26  ;;  %v22652_v28 = vunpack.c.h.s8.bf16 %v22643_v2  ;;  %v13808_v3 = vpack.c.bf16 %v11478_v33, %v11477_v19  ;;  %4462 = vmatprep.mubr.bf16.mxu0 %v22080_v55  ;;  %v14443_v54 = vpop.eup %14442 }
 0x4b4   : > { %4431 = vmatpush1.bf16.msra.mxu0 %v22649_v47  ;;  %v11480_v56 = vadd.f32 %v17464_v12, %v11278_v61  ;;  %v22653_v59 = vunpack.c.h.s8.bf16 %v22645_v6  ;;  %v18622_v63 = vrot.slane %v7772_v46, %v16121_v40  ;;  %v22656_v33 = vrot.slane %v17985_v44, %v16132_v52  ;;  %v3359_v6 = vpop.f32.mrb[61].mxu1  ;;  %4503 = vmatprep.mubr.bf16.mxu1 %v22080_v55 }
 0x4b5   : > { %4472 = vmatpush1.bf16.msra.mxu1 %v22651_v21  ;;  %4432 = vmatprep.subr.bf16.mxu0 %v22652_v28  ;;  %v10881_v47 = vmax.f32 %v10685_v17, 0.0  ;;  %v22655_v21 = vrot.slane %v17985_v44, %v16121_v40  ;;  %v3318_v28 = vpop.f32.mrb[73].mxu0  ;;  %v14445_v46 = vpop.eup %14444  ;;  %v12290_v25 = vrot.slane %v13808_v3, %v22351_v30  ;;  %v10101_v27 = vadd.f32 1.0, %v14443_v54  ;;  %v22662_v54 = vld [vmem:[#allocation69_spill] sm:$0xff] }
 0x4b6   : > { %4473 = vmatprep.subr.bf16.mxu1 %v22653_v59  ;;  %22654 = vst [vmem:[#allocation83_spill] sm:$0xff] %v18622_v63  ;;  %v7240_v61 = vmul.f32 %v22656_v33, %v3357_v20  ;;  %v13809_v2 = vpack.c.bf16 %v11480_v56, %v11479_v7  ;;  %v22657_v17 = vrot.slane %v17985_v44, %v16161_v13  ;;  %v22658_v51 = vunpack.c.h.s8.bf16 %v22648_v16  ;;  %v14447_v20 = vpop.eup %14446  ;;  %v22660_v59 = vld [vmem:[#allocation70_spill] sm:$0xff] }
 0x4b7   : > { %v7238_v19 = vmul.f32 %v22655_v21, %v3316_v62  ;;  %v3320_v62 = vpop.f32.mrb[74].mxu0  ;;  %v3361_v21 = vpop.f32.mrb[62].mxu1  ;;  %v11077_v33 = vmin.f32 %v10881_v47, 1.0  ;;  %v10103_v4 = vadd.f32 1.0, %v14445_v46  ;;  %v22661_v7 = vunpack.c.h.s8.bf16 %v22650_v26  ;;  %v22664_v47 = vld [vmem:[#allocation76_spill] sm:$0xff] }
 0x4b8   : > { %v7239_v38 = vmul.f32 %v22657_v17, %v3318_v28  ;;  %4433 = vmatpush1.bf16.msra.mxu0 %v22658_v51  ;;  %v18643_v37 = vadd.f32 %v22660_v59, %v7240_v61  ;;  %v3321_v3 = vpop.f32.mrb[75].mxu0  ;;  %v3362_v56 = vpop.f32.mrb[63].mxu1  ;;  %v22663_v28 = vunpack.c.l.s8.bf16 %v22662_v54  ;;  %v12297_v16 = vrot.slane %v13809_v2, %v22351_v30 }
 0x4b9   : > { %v18640_v63 = vadd.f32 %v22659_v49, %v7238_v19  ;;  %4474 = vmatpush1.bf16.msra.mxu1 %v22661_v7  ;;  %v10687_v51 = vmul.f32 %v14447_v20, %v18413_v39  ;;  %14456 = vrcp.f32 %v10101_v27  ;;  %v22665_v49 = vld [vmem:[#allocation73_spill] sm:$0xff]  ;;  %v14449_v61 = vpop.eup %14448  ;;  %v11279_v26 = vmul.f32 %v17296_v60, %v11077_v33  ;;  %v22667_v27 = vld [vmem:[#allocation75_spill] sm:$0xff] }
 0x4ba   : > { %4434 = vmatprep.subr.bf16.mxu0 %v22663_v28  ;;  %v18652_v46 = vadd.f32 %v22664_v47, %v7239_v38  ;;  %v22666_v19 = vunpack.c.l.s8.bf16 %v22665_v49  ;;  %14458 = vrcp.f32 %v10103_v4  ;;  %v13648_v17 = vmul.f32 -1.442695, %v18643_v37  ;;  %v14451_v62 = vpop.eup %14450  ;;  %v22670_v56 = vld [vmem:[#allocation77_spill] sm:$0xff] }
 0x4bb   : > { %v13646_v59 = vmul.f32 -1.442695, %v18640_v63  ;;  %v12299_v21 = vcombine.low %v12290_v25, %v12297_v16  ;;  %v10883_v2 = vmax.f32 %v10687_v51, 0.0  ;;  %v10686_v39 = vmul.f32 %v14449_v61, %v18422_v18  ;;  %v14453_v7 = vpop.eup %14452 }
 0x4bc   : > { %4475 = vmatprep.subr.bf16.mxu1 %v22666_v19  ;;  %v13647_v38 = vmul.f32 -1.442695, %v18652_v46  ;;  %v22668_v20 = vunpack.c.l.s8.bf16 %v22667_v27  ;;  %v18664_v3 = vadd.f32 %v17464_v12, %v11279_v26  ;;  %v10688_v4 = vmul.f32 %v14451_v62, %v18425_v8  ;;  %v14455_v16 = vpop.eup %14454  ;;  %v18678_v26 = vld [vmem:[%s15596_s26 + $0x9e0] sm:$0xff]  ;;  %v22674_v62 = vld [vmem:[#allocation71_spill] sm:$0xff] }
 0x4bd   : > { %14460 = vpow2.f32 %v13646_v59  ;;  %v22669_v25 = vrot.slane %v17985_v44, %v16174_v23  ;;  %v22671_v18 = vunpack.c.l.s8.bf16 %v22670_v56  ;;  %v22672_v28 = vunpack.c.h.s8.bf16 %v22662_v54  ;;  %v18684_v54 = vld [vmem:[%s15596_s26 + $0x9f0] sm:$0xff] }
 0x4be   : > { %4435 = vmatpush1.bf16.msra.mxu0 %v22668_v20  ;;  %v12313_v51 = vrot.slane %v12299_v21, %v22351_v30  ;;  %v11079_v47 = vmin.f32 %v10883_v2, 1.0  ;;  %v10882_v19 = vmax.f32 %v10686_v39, 0.0  ;;  %v10102_v61 = vadd.f32 1.0, %v14453_v7 }
 0x4bf   : > { %v7241_v33 = vmul.f32 %v22669_v25, %v3359_v6  ;;  %4476 = vmatpush1.bf16.msra.mxu1 %v22671_v18  ;;  %4436 = vmatprep.subr.bf16.mxu0 %v22672_v28  ;;  %v22673_v8 = vunpack.c.h.s8.bf16 %v22665_v49  ;;  %v10884_v59 = vmax.f32 %v10688_v4, 0.0  ;;  %v10104_v6 = vadd.f32 1.0, %v14455_v16  ;;  %v22677_v25 = vld [vmem:[#allocation72_spill] sm:$0xff]  ;;  %v18697_v18 = vld [vmem:[%s15596_s26 + $0x3e8] sm:$0xff]  ;;  %v22679_v16 = vld [vmem:[#allocation74_spill] sm:$0xff] }
 0x4c0   : > { %14462 = vpow2.f32 %v13648_v17  ;;  %v12314_v21 = vcombine.low %v18553_v14, %v12313_v51  ;;  %v11281_v2 = vmul.f32 %v17296_v60, %v11079_v47  ;;  %v11078_v39 = vmin.f32 %v10882_v19, 1.0  ;;  %v18706_v47 = vld [vmem:[%s15596_s26 + $0x3f8] sm:$0xff]  ;;  %v18709_v19 = vld [vmem:[%s15596_s26 + $0x3e0] sm:$0xff] }
 0x4c1   : > { %4477 = vmatprep.subr.bf16.mxu1 %v22673_v8  ;;  %v18681_v20 = vadd.f32 %v22674_v62, %v7241_v33  ;;  %14464 = vrcp.f32 %v10102_v61  ;;  %v22675_v49 = vunpack.c.h.s8.bf16 %v22667_v27  ;;  %v11080_v7 = vmin.f32 %v10884_v59, 1.0  ;;  %v3439_v59 = vpop.f32.mrb[64].mxu1 }
 0x4c2   : > { %14466 = vrcp.f32 %v10104_v6  ;;  %v22676_v4 = vunpack.c.h.s8.bf16 %v22670_v56  ;;  %v22678_v33 = vunpack.c.l.s8.bf16 %v22677_v25  ;;  %v1857_v14 = vunpack.c.l.s8.bf16 %v18678_v26  ;;  %13251 = vst [vmem:[%s17723_s8 + $0x28] sm:$0xff] %v12314_v21  ;;  %v22689_v56 = vld [vmem:[#allocation78_spill] sm:$0xff] }
 0x4c3   : > { %4437 = vmatpush1.bf16.msra.mxu0 %v22675_v49  ;;  %v13649_v17 = vmul.f32 -1.442695, %v18681_v20  ;;  %v11483_v27 = vadd.f32 %v17464_v12, %v11281_v2  ;;  %v11280_v28 = vmul.f32 %v17296_v60, %v11078_v39  ;;  %14468 = vpow2.f32 %v13647_v38  ;;  %v18717_v38 = vld [vmem:[%s15596_s26 + $0x3f0] sm:$0xff]  ;;  %v14457_v6 = vpop.eup %14456  ;;  %v3398_v49 = vpop.f32.mrb[76].mxu0 }
 0x4c4   : > { %4478 = vmatpush1.bf16.msra.mxu1 %v22676_v4  ;;  %4512 = vmatprep.subr.bf16.mxu0 %v22678_v33  ;;  %v22680_v51 = vunpack.c.l.s8.bf16 %v22679_v16  ;;  %v11282_v61 = vmul.f32 %v17296_v60, %v11080_v7  ;;  %v22681_v21 = vunpack.c.l.s8.bf16 %v18227_v58  ;;  %v14459_v7 = vpop.eup %14458  ;;  %v10689_v4 = vmul.f32 %v14457_v6, %v18528_v50 }
 0x4c5   : > { %14470 = vpow2.f32 %v13649_v17  ;;  %v11482_v62 = vadd.f32 %v17464_v12, %v11280_v28  ;;  %v22682_v33 = vunpack.c.l.s8.bf16 %v18235_v36  ;;  %v22683_v28 = vunpack.c.h.s8.bf16 %v22677_v25 }
 0x4c6   : > { %4553 = vmatprep.subr.bf16.mxu1 %v22680_v51  ;;  %13548 = vmatmul.mubr.msk.bf16.vlgmr.msra.gmra.mrb[128].mxu0 %vm2130_vm2, %v15852_v11  ;;  %v11484_v17 = vadd.f32 %v17464_v12, %v11282_v61  ;;  %v10691_v39 = vmul.f32 %v14459_v7, %v18531_v35  ;;  %v22684_v61 = vunpack.c.h.s8.bf16 %v22679_v16  ;;  %v22686_v35 = vrot.slane %v17985_v44, %v16138_v42  ;;  %v3400_v16 = vpop.f32.mrb[77].mxu0 }
 0x4c7   : > { %13549 = vmatmul.mubr.msk.bf16.vlgmr.msra.gmra.mrb[116].mxu1 %vm2130_vm2, %v15852_v11  ;;  %4513 = vmatpush1.bf16.msra.mxu0 %v22681_v21  ;;  %v13810_v2 = vpack.c.bf16 %v11482_v62, %v18664_v3  ;;  %v14461_v6 = vpop.eup %14460  ;;  %v22685_v3 = vrot.slane %v17985_v44, %v16135_v53 }
 0x4c8   : > { %4554 = vmatpush1.bf16.msra.mxu1 %v22682_v33  ;;  %4514 = vmatprep.subr.bf16.mxu0 %v22683_v28  ;;  %v13811_v33 = vpack.c.bf16 %v11484_v17, %v11483_v27  ;;  %v10885_v28 = vmax.f32 %v10689_v4, 0.0  ;;  %v7244_v7 = vmul.f32 %v22686_v35, %v3439_v59  ;;  %v10887_v21 = vmax.f32 %v10691_v39, 0.0  ;;  %v3402_v4 = vpop.f32.mrb[78].mxu0 }
 0x4c9   : > { %4555 = vmatprep.subr.bf16.mxu1 %v22684_v61  ;;  %4544 = vmatprep.mubr.bf16.mxu0 %v22080_v55  ;;  %v7242_v62 = vmul.f32 %v22685_v3, %v3398_v49  ;;  %v3441_v61 = vpop.f32.mrb[65].mxu1  ;;  %v12325_v50 = vrot.slane %v13810_v2, %v22351_v30  ;;  %v10105_v51 = vadd.f32 1.0, %v14461_v6  ;;  %v22687_v27 = vrot.slane %v17985_v44, %v16261_v5  ;;  %v3403_v6 = vpop.f32.mrb[79].mxu0 }
 0x4ca   : > { %4585 = vmatprep.mubr.bf16.mxu1 %v22080_v55  ;;  %v3443_v25 = vpop.f32.mrb[66].mxu1  ;;  %v22688_v49 = vunpack.c.h.s8.bf16 %v18227_v58  ;;  %v14463_v3 = vpop.eup %14462  ;;  %v12332_v59 = vrot.slane %v13811_v33, %v22351_v30  ;;  %v11081_v35 = vmin.f32 %v10885_v28, 1.0  ;;  %v18761_v2 = vadd.f32 %v22689_v56, %v7244_v7  ;;  %v22693_v33 = vld [vmem:[#allocation82_spill] sm:$0xff] }
 0x4cb   : > { %v7243_v17 = vmul.f32 %v22687_v27, %v3400_v16  ;;  %v18758_v8 = vadd.f32 %v18330_v15, %v7242_v62  ;;  %v22690_v39 = vunpack.c.h.s8.bf16 %v18235_v36  ;;  %v3444_v16 = vpop.f32.mrb[67].mxu1  ;;  %v22691_v27 = vld [vmem:[#allocation81_spill] sm:$0xff]  ;;  %v14465_v58 = vpop.eup %14464  ;;  %v11083_v4 = vmin.f32 %v10887_v21, 1.0  ;;  %v22694_v15 = vld [vmem:[#allocation79_spill] sm:$0xff] }
 0x4cc   : > { %4515 = vmatpush1.bf16.msra.mxu0 %v22688_v49  ;;  %v22692_v25 = vunpack.c.l.s8.bf16 %v22691_v27  ;;  %14472 = vrcp.f32 %v10105_v51  ;;  %v10107_v49 = vadd.f32 1.0, %v14463_v3  ;;  %v22695_v62 = vunpack.c.l.s8.bf16 %v22694_v15  ;;  %v14467_v56 = vpop.eup %14466 }
 0x4cd   : > { %4556 = vmatpush1.bf16.msra.mxu1 %v22690_v39  ;;  %v18768_v28 = vadd.f32 %v22693_v33, %v7243_v17  ;;  %v12347_v7 = vcombine.low %v12325_v50, %v12332_v59  ;;  %v11283_v36 = vmul.f32 %v17296_v60, %v11081_v35  ;;  %v10690_v39 = vmul.f32 %v14465_v58, %v18542_v34  ;;  %v14469_v16 = vpop.eup %14468 }
 0x4ce   : > { %4516 = vmatprep.subr.bf16.mxu0 %v22692_v25  ;;  %4557 = vmatprep.subr.bf16.mxu1 %v22695_v62  ;;  %v13650_v6 = vmul.f32 -1.442695, %v18758_v8  ;;  %v11285_v25 = vmul.f32 %v17296_v60, %v11083_v4  ;;  %v10692_v51 = vmul.f32 %v14467_v56, %v18550_v1  ;;  %14474 = vrcp.f32 %v10107_v49 }
 0x4cf   : > { %v13652_v21 = vmul.f32 -1.442695, %v18761_v2  ;;  %v22696_v17 = vunpack.c.l.s8.bf16 %v18361_v24  ;;  %v14471_v3 = vpop.eup %14470  ;;  %v18781_v50 = vrot.slane %v12347_v7, %v22351_v30  ;;  %v11485_v59 = vadd.f32 %v17464_v12, %v11283_v36 }
 0x4d0   : > { %v10886_v34 = vmax.f32 %v10690_v39, 0.0  ;;  %v10106_v35 = vadd.f32 1.0, %v14469_v16  ;;  %v22697_v58 = vunpack.c.l.s8.bf16 %v18372_v41  ;;  %v22698_v4 = vunpack.c.h.s8.bf16 %v22691_v27 }
 0x4d1   : > { %4517 = vmatpush1.bf16.msra.mxu0 %v22696_v17  ;;  %v11487_v1 = vadd.f32 %v17464_v12, %v11285_v25  ;;  %v10888_v49 = vmax.f32 %v10692_v51, 0.0  ;;  %v10108_v33 = vadd.f32 1.0, %v14471_v3  ;;  %14476 = vpow2.f32 %v13650_v6  ;;  %v22702_v51 = vld [vmem:[#allocation84_spill] sm:$0xff] }
 0x4d2   : > { %4558 = vmatpush1.bf16.msra.mxu1 %v22697_v58  ;;  %4518 = vmatprep.subr.bf16.mxu0 %v22698_v4  ;;  %v22699_v62 = vunpack.c.h.s8.bf16 %v22694_v15  ;;  %v11082_v56 = vmin.f32 %v10886_v34, 1.0  ;;  %14478 = vrcp.f32 %v10106_v35  ;;  %v13651_v7 = vmul.f32 -1.442695, %v18768_v28 }
 0x4d3   : > { %v22700_v36 = vrot.slane %v17985_v44, %v16268_v57  ;;  %v11084_v16 = vmin.f32 %v10888_v49, 1.0  ;;  %14480 = vrcp.f32 %v10108_v33  ;;  %v22701_v27 = vunpack.c.h.s8.bf16 %v18361_v24 }
 0x4d4   : > { %4559 = vmatprep.subr.bf16.mxu1 %v22699_v62  ;;  %v18798_v25 = vunpack.c.h.bf16 %v18482_v48  ;;  %v11284_v6 = vmul.f32 %v17296_v60, %v11082_v56  ;;  %14482 = vpow2.f32 %v13652_v21  ;;  %v22703_v44 = vunpack.c.h.s8.bf16 %v18372_v41 }
 0x4d5   : > { %v7245_v39 = vmul.f32 %v22700_v36, %v3441_v61  ;;  %4519 = vmatpush1.bf16.msra.mxu0 %v22701_v27  ;;  %v22704_v61 = vunpack.c.l.s8.bf16 %v18450_v31  ;;  %v11286_v48 = vmul.f32 %v17296_v60, %v11084_v16  ;;  %14484 = vpow2.f32 %v13651_v7 }
 0x4d6   : > { %4560 = vmatpush1.bf16.msra.mxu1 %v22703_v44  ;;  %v22705_v3 = vunpack.c.l.s8.bf16 %v18460_v10  ;;  %v7776_v21 = vrot.slane %v18798_v25, %v16121_v40  ;;  %v7784_v34 = vrot.slane %v18798_v25, %v16135_v53  ;;  %v11486_v41 = vadd.f32 %v17464_v12, %v11284_v6  ;;  %v14473_v49 = vpop.eup %14472 }
 0x4d7   : > { %v18804_v17 = vadd.f32 %v22702_v51, %v7245_v39  ;;  %4594 = vmatprep.subr.bf16.mxu0 %v22704_v61  ;;  %v7780_v58 = vrot.slane %v18798_v25, %v16132_v52  ;;  %v11488_v33 = vadd.f32 %v17464_v12, %v11286_v48  ;;  %v22706_v62 = vunpack.c.l.s8.bf16 %v18463_v9  ;;  %v3480_v48 = vpop.f32.mrb[80].mxu0 }
 0x4d8   : > { %4635 = vmatprep.subr.bf16.mxu1 %v22705_v3  ;;  %13550 = vmatmul.mubr.msk.bf16.vlgmr.msra.gmra.mrb[132].mxu0 %vm2130_vm2, %v15852_v11  ;;  %v18833_v56 = vrot.slane %v7776_v21, %v16121_v40  ;;  %v18836_v7 = vrot.slane %v7784_v34, %v16121_v40  ;;  %v1666_v36 = vunpack.c.h.s8.bf16 %v18697_v18  ;;  %v13812_v39 = vpack.c.bf16 %v11486_v41, %v11485_v59  ;;  %v14475_v44 = vpop.eup %14474  ;;  %v3521_v3 = vpop.f32.mrb[68].mxu1 }
 0x4d9   : > { %v13653_v35 = vmul.f32 -1.442695, %v18804_v17  ;;  %13551 = vmatmul.mubr.msk.bf16.vlgmr.msra.gmra.mrb[120].mxu1 %vm2130_vm2, %v15852_v11  ;;  %4595 = vmatpush1.bf16.msra.mxu0 %v22706_v62  ;;  %v10693_v16 = vmul.f32 %v14473_v49, %v18640_v63  ;;  %v22707_v27 = vunpack.c.l.s8.bf16 %v18471_v45  ;;  %v22708_v6 = vunpack.c.h.s8.bf16 %v18450_v31  ;;  %v3523_v49 = vpop.f32.mrb[69].mxu1 }
 0x4da   : > { %v18845_v51 = vrot.slane %v7780_v58, %v16121_v40  ;;  %v13813_v61 = vpack.c.bf16 %v11488_v33, %v11487_v1  ;;  %v22709_v21 = vunpack.c.h.s8.bf16 %v18460_v10  ;;  %4626 = vmatprep.mubr.bf16.mxu0 %v22080_v55  ;;  %v7788_v63 = vrot.slane %v18798_v25, %v16138_v42  ;;  %v3482_v10 = vpop.f32.mrb[81].mxu0  ;;  %4667 = vmatprep.mubr.bf16.mxu1 %v22080_v55 }
 0x4db   : > { %14486 = vpow2.f32 %v13653_v35  ;;  %4636 = vmatpush1.bf16.msra.mxu1 %v22707_v27  ;;  %4596 = vmatprep.subr.bf16.mxu0 %v22708_v6  ;;  %v1668_v59 = vunpack.c.h.s8.bf16 %v18706_v47  ;;  %v12339_v34 = vrot.slane %v13812_v39, %v22351_v30  ;;  %v10889_v41 = vmax.f32 %v10693_v16, 0.0  ;;  %v14477_v33 = vpop.eup %14476 }
 0x4dc   : > { %4637 = vmatprep.subr.bf16.mxu1 %v22709_v21  ;;  %v10695_v35 = vmul.f32 %v14475_v44, %v18643_v37  ;;  %v22710_v1 = vrot.slane %v18474_v29, %v16121_v40  ;;  %v12346_v62 = vrot.slane %v13813_v61, %v22351_v30  ;;  %v22711_v27 = vrot.slane %v18474_v29, %v16132_v52  ;;  %v3525_v21 = vpop.f32.mrb[70].mxu1  ;;  %v14479_v31 = vpop.eup %14478 }
 0x4dd   : > { %v22712_v39 = vrot.slane %v18474_v29, %v16161_v13  ;;  %v22713_v37 = vrot.slane %v18474_v29, %v16174_v23  ;;  %v11085_v4 = vmin.f32 %v10889_v41, 1.0  ;;  %v10109_v24 = vadd.f32 1.0, %v14477_v33  ;;  %v22717_v41 = vld [vmem:[#allocation80_spill] sm:$0xff] }
 0x4de   : > { %v7246_v58 = vmul.f32 %v22710_v1, %v3480_v48  ;;  %v7248_v6 = vmul.f32 %v22711_v27, %v3521_v3  ;;  %v3484_v48 = vpop.f32.mrb[82].mxu0  ;;  %v22714_v1 = vunpack.c.h.s8.bf16 %v18463_v9  ;;  %v10891_v61 = vmax.f32 %v10695_v35, 0.0  ;;  %v3526_v27 = vpop.f32.mrb[71].mxu1 }
 0x4df   : > { %v7247_v16 = vmul.f32 %v22712_v39, %v3482_v10  ;;  %v7249_v44 = vmul.f32 %v22713_v37, %v3523_v49  ;;  %v22715_v3 = vunpack.c.h.s8.bf16 %v18471_v45  ;;  %v3485_v10 = vpop.f32.mrb[83].mxu0  ;;  %v22716_v39 = vunpack.c.l.s8.bf16 %v18596_v0  ;;  %v14481_v49 = vpop.eup %14480 }
 0x4e0   : > { %4597 = vmatpush1.bf16.msra.mxu0 %v22714_v1  ;;  %v18873_v15 = vadd.f32 %v18568_v22, %v7246_v58  ;;  %v12348_v37 = vcombine.low %v12339_v34, %v12346_v62  ;;  %v10694_v9 = vmul.f32 %v14479_v31, %v18652_v46  ;;  %v18881_v48 = vadd.f32 %v18590_v43, %v7248_v6  ;;  %v14483_v45 = vpop.eup %14482 }
 0x4e1   : > { %4638 = vmatpush1.bf16.msra.mxu1 %v22715_v3  ;;  %4598 = vmatprep.subr.bf16.mxu0 %v22716_v39  ;;  %v18884_v35 = vadd.f32 %v22717_v41, %v7247_v16  ;;  %v22718_v22 = vunpack.c.l.s8.bf16 %v18607_v32  ;;  %v11287_v58 = vmul.f32 %v17296_v60, %v11085_v4  ;;  %v11087_v33 = vmin.f32 %v10891_v61, 1.0  ;;  %v14485_v1 = vpop.eup %14484  ;;  %v22722_v41 = vld [vmem:[#allocation83_spill] sm:$0xff] }
 0x4e2   : > { %v10696_v21 = vmul.f32 %v14481_v49, %v18681_v20  ;;  %14488 = vrcp.f32 %v10109_v24  ;;  %v12362_v34 = vrot.slane %v12348_v37, %v22351_v30  ;;  %v10890_v46 = vmax.f32 %v10694_v9, 0.0 }
 0x4e3   : > { %4639 = vmatprep.subr.bf16.mxu1 %v22718_v22  ;;  %v10111_v31 = vadd.f32 1.0, %v14483_v45  ;;  %v13654_v43 = vmul.f32 -1.442695, %v18873_v15  ;;  %v11489_v62 = vadd.f32 %v17464_v12, %v11287_v58  ;;  %v11289_v6 = vmul.f32 %v17296_v60, %v11087_v33  ;;  %v18917_v45 = vld [vmem:[%s15596_s26 + $0xa18] sm:$0xff]  ;;  %v18920_v58 = vld [vmem:[%s15596_s26 + $0xa00] sm:$0xff] }
 0x4e4   : > { %4599 = vmatpush1.bf16.msra.mxu0 %v1857_v14  ;;  %v10892_v4 = vmax.f32 %v10696_v21, 0.0  ;;  %v10110_v16 = vadd.f32 1.0, %v14485_v1  ;;  %v22719_v20 = vunpack.c.l.s8.bf16 %v18684_v54  ;;  %v22720_v24 = vunpack.c.h.s8.bf16 %v18596_v0  ;;  %v18907_v0 = vld [vmem:[%s15596_s26 + $0xa08] sm:$0xff] }
 0x4e5   : > { %v12363_v61 = vcombine.low %v18781_v50, %v12362_v34  ;;  %v11086_v3 = vmin.f32 %v10890_v46, 1.0  ;;  %14490 = vrcp.f32 %v10111_v31  ;;  %v13656_v14 = vmul.f32 -1.442695, %v18881_v48  ;;  %v14487_v27 = vpop.eup %14486  ;;  %v18935_v34 = vld [vmem:[%s15596_s26 + $0xa10] sm:$0xff] }
 0x4e6   : > { %4640 = vmatpush1.bf16.msra.mxu1 %v22719_v20  ;;  %4600 = vmatprep.subr.bf16.mxu0 %v22720_v24  ;;  %v22721_v10 = vunpack.c.h.s8.bf16 %v18607_v32  ;;  %v11491_v39 = vadd.f32 %v17464_v12, %v11289_v6  ;;  %v11088_v49 = vmin.f32 %v10892_v4, 1.0  ;;  %14492 = vrcp.f32 %v10110_v16  ;;  %v18948_v4 = vld [vmem:[%s15596_s26 + $0x408] sm:$0xff]  ;;  %v18951_v16 = vld [vmem:[%s15596_s26 + $0x418] sm:$0xff] }
 0x4e7   : > { %v13655_v37 = vmul.f32 -1.442695, %v18884_v35  ;;  %13252 = vst [vmem:[%s17723_s8 + $0x30] sm:$0xff] %v12363_v61  ;;  %v11288_v50 = vmul.f32 %v17296_v60, %v11086_v3  ;;  %v10112_v9 = vadd.f32 1.0, %v14487_v27  ;;  %14494 = vpow2.f32 %v13654_v43 }
 0x4e8   : > { %4641 = vmatprep.subr.bf16.mxu1 %v22721_v10  ;;  %v18912_v22 = vadd.f32 %v22722_v41, %v7249_v44  ;;  %v22723_v32 = vunpack.c.h.s8.bf16 %v18678_v26  ;;  %v11290_v33 = vmul.f32 %v17296_v60, %v11088_v49  ;;  %14496 = vpow2.f32 %v13656_v14  ;;  %v18960_v14 = vld [vmem:[%s15596_s26 + $0x400] sm:$0xff] }
 0x4e9   : > { %v22724_v21 = vunpack.c.h.s8.bf16 %v18684_v54  ;;  %v22725_v1 = vunpack.c.l.s8.bf16 %v18697_v18  ;;  %v18931_v26 = vrot.slane %v7788_v63, %v16121_v40  ;;  %v1667_v44 = vunpack.c.h.s8.bf16 %v18717_v38 }
 0x4ea   : > { %4601 = vmatpush1.bf16.msra.mxu0 %v22723_v32  ;;  %v11490_v46 = vadd.f32 %v17464_v12, %v11288_v50  ;;  %14498 = vrcp.f32 %v10112_v9  ;;  %v13657_v54 = vmul.f32 -1.442695, %v18912_v22  ;;  %v22726_v31 = vunpack.c.l.s8.bf16 %v18706_v47  ;;  %v18970_v9 = vld [vmem:[%s15596_s26 + $0x410] sm:$0xff] }
 0x4eb   : > { %4642 = vmatpush1.bf16.msra.mxu1 %v22724_v21  ;;  %4676 = vmatprep.subr.bf16.mxu0 %v22725_v1  ;;  %v1862_v43 = vunpack.c.l.s8.bf16 %v18907_v0  ;;  %v11492_v6 = vadd.f32 %v17464_v12, %v11290_v33  ;;  %14500 = vpow2.f32 %v13655_v37  ;;  %v1864_v25 = vunpack.c.l.s8.bf16 %v18917_v45  ;;  %v3562_v33 = vpop.f32.mrb[84].mxu0 }
 0x4ec   : > { %4717 = vmatprep.subr.bf16.mxu1 %v22726_v31  ;;  %v1861_v63 = vunpack.c.l.s8.bf16 %v18920_v58  ;;  %v13814_v20 = vpack.c.bf16 %v11490_v46, %v11489_v62  ;;  %14502 = vpow2.f32 %v13657_v54  ;;  %v22727_v24 = vunpack.c.l.s8.bf16 %v18709_v19  ;;  %v14489_v10 = vpop.eup %14488  ;;  %v3564_v54 = vpop.f32.mrb[85].mxu0 }
 0x4ed   : > { %13552 = vmatmul.mubr.msk.bf16.vlgmr.msra.gmra.mrb[136].mxu0 %vm2130_vm2, %v15852_v11  ;;  %v1863_v61 = vunpack.c.l.s8.bf16 %v18935_v34  ;;  %v2058_v3 = vunpack.c.h.s8.bf16 %v18907_v0  ;;  %v13815_v27 = vpack.c.bf16 %v11492_v6, %v11491_v39  ;;  %v22728_v49 = vunpack.c.l.s8.bf16 %v18717_v38  ;;  %v3603_v39 = vpop.f32.mrb[72].mxu1 }
 0x4ee   : > { %13553 = vmatmul.mubr.msk.bf16.vlgmr.msra.gmra.mrb[124].mxu1 %vm2130_vm2, %v15852_v11  ;;  %4677 = vmatpush1.bf16.msra.mxu0 %v22727_v24  ;;  %v2060_v62 = vunpack.c.h.s8.bf16 %v18917_v45  ;;  %v2057_v37 = vunpack.c.h.s8.bf16 %v18920_v58  ;;  %v2059_v50 = vunpack.c.h.s8.bf16 %v18935_v34  ;;  %v12374_v41 = vrot.slane %v13814_v20, %v22351_v30  ;;  %v3605_v31 = vpop.f32.mrb[73].mxu1 }
 0x4ef   : > { %4718 = vmatpush1.bf16.msra.mxu1 %v22728_v49  ;;  %4678 = vmatprep.subr.bf16.mxu0 %v1666_v36  ;;  %v10697_v32 = vmul.f32 %v14489_v10, %v18758_v8  ;;  %v1474_v18 = vunpack.c.l.s8.bf16 %v18948_v4  ;;  %v12381_v36 = vrot.slane %v13815_v27, %v22351_v30  ;;  %v22729_v21 = vrot.slane %v18474_v29, %v16135_v53  ;;  %v3566_v49 = vpop.f32.mrb[86].mxu0 }
 0x4f0   : > { %4719 = vmatprep.subr.bf16.mxu1 %v1668_v59  ;;  %4708 = vmatprep.mubr.bf16.mxu0 %v22080_v55  ;;  %v22730_v8 = vrot.slane %v18474_v29, %v16138_v42  ;;  %v14491_v59 = vpop.eup %14490  ;;  %v22731_v20 = vrot.slane %v18474_v29, %v16261_v5  ;;  %v22732_v10 = vrot.slane %v18474_v29, %v16268_v57  ;;  %v3567_v29 = vpop.f32.mrb[87].mxu0  ;;  %v22734_v58 = vunpack.c.l.s8.bf16 %v18951_v16 }
 0x4f1   : > { %v7250_v1 = vmul.f32 %v22729_v21, %v3562_v33  ;;  %4749 = vmatprep.mubr.bf16.mxu1 %v22080_v55  ;;  %v10893_v6 = vmax.f32 %v10697_v32, 0.0  ;;  %v3607_v33 = vpop.f32.mrb[74].mxu1  ;;  %v1475_v21 = vunpack.c.l.s8.bf16 %v18970_v9  ;;  %v12396_v38 = vcombine.low %v12374_v41, %v12381_v36 }
 0x4f2   : > { %v7252_v46 = vmul.f32 %v22730_v8, %v3603_v39  ;;  %v7251_v24 = vmul.f32 %v22731_v20, %v3564_v54  ;;  %v7253_v27 = vmul.f32 %v22732_v10, %v3605_v31  ;;  %v22733_v39 = vunpack.c.h.s8.bf16 %v18709_v19  ;;  %v14493_v8 = vpop.eup %14492  ;;  %v3608_v31 = vpop.f32.mrb[75].mxu1 }
 0x4f3   : > { %v10699_v47 = vmul.f32 %v14491_v59, %v18761_v2  ;;  %v18999_v32 = vadd.f32 %v18833_v56, %v7250_v1  ;;  %4720 = vmatpush1.bf16.msra.mxu1 %v1667_v44  ;;  %v14495_v20 = vpop.eup %14494  ;;  %v11089_v10 = vmin.f32 %v10893_v6, 1.0  ;;  %v10698_v19 = vmul.f32 %v14493_v8, %v18768_v28 }
 0x4f4   : > { %4679 = vmatpush1.bf16.msra.mxu0 %v22733_v39  ;;  %v19002_v54 = vadd.f32 %v18836_v7, %v7252_v46  ;;  %v19006_v49 = vadd.f32 %v18845_v51, %v7251_v24  ;;  %v19009_v41 = vadd.f32 %v18931_v26, %v7253_v27  ;;  %4721 = vmatprep.subr.bf16.mxu1 %v1864_v25  ;;  %v14497_v2 = vpop.eup %14496  ;;  %v10113_v44 = vadd.f32 1.0, %v14495_v20 }
 0x4f5   : > { %4680 = vmatprep.subr.bf16.mxu0 %v1862_v43  ;;  %v19012_v56 = vrot.slane %v12396_v38, %v22351_v30  ;;  %v10895_v7 = vmax.f32 %v10699_v47, 0.0  ;;  %v13658_v36 = vmul.f32 -1.442695, %v18999_v32  ;;  %v14499_v1 = vpop.eup %14498  ;;  %v11291_v28 = vmul.f32 %v17296_v60, %v11089_v10  ;;  %v19026_v47 = vld [vmem:[%s15606_s3 + $0x48] sm:$0xff] }
 0x4f6   : > { %v10894_v46 = vmax.f32 %v10698_v19, 0.0  ;;  %v10115_v51 = vadd.f32 1.0, %v14497_v2  ;;  %v13660_v59 = vmul.f32 -1.442695, %v19002_v54  ;;  %v14501_v26 = vpop.eup %14500  ;;  %v10700_v25 = vmul.f32 %v14499_v1, %v18804_v17  ;;  %v19032_v17 = vld [vmem:[%s15610_s17 + $0x48] sm:$0xff] }
 0x4f7   : > { %v11091_v43 = vmin.f32 %v10895_v7, 1.0  ;;  %14504 = vrcp.f32 %v10113_v44  ;;  %v13659_v38 = vmul.f32 -1.442695, %v19006_v49  ;;  %4722 = vmatpush1.bf16.msra.mxu1 %v1863_v61  ;;  %v14503_v6 = vpop.eup %14502  ;;  %v11493_v24 = vadd.f32 %v17464_v12, %v11291_v28 }
 0x4f8   : > { %4681 = vmatpush1.bf16.msra.mxu0 %v1861_v63  ;;  %v11090_v27 = vmin.f32 %v10894_v46, 1.0  ;;  %14506 = vrcp.f32 %v10115_v51  ;;  %v10114_v63 = vadd.f32 1.0, %v14501_v26  ;;  %4723 = vmatprep.subr.bf16.mxu1 %v2060_v62  ;;  %v10896_v39 = vmax.f32 %v10700_v25, 0.0  ;;  %v3644_v51 = vpop.f32.mrb[88].mxu0 }
 0x4f9   : > { %4682 = vmatprep.subr.bf16.mxu0 %v2058_v3  ;;  %v11293_v33 = vmul.f32 %v17296_v60, %v11091_v43  ;;  %v10116_v61 = vadd.f32 1.0, %v14503_v6  ;;  %14508 = vpow2.f32 %v13658_v36  ;;  %v13661_v3 = vmul.f32 -1.442695, %v19009_v41 }
 0x4fa   : > { %v11292_v0 = vmul.f32 %v17296_v60, %v11090_v27  ;;  %14510 = vrcp.f32 %v10114_v63  ;;  %v6493_v8 = vrot.slane %v19026_v47, %v16121_v40  ;;  %v11092_v62 = vmin.f32 %v10896_v39, 1.0  ;;  %v3646_v27 = vpop.f32.mrb[89].mxu0 }
 0x4fb   : > { %v11495_v45 = vadd.f32 %v17464_v12, %v11293_v33  ;;  %14512 = vrcp.f32 %v10116_v61  ;;  %4724 = vmatpush1.bf16.msra.mxu1 %v2059_v50  ;;  %v7421_v29 = vunpack.c.l.bf16 %v19032_v17  ;;  %v6497_v20 = vrot.slane %v19026_v47, %v16161_v13 }
 0x4fc   : > { %4683 = vmatpush1.bf16.msra.mxu0 %v2057_v37  ;;  %v11494_v31 = vadd.f32 %v17464_v12, %v11292_v0  ;;  %14514 = vpow2.f32 %v13660_v59  ;;  %4799 = vmatprep.subr.bf16.mxu1 %v22734_v58  ;;  %v6501_v37 = vrot.slane %v19026_v47, %v16132_v52  ;;  %v11294_v34 = vmul.f32 %v17296_v60, %v11092_v62  ;;  %v3685_v59 = vpop.f32.mrb[76].mxu1 }
 0x4fd   : > { %4758 = vmatprep.subr.bf16.mxu0 %v1474_v18  ;;  %14516 = vpow2.f32 %v13659_v38  ;;  %v7792_v50 = vrot.slane %v7421_v29, %v16121_v40  ;;  %v7800_v18 = vrot.slane %v7421_v29, %v16135_v53  ;;  %v22735_v19 = vunpack.c.l.s8.bf16 %v18960_v14  ;;  %v3687_v63 = vpop.f32.mrb[77].mxu1 }
 0x4fe   : > { %v13816_v10 = vpack.c.bf16 %v11494_v31, %v11493_v24  ;;  %14518 = vpow2.f32 %v13661_v3  ;;  %13555 = vmatmul.mubr.msk.bf16.vlgmr.msra.gmra.mrb[128].mxu1 %vm2130_vm2, %v15852_v11  ;;  %v7796_v2 = vrot.slane %v7421_v29, %v16132_v52  ;;  %v6505_v7 = vrot.slane %v19026_v47, %v16174_v23 }
 0x4ff   : > { %13554 = vmatmul.mubr.msk.bf16.vlgmr.msra.gmra.mrb[140].mxu0 %vm2130_vm2, %v15852_v11  ;;  %v11496_v44 = vadd.f32 %v17464_v12, %v11294_v34  ;;  %4800 = vmatpush1.bf16.msra.mxu1 %v1475_v21  ;;  %v8772_v36 = vrot.slane %v7792_v50, %v16121_v40  ;;  %v8780_v1 = vrot.slane %v7800_v18, %v16121_v40  ;;  %v1670_v43 = vunpack.c.h.s8.bf16 %v18948_v4  ;;  %v3648_v4 = vpop.f32.mrb[90].mxu0 }
 0x500   : > { %4759 = vmatpush1.bf16.msra.mxu0 %v22735_v19  ;;  %v7804_v28 = vrot.slane %v7421_v29, %v16138_v42  ;;  %v12388_v46 = vrot.slane %v13816_v10, %v22351_v30  ;;  %v8776_v26 = vrot.slane %v7796_v2, %v16121_v40  ;;  %v1672_v25 = vunpack.c.h.s8.bf16 %v18951_v16  ;;  %4790 = vmatprep.mubr.bf16.mxu0 %v22080_v55  ;;  %v3689_v16 = vpop.f32.mrb[78].mxu1  ;;  %v1277_v4 = vld [vmem:[%s15596_s26 + $0xa20] sm:$0xff] }
 0x501   : > { %4831 = vmatprep.mubr.bf16.mxu1 %v22080_v55  ;;  %v14505_v21 = vpop.eup %14504  ;;  %v13817_v38 = vpack.c.bf16 %v11496_v44, %v11495_v45  ;;  %v7254_v6 = vmul.f32 %v6493_v8, %v3644_v51  ;;  %v7256_v24 = vmul.f32 %v6501_v37, %v3685_v59  ;;  %v7255_v0 = vmul.f32 %v6497_v20, %v3646_v27  ;;  %v3649_v37 = vpop.f32.mrb[91].mxu0  ;;  %v19108_v16 = vld [vmem:[%s15596_s26 + $0xa30] sm:$0xff] }
 0x502   : > { %v8784_v33 = vrot.slane %v7804_v28, %v16121_v40  ;;  %v14507_v39 = vpop.eup %14506  ;;  %v10701_v61 = vmul.f32 %v14505_v21, %v18873_v15  ;;  %v7257_v3 = vmul.f32 %v6505_v7, %v3687_v63  ;;  %4760 = vmatprep.subr.bf16.mxu0 %v1670_v43  ;;  %4801 = vmatprep.subr.bf16.mxu1 %v1672_v25  ;;  %v1669_v62 = vunpack.c.h.s8.bf16 %v18960_v14  ;;  %v3690_v34 = vpop.f32.mrb[79].mxu1 }
 0x503   : > { %v14509_v29 = vpop.eup %14508  ;;  %v12395_v45 = vrot.slane %v13817_v38, %v22351_v30  ;;  %v10703_v8 = vmul.f32 %v14507_v39, %v18881_v48  ;;  %v19083_v31 = vadd.f32 %v8772_v36, %v7254_v6  ;;  %v19085_v58 = vadd.f32 %v8780_v1, %v7256_v24  ;;  %v1278_v39 = vld [vmem:[%s15596_s26 + $0xa28] sm:$0xff] }
 0x504   : > { %v14511_v15 = vpop.eup %14510  ;;  %v10897_v20 = vmax.f32 %v10701_v61, 0.0  ;;  %v10117_v50 = vadd.f32 1.0, %v14509_v29  ;;  %v19087_v18 = vadd.f32 %v8776_v26, %v7255_v0  ;;  %v19089_v10 = vadd.f32 %v8784_v33, %v7257_v3  ;;  %4761 = vmatpush1.bf16.msra.mxu0 %v1669_v62  ;;  %v1280_v61 = vld [vmem:[%s15596_s26 + $0xa38] sm:$0xff] }
 0x505   : > { %v14513_v14 = vpop.eup %14512  ;;  %v12397_v19 = vcombine.low %v12388_v46, %v12395_v45  ;;  %v10899_v2 = vmax.f32 %v10703_v8, 0.0  ;;  %v10702_v7 = vmul.f32 %v14511_v15, %v18884_v35  ;;  %v13662_v48 = vmul.f32 -1.442695, %v19083_v31  ;;  %v19115_v15 = vld [vmem:[%s15596_s26 + $0x428] sm:$0xff] }
 0x506   : > { %v14515_v44 = vpop.eup %14514  ;;  %v11093_v36 = vmin.f32 %v10897_v20, 1.0  ;;  %v10704_v1 = vmul.f32 %v14513_v14, %v18912_v22  ;;  %14520 = vrcp.f32 %v10117_v50  ;;  %v13664_v28 = vmul.f32 -1.442695, %v19085_v58  ;;  %v19118_v20 = vld [vmem:[%s15596_s26 + $0x438] sm:$0xff] }
 0x507   : > { %v14517_v51 = vpop.eup %14516  ;;  %v12411_v59 = vrot.slane %v12397_v19, %v22351_v30  ;;  %v11095_v26 = vmin.f32 %v10899_v2, 1.0  ;;  %v10898_v43 = vmax.f32 %v10702_v7, 0.0  ;;  %v10119_v46 = vadd.f32 1.0, %v14515_v44  ;;  %v19123_v2 = vld [vmem:[%s15596_s26 + $0x420] sm:$0xff]  ;;  %v19126_v7 = vld [vmem:[%s15596_s26 + $0x430] sm:$0xff] }
 0x508   : > { %v14519_v25 = vpop.eup %14518  ;;  %v11295_v35 = vmul.f32 %v17296_v60, %v11093_v36  ;;  %v10900_v21 = vmax.f32 %v10704_v1, 0.0  ;;  %v10118_v38 = vadd.f32 1.0, %v14517_v51  ;;  %14522 = vpow2.f32 %v13662_v48 }
 0x509   : > { %v12412_v22 = vcombine.low %v19012_v56, %v12411_v59  ;;  %v11297_v6 = vmul.f32 %v17296_v60, %v11095_v26  ;;  %v11094_v24 = vmin.f32 %v10898_v43, 1.0  ;;  %14524 = vrcp.f32 %v10119_v46  ;;  %v3726_v43 = vpop.f32.mrb[92].mxu0 }
 0x50a   : > { %v11497_v27 = vadd.f32 %v17464_v12, %v11295_v35  ;;  %v11096_v63 = vmin.f32 %v10900_v21, 1.0  ;;  %14526 = vrcp.f32 %v10118_v38  ;;  %v10120_v33 = vadd.f32 1.0, %v14519_v25  ;;  %v3767_v38 = vpop.f32.mrb[80].mxu1 }
 0x50b   : > { %13253 = vst [vmem:[%s17723_s8 + $0x38] sm:$0xff] %v12412_v22  ;;  %v11499_v0 = vadd.f32 %v17464_v12, %v11297_v6  ;;  %v11296_v3 = vmul.f32 %v17296_v60, %v11094_v24  ;;  %14528 = vpow2.f32 %v13664_v28  ;;  %v13663_v56 = vmul.f32 -1.442695, %v19087_v18  ;;  %v19135_v22 = vpop.f32.mrb[93].mxu0 }
 0x50c   : > { %v11298_v62 = vmul.f32 %v17296_v60, %v11096_v63  ;;  %14530 = vrcp.f32 %v10120_v33  ;;  %v13665_v29 = vmul.f32 -1.442695, %v19089_v10  ;;  %v1671_v45 = vunpack.c.h.s8.bf16 %v18970_v9  ;;  %v19145_v33 = vpop.f32.mrb[81].mxu1 }
 0x50d   : > { %v11498_v8 = vadd.f32 %v17464_v12, %v11296_v3  ;;  %14532 = vpow2.f32 %v13663_v56  ;;  %v1866_v37 = vunpack.c.l.s8.bf16 %v1278_v39  ;;  %v1868_v34 = vunpack.c.l.s8.bf16 %v1280_v61 }
 0x50e   : > { %v11500_v50 = vadd.f32 %v17464_v12, %v11298_v62  ;;  %14534 = vpow2.f32 %v13665_v29  ;;  %4802 = vmatpush1.bf16.msra.mxu1 %v1671_v45  ;;  %v1865_v14 = vunpack.c.l.s8.bf16 %v1277_v4  ;;  %v1867_v19 = vunpack.c.l.s8.bf16 %v19108_v16 }
 0x50f   : > { %v13818_v9 = vpack.c.bf16 %v11498_v8, %v11497_v27  ;;  %4762 = vmatprep.subr.bf16.mxu0 %v1866_v37  ;;  %4803 = vmatprep.subr.bf16.mxu1 %v1868_v34  ;;  %v2062_v48 = vunpack.c.h.s8.bf16 %v1278_v39  ;;  %v2064_v44 = vunpack.c.h.s8.bf16 %v1280_v61  ;;  %v2061_v36 = vunpack.c.h.s8.bf16 %v1277_v4  ;;  %v3730_v39 = vpop.f32.mrb[94].mxu0 }
 0x510   : > { %v14521_v1 = vpop.eup %14520  ;;  %v13819_v28 = vpack.c.bf16 %v11500_v50, %v11499_v0  ;;  %4763 = vmatpush1.bf16.msra.mxu0 %v1865_v14  ;;  %v2063_v51 = vunpack.c.h.s8.bf16 %v19108_v16  ;;  %v1478_v59 = vunpack.c.l.s8.bf16 %v19115_v15  ;;  %v1480_v26 = vunpack.c.l.s8.bf16 %v19118_v20  ;;  %v3771_v16 = vpop.f32.mrb[82].mxu1 }
 0x511   : > { %v12423_v46 = vrot.slane %v13818_v9, %v22351_v30  ;;  %v10705_v25 = vmul.f32 %v14521_v1, %v18999_v32  ;;  %4764 = vmatprep.subr.bf16.mxu0 %v2062_v48  ;;  %v1477_v35 = vunpack.c.l.s8.bf16 %v19123_v2  ;;  %v1479_v21 = vunpack.c.l.s8.bf16 %v19126_v7  ;;  %v3731_v62 = vpop.f32.mrb[95].mxu0  ;;  %v3772_v34 = vpop.f32.mrb[83].mxu1 }
 0x512   : > { %v14523_v6 = vpop.eup %14522  ;;  %v12430_v24 = vrot.slane %v13819_v28, %v22351_v30  ;;  %4804 = vmatpush1.bf16.msra.mxu1 %v1867_v19  ;;  %v6509_v27 = vrot.slane %v19026_v47, %v16135_v53  ;;  %v19141_v63 = vunpack.c.h.bf16 %v19032_v17  ;;  %v6517_v32 = vrot.slane %v19026_v47, %v16138_v42  ;;  %v1282_v34 = vld [vmem:[%s15596_s26 + $0xa48] sm:$0xff] }
 0x513   : > { %v14525_v61 = vpop.eup %14524  ;;  %v10901_v0 = vmax.f32 %v10705_v25, 0.0  ;;  %v10121_v3 = vadd.f32 1.0, %v14523_v6  ;;  %4805 = vmatprep.subr.bf16.mxu1 %v2064_v44  ;;  %v6513_v56 = vrot.slane %v19026_v47, %v16261_v5  ;;  %v6521_v4 = vrot.slane %v19026_v47, %v16268_v57 }
 0x514   : > { %v14527_v17 = vpop.eup %14526  ;;  %v12445_v29 = vcombine.low %v12423_v46, %v12430_v24  ;;  %v10707_v45 = vmul.f32 %v14525_v61, %v19002_v54  ;;  %4765 = vmatpush1.bf16.msra.mxu0 %v2061_v36  ;;  %v7258_v8 = vmul.f32 %v6509_v27, %v3726_v43  ;;  %v7808_v37 = vrot.slane %v19141_v63, %v16121_v40 }
 0x515   : > { %v14529_v50 = vpop.eup %14528  ;;  %v11097_v14 = vmin.f32 %v10901_v0, 1.0  ;;  %v10706_v19 = vmul.f32 %v14527_v17, %v19006_v49  ;;  %14536 = vrcp.f32 %v10121_v3  ;;  %4840 = vmatprep.subr.bf16.mxu0 %v1478_v59  ;;  %v7260_v9 = vmul.f32 %v6517_v32, %v3767_v38 }
 0x516   : > { %v14531_v47 = vpop.eup %14530  ;;  %v19156_v48 = vrot.slane %v12445_v29, %v22351_v30  ;;  %v10903_v44 = vmax.f32 %v10707_v45, 0.0  ;;  %v10123_v1 = vadd.f32 1.0, %v14529_v50  ;;  %4806 = vmatpush1.bf16.msra.mxu1 %v2063_v51  ;;  %v8788_v54 = vrot.slane %v7808_v37, %v16121_v40 }
 0x517   : > { %v14533_v36 = vpop.eup %14532  ;;  %v11299_v28 = vmul.f32 %v17296_v60, %v11097_v14  ;;  %v10902_v43 = vmax.f32 %v10706_v19, 0.0  ;;  %v10708_v46 = vmul.f32 %v14531_v47, %v19009_v41  ;;  %13556 = vmatmul.mubr.msk.bf16.vlgmr.msra.gmra.mrb[144].mxu0 %vm2130_vm2, %v15852_v11  ;;  %4881 = vmatprep.subr.bf16.mxu1 %v1480_v26  ;;  %v7816_v49 = vrot.slane %v19141_v63, %v16135_v53 }
 0x518   : > { %v14535_v59 = vpop.eup %14534  ;;  %v11099_v25 = vmin.f32 %v10903_v44, 1.0  ;;  %14538 = vrcp.f32 %v10123_v1  ;;  %v10122_v38 = vadd.f32 1.0, %v14533_v36  ;;  %4841 = vmatpush1.bf16.msra.mxu0 %v1477_v35  ;;  %v19165_v51 = vadd.f32 %v8788_v54, %v7258_v8  ;;  %4872 = vmatprep.mubr.bf16.mxu0 %v22080_v55  ;;  %v19206_v1 = vpop.f32.mrb[96].mxu0 }
 0x519   : > { %v11501_v6 = vadd.f32 %v17464_v12, %v11299_v28  ;;  %v11098_v24 = vmin.f32 %v10902_v43, 1.0  ;;  %v10904_v41 = vmax.f32 %v10708_v46, 0.0  ;;  %v10124_v27 = vadd.f32 1.0, %v14535_v59  ;;  %13557 = vmatmul.mubr.msk.bf16.vlgmr.msra.gmra.mrb[132].mxu1 %vm2130_vm2, %v15852_v11  ;;  %v19211_v43 = vpop.f32.mrb[84].mxu1 }
 0x51a   : > { %v11301_v26 = vmul.f32 %v17296_v60, %v11099_v25  ;;  %14540 = vrcp.f32 %v10122_v38  ;;  %4882 = vmatpush1.bf16.msra.mxu1 %v1479_v21  ;;  %v13666_v32 = vmul.f32 -1.442695, %v19165_v51  ;;  %v8796_v35 = vrot.slane %v7816_v49, %v16121_v40  ;;  %4913 = vmatprep.mubr.bf16.mxu1 %v22080_v55  ;;  %v19217_v38 = vpop.f32.mrb[85].mxu1 }
 0x51b   : > { %v11300_v39 = vmul.f32 %v17296_v60, %v11098_v24  ;;  %v11100_v61 = vmin.f32 %v10904_v41, 1.0  ;;  %14542 = vrcp.f32 %v10124_v27  ;;  %v7259_v0 = vmul.f32 %v6513_v56, %v19135_v22 }
 0x51c   : > { %v11503_v3 = vadd.f32 %v17464_v12, %v11301_v26  ;;  %14544 = vpow2.f32 %v13666_v32  ;;  %v19178_v16 = vadd.f32 %v8796_v35, %v7260_v9  ;;  %v7812_v21 = vrot.slane %v19141_v63, %v16132_v52  ;;  %v3853_v32 = vpop.f32.mrb[86].mxu1 }
 0x51d   : > { %v11502_v62 = vadd.f32 %v17464_v12, %v11300_v39  ;;  %v11302_v17 = vmul.f32 %v17296_v60, %v11100_v61  ;;  %v7261_v29 = vmul.f32 %v6521_v4, %v19145_v33  ;;  %v7820_v45 = vrot.slane %v19141_v63, %v16138_v42  ;;  %v1284_v4 = vld [vmem:[%s15596_s26 + $0xa58] sm:$0xff]  ;;  %v19197_v63 = vld [vmem:[%s15596_s26 + $0xa40] sm:$0xff] }
 0x51e   : > { %v13668_v22 = vmul.f32 -1.442695, %v19178_v16  ;;  %v8792_v56 = vrot.slane %v7812_v21, %v16121_v40  ;;  %v1674_v8 = vunpack.c.h.s8.bf16 %v19115_v15  ;;  %v1676_v37 = vunpack.c.h.s8.bf16 %v19118_v20  ;;  %v19204_v20 = vld [vmem:[%s15596_s26 + $0xa50] sm:$0xff]  ;;  %v3854_v21 = vpop.f32.mrb[87].mxu1 }
 0x51f   : > { %v14537_v50 = vpop.eup %14536  ;;  %v13820_v14 = vpack.c.bf16 %v11502_v62, %v11501_v6  ;;  %v11504_v19 = vadd.f32 %v17464_v12, %v11302_v17  ;;  %v8800_v9 = vrot.slane %v7820_v45, %v16121_v40  ;;  %v1673_v33 = vunpack.c.h.s8.bf16 %v19123_v2  ;;  %v19225_v45 = vld [vmem:[%s15596_s26 + $0x448] sm:$0xff] }
 0x520   : > { %v10709_v47 = vmul.f32 %v14537_v50, %v19083_v31  ;;  %14546 = vpow2.f32 %v13668_v22  ;;  %v19200_v44 = vadd.f32 %v8792_v56, %v7259_v0  ;;  %4842 = vmatprep.subr.bf16.mxu0 %v1674_v8  ;;  %4883 = vmatprep.subr.bf16.mxu1 %v1676_v37  ;;  %v1675_v15 = vunpack.c.h.s8.bf16 %v19126_v7  ;;  %v19213_v31 = vpop.f32.mrb[97].mxu0  ;;  %v19228_v22 = vld [vmem:[%s15596_s26 + $0x458] sm:$0xff] }
 0x521   : > { %v12437_v54 = vrot.slane %v13820_v14, %v22351_v30  ;;  %v13821_v36 = vpack.c.bf16 %v11504_v19, %v11503_v3  ;;  %v19209_v2 = vadd.f32 %v8800_v9, %v7261_v29  ;;  %4843 = vmatpush1.bf16.msra.mxu0 %v1673_v33  ;;  %v1870_v28 = vunpack.c.l.s8.bf16 %v1282_v34  ;;  %v3812_v6 = vpop.f32.mrb[98].mxu0  ;;  %v19236_v33 = vld [vmem:[%s15596_s26 + $0x440] sm:$0xff] }
 0x522   : > { %v14539_v46 = vpop.eup %14538  ;;  %v10905_v49 = vmax.f32 %v10709_v47, 0.0  ;;  %v13667_v59 = vmul.f32 -1.442695, %v19200_v44  ;;  %4884 = vmatpush1.bf16.msra.mxu1 %v1675_v15  ;;  %v1872_v7 = vunpack.c.l.s8.bf16 %v1284_v4  ;;  %v1869_v25 = vunpack.c.l.s8.bf16 %v19197_v63  ;;  %v3813_v35 = vpop.f32.mrb[99].mxu0  ;;  %v19242_v47 = vld [vmem:[%s15606_s3 + $0x50] sm:$0xff] }
 0x523   : > { %v12444_v24 = vrot.slane %v13821_v36, %v22351_v30  ;;  %v10711_v41 = vmul.f32 %v14539_v46, %v19085_v58  ;;  %v13669_v27 = vmul.f32 -1.442695, %v19209_v2  ;;  %4844 = vmatprep.subr.bf16.mxu0 %v1870_v28  ;;  %v1871_v26 = vunpack.c.l.s8.bf16 %v19204_v20 }
 0x524   : > { %v14541_v39 = vpop.eup %14540  ;;  %v11101_v61 = vmin.f32 %v10905_v49, 1.0  ;;  %14548 = vpow2.f32 %v13667_v59  ;;  %4885 = vmatprep.subr.bf16.mxu1 %v1872_v7  ;;  %v2066_v0 = vunpack.c.h.s8.bf16 %v1282_v34  ;;  %v2068_v3 = vunpack.c.h.s8.bf16 %v1284_v4  ;;  %v19239_v4 = vld [vmem:[%s15596_s26 + $0x450] sm:$0xff] }
 0x525   : > { %v14543_v62 = vpop.eup %14542  ;;  %v12446_v17 = vcombine.low %v12437_v54, %v12444_v24  ;;  %v10907_v29 = vmax.f32 %v10711_v41, 0.0  ;;  %v10710_v58 = vmul.f32 %v14541_v39, %v19087_v18  ;;  %14550 = vpow2.f32 %v13669_v27  ;;  %4845 = vmatpush1.bf16.msra.mxu0 %v1869_v25  ;;  %v19248_v54 = vld [vmem:[%s15610_s17 + $0x50] sm:$0xff] }
 0x526   : > { %v14545_v56 = vpop.eup %14544  ;;  %v11303_v8 = vmul.f32 %v17296_v60, %v11101_v61  ;;  %v10712_v37 = vmul.f32 %v14543_v62, %v19089_v10  ;;  %4886 = vmatpush1.bf16.msra.mxu1 %v1871_v26  ;;  %4846 = vmatprep.subr.bf16.mxu0 %v2066_v0  ;;  %v2065_v34 = vunpack.c.h.s8.bf16 %v19197_v63  ;;  %v2067_v18 = vunpack.c.h.s8.bf16 %v19204_v20 }
 0x527   : > { %v12460_v50 = vrot.slane %v12446_v17, %v22351_v30  ;;  %v11103_v14 = vmin.f32 %v10907_v29, 1.0  ;;  %v10906_v19 = vmax.f32 %v10710_v58, 0.0  ;;  %v10125_v9 = vadd.f32 1.0, %v14545_v56  ;;  %4887 = vmatprep.subr.bf16.mxu1 %v2068_v3 }
 0x528   : > { %v11505_v10 = vadd.f32 %v17464_v12, %v11303_v8  ;;  %v10908_v15 = vmax.f32 %v10712_v37, 0.0  ;;  %v1482_v63 = vunpack.c.l.s8.bf16 %v19225_v45  ;;  %v1484_v20 = vunpack.c.l.s8.bf16 %v19228_v22 }
 0x529   : > { %v12461_v36 = vcombine.low %v19156_v48, %v12460_v50  ;;  %v11305_v28 = vmul.f32 %v17296_v60, %v11103_v14  ;;  %v11102_v46 = vmin.f32 %v10906_v19, 1.0  ;;  %14552 = vrcp.f32 %v10125_v9  ;;  %4847 = vmatpush1.bf16.msra.mxu0 %v2065_v34  ;;  %v19284_v14 = vpop.f32.mrb[100].mxu0 }
 0x52a   : > { %v14547_v49 = vpop.eup %14546  ;;  %v11104_v59 = vmin.f32 %v10908_v15, 1.0  ;;  %4888 = vmatpush1.bf16.msra.mxu1 %v2067_v18  ;;  %4922 = vmatprep.subr.bf16.mxu0 %v1482_v63  ;;  %v1481_v7 = vunpack.c.l.s8.bf16 %v19236_v33  ;;  %v1483_v25 = vunpack.c.l.s8.bf16 %v19239_v4  ;;  %v6525_v6 = vrot.slane %v19242_v47, %v16121_v40  ;;  %v19291_v15 = vpop.f32.mrb[88].mxu1 }
 0x52b   : > { %13254 = vst [vmem:[%s17723_s8 + $0x40] sm:$0xff] %v12461_v36  ;;  %v11507_v24 = vadd.f32 %v17464_v12, %v11305_v28  ;;  %v11304_v48 = vmul.f32 %v17296_v60, %v11102_v46  ;;  %v10127_v41 = vadd.f32 1.0, %v14547_v49  ;;  %4963 = vmatprep.subr.bf16.mxu1 %v1484_v20  ;;  %v7423_v27 = vunpack.c.l.bf16 %v19248_v54  ;;  %v19293_v63 = vpop.f32.mrb[101].mxu0  ;;  %v19300_v46 = vld [vmem:[%s15596_s26 + $0xa68] sm:$0xff]  ;;  %v19302_v49 = vpop.f32.mrb[89].mxu1 }
 0x52c   : > { %v11306_v26 = vmul.f32 %v17296_v60, %v11104_v59  ;;  %13558 = vmatmul.mubr.msk.bf16.vlgmr.msra.gmra.mrb[148].mxu0 %vm2130_vm2, %v15852_v11  ;;  %v7262_v32 = vmul.f32 %v6525_v6, %v19206_v1  ;;  %v6533_v35 = vrot.slane %v19242_v47, %v16132_v52  ;;  %v6529_v39 = vrot.slane %v19242_v47, %v16161_v13  ;;  %v3894_v59 = vpop.f32.mrb[102].mxu0 }
 0x52d   : > { %v11506_v61 = vadd.f32 %v17464_v12, %v11304_v48  ;;  %14554 = vrcp.f32 %v10127_v41  ;;  %13559 = vmatmul.mubr.msk.bf16.vlgmr.msra.gmra.mrb[136].mxu1 %vm2130_vm2, %v15852_v11  ;;  %4923 = vmatpush1.bf16.msra.mxu0 %v1481_v7  ;;  %v7824_v0 = vrot.slane %v7423_v27, %v16121_v40  ;;  %v7832_v3 = vrot.slane %v7423_v27, %v16135_v53  ;;  %v3935_v41 = vpop.f32.mrb[90].mxu1 }
 0x52e   : > { %v14549_v21 = vpop.eup %14548  ;;  %v11508_v1 = vadd.f32 %v17464_v12, %v11306_v26  ;;  %4964 = vmatpush1.bf16.msra.mxu1 %v1483_v25  ;;  %v7264_v62 = vmul.f32 %v6533_v35, %v19211_v43  ;;  %v7263_v17 = vmul.f32 %v6529_v39, %v19213_v31  ;;  %v7828_v29 = vrot.slane %v7423_v27, %v16132_v52  ;;  %v3895_v26 = vpop.f32.mrb[103].mxu0 }
 0x52f   : > { %v14551_v58 = vpop.eup %14550  ;;  %v13822_v56 = vpack.c.bf16 %v11506_v61, %v11505_v10  ;;  %v10126_v8 = vadd.f32 1.0, %v14549_v21  ;;  %v8804_v37 = vrot.slane %v7824_v0, %v16121_v40  ;;  %v8812_v34 = vrot.slane %v7832_v3, %v16121_v40  ;;  %4954 = vmatprep.mubr.bf16.mxu0 %v22080_v55  ;;  %4995 = vmatprep.mubr.bf16.mxu1 %v22080_v55  ;;  %v1288_v61 = vld [vmem:[%s15596_s26 + $0xa78] sm:$0xff]  ;;  %v1285_v0 = vld [vmem:[%s15596_s26 + $0xa60] sm:$0xff]  ;;  %v3936_v3 = vpop.f32.mrb[91].mxu1 }
 0x530   : > { %v13823_v18 = vpack.c.bf16 %v11508_v1, %v11507_v24  ;;  %v10128_v50 = vadd.f32 1.0, %v14551_v58  ;;  %v8808_v43 = vrot.slane %v7828_v29, %v16121_v40  ;;  %v6537_v31 = vrot.slane %v19242_v47, %v16174_v23  ;;  %v1287_v1 = vld [vmem:[%s15596_s26 + $0xa70] sm:$0xff] }
 0x531   : > { %v12472_v19 = vrot.slane %v13822_v56, %v22351_v30  ;;  %14556 = vrcp.f32 %v10126_v8  ;;  %v19287_v9 = vadd.f32 %v8804_v37, %v7262_v32  ;;  %v19289_v10 = vadd.f32 %v8812_v34, %v7264_v62  ;;  %v19327_v56 = vld [vmem:[%s15596_s26 + $0x478] sm:$0xff] }
 0x532   : > { %v12479_v20 = vrot.slane %v13823_v18, %v22351_v30  ;;  %14558 = vrcp.f32 %v10128_v50  ;;  %v19296_v36 = vadd.f32 %v8808_v43, %v7263_v17  ;;  %v7265_v28 = vmul.f32 %v6537_v31, %v19217_v38  ;;  %v19332_v50 = vld [vmem:[%s15596_s26 + $0x460] sm:$0xff]  ;;  %v19335_v43 = vld [vmem:[%s15596_s26 + $0x470] sm:$0xff] }
 0x533   : > { %v14553_v7 = vpop.eup %14552  ;;  %v13670_v25 = vmul.f32 -1.442695, %v19287_v9  ;;  %v13672_v6 = vmul.f32 -1.442695, %v19289_v10  ;;  %v7836_v24 = vrot.slane %v7423_v27, %v16138_v42  ;;  %v1678_v48 = vunpack.c.h.s8.bf16 %v19225_v45 }
 0x534   : > { %v12494_v32 = vcombine.low %v12472_v19, %v12479_v20  ;;  %v10713_v38 = vmul.f32 %v14553_v7, %v19165_v51  ;;  %v13671_v35 = vmul.f32 -1.442695, %v19296_v36  ;;  %v1680_v39 = vunpack.c.h.s8.bf16 %v19228_v22 }
 0x535   : > { %14560 = vpow2.f32 %v13670_v25  ;;  %v8816_v21 = vrot.slane %v7836_v24, %v16121_v40  ;;  %4924 = vmatprep.subr.bf16.mxu0 %v1678_v48  ;;  %v1677_v27 = vunpack.c.h.s8.bf16 %v19236_v33  ;;  %v1679_v45 = vunpack.c.h.s8.bf16 %v19239_v4  ;;  %v19324_v4 = vld [vmem:[%s15596_s26 + $0x468] sm:$0xff] }
 0x536   : > { %v19318_v51 = vrot.slane %v12494_v32, %v22351_v30  ;;  %v10909_v62 = vmax.f32 %v10713_v38, 0.0  ;;  %14562 = vpow2.f32 %v13672_v6  ;;  %4965 = vmatprep.subr.bf16.mxu1 %v1680_v39  ;;  %v1874_v22 = vunpack.c.l.s8.bf16 %v19300_v46 }
 0x537   : > { %v14555_v17 = vpop.eup %14554  ;;  %14564 = vpow2.f32 %v13671_v35  ;;  %v19321_v29 = vadd.f32 %v8816_v21, %v7265_v28  ;;  %4925 = vmatpush1.bf16.msra.mxu0 %v1677_v27  ;;  %4966 = vmatpush1.bf16.msra.mxu1 %v1679_v45  ;;  %v1876_v33 = vunpack.c.l.s8.bf16 %v1288_v61  ;;  %v1873_v58 = vunpack.c.l.s8.bf16 %v1285_v0 }
 0x538   : > { %v11105_v8 = vmin.f32 %v10909_v62, 1.0  ;;  %v10715_v37 = vmul.f32 %v14555_v17, %v19178_v16  ;;  %4926 = vmatprep.subr.bf16.mxu0 %v1874_v22  ;;  %v1875_v34 = vunpack.c.l.s8.bf16 %v1287_v1  ;;  %v2070_v18 = vunpack.c.h.s8.bf16 %v19300_v46 }
 0x539   : > { %v13673_v31 = vmul.f32 -1.442695, %v19321_v29  ;;  %4967 = vmatprep.subr.bf16.mxu1 %v1876_v33  ;;  %v2072_v19 = vunpack.c.h.s8.bf16 %v1288_v61  ;;  %v2069_v20 = vunpack.c.h.s8.bf16 %v1285_v0  ;;  %v2071_v28 = vunpack.c.h.s8.bf16 %v1287_v1 }
 0x53a   : > { %v11307_v59 = vmul.f32 %v17296_v60, %v11105_v8  ;;  %v10911_v7 = vmax.f32 %v10715_v37, 0.0  ;;  %v1486_v25 = vunpack.c.l.s8.bf16 %v19324_v4  ;;  %v1488_v16 = vunpack.c.l.s8.bf16 %v19327_v56  ;;  %v19369_v37 = vpop.f32.mrb[104].mxu0 }
 0x53b   : > { %v14557_v6 = vpop.eup %14556  ;;  %14566 = vpow2.f32 %v13673_v31  ;;  %4927 = vmatpush1.bf16.msra.mxu0 %v1873_v58  ;;  %4968 = vmatpush1.bf16.msra.mxu1 %v1875_v34  ;;  %v1485_v46 = vunpack.c.l.s8.bf16 %v19332_v50  ;;  %v1487_v24 = vunpack.c.l.s8.bf16 %v19335_v43  ;;  %v6541_v48 = vrot.slane %v19242_v47, %v16135_v53 }
 0x53c   : > { %v14559_v41 = vpop.eup %14558  ;;  %v19346_v26 = vadd.f32 %v17464_v12, %v11307_v59  ;;  %v11107_v32 = vmin.f32 %v10911_v7, 1.0  ;;  %v10714_v38 = vmul.f32 %v14557_v6, %v19200_v44  ;;  %4928 = vmatprep.subr.bf16.mxu0 %v2070_v18  ;;  %4969 = vmatprep.subr.bf16.mxu1 %v2072_v19  ;;  %v19350_v35 = vunpack.c.h.bf16 %v19248_v54  ;;  %v19373_v19 = vpop.f32.mrb[92].mxu1 }
 0x53d   : > { %v10716_v39 = vmul.f32 %v14559_v41, %v19209_v2  ;;  %v7266_v61 = vmul.f32 %v6541_v48, %v19284_v14  ;;  %v6549_v0 = vrot.slane %v19242_v47, %v16138_v42  ;;  %v6545_v3 = vrot.slane %v19242_v47, %v16261_v5 }
 0x53e   : > { %v11309_v21 = vmul.f32 %v17296_v60, %v11107_v32  ;;  %v10910_v27 = vmax.f32 %v10714_v38, 0.0  ;;  %v7840_v44 = vrot.slane %v19350_v35, %v16121_v40  ;;  %v7848_v54 = vrot.slane %v19350_v35, %v16135_v53 }
 0x53f   : > { %v14561_v45 = vpop.eup %14560  ;;  %v10912_v1 = vmax.f32 %v10716_v39, 0.0  ;;  %4929 = vmatpush1.bf16.msra.mxu0 %v2069_v20  ;;  %4970 = vmatpush1.bf16.msra.mxu1 %v2071_v28  ;;  %v7268_v2 = vmul.f32 %v6549_v0, %v19291_v15  ;;  %v7267_v14 = vmul.f32 %v6545_v3, %v19293_v63  ;;  %v7844_v62 = vrot.slane %v19350_v35, %v16132_v52  ;;  %v19375_v20 = vpop.f32.mrb[105].mxu0 }
 0x540   : > { %v14563_v22 = vpop.eup %14562  ;;  %v11511_v17 = vadd.f32 %v17464_v12, %v11309_v21  ;;  %v11106_v33 = vmin.f32 %v10910_v27, 1.0  ;;  %v10129_v58 = vadd.f32 1.0, %v14561_v45  ;;  %5004 = vmatprep.subr.bf16.mxu0 %v1486_v25  ;;  %5045 = vmatprep.subr.bf16.mxu1 %v1488_v16  ;;  %v8820_v8 = vrot.slane %v7840_v44, %v16121_v40  ;;  %v19384_v25 = vpop.f32.mrb[93].mxu1 }
 0x541   : > { %v14565_v34 = vpop.eup %14564  ;;  %v11108_v18 = vmin.f32 %v10912_v1, 1.0  ;;  %v10131_v31 = vadd.f32 1.0, %v14563_v22  ;;  %v8828_v15 = vrot.slane %v7848_v54, %v16121_v40  ;;  %v8824_v63 = vrot.slane %v7844_v62, %v16121_v40  ;;  %v3976_v16 = vpop.f32.mrb[106].mxu0  ;;  %v1290_v1 = vld [vmem:[%s15596_s26 + $0xa88] sm:$0xff]  ;;  %v1292_v22 = vld [vmem:[%s15596_s26 + $0xa98] sm:$0xff] }
 0x542   : > { %v11308_v28 = vmul.f32 %v17296_v60, %v11106_v33  ;;  %14568 = vrcp.f32 %v10129_v58  ;;  %v10130_v59 = vadd.f32 1.0, %v14565_v34  ;;  %13560 = vmatmul.mubr.msk.bf16.vlgmr.msra.gmra.mrb[152].mxu0 %vm2130_vm2, %v15852_v11  ;;  %13561 = vmatmul.mubr.msk.bf16.vlgmr.msra.gmra.mrb[140].mxu1 %vm2130_vm2, %v15852_v11  ;;  %v19382_v7 = vadd.f32 %v8820_v8, %v7266_v61  ;;  %v4017_v32 = vpop.f32.mrb[94].mxu1  ;;  %v3977_v38 = vpop.f32.mrb[107].mxu0  ;;  %v19409_v33 = vld [vmem:[%s15596_s26 + $0xa80] sm:$0xff]  ;;  %v19412_v58 = vld [vmem:[%s15596_s26 + $0xa90] sm:$0xff]  ;;  %v19422_v34 = vld [vmem:[%s15596_s26 + $0x488] sm:$0xff] }
 0x543   : > { %v11310_v6 = vmul.f32 %v17296_v60, %v11108_v18  ;;  %14570 = vrcp.f32 %v10131_v31  ;;  %5005 = vmatpush1.bf16.msra.mxu0 %v1485_v46  ;;  %5046 = vmatpush1.bf16.msra.mxu1 %v1487_v24  ;;  %v19387_v48 = vadd.f32 %v8828_v15, %v7268_v2  ;;  %v19389_v41 = vadd.f32 %v8824_v63, %v7267_v14  ;;  %v4018_v46 = vpop.f32.mrb[95].mxu1  ;;  %v19425_v18 = vld [vmem:[%s15596_s26 + $0x498] sm:$0xff]  ;;  %v19430_v63 = vld [vmem:[%s15596_s26 + $0x480] sm:$0xff] }
 0x544   : > { %v11510_v39 = vadd.f32 %v17464_v12, %v11308_v28  ;;  %14572 = vrcp.f32 %v10130_v59  ;;  %v13674_v61 = vmul.f32 -1.442695, %v19382_v7  ;;  %v6553_v0 = vrot.slane %v19242_v47, %v16268_v57  ;;  %5036 = vmatprep.mubr.bf16.mxu0 %v22080_v55  ;;  %5077 = vmatprep.mubr.bf16.mxu1 %v22080_v55  ;;  %v19437_v32 = vld [vmem:[%s15606_s3 + $0x58] sm:$0xff]  ;;  %v19440_v38 = vld [vmem:[%s15610_s17 + $0x58] sm:$0xff] }
 0x545   : > { %v14567_v24 = vpop.eup %14566  ;;  %v11512_v3 = vadd.f32 %v17464_v12, %v11310_v6  ;;  %v13676_v21 = vmul.f32 -1.442695, %v19387_v48  ;;  %v13675_v27 = vmul.f32 -1.442695, %v19389_v41  ;;  %v7852_v44 = vrot.slane %v19350_v35, %v16138_v42  ;;  %v19434_v6 = vld [vmem:[%s15596_s26 + $0x490] sm:$0xff] }
 0x546   : > { %v13824_v47 = vpack.c.bf16 %v11510_v39, %v19346_v26  ;;  %v10132_v54 = vadd.f32 1.0, %v14567_v24  ;;  %14574 = vpow2.f32 %v13674_v61  ;;  %v7269_v45 = vmul.f32 %v6553_v0, %v19302_v49 }
 0x547   : > { %v13825_v2 = vpack.c.bf16 %v11512_v3, %v11511_v17  ;;  %14576 = vpow2.f32 %v13676_v21  ;;  %v8832_v14 = vrot.slane %v7852_v44, %v16121_v40  ;;  %v1682_v62 = vunpack.c.h.s8.bf16 %v19324_v4 }
 0x548   : > { %v12486_v26 = vrot.slane %v13824_v47, %v22351_v30  ;;  %14578 = vrcp.f32 %v10132_v54  ;;  %v1684_v49 = vunpack.c.h.s8.bf16 %v19327_v56  ;;  %v1681_v35 = vunpack.c.h.s8.bf16 %v19332_v50 }
 0x549   : > { %v12493_v17 = vrot.slane %v13825_v2, %v22351_v30  ;;  %14580 = vpow2.f32 %v13675_v27  ;;  %v19418_v8 = vadd.f32 %v8832_v14, %v7269_v45  ;;  %5006 = vmatprep.subr.bf16.mxu0 %v1682_v62  ;;  %v1683_v4 = vunpack.c.h.s8.bf16 %v19335_v43 }
 0x54a   : > { %5047 = vmatprep.subr.bf16.mxu1 %v1684_v49  ;;  %5007 = vmatpush1.bf16.msra.mxu0 %v1681_v35  ;;  %v1878_v56 = vunpack.c.l.s8.bf16 %v1290_v1  ;;  %v1880_v31 = vunpack.c.l.s8.bf16 %v1292_v22  ;;  %v1877_v50 = vunpack.c.l.s8.bf16 %v19409_v33  ;;  %v1879_v15 = vunpack.c.l.s8.bf16 %v19412_v58 }
 0x54b   : > { %v12495_v28 = vcombine.low %v12486_v26, %v12493_v17  ;;  %v13677_v59 = vmul.f32 -1.442695, %v19418_v8  ;;  %5048 = vmatpush1.bf16.msra.mxu1 %v1683_v4  ;;  %v2074_v43 = vunpack.c.h.s8.bf16 %v1290_v1  ;;  %v2076_v16 = vunpack.c.h.s8.bf16 %v1292_v22 }
 0x54c   : > { %v14569_v39 = vpop.eup %14568  ;;  %5008 = vmatprep.subr.bf16.mxu0 %v1878_v56  ;;  %5049 = vmatprep.subr.bf16.mxu1 %v1880_v31  ;;  %v2073_v61 = vunpack.c.h.s8.bf16 %v19409_v33  ;;  %v2075_v0 = vunpack.c.h.s8.bf16 %v19412_v58  ;;  %v1490_v46 = vunpack.c.l.s8.bf16 %v19422_v34  ;;  %v1492_v24 = vunpack.c.l.s8.bf16 %v19425_v18  ;;  %v19469_v31 = vpop.f32.mrb[96].mxu1 }
 0x54d   : > { %v14571_v3 = vpop.eup %14570  ;;  %v12509_v21 = vrot.slane %v12495_v28, %v22351_v30  ;;  %v10717_v27 = vmul.f32 %v14569_v39, %v19287_v9  ;;  %14582 = vpow2.f32 %v13677_v59  ;;  %v1489_v44 = vunpack.c.l.s8.bf16 %v19430_v63 }
 0x54e   : > { %v14573_v47 = vpop.eup %14572  ;;  %v10719_v54 = vmul.f32 %v14571_v3, %v19289_v10  ;;  %5009 = vmatpush1.bf16.msra.mxu0 %v1877_v50  ;;  %v1491_v45 = vunpack.c.l.s8.bf16 %v19434_v6  ;;  %v6557_v1 = vrot.slane %v19437_v32, %v16121_v40  ;;  %v19454_v2 = vunpack.c.l.bf16 %v19440_v38 }
 0x54f   : > { %v12510_v14 = vcombine.low %v19318_v51, %v12509_v21  ;;  %v10913_v62 = vmax.f32 %v10717_v27, 0.0  ;;  %v10718_v9 = vmul.f32 %v14573_v47, %v19296_v36  ;;  %5050 = vmatpush1.bf16.msra.mxu1 %v1879_v15  ;;  %5010 = vmatprep.subr.bf16.mxu0 %v2074_v43  ;;  %v6565_v10 = vrot.slane %v19437_v32, %v16132_v52  ;;  %v19465_v51 = vpop.f32.mrb[108].mxu0 }
 0x550   : > { %v14575_v22 = vpop.eup %14574  ;;  %v10915_v33 = vmax.f32 %v10719_v54, 0.0  ;;  %5051 = vmatprep.subr.bf16.mxu1 %v2076_v16  ;;  %v7270_v58 = vmul.f32 %v6557_v1, %v19369_v37  ;;  %v7856_v26 = vrot.slane %v19454_v2, %v16121_v40  ;;  %v7864_v49 = vrot.slane %v19454_v2, %v16135_v53  ;;  %v19471_v50 = vpop.f32.mrb[109].mxu0 }
 0x551   : > { %v14577_v35 = vpop.eup %14576  ;;  %13255 = vst [vmem:[%s17723_s8 + $0x48] sm:$0xff] %v12510_v14  ;;  %v11109_v36 = vmin.f32 %v10913_v62, 1.0  ;;  %v10914_v17 = vmax.f32 %v10718_v9, 0.0  ;;  %v10133_v4 = vadd.f32 1.0, %v14575_v22  ;;  %v7272_v56 = vmul.f32 %v6565_v10, %v19373_v19  ;;  %v19475_v16 = vpop.f32.mrb[97].mxu1 }
 0x552   : > { %v14579_v37 = vpop.eup %14578  ;;  %v11111_v15 = vmin.f32 %v10915_v33, 1.0  ;;  %v10135_v28 = vadd.f32 1.0, %v14577_v35  ;;  %5011 = vmatpush1.bf16.msra.mxu0 %v2073_v61  ;;  %v8836_v59 = vrot.slane %v7856_v26, %v16121_v40  ;;  %v8844_v43 = vrot.slane %v7864_v49, %v16121_v40  ;;  %v4058_v39 = vpop.f32.mrb[110].mxu0 }
 0x553   : > { %v14581_v3 = vpop.eup %14580  ;;  %v11311_v21 = vmul.f32 %v17296_v60, %v11109_v36  ;;  %v11110_v27 = vmin.f32 %v10914_v17, 1.0  ;;  %v10720_v19 = vmul.f32 %v14579_v37, %v19321_v29  ;;  %14584 = vrcp.f32 %v10133_v4  ;;  %5052 = vmatpush1.bf16.msra.mxu1 %v2075_v0  ;;  %5086 = vmatprep.subr.bf16.mxu0 %v1490_v46  ;;  %v4099_v47 = vpop.f32.mrb[98].mxu1  ;;  %v19506_v37 = vld [vmem:[%s15596_s26 + $0xaa8] sm:$0xff] }
 0x554   : > { %v4059_v54 = vpop.f32.mrb[111].mxu0  ;;  %v11313_v61 = vmul.f32 %v17296_v60, %v11111_v15  ;;  %14586 = vrcp.f32 %v10135_v28  ;;  %v10134_v1 = vadd.f32 1.0, %v14581_v3  ;;  %5127 = vmatprep.subr.bf16.mxu1 %v1492_v24  ;;  %v19480_v14 = vadd.f32 %v8836_v59, %v7270_v58  ;;  %v4100_v62 = vpop.f32.mrb[99].mxu1  ;;  %v1296_v59 = vld [vmem:[%s15596_s26 + $0xab8] sm:$0xff] }
 0x555   : > { %v11513_v9 = vadd.f32 %v17464_v12, %v11311_v21  ;;  %v11312_v10 = vmul.f32 %v17296_v60, %v11110_v27  ;;  %v10916_v22 = vmax.f32 %v10720_v19, 0.0  ;;  %13562 = vmatmul.mubr.msk.bf16.vlgmr.msra.gmra.mrb[156].mxu0 %vm2130_vm2, %v15852_v11  ;;  %v19486_v29 = vadd.f32 %v8844_v43, %v7272_v56  ;;  %v19514_v43 = vld [vmem:[%s15596_s26 + $0xaa0] sm:$0xff]  ;;  %v19522_v19 = vld [vmem:[%s15596_s26 + $0xab0] sm:$0xff] }
 0x556   : > { %v11515_v0 = vadd.f32 %v17464_v12, %v11313_v61  ;;  %14588 = vrcp.f32 %v10134_v1  ;;  %13563 = vmatmul.mubr.msk.bf16.vlgmr.msra.gmra.mrb[144].mxu1 %vm2130_vm2, %v15852_v11  ;;  %5087 = vmatpush1.bf16.msra.mxu0 %v1489_v44  ;;  %v13678_v46 = vmul.f32 -1.442695, %v19480_v14  ;;  %v6561_v24 = vrot.slane %v19437_v32, %v16161_v13 }
 0x557   : > { %v14583_v33 = vpop.eup %14582  ;;  %v11514_v58 = vadd.f32 %v17464_v12, %v11312_v10  ;;  %v11112_v26 = vmin.f32 %v10916_v22, 1.0  ;;  %5128 = vmatpush1.bf16.msra.mxu1 %v1491_v45  ;;  %v13680_v49 = vmul.f32 -1.442695, %v19486_v29  ;;  %v7860_v35 = vrot.slane %v19454_v2, %v16132_v52  ;;  %5118 = vmatprep.mubr.bf16.mxu0 %v22080_v55 }
 0x558   : > { %v10136_v44 = vadd.f32 1.0, %v14583_v33  ;;  %14590 = vpow2.f32 %v13678_v46  ;;  %v7271_v36 = vmul.f32 %v6561_v24, %v19375_v20  ;;  %v6569_v17 = vrot.slane %v19437_v32, %v16174_v23  ;;  %5159 = vmatprep.mubr.bf16.mxu1 %v22080_v55 }
 0x559   : > { %v13826_v45 = vpack.c.bf16 %v11514_v58, %v11513_v9  ;;  %v11314_v4 = vmul.f32 %v17296_v60, %v11112_v26  ;;  %14592 = vpow2.f32 %v13680_v49  ;;  %v8840_v56 = vrot.slane %v7860_v35, %v16121_v40  ;;  %v19544_v58 = vld [vmem:[%s15596_s26 + $0x4a0] sm:$0xff] }
 0x55a   : > { %14594 = vrcp.f32 %v10136_v44  ;;  %v7273_v15 = vmul.f32 %v6569_v17, %v19384_v25  ;;  %v7868_v20 = vrot.slane %v19454_v2, %v16138_v42  ;;  %v1686_v28 = vunpack.c.h.s8.bf16 %v19422_v34  ;;  %v19549_v17 = vpop.f32.mrb[112].mxu0 }
 0x55b   : > { %v12521_v39 = vrot.slane %v13826_v45, %v22351_v30  ;;  %v11516_v3 = vadd.f32 %v17464_v12, %v11314_v4  ;;  %v19518_v21 = vadd.f32 %v8840_v56, %v7271_v36  ;;  %v1688_v27 = vunpack.c.h.s8.bf16 %v19425_v18 }
 0x55c   : > { %v8848_v25 = vrot.slane %v7868_v20, %v16121_v40  ;;  %5088 = vmatprep.subr.bf16.mxu0 %v1686_v28  ;;  %v1685_v2 = vunpack.c.h.s8.bf16 %v19430_v63  ;;  %v1687_v34 = vunpack.c.h.s8.bf16 %v19434_v6  ;;  %v1882_v47 = vunpack.c.l.s8.bf16 %v19506_v37  ;;  %v19558_v20 = vpop.f32.mrb[113].mxu0 }
 0x55d   : > { %v14585_v54 = vpop.eup %14584  ;;  %v13827_v61 = vpack.c.bf16 %v11516_v3, %v11515_v0  ;;  %v13679_v1 = vmul.f32 -1.442695, %v19518_v21  ;;  %5129 = vmatprep.subr.bf16.mxu1 %v1688_v27  ;;  %v1884_v62 = vunpack.c.l.s8.bf16 %v1296_v59  ;;  %v1881_v18 = vunpack.c.l.s8.bf16 %v19514_v43  ;;  %v19536_v0 = vld [vmem:[%s15596_s26 + $0x4a8] sm:$0xff] }
 0x55e   : > { %v14587_v9 = vpop.eup %14586  ;;  %v10721_v10 = vmul.f32 %v14585_v54, %v19382_v7  ;;  %v19531_v22 = vadd.f32 %v8848_v25, %v7273_v15  ;;  %5089 = vmatpush1.bf16.msra.mxu0 %v1685_v2  ;;  %5130 = vmatpush1.bf16.msra.mxu1 %v1687_v34  ;;  %v1883_v63 = vunpack.c.l.s8.bf16 %v19522_v19  ;;  %v2078_v6 = vunpack.c.h.s8.bf16 %v19506_v37  ;;  %v19541_v7 = vld [vmem:[%s15596_s26 + $0x4b8] sm:$0xff]  ;;  %v19554_v37 = vld [vmem:[%s15596_s26 + $0x4b0] sm:$0xff]  ;;  %v19556_v15 = vpop.f32.mrb[100].mxu1 }
 0x55f   : > { %v12528_v46 = vrot.slane %v13827_v61, %v22351_v30  ;;  %v10723_v24 = vmul.f32 %v14587_v9, %v19387_v48  ;;  %14596 = vpow2.f32 %v13679_v1  ;;  %5090 = vmatprep.subr.bf16.mxu0 %v1882_v47  ;;  %5131 = vmatprep.subr.bf16.mxu1 %v1884_v62  ;;  %v2080_v33 = vunpack.c.h.s8.bf16 %v1296_v59  ;;  %v19562_v3 = vpop.f32.mrb[101].mxu1 }
 0x560   : > { %v14589_v26 = vpop.eup %14588  ;;  %v10917_v49 = vmax.f32 %v10721_v10, 0.0  ;;  %v13681_v35 = vmul.f32 -1.442695, %v19531_v22  ;;  %v2077_v44 = vunpack.c.h.s8.bf16 %v19514_v43  ;;  %v2079_v36 = vunpack.c.h.s8.bf16 %v19522_v19  ;;  %v4181_v47 = vpop.f32.mrb[102].mxu1 }
 0x561   : > { %v12543_v48 = vcombine.low %v12521_v39, %v12528_v46  ;;  %v10919_v45 = vmax.f32 %v10723_v24, 0.0  ;;  %v10722_v4 = vmul.f32 %v14589_v26, %v19389_v41  ;;  %v1494_v56 = vunpack.c.l.s8.bf16 %v19536_v0  ;;  %v4140_v41 = vpop.f32.mrb[114].mxu0  ;;  %v4182_v10 = vpop.f32.mrb[103].mxu1 }
 0x562   : > { %v14591_v28 = vpop.eup %14590  ;;  %v11113_v59 = vmin.f32 %v10917_v49, 1.0  ;;  %14598 = vpow2.f32 %v13681_v35  ;;  %5091 = vmatpush1.bf16.msra.mxu0 %v1881_v18  ;;  %5132 = vmatpush1.bf16.msra.mxu1 %v1883_v63  ;;  %v1496_v43 = vunpack.c.l.s8.bf16 %v19541_v7  ;;  %v1493_v39 = vunpack.c.l.s8.bf16 %v19544_v58  ;;  %v4141_v54 = vpop.f32.mrb[115].mxu0 }
 0x563   : > { %v14593_v27 = vpop.eup %14592  ;;  %v19565_v19 = vrot.slane %v12543_v48, %v22351_v30  ;;  %v11115_v25 = vmin.f32 %v10919_v45, 1.0  ;;  %v10918_v2 = vmax.f32 %v10722_v4, 0.0  ;;  %v10137_v34 = vadd.f32 1.0, %v14591_v28  ;;  %5092 = vmatprep.subr.bf16.mxu0 %v2078_v6  ;;  %5133 = vmatprep.subr.bf16.mxu1 %v2080_v33 }
 0x564   : > { %v14595_v61 = vpop.eup %14594  ;;  %v11315_v1 = vmul.f32 %v17296_v60, %v11113_v59  ;;  %v10139_v62 = vadd.f32 1.0, %v14593_v27  ;;  %v1495_v18 = vunpack.c.l.s8.bf16 %v19554_v37  ;;  %v6573_v9 = vrot.slane %v19437_v32, %v16135_v53 }
 0x565   : > { %v11317_v63 = vmul.f32 %v17296_v60, %v11115_v25  ;;  %v11114_v46 = vmin.f32 %v10918_v2, 1.0  ;;  %v10724_v24 = vmul.f32 %v14595_v61, %v19418_v8  ;;  %14600 = vrcp.f32 %v10137_v34 }
 0x566   : > { %v11517_v6 = vadd.f32 %v17464_v12, %v11315_v1  ;;  %14602 = vrcp.f32 %v10139_v62  ;;  %5093 = vmatpush1.bf16.msra.mxu0 %v2077_v44  ;;  %5134 = vmatpush1.bf16.msra.mxu1 %v2079_v36  ;;  %v7274_v33 = vmul.f32 %v6573_v9, %v19465_v51  ;;  %v7426_v26 = vunpack.c.h.bf16 %v19440_v38 }
 0x567   : > { %v11519_v49 = vadd.f32 %v17464_v12, %v11317_v63  ;;  %v11316_v35 = vmul.f32 %v17296_v60, %v11114_v46  ;;  %v10920_v48 = vmax.f32 %v10724_v24, 0.0  ;;  %5168 = vmatprep.subr.bf16.mxu0 %v1494_v56  ;;  %5209 = vmatprep.subr.bf16.mxu1 %v1496_v43  ;;  %v6581_v8 = vrot.slane %v19437_v32, %v16138_v42 }
 0x568   : > { %v7872_v45 = vrot.slane %v7426_v26, %v16121_v40  ;;  %v7880_v4 = vrot.slane %v7426_v26, %v16135_v53  ;;  %v6577_v44 = vrot.slane %v19437_v32, %v16261_v5  ;;  %v7876_v51 = vrot.slane %v7426_v26, %v16132_v52 }
 0x569   : > { %v14597_v38 = vpop.eup %14596  ;;  %v11518_v36 = vadd.f32 %v17464_v12, %v11316_v35  ;;  %v11116_v28 = vmin.f32 %v10920_v48, 1.0  ;;  %13564 = vmatmul.mubr.msk.bf16.vlgmr.msra.gmra.mrb[160].mxu0 %vm2130_vm2, %v15852_v11  ;;  %13565 = vmatmul.mubr.msk.bf16.vlgmr.msra.gmra.mrb[148].mxu1 %vm2130_vm2, %v15852_v11  ;;  %v7276_v56 = vmul.f32 %v6581_v8, %v19469_v31  ;;  %v6585_v59 = vrot.slane %v19437_v32, %v16268_v57 }
 0x56a   : > { %v10138_v43 = vadd.f32 1.0, %v14597_v38  ;;  %5169 = vmatpush1.bf16.msra.mxu0 %v1493_v39  ;;  %5210 = vmatpush1.bf16.msra.mxu1 %v1495_v18  ;;  %v8852_v41 = vrot.slane %v7872_v45, %v16121_v40  ;;  %v8860_v27 = vrot.slane %v7880_v4, %v16121_v40  ;;  %v7275_v25 = vmul.f32 %v6577_v44, %v19471_v50  ;;  %v1300_v4 = vld [vmem:[%s15596_s26 + $0xad8] sm:$0xff]  ;;  %v19633_v38 = vpop.f32.mrb[104].mxu1 }
 0x56b   : > { %v13828_v2 = vpack.c.bf16 %v11518_v36, %v11517_v6  ;;  %v11318_v34 = vmul.f32 %v17296_v60, %v11116_v28  ;;  %v8856_v47 = vrot.slane %v7876_v51, %v16121_v40  ;;  %v7277_v54 = vmul.f32 %v6585_v59, %v19475_v16  ;;  %5200 = vmatprep.mubr.bf16.mxu0 %v22080_v55  ;;  %v19638_v59 = vpop.f32.mrb[105].mxu1 }
 0x56c   : > { %v14599_v31 = vpop.eup %14598  ;;  %14604 = vrcp.f32 %v10138_v43  ;;  %v19600_v32 = vadd.f32 %v8852_v41, %v7274_v33  ;;  %v19602_v39 = vadd.f32 %v8860_v27, %v7276_v56  ;;  %v7884_v61 = vrot.slane %v7426_v26, %v16138_v42  ;;  %5241 = vmatprep.mubr.bf16.mxu1 %v22080_v55  ;;  %v1298_v26 = vld [vmem:[%s15596_s26 + $0xac8] sm:$0xff] }
 0x56d   : > { %v12535_v50 = vrot.slane %v13828_v2, %v22351_v30  ;;  %v11520_v1 = vadd.f32 %v17464_v12, %v11318_v34  ;;  %v10140_v62 = vadd.f32 1.0, %v14599_v31  ;;  %v19608_v18 = vadd.f32 %v8856_v47, %v7275_v25  ;;  %v19642_v25 = vld [vmem:[%s15596_s26 + $0x4c8] sm:$0xff]  ;;  %v19645_v2 = vld [vmem:[%s15596_s26 + $0x4d8] sm:$0xff]  ;;  %v4263_v34 = vpop.f32.mrb[106].mxu1 }
 0x56e   : > { %v13682_v16 = vmul.f32 -1.442695, %v19600_v32  ;;  %v13684_v9 = vmul.f32 -1.442695, %v19602_v39  ;;  %v8864_v10 = vrot.slane %v7884_v61, %v16121_v40  ;;  %v1690_v63 = vunpack.c.h.s8.bf16 %v19536_v0  ;;  %v19623_v0 = vld [vmem:[%s15596_s26 + $0xac0] sm:$0xff] }
 0x56f   : > { %v14601_v46 = vpop.eup %14600  ;;  %v13829_v24 = vpack.c.bf16 %v11520_v1, %v11519_v49  ;;  %14606 = vrcp.f32 %v10140_v62  ;;  %v13683_v6 = vmul.f32 -1.442695, %v19608_v18  ;;  %v1692_v33 = vunpack.c.h.s8.bf16 %v19541_v7  ;;  %v19625_v49 = vpop.f32.mrb[116].mxu0 }
 0x570   : > { %v14603_v35 = vpop.eup %14602  ;;  %v10725_v48 = vmul.f32 %v14601_v46, %v19480_v14  ;;  %14608 = vpow2.f32 %v13682_v16  ;;  %v19618_v8 = vadd.f32 %v8864_v10, %v7277_v54  ;;  %5170 = vmatprep.subr.bf16.mxu0 %v1690_v63  ;;  %v1689_v45 = vunpack.c.h.s8.bf16 %v19544_v58  ;;  %v19631_v14 = vld [vmem:[%s15596_s26 + $0xad0] sm:$0xff]  ;;  %v19635_v58 = vpop.f32.mrb[117].mxu0  ;;  %v19657_v46 = vld [vmem:[%s15606_s3 + $0x60] sm:$0xff] }
 0x571   : > { %v12542_v44 = vrot.slane %v13829_v24, %v22351_v30  ;;  %v10727_v7 = vmul.f32 %v14603_v35, %v19486_v29  ;;  %14610 = vpow2.f32 %v13684_v9  ;;  %5211 = vmatprep.subr.bf16.mxu1 %v1692_v33  ;;  %v1691_v51 = vunpack.c.h.s8.bf16 %v19554_v37  ;;  %v4222_v29 = vpop.f32.mrb[118].mxu0  ;;  %v4264_v1 = vpop.f32.mrb[107].mxu1  ;;  %v19654_v63 = vld [vmem:[%s15596_s26 + $0x4d0] sm:$0xff] }
 0x572   : > { %v10921_v36 = vmax.f32 %v10725_v48, 0.0  ;;  %14612 = vpow2.f32 %v13683_v6  ;;  %v13685_v28 = vmul.f32 -1.442695, %v19618_v8  ;;  %5171 = vmatpush1.bf16.msra.mxu0 %v1689_v45  ;;  %v1886_v56 = vunpack.c.l.s8.bf16 %v1298_v26  ;;  %v4223_v47 = vpop.f32.mrb[119].mxu0  ;;  %v19660_v24 = vld [vmem:[%s15610_s17 + $0x60] sm:$0xff] }
 0x573   : > { %v12544_v43 = vcombine.low %v12535_v50, %v12542_v44  ;;  %v10923_v37 = vmax.f32 %v10727_v7, 0.0  ;;  %5212 = vmatpush1.bf16.msra.mxu1 %v1691_v51  ;;  %v1888_v41 = vunpack.c.l.s8.bf16 %v1300_v4  ;;  %v1885_v27 = vunpack.c.l.s8.bf16 %v19623_v0  ;;  %v19649_v50 = vld [vmem:[%s15596_s26 + $0x4c0] sm:$0xff] }
 0x574   : > { %v11117_v54 = vmin.f32 %v10921_v36, 1.0  ;;  %14614 = vpow2.f32 %v13685_v28  ;;  %5172 = vmatprep.subr.bf16.mxu0 %v1886_v56  ;;  %v1887_v31 = vunpack.c.l.s8.bf16 %v19631_v14  ;;  %v2082_v61 = vunpack.c.h.s8.bf16 %v1298_v26 }
 0x575   : > { %v12558_v62 = vrot.slane %v12544_v43, %v22351_v30  ;;  %v11119_v16 = vmin.f32 %v10923_v37, 1.0  ;;  %5213 = vmatprep.subr.bf16.mxu1 %v1888_v41  ;;  %v2084_v9 = vunpack.c.h.s8.bf16 %v1300_v4  ;;  %v2081_v10 = vunpack.c.h.s8.bf16 %v19623_v0 }
 0x576   : > { %v14605_v6 = vpop.eup %14604  ;;  %v11319_v33 = vmul.f32 %v17296_v60, %v11117_v54  ;;  %5173 = vmatpush1.bf16.msra.mxu0 %v1885_v27  ;;  %v2083_v26 = vunpack.c.h.s8.bf16 %v19631_v14  ;;  %v1498_v35 = vunpack.c.l.s8.bf16 %v19642_v25  ;;  %v1500_v48 = vunpack.c.l.s8.bf16 %v19645_v2 }
 0x577   : > { %v12559_v45 = vcombine.low %v19565_v19, %v12558_v62  ;;  %v11321_v4 = vmul.f32 %v17296_v60, %v11119_v16  ;;  %v10726_v0 = vmul.f32 %v14605_v6, %v19518_v21  ;;  %5214 = vmatpush1.bf16.msra.mxu1 %v1887_v31  ;;  %5174 = vmatprep.subr.bf16.mxu0 %v2082_v61  ;;  %v1497_v44 = vunpack.c.l.s8.bf16 %v19649_v50 }
 0x578   : > { %v19671_v7 = vadd.f32 %v17464_v12, %v11319_v33  ;;  %5215 = vmatprep.subr.bf16.mxu1 %v2084_v9  ;;  %v1499_v51 = vunpack.c.l.s8.bf16 %v19654_v63  ;;  %v6589_v14 = vrot.slane %v19657_v46, %v16121_v40  ;;  %v19677_v36 = vunpack.c.l.bf16 %v19660_v24 }
 0x579   : > { %v14607_v19 = vpop.eup %14606  ;;  %13256 = vst [vmem:[%s17723_s8 + $0x50] sm:$0xff] %v12559_v45  ;;  %v19681_v21 = vadd.f32 %v17464_v12, %v11321_v4  ;;  %v10922_v28 = vmax.f32 %v10726_v0, 0.0  ;;  %v6597_v56 = vrot.slane %v19657_v46, %v16132_v52  ;;  %v6593_v29 = vrot.slane %v19657_v46, %v16161_v13 }
 0x57a   : > { %v14609_v43 = vpop.eup %14608  ;;  %v10728_v37 = vmul.f32 %v14607_v19, %v19531_v22  ;;  %5175 = vmatpush1.bf16.msra.mxu0 %v2081_v10  ;;  %v7278_v41 = vmul.f32 %v6589_v14, %v19549_v17  ;;  %v7888_v27 = vrot.slane %v19677_v36, %v16121_v40  ;;  %v7896_v34 = vrot.slane %v19677_v36, %v16135_v53 }
 0x57b   : > { %v14611_v47 = vpop.eup %14610  ;;  %v11118_v54 = vmin.f32 %v10922_v28, 1.0  ;;  %v10141_v31 = vadd.f32 1.0, %v14609_v43  ;;  %5216 = vmatpush1.bf16.msra.mxu1 %v2083_v26  ;;  %5250 = vmatprep.subr.bf16.mxu0 %v1498_v35  ;;  %v7280_v61 = vmul.f32 %v6597_v56, %v19556_v15  ;;  %v7279_v1 = vmul.f32 %v6593_v29, %v19558_v20  ;;  %v19717_v28 = vpop.f32.mrb[120].mxu0 }
 0x57c   : > { %v14613_v62 = vpop.eup %14612  ;;  %v10924_v22 = vmax.f32 %v10728_v37, 0.0  ;;  %v10143_v16 = vadd.f32 1.0, %v14611_v47  ;;  %5291 = vmatprep.subr.bf16.mxu1 %v1500_v48  ;;  %v8868_v17 = vrot.slane %v7888_v27, %v16121_v40  ;;  %v8876_v9 = vrot.slane %v7896_v34, %v16121_v40  ;;  %v19724_v43 = vpop.f32.mrb[108].mxu1  ;;  %v19733_v47 = vld [vmem:[%s15596_s26 + $0xaf8] sm:$0xff] }
 0x57d   : > { %v11320_v10 = vmul.f32 %v17296_v60, %v11118_v54  ;;  %14616 = vrcp.f32 %v10141_v31  ;;  %v10142_v6 = vadd.f32 1.0, %v14613_v62  ;;  %13566 = vmatmul.mubr.msk.bf16.vlgmr.msra.gmra.mrb[164].mxu0 %vm2130_vm2, %v15852_v11  ;;  %v7892_v15 = vrot.slane %v19677_v36, %v16132_v52  ;;  %v19726_v37 = vpop.f32.mrb[121].mxu0  ;;  %v19735_v54 = vpop.f32.mrb[109].mxu1  ;;  %v19741_v62 = vld [vmem:[%s15596_s26 + $0xae0] sm:$0xff] }
 0x57e   : > { %v14615_v33 = vpop.eup %14614  ;;  %v11120_v20 = vmin.f32 %v10924_v22, 1.0  ;;  %14618 = vrcp.f32 %v10143_v16  ;;  %13567 = vmatmul.mubr.msk.bf16.vlgmr.msra.gmra.mrb[152].mxu1 %vm2130_vm2, %v15852_v11  ;;  %5251 = vmatpush1.bf16.msra.mxu0 %v1497_v44  ;;  %v19704_v26 = vadd.f32 %v8868_v17, %v7278_v41  ;;  %v19706_v35 = vadd.f32 %v8876_v9, %v7280_v61  ;;  %v4304_v31 = vpop.f32.mrb[122].mxu0 }
 0x57f   : > { %v11522_v48 = vadd.f32 %v17464_v12, %v11320_v10  ;;  %14620 = vrcp.f32 %v10142_v6  ;;  %v10144_v45 = vadd.f32 1.0, %v14615_v33  ;;  %5292 = vmatpush1.bf16.msra.mxu1 %v1499_v51  ;;  %v8872_v4 = vrot.slane %v7892_v15, %v16121_v40  ;;  %5282 = vmatprep.mubr.bf16.mxu0 %v22080_v55  ;;  %v4305_v22 = vpop.f32.mrb[123].mxu0 }
 0x580   : > { %v11322_v0 = vmul.f32 %v17296_v60, %v11120_v20  ;;  %v13686_v14 = vmul.f32 -1.442695, %v19704_v26  ;;  %v13688_v44 = vmul.f32 -1.442695, %v19706_v35  ;;  %v6601_v19 = vrot.slane %v19657_v46, %v16174_v23  ;;  %5323 = vmatprep.mubr.bf16.mxu1 %v22080_v55 }
 0x581   : > { %v13830_v51 = vpack.c.bf16 %v11522_v48, %v19671_v7  ;;  %14622 = vrcp.f32 %v10144_v45  ;;  %v19720_v56 = vadd.f32 %v8872_v4, %v7279_v1  ;;  %v7900_v29 = vrot.slane %v19677_v36, %v16138_v42  ;;  %v1302_v7 = vld [vmem:[%s15596_s26 + $0xae8] sm:$0xff]  ;;  %v19757_v45 = vld [vmem:[%s15596_s26 + $0x4f8] sm:$0xff]  ;;  %v19763_v4 = vld [vmem:[%s15596_s26 + $0x4e0] sm:$0xff] }
 0x582   : > { %v11524_v41 = vadd.f32 %v17464_v12, %v11322_v0  ;;  %14624 = vpow2.f32 %v13686_v14  ;;  %v7281_v27 = vmul.f32 %v6601_v19, %v19562_v3  ;;  %v1694_v34 = vunpack.c.h.s8.bf16 %v19642_v25  ;;  %v19744_v3 = vld [vmem:[%s15596_s26 + $0xaf0] sm:$0xff]  ;;  %v4345_v25 = vpop.f32.mrb[110].mxu1  ;;  %v19754_v48 = vld [vmem:[%s15596_s26 + $0x4e8] sm:$0xff] }
 0x583   : > { %v12570_v36 = vrot.slane %v13830_v51, %v22351_v30  ;;  %14626 = vpow2.f32 %v13688_v44  ;;  %v13687_v61 = vmul.f32 -1.442695, %v19720_v56  ;;  %v8880_v1 = vrot.slane %v7900_v29, %v16121_v40  ;;  %v4346_v6 = vpop.f32.mrb[111].mxu1  ;;  %v19766_v0 = vld [vmem:[%s15596_s26 + $0x4f0] sm:$0xff] }
 0x584   : > { %v13831_v16 = vpack.c.bf16 %v11524_v41, %v19681_v21  ;;  %5252 = vmatprep.subr.bf16.mxu0 %v1694_v34  ;;  %v1696_v17 = vunpack.c.h.s8.bf16 %v19645_v2  ;;  %v1693_v9 = vunpack.c.h.s8.bf16 %v19649_v50  ;;  %v1695_v10 = vunpack.c.h.s8.bf16 %v19654_v63 }
 0x585   : > { %14628 = vpow2.f32 %v13687_v61  ;;  %v19750_v15 = vadd.f32 %v8880_v1, %v7281_v27  ;;  %v1890_v33 = vunpack.c.l.s8.bf16 %v1302_v7  ;;  %v1892_v20 = vunpack.c.l.s8.bf16 %v19733_v47 }
 0x586   : > { %v12577_v21 = vrot.slane %v13831_v16, %v22351_v30  ;;  %5293 = vmatprep.subr.bf16.mxu1 %v1696_v17  ;;  %5253 = vmatpush1.bf16.msra.mxu0 %v1693_v9  ;;  %v1889_v2 = vunpack.c.l.s8.bf16 %v19741_v62  ;;  %v1891_v50 = vunpack.c.l.s8.bf16 %v19744_v3  ;;  %v2086_v63 = vunpack.c.h.s8.bf16 %v1302_v7 }
 0x587   : > { %v14617_v14 = vpop.eup %14616  ;;  %v13689_v44 = vmul.f32 -1.442695, %v19750_v15  ;;  %5294 = vmatpush1.bf16.msra.mxu1 %v1695_v10  ;;  %5254 = vmatprep.subr.bf16.mxu0 %v1890_v33  ;;  %v2088_v19 = vunpack.c.h.s8.bf16 %v19733_v47  ;;  %v2085_v51 = vunpack.c.h.s8.bf16 %v19741_v62  ;;  %v2087_v29 = vunpack.c.h.s8.bf16 %v19744_v3 }
 0x588   : > { %v14619_v41 = vpop.eup %14618  ;;  %v12592_v27 = vcombine.low %v12570_v36, %v12577_v21  ;;  %v10729_v34 = vmul.f32 %v14617_v14, %v19600_v32  ;;  %5295 = vmatprep.subr.bf16.mxu1 %v1892_v20  ;;  %v1502_v7 = vunpack.c.l.s8.bf16 %v19754_v48  ;;  %v1504_v31 = vunpack.c.l.s8.bf16 %v19757_v45 }
 0x589   : > { %v14621_v61 = vpop.eup %14620  ;;  %v10731_v1 = vmul.f32 %v14619_v41, %v19602_v39  ;;  %14630 = vpow2.f32 %v13689_v44  ;;  %v1501_v25 = vunpack.c.l.s8.bf16 %v19763_v4  ;;  %v1503_v47 = vunpack.c.l.s8.bf16 %v19766_v0 }
 0x58a   : > { %v19779_v62 = vrot.slane %v12592_v27, %v22351_v30  ;;  %v10925_v3 = vmax.f32 %v10729_v34, 0.0  ;;  %v10730_v36 = vmul.f32 %v14621_v61, %v19608_v18  ;;  %5255 = vmatpush1.bf16.msra.mxu0 %v1889_v2  ;;  %v6605_v32 = vrot.slane %v19657_v46, %v16135_v53 }
 0x58b   : > { %v14623_v22 = vpop.eup %14622  ;;  %v10927_v16 = vmax.f32 %v10731_v1, 0.0  ;;  %5296 = vmatpush1.bf16.msra.mxu1 %v1891_v50  ;;  %5256 = vmatprep.subr.bf16.mxu0 %v2086_v63  ;;  %v19785_v39 = vunpack.c.h.bf16 %v19660_v24  ;;  %v6613_v17 = vrot.slane %v19657_v46, %v16138_v42  ;;  %v6609_v9 = vrot.slane %v19657_v46, %v16261_v5 }
 0x58c   : > { %v14625_v10 = vpop.eup %14624  ;;  %v11121_v6 = vmin.f32 %v10925_v3, 1.0  ;;  %v10926_v18 = vmax.f32 %v10730_v36, 0.0  ;;  %v10732_v33 = vmul.f32 %v14623_v22, %v19618_v8  ;;  %5297 = vmatprep.subr.bf16.mxu1 %v2088_v19  ;;  %v7282_v20 = vmul.f32 %v6605_v32, %v19625_v49  ;;  %v19803_v3 = vpop.f32.mrb[124].mxu0 }
 0x58d   : > { %v14627_v21 = vpop.eup %14626  ;;  %v11123_v2 = vmin.f32 %v10927_v16, 1.0  ;;  %v10145_v50 = vadd.f32 1.0, %v14625_v10  ;;  %v7904_v24 = vrot.slane %v19785_v39, %v16121_v40  ;;  %v7284_v63 = vmul.f32 %v6613_v17, %v19633_v38  ;;  %v19811_v32 = vpop.f32.mrb[112].mxu1 }
 0x58e   : > { %v11323_v14 = vmul.f32 %v17296_v60, %v11121_v6  ;;  %v11122_v44 = vmin.f32 %v10926_v18, 1.0  ;;  %v10928_v41 = vmax.f32 %v10732_v33, 0.0  ;;  %v10147_v27 = vadd.f32 1.0, %v14627_v21  ;;  %5257 = vmatpush1.bf16.msra.mxu0 %v2085_v51  ;;  %v19813_v22 = vpop.f32.mrb[125].mxu0  ;;  %v19821_v6 = vpop.f32.mrb[113].mxu1 }
 0x58f   : > { %v14629_v34 = vpop.eup %14628  ;;  %v11325_v8 = vmul.f32 %v17296_v60, %v11123_v2  ;;  %14632 = vrcp.f32 %v10145_v50  ;;  %5298 = vmatpush1.bf16.msra.mxu1 %v2087_v29  ;;  %5332 = vmatprep.subr.bf16.mxu0 %v1502_v7  ;;  %v8884_v49 = vrot.slane %v7904_v24, %v16121_v40  ;;  %v7912_v19 = vrot.slane %v19785_v39, %v16135_v53  ;;  %v4386_v18 = vpop.f32.mrb[126].mxu0 }
 0x590   : > { %v11525_v61 = vadd.f32 %v17464_v12, %v11323_v14  ;;  %v11324_v38 = vmul.f32 %v17296_v60, %v11122_v44  ;;  %v11124_v1 = vmin.f32 %v10928_v41, 1.0  ;;  %14634 = vrcp.f32 %v10147_v27  ;;  %5373 = vmatprep.subr.bf16.mxu1 %v1504_v31  ;;  %v1306_v41 = vld [vmem:[%s15596_s26 + $0xb08] sm:$0xff] }
 0x591   : > { %v11527_v51 = vadd.f32 %v17464_v12, %v11325_v8  ;;  %v10146_v36 = vadd.f32 1.0, %v14629_v34  ;;  %13568 = vmatmul.mubr.msk.bf16.vlgmr.msra.gmra.mrb[168].mxu0 %vm2130_vm2, %v15852_v11  ;;  %v19808_v29 = vadd.f32 %v8884_v49, %v7282_v20  ;;  %v8892_v7 = vrot.slane %v7912_v19, %v16121_v40  ;;  %v1308_v8 = vld [vmem:[%s15596_s26 + $0xb18] sm:$0xff]  ;;  %v19842_v49 = vld [vmem:[%s15596_s26 + $0xb00] sm:$0xff] }
 0x592   : > { %v11526_v16 = vadd.f32 %v17464_v12, %v11324_v38  ;;  %v11326_v31 = vmul.f32 %v17296_v60, %v11124_v1  ;;  %13569 = vmatmul.mubr.msk.bf16.vlgmr.msra.gmra.mrb[156].mxu1 %vm2130_vm2, %v15852_v11  ;;  %5333 = vmatpush1.bf16.msra.mxu0 %v1501_v25  ;;  %v7283_v17 = vmul.f32 %v6609_v9, %v19635_v58  ;;  %v1698_v10 = vunpack.c.h.s8.bf16 %v19754_v48  ;;  %v4427_v25 = vpop.f32.mrb[114].mxu1  ;;  %v4387_v58 = vpop.f32.mrb[127].mxu0  ;;  %v19849_v1 = vld [vmem:[%s15596_s26 + $0xb10] sm:$0xff] }
 0x593   : > { %v14631_v33 = vpop.eup %14630  ;;  %14636 = vrcp.f32 %v10146_v36  ;;  %5374 = vmatpush1.bf16.msra.mxu1 %v1503_v47  ;;  %v13690_v20 = vmul.f32 -1.442695, %v19808_v29  ;;  %v19824_v21 = vadd.f32 %v8892_v7, %v7284_v63  ;;  %v7908_v2 = vrot.slane %v19785_v39, %v16132_v52  ;;  %5364 = vmatprep.mubr.bf16.mxu0 %v22080_v55  ;;  %v4428_v24 = vpop.f32.mrb[115].mxu1 }
 0x594   : > { %v13832_v9 = vpack.c.bf16 %v11526_v16, %v11525_v61  ;;  %v11528_v48 = vadd.f32 %v17464_v12, %v11326_v31  ;;  %v10148_v50 = vadd.f32 1.0, %v14631_v33  ;;  %v6617_v47 = vrot.slane %v19657_v46, %v16268_v57  ;;  %5334 = vmatprep.subr.bf16.mxu0 %v1698_v10  ;;  %5405 = vmatprep.mubr.bf16.mxu1 %v22080_v55 }
 0x595   : > { %14638 = vpow2.f32 %v13690_v20  ;;  %v13692_v63 = vmul.f32 -1.442695, %v19824_v21  ;;  %v8888_v14 = vrot.slane %v7908_v2, %v16121_v40  ;;  %v7916_v44 = vrot.slane %v19785_v39, %v16138_v42  ;;  %v19861_v20 = vld [vmem:[%s15596_s26 + $0x508] sm:$0xff]  ;;  %v19864_v2 = vld [vmem:[%s15596_s26 + $0x518] sm:$0xff] }
 0x596   : > { %v12584_v27 = vrot.slane %v13832_v9, %v22351_v30  ;;  %v13833_v34 = vpack.c.bf16 %v11528_v48, %v11527_v51  ;;  %14640 = vrcp.f32 %v10148_v50  ;;  %v7285_v46 = vmul.f32 %v6617_v47, %v19638_v59  ;;  %v19869_v9 = vld [vmem:[%s15596_s26 + $0x500] sm:$0xff] }
 0x597   : > { %14642 = vpow2.f32 %v13692_v63  ;;  %v19844_v19 = vadd.f32 %v8888_v14, %v7283_v17  ;;  %v8896_v61 = vrot.slane %v7916_v44, %v16121_v40  ;;  %v1700_v38 = vunpack.c.h.s8.bf16 %v19757_v45  ;;  %v19875_v63 = vld [vmem:[%s15596_s26 + $0x510] sm:$0xff] }
 0x598   : > { %v12591_v39 = vrot.slane %v13833_v34, %v22351_v30  ;;  %v1697_v36 = vunpack.c.h.s8.bf16 %v19763_v4  ;;  %v1699_v51 = vunpack.c.h.s8.bf16 %v19766_v0  ;;  %v1894_v59 = vunpack.c.l.s8.bf16 %v1306_v41  ;;  %v19878_v14 = vld [vmem:[%s15606_s3 + $0x68] sm:$0xff] }
 0x599   : > { %v14633_v7 = vpop.eup %14632  ;;  %v13691_v16 = vmul.f32 -1.442695, %v19844_v19  ;;  %v19855_v31 = vadd.f32 %v8896_v61, %v7285_v46  ;;  %5375 = vmatprep.subr.bf16.mxu1 %v1700_v38  ;;  %v1896_v17 = vunpack.c.l.s8.bf16 %v1308_v8  ;;  %v1893_v45 = vunpack.c.l.s8.bf16 %v19842_v49 }
 0x59a   : > { %v14635_v10 = vpop.eup %14634  ;;  %v12593_v18 = vcombine.low %v12584_v27, %v12591_v39  ;;  %v10733_v33 = vmul.f32 %v14633_v7, %v19704_v26  ;;  %5335 = vmatpush1.bf16.msra.mxu0 %v1697_v36  ;;  %5376 = vmatpush1.bf16.msra.mxu1 %v1699_v51  ;;  %v1895_v4 = vunpack.c.l.s8.bf16 %v19849_v1  ;;  %v2090_v0 = vunpack.c.h.s8.bf16 %v1306_v41 }
 0x59b   : > { %v10735_v25 = vmul.f32 %v14635_v10, %v19706_v35  ;;  %14644 = vpow2.f32 %v13691_v16  ;;  %v13693_v58 = vmul.f32 -1.442695, %v19855_v31  ;;  %5336 = vmatprep.subr.bf16.mxu0 %v1894_v59  ;;  %5377 = vmatprep.subr.bf16.mxu1 %v1896_v17  ;;  %v2092_v26 = vunpack.c.h.s8.bf16 %v1308_v8  ;;  %v19881_v35 = vld [vmem:[%s15610_s17 + $0x68] sm:$0xff]  ;;  %v19898_v17 = vpop.f32.mrb[128].mxu0 }
 0x59c   : > { %v12607_v48 = vrot.slane %v12593_v18, %v22351_v30  ;;  %v10929_v50 = vmax.f32 %v10733_v33, 0.0  ;;  %v2089_v47 = vunpack.c.h.s8.bf16 %v19842_v49  ;;  %v2091_v24 = vunpack.c.h.s8.bf16 %v19849_v1 }
 0x59d   : > { %v14637_v44 = vpop.eup %14636  ;;  %v10931_v41 = vmax.f32 %v10735_v25, 0.0  ;;  %14646 = vpow2.f32 %v13693_v58  ;;  %v1506_v27 = vunpack.c.l.s8.bf16 %v19861_v20  ;;  %v1508_v34 = vunpack.c.l.s8.bf16 %v19864_v2  ;;  %v19907_v25 = vpop.f32.mrb[129].mxu0 }
 0x59e   : > { %v12608_v46 = vcombine.low %v19779_v62, %v12607_v48  ;;  %v11125_v8 = vmin.f32 %v10929_v50, 1.0  ;;  %v10734_v49 = vmul.f32 %v14637_v44, %v19720_v56  ;;  %5337 = vmatpush1.bf16.msra.mxu0 %v1893_v45  ;;  %5378 = vmatpush1.bf16.msra.mxu1 %v1895_v4  ;;  %v1505_v61 = vunpack.c.l.s8.bf16 %v19869_v9  ;;  %v4468_v44 = vpop.f32.mrb[130].mxu0 }
 0x59f   : > { %v14639_v38 = vpop.eup %14638  ;;  %v11127_v1 = vmin.f32 %v10931_v41, 1.0  ;;  %5338 = vmatprep.subr.bf16.mxu0 %v2090_v0  ;;  %5379 = vmatprep.subr.bf16.mxu1 %v2092_v26  ;;  %v1507_v39 = vunpack.c.l.s8.bf16 %v19875_v63  ;;  %v6621_v36 = vrot.slane %v19878_v14, %v16121_v40  ;;  %v19892_v51 = vunpack.c.l.bf16 %v19881_v35  ;;  %v19905_v0 = vpop.f32.mrb[116].mxu1  ;;  %v19947_v44 = vld [vmem:[%s15596_s26 + $0xb28] sm:$0xff] }
 0x5a0   : > { %v14641_v62 = vpop.eup %14640  ;;  %13257 = vst [vmem:[%s17723_s8 + $0x58] sm:$0xff] %v12608_v46  ;;  %v11327_v56 = vmul.f32 %v17296_v60, %v11125_v8  ;;  %v10930_v59 = vmax.f32 %v10734_v49, 0.0  ;;  %v10149_v7 = vadd.f32 1.0, %v14639_v38  ;;  %v6629_v16 = vrot.slane %v19878_v14, %v16132_v52  ;;  %v19910_v50 = vpop.f32.mrb[117].mxu1 }
 0x5a1   : > { %v14643_v45 = vpop.eup %14642  ;;  %v11329_v10 = vmul.f32 %v17296_v60, %v11127_v1  ;;  %v10736_v18 = vmul.f32 %v14641_v62, %v19750_v15  ;;  %v7286_v33 = vmul.f32 %v6621_v36, %v19717_v28  ;;  %v7920_v4 = vrot.slane %v19892_v51, %v16121_v40  ;;  %v4509_v8 = vpop.f32.mrb[118].mxu1 }
 0x5a2   : > { %v11529_v58 = vadd.f32 %v17464_v12, %v11327_v56  ;;  %v11126_v26 = vmin.f32 %v10930_v59, 1.0  ;;  %14648 = vrcp.f32 %v10149_v7  ;;  %v10151_v48 = vadd.f32 1.0, %v14643_v45  ;;  %5339 = vmatpush1.bf16.msra.mxu0 %v2089_v47  ;;  %5380 = vmatpush1.bf16.msra.mxu1 %v2091_v24  ;;  %v4469_v49 = vpop.f32.mrb[131].mxu0  ;;  %v4510_v1 = vpop.f32.mrb[119].mxu1 }
 0x5a3   : > { %v11531_v15 = vadd.f32 %v17464_v12, %v11329_v10  ;;  %v10932_v28 = vmax.f32 %v10736_v18, 0.0  ;;  %5414 = vmatprep.subr.bf16.mxu0 %v1506_v27  ;;  %5455 = vmatprep.subr.bf16.mxu1 %v1508_v34  ;;  %v8900_v41 = vrot.slane %v7920_v4, %v16121_v40  ;;  %v7288_v46 = vmul.f32 %v6629_v16, %v19724_v43 }
 0x5a4   : > { %v11328_v38 = vmul.f32 %v17296_v60, %v11126_v26  ;;  %14650 = vrcp.f32 %v10151_v48  ;;  %v7928_v47 = vrot.slane %v19892_v51, %v16135_v53  ;;  %v6625_v24 = vrot.slane %v19878_v14, %v16161_v13 }
 0x5a5   : > { %v14645_v36 = vpop.eup %14644  ;;  %v11128_v62 = vmin.f32 %v10932_v28, 1.0  ;;  %13570 = vmatmul.mubr.msk.bf16.vlgmr.msra.gmra.mrb[172].mxu0 %vm2130_vm2, %v15852_v11  ;;  %13571 = vmatmul.mubr.msk.bf16.vlgmr.msra.gmra.mrb[160].mxu1 %vm2130_vm2, %v15852_v11  ;;  %v19924_v43 = vadd.f32 %v8900_v41, %v7286_v33  ;;  %v7924_v27 = vrot.slane %v19892_v51, %v16132_v52  ;;  %v6633_v34 = vrot.slane %v19878_v14, %v16174_v23 }
 0x5a6   : > { %v11530_v56 = vadd.f32 %v17464_v12, %v11328_v38  ;;  %v10150_v59 = vadd.f32 1.0, %v14645_v36  ;;  %5415 = vmatpush1.bf16.msra.mxu0 %v1505_v61  ;;  %5456 = vmatpush1.bf16.msra.mxu1 %v1507_v39  ;;  %v8908_v7 = vrot.slane %v7928_v47, %v16121_v40  ;;  %v7287_v16 = vmul.f32 %v6625_v24, %v19726_v37  ;;  %v1312_v47 = vld [vmem:[%s15596_s26 + $0xb38] sm:$0xff]  ;;  %v19957_v24 = vld [vmem:[%s15596_s26 + $0xb20] sm:$0xff] }
 0x5a7   : > { %v14647_v45 = vpop.eup %14646  ;;  %v11330_v10 = vmul.f32 %v17296_v60, %v11128_v62  ;;  %v13694_v18 = vmul.f32 -1.442695, %v19924_v43  ;;  %v8904_v33 = vrot.slane %v7924_v27, %v16121_v40  ;;  %v7289_v4 = vmul.f32 %v6633_v34, %v19735_v54  ;;  %5446 = vmatprep.mubr.bf16.mxu0 %v22080_v55  ;;  %5487 = vmatprep.mubr.bf16.mxu1 %v22080_v55  ;;  %v19970_v34 = vld [vmem:[%s15596_s26 + $0x528] sm:$0xff] }
 0x5a8   : > { %v13834_v61 = vpack.c.bf16 %v11530_v56, %v11529_v58  ;;  %14652 = vrcp.f32 %v10150_v59  ;;  %v10152_v39 = vadd.f32 1.0, %v14647_v45  ;;  %v19939_v37 = vadd.f32 %v8908_v7, %v7288_v46 }
 0x5a9   : > { %v11532_v26 = vadd.f32 %v17464_v12, %v11330_v10  ;;  %14654 = vpow2.f32 %v13694_v18  ;;  %v19942_v48 = vadd.f32 %v8904_v33, %v7287_v16  ;;  %v7932_v54 = vrot.slane %v19892_v51, %v16138_v42  ;;  %v19960_v51 = vld [vmem:[%s15596_s26 + $0xb30] sm:$0xff]  ;;  %v19978_v18 = vld [vmem:[%s15596_s26 + $0x538] sm:$0xff]  ;;  %v19981_v33 = vld [vmem:[%s15596_s26 + $0x520] sm:$0xff] }
 0x5aa   : > { %v12619_v28 = vrot.slane %v13834_v61, %v22351_v30  ;;  %14656 = vrcp.f32 %v10152_v39  ;;  %v13696_v58 = vmul.f32 -1.442695, %v19939_v37  ;;  %v1702_v41 = vunpack.c.h.s8.bf16 %v19861_v20 }
 0x5ab   : > { %v13835_v46 = vpack.c.bf16 %v11532_v26, %v11531_v15  ;;  %v13695_v8 = vmul.f32 -1.442695, %v19942_v48  ;;  %v8912_v49 = vrot.slane %v7932_v54, %v16121_v40  ;;  %v1704_v38 = vunpack.c.h.s8.bf16 %v19864_v2 }
 0x5ac   : > { %v14649_v1 = vpop.eup %14648  ;;  %14658 = vpow2.f32 %v13696_v58  ;;  %5416 = vmatprep.subr.bf16.mxu0 %v1702_v41  ;;  %v1701_v36 = vunpack.c.h.s8.bf16 %v19869_v9  ;;  %v1703_v20 = vunpack.c.h.s8.bf16 %v19875_v63  ;;  %v1898_v15 = vunpack.c.l.s8.bf16 %v19947_v44  ;;  %v19994_v41 = vpop.f32.mrb[120].mxu1 }
 0x5ad   : > { %v12626_v62 = vrot.slane %v13835_v46, %v22351_v30  ;;  %v10737_v27 = vmul.f32 %v14649_v1, %v19808_v29  ;;  %14660 = vpow2.f32 %v13695_v8  ;;  %v19967_v2 = vadd.f32 %v8912_v49, %v7289_v4  ;;  %5457 = vmatprep.subr.bf16.mxu1 %v1704_v38  ;;  %v19984_v4 = vld [vmem:[%s15596_s26 + $0x530] sm:$0xff] }
 0x5ae   : > { %v14651_v56 = vpop.eup %14650  ;;  %5417 = vmatpush1.bf16.msra.mxu0 %v1701_v36  ;;  %5458 = vmatpush1.bf16.msra.mxu1 %v1703_v20  ;;  %v1900_v9 = vunpack.c.l.s8.bf16 %v1312_v47  ;;  %v1897_v63 = vunpack.c.l.s8.bf16 %v19957_v24  ;;  %v1899_v59 = vunpack.c.l.s8.bf16 %v19960_v51  ;;  %v2094_v7 = vunpack.c.h.s8.bf16 %v19947_v44  ;;  %v19989_v44 = vpop.f32.mrb[132].mxu0 }
 0x5af   : > { %v12641_v29 = vcombine.low %v12619_v28, %v12626_v62  ;;  %v10933_v16 = vmax.f32 %v10737_v27, 0.0  ;;  %v10739_v45 = vmul.f32 %v14651_v56, %v19824_v21  ;;  %v13697_v10 = vmul.f32 -1.442695, %v19967_v2  ;;  %5418 = vmatprep.subr.bf16.mxu0 %v1898_v15  ;;  %v19996_v46 = vpop.f32.mrb[133].mxu0 }
 0x5b0   : > { %5459 = vmatprep.subr.bf16.mxu1 %v1900_v9  ;;  %v2096_v61 = vunpack.c.h.s8.bf16 %v1312_v47  ;;  %v2093_v39 = vunpack.c.h.s8.bf16 %v19957_v24  ;;  %v2095_v26 = vunpack.c.h.s8.bf16 %v19960_v51  ;;  %v1510_v54 = vunpack.c.l.s8.bf16 %v19970_v34  ;;  %v20003_v51 = vpop.f32.mrb[121].mxu1  ;;  %v4550_v1 = vpop.f32.mrb[134].mxu0 }
 0x5b1   : > { %v19992_v21 = vrot.slane %v12641_v29, %v22351_v30  ;;  %v11129_v28 = vmin.f32 %v10933_v16, 1.0  ;;  %v10935_v58 = vmax.f32 %v10739_v45, 0.0  ;;  %14662 = vpow2.f32 %v13697_v10  ;;  %v4591_v56 = vpop.f32.mrb[122].mxu1  ;;  %v4551_v9 = vpop.f32.mrb[135].mxu0 }
 0x5b2   : > { %v14653_v8 = vpop.eup %14652  ;;  %5419 = vmatpush1.bf16.msra.mxu0 %v1897_v63  ;;  %5460 = vmatpush1.bf16.msra.mxu1 %v1899_v59  ;;  %v1512_v49 = vunpack.c.l.s8.bf16 %v19978_v18  ;;  %v1509_v38 = vunpack.c.l.s8.bf16 %v19981_v33  ;;  %v1511_v47 = vunpack.c.l.s8.bf16 %v19984_v4  ;;  %v6637_v24 = vrot.slane %v19878_v14, %v16135_v53  ;;  %v4592_v10 = vpop.f32.mrb[123].mxu1 }
 0x5b3   : > { %v14655_v36 = vpop.eup %14654  ;;  %v11331_v20 = vmul.f32 %v17296_v60, %v11129_v28  ;;  %v11131_v15 = vmin.f32 %v10935_v58, 1.0  ;;  %v10738_v62 = vmul.f32 %v14653_v8, %v19844_v19  ;;  %5420 = vmatprep.subr.bf16.mxu0 %v2094_v7  ;;  %5461 = vmatprep.subr.bf16.mxu1 %v2096_v61  ;;  %v7430_v27 = vunpack.c.h.bf16 %v19881_v35 }
 0x5b4   : > { %v14657_v63 = vpop.eup %14656  ;;  %v10153_v59 = vadd.f32 1.0, %v14655_v36  ;;  %v7290_v29 = vmul.f32 %v6637_v24, %v19803_v3  ;;  %v6645_v16 = vrot.slane %v19878_v14, %v16138_v42  ;;  %v6641_v45 = vrot.slane %v19878_v14, %v16261_v5 }
 0x5b5   : > { %v11533_v28 = vadd.f32 %v17464_v12, %v11331_v20  ;;  %v11333_v19 = vmul.f32 %v17296_v60, %v11131_v15  ;;  %v10934_v7 = vmax.f32 %v10738_v62, 0.0  ;;  %v10740_v35 = vmul.f32 %v14657_v63, %v19855_v31 }
 0x5b6   : > { %v14659_v61 = vpop.eup %14658  ;;  %14664 = vrcp.f32 %v10153_v59  ;;  %5421 = vmatpush1.bf16.msra.mxu0 %v2093_v39  ;;  %5462 = vmatpush1.bf16.msra.mxu1 %v2095_v26  ;;  %v7936_v3 = vrot.slane %v7430_v27, %v16121_v40  ;;  %v7292_v58 = vmul.f32 %v6645_v16, %v19811_v32  ;;  %v7944_v8 = vrot.slane %v7430_v27, %v16135_v53 }
 0x5b7   : > { %v14661_v24 = vpop.eup %14660  ;;  %v11535_v1 = vadd.f32 %v17464_v12, %v11333_v19  ;;  %v11130_v36 = vmin.f32 %v10934_v7, 1.0  ;;  %v10936_v20 = vmax.f32 %v10740_v35, 0.0  ;;  %v10155_v56 = vadd.f32 1.0, %v14659_v61  ;;  %5496 = vmatprep.subr.bf16.mxu0 %v1510_v54  ;;  %5537 = vmatprep.subr.bf16.mxu1 %v1512_v49  ;;  %v1314_v61 = vld [vmem:[%s15596_s26 + $0xb48] sm:$0xff] }
 0x5b8   : > { %v10154_v15 = vadd.f32 1.0, %v14661_v24  ;;  %v8916_v31 = vrot.slane %v7936_v3, %v16121_v40  ;;  %v8924_v39 = vrot.slane %v7944_v8, %v16121_v40  ;;  %v7291_v26 = vmul.f32 %v6641_v45, %v19813_v22 }
 0x5b9   : > { %v11332_v62 = vmul.f32 %v17296_v60, %v11130_v36  ;;  %v11132_v32 = vmin.f32 %v10936_v20, 1.0  ;;  %14666 = vrcp.f32 %v10155_v56  ;;  %13572 = vmatmul.mubr.msk.bf16.vlgmr.msra.gmra.mrb[176].mxu0 %vm2130_vm2, %v15852_v11  ;;  %13573 = vmatmul.mubr.msk.bf16.vlgmr.msra.gmra.mrb[164].mxu1 %vm2130_vm2, %v15852_v11  ;;  %v7940_v54 = vrot.slane %v7430_v27, %v16132_v52  ;;  %v20058_v20 = vld [vmem:[%s15596_s26 + $0xb40] sm:$0xff]  ;;  %v20061_v56 = vld [vmem:[%s15596_s26 + $0xb50] sm:$0xff] }
 0x5ba   : > { %14668 = vrcp.f32 %v10154_v15  ;;  %5497 = vmatpush1.bf16.msra.mxu0 %v1509_v38  ;;  %5538 = vmatpush1.bf16.msra.mxu1 %v1511_v47  ;;  %v20029_v49 = vadd.f32 %v8916_v31, %v7290_v29  ;;  %v20031_v9 = vadd.f32 %v8924_v39, %v7292_v58  ;;  %v6649_v22 = vrot.slane %v19878_v14, %v16268_v57 }
 0x5bb   : > { %v14663_v63 = vpop.eup %14662  ;;  %v11534_v59 = vadd.f32 %v17464_v12, %v11332_v62  ;;  %v11334_v16 = vmul.f32 %v17296_v60, %v11132_v32  ;;  %v8920_v45 = vrot.slane %v7940_v54, %v16121_v40  ;;  %v7948_v10 = vrot.slane %v7430_v27, %v16138_v42  ;;  %5528 = vmatprep.mubr.bf16.mxu0 %v22080_v55  ;;  %v20072_v62 = vld [vmem:[%s15596_s26 + $0x548] sm:$0xff] }
 0x5bc   : > { %v10156_v38 = vadd.f32 1.0, %v14663_v63  ;;  %v13698_v47 = vmul.f32 -1.442695, %v20029_v49  ;;  %v13700_v29 = vmul.f32 -1.442695, %v20031_v9  ;;  %v7293_v14 = vmul.f32 %v6649_v22, %v19821_v6  ;;  %5569 = vmatprep.mubr.bf16.mxu1 %v22080_v55  ;;  %v20053_v6 = vld [vmem:[%s15596_s26 + $0xb58] sm:$0xff] }
 0x5bd   : > { %v13836_v19 = vpack.c.bf16 %v11534_v59, %v11533_v28  ;;  %v11536_v7 = vadd.f32 %v17464_v12, %v11334_v16  ;;  %v20045_v35 = vadd.f32 %v8920_v45, %v7291_v26  ;;  %v8928_v27 = vrot.slane %v7948_v10, %v16121_v40  ;;  %v20082_v59 = vld [vmem:[%s15596_s26 + $0x558] sm:$0xff] }
 0x5be   : > { %14670 = vrcp.f32 %v10156_v38  ;;  %v1706_v3 = vunpack.c.h.s8.bf16 %v19970_v34  ;;  %v1708_v58 = vunpack.c.h.s8.bf16 %v19978_v18  ;;  %v1705_v8 = vunpack.c.h.s8.bf16 %v19981_v33 }
 0x5bf   : > { %v12633_v24 = vrot.slane %v13836_v19, %v22351_v30  ;;  %v13837_v36 = vpack.c.bf16 %v11536_v7, %v11535_v1  ;;  %14672 = vpow2.f32 %v13698_v47  ;;  %v13699_v28 = vmul.f32 -1.442695, %v20045_v35  ;;  %v20089_v19 = vld [vmem:[%s15596_s26 + $0x540] sm:$0xff]  ;;  %v20092_v7 = vld [vmem:[%s15596_s26 + $0x550] sm:$0xff] }
 0x5c0   : > { %v14665_v15 = vpop.eup %14664  ;;  %14674 = vpow2.f32 %v13700_v29  ;;  %v20063_v34 = vadd.f32 %v8928_v27, %v7293_v14  ;;  %5498 = vmatprep.subr.bf16.mxu0 %v1706_v3  ;;  %5539 = vmatprep.subr.bf16.mxu1 %v1708_v58  ;;  %v1707_v18 = vunpack.c.h.s8.bf16 %v19984_v4  ;;  %v1902_v33 = vunpack.c.l.s8.bf16 %v1314_v61  ;;  %v20066_v31 = vpop.f32.mrb[136].mxu0  ;;  %v20095_v27 = vld [vmem:[%s15606_s3 + $0x70] sm:$0xff] }
 0x5c1   : > { %v12640_v1 = vrot.slane %v13837_v36, %v22351_v30  ;;  %v10741_v39 = vmul.f32 %v14665_v15, %v19924_v43  ;;  %14676 = vpow2.f32 %v13699_v28  ;;  %5499 = vmatpush1.bf16.msra.mxu0 %v1705_v8  ;;  %v1904_v26 = vunpack.c.l.s8.bf16 %v20053_v6  ;;  %v20074_v32 = vpop.f32.mrb[124].mxu1  ;;  %v20076_v54 = vpop.f32.mrb[137].mxu0  ;;  %v20101_v28 = vld [vmem:[%s15610_s17 + $0x70] sm:$0xff] }
 0x5c2   : > { %v13701_v4 = vmul.f32 -1.442695, %v20063_v34  ;;  %5540 = vmatpush1.bf16.msra.mxu1 %v1707_v18  ;;  %5500 = vmatprep.subr.bf16.mxu0 %v1902_v33  ;;  %v1901_v22 = vunpack.c.l.s8.bf16 %v20058_v20  ;;  %v1903_v43 = vunpack.c.l.s8.bf16 %v20061_v56  ;;  %v2098_v63 = vunpack.c.h.s8.bf16 %v1314_v61  ;;  %v20084_v16 = vpop.f32.mrb[125].mxu1  ;;  %v4632_v45 = vpop.f32.mrb[138].mxu0 }
 0x5c3   : > { %v14667_v10 = vpop.eup %14666  ;;  %v12642_v38 = vcombine.low %v12633_v24, %v12640_v1  ;;  %v10937_v47 = vmax.f32 %v10741_v39, 0.0  ;;  %5541 = vmatprep.subr.bf16.mxu1 %v1904_v26  ;;  %v2100_v29 = vunpack.c.h.s8.bf16 %v20053_v6  ;;  %v2097_v14 = vunpack.c.h.s8.bf16 %v20058_v20  ;;  %v4673_v61 = vpop.f32.mrb[126].mxu1 }
 0x5c4   : > { %v4633_v3 = vpop.f32.mrb[139].mxu0  ;;  %v14669_v58 = vpop.eup %14668  ;;  %v10743_v8 = vmul.f32 %v14667_v10, %v19939_v37  ;;  %14678 = vpow2.f32 %v13701_v4  ;;  %v2099_v24 = vunpack.c.h.s8.bf16 %v20061_v56  ;;  %v1514_v36 = vunpack.c.l.s8.bf16 %v20072_v62 }
 0x5c5   : > { %v4674_v6 = vpop.f32.mrb[127].mxu1  ;;  %v12656_v20 = vrot.slane %v12642_v38, %v22351_v30  ;;  %v11133_v15 = vmin.f32 %v10937_v47, 1.0  ;;  %v10742_v18 = vmul.f32 %v14669_v58, %v19942_v48  ;;  %5501 = vmatpush1.bf16.msra.mxu0 %v1901_v22  ;;  %v1516_v33 = vunpack.c.l.s8.bf16 %v20082_v59 }
 0x5c6   : > { %v10939_v1 = vmax.f32 %v10743_v8, 0.0  ;;  %5542 = vmatpush1.bf16.msra.mxu1 %v1903_v43  ;;  %5502 = vmatprep.subr.bf16.mxu0 %v2098_v63  ;;  %v1513_v37 = vunpack.c.l.s8.bf16 %v20089_v19  ;;  %v1515_v56 = vunpack.c.l.s8.bf16 %v20092_v7  ;;  %v6653_v39 = vrot.slane %v20095_v27, %v16121_v40 }
 0x5c7   : > { %v12657_v26 = vcombine.low %v19992_v21, %v12656_v20  ;;  %v11335_v4 = vmul.f32 %v17296_v60, %v11133_v15  ;;  %v10938_v45 = vmax.f32 %v10742_v18, 0.0  ;;  %5543 = vmatprep.subr.bf16.mxu1 %v2100_v29  ;;  %v20113_v48 = vunpack.c.l.bf16 %v20101_v28 }
 0x5c8   : > { %v14671_v22 = vpop.eup %14670  ;;  %v11135_v43 = vmin.f32 %v10939_v1, 1.0  ;;  %v7294_v63 = vmul.f32 %v6653_v39, %v19898_v17  ;;  %v6661_v10 = vrot.slane %v20095_v27, %v16132_v52  ;;  %v6657_v38 = vrot.slane %v20095_v27, %v16161_v13 }
 0x5c9   : > { %v14673_v47 = vpop.eup %14672  ;;  %13258 = vst [vmem:[%s17723_s8 + $0x60] sm:$0xff] %v12657_v26  ;;  %v11537_v21 = vadd.f32 %v17464_v12, %v11335_v4  ;;  %v11134_v61 = vmin.f32 %v10938_v45, 1.0  ;;  %v10744_v29 = vmul.f32 %v14671_v22, %v19967_v2  ;;  %5503 = vmatpush1.bf16.msra.mxu0 %v2097_v14  ;;  %v7952_v3 = vrot.slane %v20113_v48, %v16121_v40 }
 0x5ca   : > { %v14675_v58 = vpop.eup %14674  ;;  %v11337_v17 = vmul.f32 %v17296_v60, %v11135_v43  ;;  %v10157_v8 = vadd.f32 1.0, %v14673_v47  ;;  %5544 = vmatpush1.bf16.msra.mxu1 %v2099_v24  ;;  %5578 = vmatprep.subr.bf16.mxu0 %v1514_v36  ;;  %v7296_v6 = vmul.f32 %v6661_v10, %v19905_v0  ;;  %v7960_v20 = vrot.slane %v20113_v48, %v16135_v53 }
 0x5cb   : > { %v14677_v15 = vpop.eup %14676  ;;  %v11336_v18 = vmul.f32 %v17296_v60, %v11134_v61  ;;  %v10940_v1 = vmax.f32 %v10744_v29, 0.0  ;;  %v10159_v2 = vadd.f32 1.0, %v14675_v58  ;;  %5619 = vmatprep.subr.bf16.mxu1 %v1516_v33  ;;  %v8932_v14 = vrot.slane %v7952_v3, %v16121_v40 }
 0x5cc   : > { %v11539_v39 = vadd.f32 %v17464_v12, %v11337_v17  ;;  %14680 = vrcp.f32 %v10157_v8  ;;  %v10158_v26 = vadd.f32 1.0, %v14677_v15  ;;  %13574 = vmatmul.mubr.msk.bf16.vlgmr.msra.gmra.mrb[180].mxu0 %vm2130_vm2, %v15852_v11  ;;  %v8940_v0 = vrot.slane %v7960_v20, %v16121_v40  ;;  %v1318_v17 = vld [vmem:[%s15596_s26 + $0xb68] sm:$0xff] }
 0x5cd   : > { %v11538_v24 = vadd.f32 %v17464_v12, %v11336_v18  ;;  %v11136_v36 = vmin.f32 %v10940_v1, 1.0  ;;  %14682 = vrcp.f32 %v10159_v2  ;;  %13575 = vmatmul.mubr.msk.bf16.vlgmr.msra.gmra.mrb[168].mxu1 %vm2130_vm2, %v15852_v11  ;;  %5579 = vmatpush1.bf16.msra.mxu0 %v1513_v37  ;;  %v20138_v33 = vadd.f32 %v8932_v14, %v7294_v63  ;;  %v1320_v18 = vld [vmem:[%s15596_s26 + $0xb78] sm:$0xff]  ;;  %v20171_v1 = vld [vmem:[%s15596_s26 + $0xb60] sm:$0xff]  ;;  %v20174_v2 = vld [vmem:[%s15596_s26 + $0xb70] sm:$0xff] }
 0x5ce   : > { %v14679_v4 = vpop.eup %14678  ;;  %14684 = vrcp.f32 %v10158_v26  ;;  %5620 = vmatpush1.bf16.msra.mxu1 %v1515_v56  ;;  %v20140_v45 = vadd.f32 %v8940_v0, %v7296_v6  ;;  %v7295_v22 = vmul.f32 %v6657_v38, %v19907_v25  ;;  %v7956_v43 = vrot.slane %v20113_v48, %v16132_v52  ;;  %5610 = vmatprep.mubr.bf16.mxu0 %v22080_v55 }
 0x5cf   : > { %v13838_v10 = vpack.c.bf16 %v11538_v24, %v11537_v21  ;;  %v11338_v47 = vmul.f32 %v17296_v60, %v11136_v36  ;;  %v10160_v61 = vadd.f32 1.0, %v14679_v4  ;;  %v13702_v37 = vmul.f32 -1.442695, %v20138_v33  ;;  %5651 = vmatprep.mubr.bf16.mxu1 %v22080_v55 }
 0x5d0   : > { %v13704_v56 = vmul.f32 -1.442695, %v20140_v45  ;;  %v8936_v63 = vrot.slane %v7956_v43, %v16121_v40  ;;  %v6665_v25 = vrot.slane %v20095_v27, %v16174_v23  ;;  %v7964_v38 = vrot.slane %v20113_v48, %v16138_v42 }
 0x5d1   : > { %v12668_v29 = vrot.slane %v13838_v10, %v22351_v30  ;;  %v11540_v3 = vadd.f32 %v17464_v12, %v11338_v47  ;;  %14686 = vrcp.f32 %v10160_v61  ;;  %v1710_v58 = vunpack.c.h.s8.bf16 %v20072_v62  ;;  %v20161_v8 = vpop.f32.mrb[128].mxu1 }
 0x5d2   : > { %v20155_v21 = vpop.f32.mrb[140].mxu0  ;;  %14688 = vpow2.f32 %v13702_v37  ;;  %v20165_v20 = vadd.f32 %v8936_v63, %v7295_v22  ;;  %v7297_v15 = vmul.f32 %v6665_v25, %v19910_v50  ;;  %v8944_v48 = vrot.slane %v7964_v38, %v16121_v40  ;;  %v20176_v14 = vpop.f32.mrb[129].mxu1  ;;  %v20188_v37 = vld [vmem:[%s15596_s26 + $0x568] sm:$0xff] }
 0x5d3   : > { %v20163_v6 = vpop.f32.mrb[141].mxu0  ;;  %v13839_v26 = vpack.c.bf16 %v11540_v3, %v11539_v39  ;;  %14690 = vpow2.f32 %v13704_v56  ;;  %5580 = vmatprep.subr.bf16.mxu0 %v1710_v58  ;;  %v1712_v0 = vunpack.c.h.s8.bf16 %v20082_v59  ;;  %v1709_v24 = vunpack.c.h.s8.bf16 %v20089_v19  ;;  %v4755_v50 = vpop.f32.mrb[130].mxu1  ;;  %v20191_v56 = vld [vmem:[%s15596_s26 + $0x578] sm:$0xff]  ;;  %v20195_v3 = vld [vmem:[%s15596_s26 + $0x560] sm:$0xff] }
 0x5d4   : > { %v4714_v62 = vpop.f32.mrb[142].mxu0  ;;  %v13703_v4 = vmul.f32 -1.442695, %v20165_v20  ;;  %v20181_v22 = vadd.f32 %v8944_v48, %v7297_v15  ;;  %v1711_v43 = vunpack.c.h.s8.bf16 %v20092_v7  ;;  %v1906_v10 = vunpack.c.l.s8.bf16 %v1318_v17  ;;  %v4756_v47 = vpop.f32.mrb[131].mxu1 }
 0x5d5   : > { %v4715_v36 = vpop.f32.mrb[143].mxu0  ;;  %v12675_v39 = vrot.slane %v13839_v26, %v22351_v30  ;;  %5621 = vmatprep.subr.bf16.mxu1 %v1712_v0  ;;  %5581 = vmatpush1.bf16.msra.mxu0 %v1709_v24  ;;  %v1908_v61 = vunpack.c.l.s8.bf16 %v1320_v18  ;;  %v1905_v59 = vunpack.c.l.s8.bf16 %v20171_v1  ;;  %v1907_v19 = vunpack.c.l.s8.bf16 %v20174_v2  ;;  %v20201_v0 = vld [vmem:[%s15596_s26 + $0x570] sm:$0xff] }
 0x5d6   : > { %v14681_v63 = vpop.eup %14680  ;;  %14692 = vpow2.f32 %v13703_v4  ;;  %v13705_v7 = vmul.f32 -1.442695, %v20181_v22  ;;  %5622 = vmatpush1.bf16.msra.mxu1 %v1711_v43  ;;  %5582 = vmatprep.subr.bf16.mxu0 %v1906_v10  ;;  %v2102_v25 = vunpack.c.h.s8.bf16 %v1318_v17  ;;  %v2104_v38 = vunpack.c.h.s8.bf16 %v1320_v18 }
 0x5d7   : > { %v14683_v58 = vpop.eup %14682  ;;  %v12690_v15 = vcombine.low %v12668_v29, %v12675_v39  ;;  %v10745_v48 = vmul.f32 %v14681_v63, %v20029_v49  ;;  %5623 = vmatprep.subr.bf16.mxu1 %v1908_v61  ;;  %v2101_v62 = vunpack.c.h.s8.bf16 %v20171_v1  ;;  %v2103_v26 = vunpack.c.h.s8.bf16 %v20174_v2 }
 0x5d8   : > { %v14685_v24 = vpop.eup %14684  ;;  %v10747_v50 = vmul.f32 %v14683_v58, %v20031_v9  ;;  %14694 = vpow2.f32 %v13705_v7  ;;  %v1518_v17 = vunpack.c.l.s8.bf16 %v20188_v37  ;;  %v1520_v18 = vunpack.c.l.s8.bf16 %v20191_v56 }
 0x5d9   : > { %v20207_v36 = vrot.slane %v12690_v15, %v22351_v30  ;;  %v10941_v29 = vmax.f32 %v10745_v48, 0.0  ;;  %v10746_v49 = vmul.f32 %v14685_v24, %v20045_v35  ;;  %5583 = vmatpush1.bf16.msra.mxu0 %v1905_v59  ;;  %v1517_v1 = vunpack.c.l.s8.bf16 %v20195_v3 }
 0x5da   : > { %v10943_v2 = vmax.f32 %v10747_v50, 0.0  ;;  %5624 = vmatpush1.bf16.msra.mxu1 %v1907_v19  ;;  %5584 = vmatprep.subr.bf16.mxu0 %v2102_v25  ;;  %v1519_v4 = vunpack.c.l.s8.bf16 %v20201_v0  ;;  %v6669_v9 = vrot.slane %v20095_v27, %v16135_v53  ;;  %v20215_v43 = vunpack.c.h.bf16 %v20101_v28 }
 0x5db   : > { %v14687_v10 = vpop.eup %14686  ;;  %v11137_v47 = vmin.f32 %v10941_v29, 1.0  ;;  %v10942_v39 = vmax.f32 %v10746_v49, 0.0  ;;  %5625 = vmatprep.subr.bf16.mxu1 %v2104_v38  ;;  %v6677_v35 = vrot.slane %v20095_v27, %v16138_v42  ;;  %v6673_v61 = vrot.slane %v20095_v27, %v16261_v5 }
 0x5dc   : > { %v14689_v59 = vpop.eup %14688  ;;  %v11139_v19 = vmin.f32 %v10943_v2, 1.0  ;;  %v10748_v63 = vmul.f32 %v14687_v10, %v20063_v34  ;;  %v7298_v7 = vmul.f32 %v6669_v9, %v19989_v44  ;;  %v7968_v28 = vrot.slane %v20215_v43, %v16121_v40 }
 0x5dd   : > { %v14691_v25 = vpop.eup %14690  ;;  %v11339_v58 = vmul.f32 %v17296_v60, %v11137_v47  ;;  %v11138_v15 = vmin.f32 %v10942_v39, 1.0  ;;  %v10161_v38 = vadd.f32 1.0, %v14689_v59  ;;  %5585 = vmatpush1.bf16.msra.mxu0 %v2101_v62  ;;  %v7300_v48 = vmul.f32 %v6677_v35, %v19994_v41 }
 0x5de   : > { %v11341_v24 = vmul.f32 %v17296_v60, %v11139_v19  ;;  %v10944_v50 = vmax.f32 %v10748_v63, 0.0  ;;  %v10163_v29 = vadd.f32 1.0, %v14691_v25  ;;  %5626 = vmatpush1.bf16.msra.mxu1 %v2103_v26  ;;  %5660 = vmatprep.subr.bf16.mxu0 %v1518_v17  ;;  %v8948_v34 = vrot.slane %v7968_v28, %v16121_v40 }
 0x5df   : > { %v11541_v44 = vadd.f32 %v17464_v12, %v11339_v58  ;;  %v11340_v49 = vmul.f32 %v17296_v60, %v11138_v15  ;;  %14696 = vrcp.f32 %v10161_v38  ;;  %5701 = vmatprep.subr.bf16.mxu1 %v1520_v18  ;;  %v7976_v2 = vrot.slane %v20215_v43, %v16135_v53  ;;  %v20261_v15 = vld [vmem:[%s15596_s26 + $0xb88] sm:$0xff]  ;;  %v20264_v38 = vld [vmem:[%s15596_s26 + $0xb98] sm:$0xff] }
 0x5e0   : > { %v14693_v62 = vpop.eup %14692  ;;  %v11543_v41 = vadd.f32 %v17464_v12, %v11341_v24  ;;  %v11140_v9 = vmin.f32 %v10944_v50, 1.0  ;;  %14698 = vrcp.f32 %v10163_v29  ;;  %13576 = vmatmul.mubr.msk.bf16.vlgmr.msra.gmra.mrb[184].mxu0 %vm2130_vm2, %v15852_v11  ;;  %v20236_v26 = vadd.f32 %v8948_v34, %v7298_v7  ;;  %v20274_v34 = vld [vmem:[%s15596_s26 + $0xb90] sm:$0xff] }
 0x5e1   : > { %v11542_v17 = vadd.f32 %v17464_v12, %v11340_v49  ;;  %v10162_v10 = vadd.f32 1.0, %v14693_v62  ;;  %13577 = vmatmul.mubr.msk.bf16.vlgmr.msra.gmra.mrb[172].mxu1 %vm2130_vm2, %v15852_v11  ;;  %5661 = vmatpush1.bf16.msra.mxu0 %v1517_v1  ;;  %v8956_v18 = vrot.slane %v7976_v2, %v16121_v40  ;;  %v7299_v47 = vmul.f32 %v6673_v61, %v19996_v46 }
 0x5e2   : > { %v14695_v39 = vpop.eup %14694  ;;  %v11342_v35 = vmul.f32 %v17296_v60, %v11140_v9  ;;  %5702 = vmatpush1.bf16.msra.mxu1 %v1519_v4  ;;  %v13706_v59 = vmul.f32 -1.442695, %v20236_v26  ;;  %v7972_v19 = vrot.slane %v20215_v43, %v16132_v52  ;;  %v6681_v63 = vrot.slane %v20095_v27, %v16268_v57  ;;  %5692 = vmatprep.mubr.bf16.mxu0 %v22080_v55 }
 0x5e3   : > { %v13840_v1 = vpack.c.bf16 %v11542_v17, %v11541_v44  ;;  %14700 = vrcp.f32 %v10162_v10  ;;  %v10164_v7 = vadd.f32 1.0, %v14695_v39  ;;  %v20250_v46 = vadd.f32 %v8956_v18, %v7300_v48  ;;  %5733 = vmatprep.mubr.bf16.mxu1 %v22080_v55  ;;  %v20289_v10 = vld [vmem:[%s15596_s26 + $0x588] sm:$0xff]  ;;  %v20292_v18 = vld [vmem:[%s15596_s26 + $0x598] sm:$0xff] }
 0x5e4   : > { %v11544_v4 = vadd.f32 %v17464_v12, %v11342_v35  ;;  %14702 = vpow2.f32 %v13706_v59  ;;  %v8952_v61 = vrot.slane %v7972_v19, %v16121_v40  ;;  %v7301_v28 = vmul.f32 %v6681_v63, %v20003_v51  ;;  %v20271_v51 = vld [vmem:[%s15596_s26 + $0xb80] sm:$0xff]  ;;  %v20300_v63 = vld [vmem:[%s15596_s26 + $0x590] sm:$0xff] }
 0x5e5   : > { %v12682_v27 = vrot.slane %v13840_v1, %v22351_v30  ;;  %14704 = vrcp.f32 %v10164_v7  ;;  %v13708_v25 = vmul.f32 -1.442695, %v20250_v46  ;;  %v7980_v58 = vrot.slane %v20215_v43, %v16138_v42  ;;  %v20297_v19 = vld [vmem:[%s15596_s26 + $0x580] sm:$0xff] }
 0x5e6   : > { %v13841_v48 = vpack.c.bf16 %v11544_v4, %v11543_v41  ;;  %v20266_v24 = vadd.f32 %v8952_v61, %v7299_v47  ;;  %v1714_v50 = vunpack.c.h.s8.bf16 %v20188_v37  ;;  %v1716_v29 = vunpack.c.h.s8.bf16 %v20191_v56 }
 0x5e7   : > { %14706 = vpow2.f32 %v13708_v25  ;;  %v8960_v44 = vrot.slane %v7980_v58, %v16121_v40  ;;  %v1713_v43 = vunpack.c.h.s8.bf16 %v20195_v3  ;;  %v1715_v49 = vunpack.c.h.s8.bf16 %v20201_v0 }
 0x5e8   : > { %v12689_v2 = vrot.slane %v13841_v48, %v22351_v30  ;;  %v13707_v62 = vmul.f32 -1.442695, %v20266_v24  ;;  %5662 = vmatprep.subr.bf16.mxu0 %v1714_v50  ;;  %5703 = vmatprep.subr.bf16.mxu1 %v1716_v29  ;;  %v1910_v37 = vunpack.c.l.s8.bf16 %v20261_v15  ;;  %v1912_v56 = vunpack.c.l.s8.bf16 %v20264_v38  ;;  %v20317_v48 = vld [vmem:[%s15610_s17 + $0x78] sm:$0xff] }
 0x5e9   : > { %v14697_v41 = vpop.eup %14696  ;;  %v20283_v9 = vadd.f32 %v8960_v44, %v7301_v28  ;;  %5663 = vmatpush1.bf16.msra.mxu0 %v1713_v43  ;;  %5704 = vmatpush1.bf16.msra.mxu1 %v1715_v49  ;;  %v1909_v3 = vunpack.c.l.s8.bf16 %v20271_v51  ;;  %v1911_v0 = vunpack.c.l.s8.bf16 %v20274_v34  ;;  %v2106_v17 = vunpack.c.h.s8.bf16 %v20261_v15  ;;  %v20309_v28 = vld [vmem:[%s15606_s3 + $0x78] sm:$0xff] }
 0x5ea   : > { %v14699_v47 = vpop.eup %14698  ;;  %v12691_v39 = vcombine.low %v12682_v27, %v12689_v2  ;;  %v10749_v35 = vmul.f32 %v14697_v41, %v20138_v33  ;;  %14708 = vpow2.f32 %v13707_v62  ;;  %5664 = vmatprep.subr.bf16.mxu0 %v1910_v37  ;;  %5705 = vmatprep.subr.bf16.mxu1 %v1912_v56  ;;  %v2108_v59 = vunpack.c.h.s8.bf16 %v20264_v38  ;;  %v20302_v1 = vpop.f32.mrb[144].mxu0 }
 0x5eb   : > { %v10751_v7 = vmul.f32 %v14699_v47, %v20140_v45  ;;  %v13709_v4 = vmul.f32 -1.442695, %v20283_v9  ;;  %v2105_v61 = vunpack.c.h.s8.bf16 %v20271_v51  ;;  %v2107_v33 = vunpack.c.h.s8.bf16 %v20274_v34  ;;  %v20311_v27 = vpop.f32.mrb[145].mxu0 }
 0x5ec   : > { %v12705_v25 = vrot.slane %v12691_v39, %v22351_v30  ;;  %v10945_v58 = vmax.f32 %v10749_v35, 0.0  ;;  %v1522_v15 = vunpack.c.l.s8.bf16 %v20289_v10  ;;  %v1524_v38 = vunpack.c.l.s8.bf16 %v20292_v18  ;;  %v20319_v45 = vpop.f32.mrb[132].mxu1  ;;  %v4796_v50 = vpop.f32.mrb[146].mxu0 }
 0x5ed   : > { %v14701_v29 = vpop.eup %14700  ;;  %v10947_v51 = vmax.f32 %v10751_v7, 0.0  ;;  %14710 = vpow2.f32 %v13709_v4  ;;  %5665 = vmatpush1.bf16.msra.mxu0 %v1909_v3  ;;  %5706 = vmatpush1.bf16.msra.mxu1 %v1911_v0  ;;  %v1521_v34 = vunpack.c.l.s8.bf16 %v20297_v19  ;;  %v1523_v44 = vunpack.c.l.s8.bf16 %v20300_v63  ;;  %v20323_v43 = vpop.f32.mrb[133].mxu1 }
 0x5ee   : > { %v4797_v49 = vpop.f32.mrb[147].mxu0  ;;  %v14703_v2 = vpop.eup %14702  ;;  %v12706_v62 = vcombine.low %v20207_v36, %v12705_v25  ;;  %v11141_v37 = vmin.f32 %v10945_v58, 1.0  ;;  %v10750_v56 = vmul.f32 %v14701_v29, %v20165_v20  ;;  %5666 = vmatprep.subr.bf16.mxu0 %v2106_v17  ;;  %5707 = vmatprep.subr.bf16.mxu1 %v2108_v59  ;;  %v6685_v41 = vrot.slane %v20309_v28, %v16121_v40 }
 0x5ef   : > { %v4837_v3 = vpop.f32.mrb[134].mxu1  ;;  %v14705_v0 = vpop.eup %14704  ;;  %v11143_v47 = vmin.f32 %v10947_v51, 1.0  ;;  %v10165_v39 = vadd.f32 1.0, %v14703_v2  ;;  %v7433_v35 = vunpack.c.l.bf16 %v20317_v48  ;;  %v6693_v7 = vrot.slane %v20309_v28, %v16132_v52 }
 0x5f0   : > { %v4838_v4 = vpop.f32.mrb[135].mxu1  ;;  %13259 = vst [vmem:[%s17723_s8 + $0x68] sm:$0xff] %v12706_v62  ;;  %v11343_v36 = vmul.f32 %v17296_v60, %v11141_v37  ;;  %v10946_v25 = vmax.f32 %v10750_v56, 0.0  ;;  %v10752_v20 = vmul.f32 %v14705_v0, %v20181_v22  ;;  %v7302_v17 = vmul.f32 %v6685_v41, %v20066_v31 }
 0x5f1   : > { %v14707_v59 = vpop.eup %14706  ;;  %v11345_v58 = vmul.f32 %v17296_v60, %v11143_v47  ;;  %14712 = vrcp.f32 %v10165_v39  ;;  %5667 = vmatpush1.bf16.msra.mxu0 %v2105_v61  ;;  %5708 = vmatpush1.bf16.msra.mxu1 %v2107_v33  ;;  %v7984_v50 = vrot.slane %v7433_v35, %v16121_v40  ;;  %v7304_v29 = vmul.f32 %v6693_v7, %v20074_v32 }
 0x5f2   : > { %v11545_v51 = vadd.f32 %v17464_v12, %v11343_v36  ;;  %v11142_v49 = vmin.f32 %v10946_v25, 1.0  ;;  %v10948_v2 = vmax.f32 %v10752_v20, 0.0  ;;  %v10167_v62 = vadd.f32 1.0, %v14707_v59  ;;  %5742 = vmatprep.subr.bf16.mxu0 %v1522_v15  ;;  %5783 = vmatprep.subr.bf16.mxu1 %v1524_v38 }
 0x5f3   : > { %v11547_v22 = vadd.f32 %v17464_v12, %v11345_v58  ;;  %v8964_v31 = vrot.slane %v7984_v50, %v16121_v40  ;;  %v7992_v37 = vrot.slane %v7433_v35, %v16135_v53  ;;  %v6689_v61 = vrot.slane %v20309_v28, %v16161_v13 }
 0x5f4   : > { %v14709_v33 = vpop.eup %14708  ;;  %v11344_v56 = vmul.f32 %v17296_v60, %v11142_v49  ;;  %v11144_v32 = vmin.f32 %v10948_v2, 1.0  ;;  %14714 = vrcp.f32 %v10167_v62  ;;  %13578 = vmatmul.mubr.msk.bf16.vlgmr.msra.gmra.mrb[188].mxu0 %vm2130_vm2, %v15852_v11  ;;  %13579 = vmatmul.mubr.msk.bf16.vlgmr.msra.gmra.mrb[176].mxu1 %vm2130_vm2, %v15852_v11  ;;  %v7988_v15 = vrot.slane %v7433_v35, %v16132_v52  ;;  %v1326_v2 = vld [vmem:[%s15596_s26 + $0xba8] sm:$0xff]  ;;  %v20376_v62 = vld [vmem:[%s15596_s26 + $0xbb8] sm:$0xff] }
 0x5f5   : > { %v10166_v38 = vadd.f32 1.0, %v14709_v33  ;;  %5743 = vmatpush1.bf16.msra.mxu0 %v1521_v34  ;;  %5784 = vmatpush1.bf16.msra.mxu1 %v1523_v44  ;;  %v20351_v41 = vadd.f32 %v8964_v31, %v7302_v17  ;;  %v8972_v3 = vrot.slane %v7992_v37, %v16121_v40  ;;  %v7303_v0 = vmul.f32 %v6689_v61, %v20076_v54 }
 0x5f6   : > { %v11546_v47 = vadd.f32 %v17464_v12, %v11344_v56  ;;  %v11346_v39 = vmul.f32 %v17296_v60, %v11144_v32  ;;  %v8968_v7 = vrot.slane %v7988_v15, %v16121_v40  ;;  %v6697_v4 = vrot.slane %v20309_v28, %v16174_v23  ;;  %5774 = vmatprep.mubr.bf16.mxu0 %v22080_v55  ;;  %v20386_v56 = vld [vmem:[%s15596_s26 + $0xbb0] sm:$0xff] }
 0x5f7   : > { %v14711_v36 = vpop.eup %14710  ;;  %14716 = vrcp.f32 %v10166_v38  ;;  %v13710_v34 = vmul.f32 -1.442695, %v20351_v41  ;;  %v20362_v44 = vadd.f32 %v8972_v3, %v7304_v29  ;;  %v7996_v54 = vrot.slane %v7433_v35, %v16138_v42  ;;  %5815 = vmatprep.mubr.bf16.mxu1 %v22080_v55 }
 0x5f8   : > { %v13842_v25 = vpack.c.bf16 %v11546_v47, %v11545_v51  ;;  %v11548_v20 = vadd.f32 %v17464_v12, %v11346_v39  ;;  %v10168_v17 = vadd.f32 1.0, %v14711_v36  ;;  %v20367_v59 = vadd.f32 %v8968_v7, %v7303_v0  ;;  %v20403_v36 = vld [vmem:[%s15596_s26 + $0x5a0] sm:$0xff] }
 0x5f9   : > { %14718 = vpow2.f32 %v13710_v34  ;;  %v13712_v58 = vmul.f32 -1.442695, %v20362_v44  ;;  %v7305_v50 = vmul.f32 %v6697_v4, %v20084_v16  ;;  %v8976_v29 = vrot.slane %v7996_v54, %v16121_v40  ;;  %v20383_v16 = vld [vmem:[%s15596_s26 + $0xba0] sm:$0xff]  ;;  %v20397_v4 = vld [vmem:[%s15596_s26 + $0x5a8] sm:$0xff] }
 0x5fa   : > { %v12717_v49 = vrot.slane %v13842_v25, %v22351_v30  ;;  %v13843_v35 = vpack.c.bf16 %v11548_v20, %v11547_v22  ;;  %14720 = vrcp.f32 %v10168_v17  ;;  %v13711_v51 = vmul.f32 -1.442695, %v20367_v59  ;;  %v20408_v25 = vld [vmem:[%s15596_s26 + $0x5b0] sm:$0xff] }
 0x5fb   : > { %v14713_v31 = vpop.eup %14712  ;;  %14722 = vpow2.f32 %v13712_v58  ;;  %v20378_v37 = vadd.f32 %v8976_v29, %v7305_v50  ;;  %v1718_v61 = vunpack.c.h.s8.bf16 %v20289_v10  ;;  %v1720_v33 = vunpack.c.h.s8.bf16 %v20292_v18 }
 0x5fc   : > { %v12724_v22 = vrot.slane %v13843_v35, %v22351_v30  ;;  %v10753_v32 = vmul.f32 %v14713_v31, %v20236_v26  ;;  %14724 = vpow2.f32 %v13711_v51  ;;  %v1717_v15 = vunpack.c.h.s8.bf16 %v20297_v19  ;;  %v20400_v19 = vld [vmem:[%s15596_s26 + $0x5b8] sm:$0xff] }
 0x5fd   : > { %v13713_v38 = vmul.f32 -1.442695, %v20378_v37  ;;  %5744 = vmatprep.subr.bf16.mxu0 %v1718_v61  ;;  %5785 = vmatprep.subr.bf16.mxu1 %v1720_v33  ;;  %v1719_v10 = vunpack.c.h.s8.bf16 %v20300_v63  ;;  %v1914_v18 = vunpack.c.l.s8.bf16 %v1326_v2  ;;  %v1916_v3 = vunpack.c.l.s8.bf16 %v20376_v62 }
 0x5fe   : > { %v14715_v0 = vpop.eup %14714  ;;  %v12739_v47 = vcombine.low %v12717_v49, %v12724_v22  ;;  %v10949_v39 = vmax.f32 %v10753_v32, 0.0  ;;  %5745 = vmatpush1.bf16.msra.mxu0 %v1717_v15  ;;  %v1913_v26 = vunpack.c.l.s8.bf16 %v20383_v16  ;;  %v1915_v7 = vunpack.c.l.s8.bf16 %v20386_v56 }
 0x5ff   : > { %v10755_v63 = vmul.f32 %v14715_v0, %v20250_v46  ;;  %14726 = vpow2.f32 %v13713_v38  ;;  %5786 = vmatpush1.bf16.msra.mxu1 %v1719_v10  ;;  %5746 = vmatprep.subr.bf16.mxu0 %v1914_v18  ;;  %v2110_v34 = vunpack.c.h.s8.bf16 %v1326_v2  ;;  %v2112_v54 = vunpack.c.h.s8.bf16 %v20376_v62  ;;  %v20410_v20 = vpop.f32.mrb[148].mxu0 }
 0x600   : > { %v20413_v17 = vrot.slane %v12739_v47, %v22351_v30  ;;  %v11145_v58 = vmin.f32 %v10949_v39, 1.0  ;;  %5787 = vmatprep.subr.bf16.mxu1 %v1916_v3  ;;  %v2109_v50 = vunpack.c.h.s8.bf16 %v20383_v16  ;;  %v2111_v29 = vunpack.c.h.s8.bf16 %v20386_v56  ;;  %v20417_v46 = vpop.f32.mrb[136].mxu1  ;;  %v20419_v49 = vpop.f32.mrb[149].mxu0 }
 0x601   : > { %v14717_v35 = vpop.eup %14716  ;;  %v10951_v51 = vmax.f32 %v10755_v63, 0.0  ;;  %v1526_v2 = vunpack.c.l.s8.bf16 %v20397_v4  ;;  %v1528_v62 = vunpack.c.l.s8.bf16 %v20400_v19  ;;  %v1525_v31 = vunpack.c.l.s8.bf16 %v20403_v36  ;;  %v20424_v61 = vpop.f32.mrb[137].mxu1 }
 0x602   : > { %v4878_v33 = vpop.f32.mrb[150].mxu0  ;;  %v11347_v22 = vmul.f32 %v17296_v60, %v11145_v58  ;;  %v10754_v16 = vmul.f32 %v14717_v35, %v20266_v24  ;;  %5747 = vmatpush1.bf16.msra.mxu0 %v1913_v26  ;;  %v1527_v56 = vunpack.c.l.s8.bf16 %v20408_v25  ;;  %v6701_v32 = vrot.slane %v20309_v28, %v16135_v53  ;;  %v4919_v15 = vpop.f32.mrb[138].mxu1 }
 0x603   : > { %v4879_v38 = vpop.f32.mrb[151].mxu0  ;;  %v14719_v10 = vpop.eup %14718  ;;  %v11147_v18 = vmin.f32 %v10951_v51, 1.0  ;;  %5788 = vmatpush1.bf16.msra.mxu1 %v1915_v7  ;;  %5748 = vmatprep.subr.bf16.mxu0 %v2110_v34  ;;  %v7434_v3 = vunpack.c.h.bf16 %v20317_v48  ;;  %v6709_v0 = vrot.slane %v20309_v28, %v16138_v42  ;;  %v6705_v24 = vrot.slane %v20309_v28, %v16261_v5 }
 0x604   : > { %v4920_v47 = vpop.f32.mrb[139].mxu1  ;;  %v14721_v39 = vpop.eup %14720  ;;  %v11549_v26 = vadd.f32 %v17464_v12, %v11347_v22  ;;  %v10950_v63 = vmax.f32 %v10754_v16, 0.0  ;;  %v10169_v58 = vadd.f32 1.0, %v14719_v10  ;;  %5789 = vmatprep.subr.bf16.mxu1 %v2112_v54  ;;  %v7306_v35 = vmul.f32 %v6701_v32, %v20155_v21 }
 0x605   : > { %v14723_v51 = vpop.eup %14722  ;;  %v11349_v7 = vmul.f32 %v17296_v60, %v11147_v18  ;;  %v10756_v48 = vmul.f32 %v14721_v39, %v20283_v9  ;;  %v8000_v34 = vrot.slane %v7434_v3, %v16121_v40  ;;  %v7308_v33 = vmul.f32 %v6709_v0, %v20161_v8 }
 0x606   : > { %v14725_v15 = vpop.eup %14724  ;;  %v11146_v38 = vmin.f32 %v10950_v63, 1.0  ;;  %14728 = vrcp.f32 %v10169_v58  ;;  %v10171_v47 = vadd.f32 1.0, %v14723_v51  ;;  %5749 = vmatpush1.bf16.msra.mxu0 %v2109_v50  ;;  %v8008_v22 = vrot.slane %v7434_v3, %v16135_v53 }
 0x607   : > { %v11551_v54 = vadd.f32 %v17464_v12, %v11349_v7  ;;  %v10952_v16 = vmax.f32 %v10756_v48, 0.0  ;;  %v10170_v21 = vadd.f32 1.0, %v14725_v15  ;;  %5790 = vmatpush1.bf16.msra.mxu1 %v2111_v29  ;;  %5824 = vmatprep.subr.bf16.mxu0 %v1526_v2  ;;  %v8980_v32 = vrot.slane %v8000_v34, %v16121_v40  ;;  %v1330_v34 = vld [vmem:[%s15596_s26 + $0xbc8] sm:$0xff] }
 0x608   : > { %v11348_v9 = vmul.f32 %v17296_v60, %v11146_v38  ;;  %14730 = vrcp.f32 %v10171_v47  ;;  %5865 = vmatprep.subr.bf16.mxu1 %v1528_v62  ;;  %v8988_v8 = vrot.slane %v8008_v22, %v16121_v40  ;;  %v7307_v10 = vmul.f32 %v6705_v24, %v20163_v6 }
 0x609   : > { %v14727_v18 = vpop.eup %14726  ;;  %v11148_v50 = vmin.f32 %v10952_v16, 1.0  ;;  %14732 = vrcp.f32 %v10170_v21  ;;  %13580 = vmatmul.mubr.msk.bf16.vlgmr.msra.gmra.mrb[192].mxu0 %vm2130_vm2, %v15852_v11  ;;  %v20450_v0 = vadd.f32 %v8980_v32, %v7306_v35  ;;  %v8004_v29 = vrot.slane %v7434_v3, %v16132_v52  ;;  %v20487_v21 = vld [vmem:[%s15596_s26 + $0xbd0] sm:$0xff] }
 0x60a   : > { %v11550_v2 = vadd.f32 %v17464_v12, %v11348_v9  ;;  %v10172_v39 = vadd.f32 1.0, %v14727_v18  ;;  %13581 = vmatmul.mubr.msk.bf16.vlgmr.msra.gmra.mrb[180].mxu1 %vm2130_vm2, %v15852_v11  ;;  %5825 = vmatpush1.bf16.msra.mxu0 %v1525_v31  ;;  %v20456_v62 = vadd.f32 %v8988_v8, %v7308_v33  ;;  %v6713_v6 = vrot.slane %v20309_v28, %v16268_v57  ;;  %v20477_v33 = vld [vmem:[%s15596_s26 + $0xbc0] sm:$0xff]  ;;  %v20496_v18 = vld [vmem:[%s15596_s26 + $0x5c8] sm:$0xff] }
 0x60b   : > { %v11350_v24 = vmul.f32 %v17296_v60, %v11148_v50  ;;  %5866 = vmatpush1.bf16.msra.mxu1 %v1527_v56  ;;  %v13714_v63 = vmul.f32 -1.442695, %v20450_v0  ;;  %v8984_v58 = vrot.slane %v8004_v29, %v16121_v40  ;;  %v8012_v35 = vrot.slane %v7434_v3, %v16138_v42  ;;  %5856 = vmatprep.mubr.bf16.mxu0 %v22080_v55  ;;  %v20474_v3 = vld [vmem:[%s15596_s26 + $0xbd8] sm:$0xff] }
 0x60c   : > { %v13844_v31 = vpack.c.bf16 %v11550_v2, %v11549_v26  ;;  %14734 = vrcp.f32 %v10172_v39  ;;  %v13716_v51 = vmul.f32 -1.442695, %v20456_v62  ;;  %v7309_v28 = vmul.f32 %v6713_v6, %v20176_v14  ;;  %5897 = vmatprep.mubr.bf16.mxu1 %v22080_v55  ;;  %v20499_v50 = vld [vmem:[%s15596_s26 + $0x5d8] sm:$0xff]  ;;  %v20505_v6 = vld [vmem:[%s15596_s26 + $0x5c0] sm:$0xff] }
 0x60d   : > { %v11552_v56 = vadd.f32 %v17464_v12, %v11350_v24  ;;  %14736 = vpow2.f32 %v13714_v63  ;;  %v20469_v7 = vadd.f32 %v8984_v58, %v7307_v10  ;;  %v8992_v48 = vrot.slane %v8012_v35, %v16121_v40 }
 0x60e   : > { %v12731_v26 = vrot.slane %v13844_v31, %v22351_v30  ;;  %14738 = vpow2.f32 %v13716_v51  ;;  %v1722_v14 = vunpack.c.h.s8.bf16 %v20397_v4  ;;  %v1724_v15 = vunpack.c.h.s8.bf16 %v20400_v19  ;;  %v20509_v31 = vld [vmem:[%s15596_s26 + $0x5d0] sm:$0xff]  ;;  %v20512_v51 = vld [vmem:[%s15606_s3 + $0x80] sm:$0xff] }
 0x60f   : > { %v13845_v38 = vpack.c.bf16 %v11552_v56, %v11551_v54  ;;  %v13715_v47 = vmul.f32 -1.442695, %v20469_v7  ;;  %v20483_v22 = vadd.f32 %v8992_v48, %v7309_v28  ;;  %v1721_v16 = vunpack.c.h.s8.bf16 %v20403_v36  ;;  %v20515_v28 = vld [vmem:[%s15610_s17 + $0x80] sm:$0xff] }
 0x610   : > { %v14729_v32 = vpop.eup %14728  ;;  %5826 = vmatprep.subr.bf16.mxu0 %v1722_v14  ;;  %5867 = vmatprep.subr.bf16.mxu1 %v1724_v15  ;;  %v1723_v9 = vunpack.c.h.s8.bf16 %v20408_v25  ;;  %v1918_v8 = vunpack.c.l.s8.bf16 %v1330_v34  ;;  %v1920_v4 = vunpack.c.l.s8.bf16 %v20474_v3  ;;  %v1917_v19 = vunpack.c.l.s8.bf16 %v20477_v33 }
 0x611   : > { %v12738_v54 = vrot.slane %v13845_v38, %v22351_v30  ;;  %v10757_v10 = vmul.f32 %v14729_v32, %v20351_v41  ;;  %14740 = vpow2.f32 %v13715_v47  ;;  %v13717_v36 = vmul.f32 -1.442695, %v20483_v22  ;;  %5827 = vmatpush1.bf16.msra.mxu0 %v1721_v16 }
 0x612   : > { %v14731_v25 = vpop.eup %14730  ;;  %5868 = vmatpush1.bf16.msra.mxu1 %v1723_v9  ;;  %5828 = vmatprep.subr.bf16.mxu0 %v1918_v8  ;;  %v1919_v29 = vunpack.c.l.s8.bf16 %v20487_v21  ;;  %v2114_v2 = vunpack.c.h.s8.bf16 %v1330_v34  ;;  %v2116_v39 = vunpack.c.h.s8.bf16 %v20474_v3  ;;  %v2113_v41 = vunpack.c.h.s8.bf16 %v20477_v33 }
 0x613   : > { %v14733_v24 = vpop.eup %14732  ;;  %v12740_v63 = vcombine.low %v12731_v26, %v12738_v54  ;;  %v10953_v58 = vmax.f32 %v10757_v10, 0.0  ;;  %v10759_v35 = vmul.f32 %v14731_v25, %v20362_v44  ;;  %14742 = vpow2.f32 %v13717_v36  ;;  %5869 = vmatprep.subr.bf16.mxu1 %v1920_v4 }
 0x614   : > { %v10758_v56 = vmul.f32 %v14733_v24, %v20367_v59  ;;  %v2115_v48 = vunpack.c.h.s8.bf16 %v20487_v21  ;;  %v1530_v34 = vunpack.c.l.s8.bf16 %v20496_v18  ;;  %v1532_v3 = vunpack.c.l.s8.bf16 %v20499_v50 }
 0x615   : > { %v12754_v33 = vrot.slane %v12740_v63, %v22351_v30  ;;  %v11149_v26 = vmin.f32 %v10953_v58, 1.0  ;;  %v10955_v44 = vmax.f32 %v10759_v35, 0.0  ;;  %5829 = vmatpush1.bf16.msra.mxu0 %v1917_v19  ;;  %v1529_v14 = vunpack.c.l.s8.bf16 %v20505_v6  ;;  %v20523_v15 = vpop.f32.mrb[152].mxu0  ;;  %v20525_v38 = vpop.f32.mrb[140].mxu1 }
 0x616   : > { %v14735_v47 = vpop.eup %14734  ;;  %v10954_v16 = vmax.f32 %v10758_v56, 0.0  ;;  %5870 = vmatpush1.bf16.msra.mxu1 %v1919_v29  ;;  %5830 = vmatprep.subr.bf16.mxu0 %v2114_v2  ;;  %v1531_v59 = vunpack.c.l.s8.bf16 %v20509_v31  ;;  %v6717_v21 = vrot.slane %v20512_v51, %v16121_v40  ;;  %v20531_v32 = vunpack.c.l.bf16 %v20515_v28  ;;  %v20533_v9 = vpop.f32.mrb[153].mxu0 }
 0x617   : > { %v20535_v8 = vpop.f32.mrb[141].mxu1  ;;  %v14737_v4 = vpop.eup %14736  ;;  %v12755_v19 = vcombine.low %v20413_v17, %v12754_v33  ;;  %v11351_v54 = vmul.f32 %v17296_v60, %v11149_v26  ;;  %v11151_v10 = vmin.f32 %v10955_v44, 1.0  ;;  %v10760_v36 = vmul.f32 %v14735_v47, %v20378_v37  ;;  %5871 = vmatprep.subr.bf16.mxu1 %v2116_v39 }
 0x618   : > { %22736 = vst [vmem:[#allocation85_spill] sm:$0xff] %v20535_v8  ;;  %v4960_v25 = vpop.f32.mrb[154].mxu0  ;;  %v5001_v29 = vpop.f32.mrb[142].mxu1  ;;  %v11150_v24 = vmin.f32 %v10954_v16, 1.0  ;;  %v10173_v63 = vadd.f32 1.0, %v14737_v4  ;;  %v7310_v58 = vmul.f32 %v6717_v21, %v20302_v1  ;;  %v8016_v35 = vrot.slane %v20531_v32, %v16121_v40 }
 0x619   : > { %v14739_v2 = vpop.eup %14738  ;;  %v4961_v56 = vpop.f32.mrb[155].mxu0  ;;  %13260 = vst [vmem:[%s17723_s8 + $0x70] sm:$0xff] %v12755_v19  ;;  %v11553_v17 = vadd.f32 %v17464_v12, %v11351_v54  ;;  %v11353_v33 = vmul.f32 %v17296_v60, %v11151_v10  ;;  %v10956_v26 = vmax.f32 %v10760_v36, 0.0  ;;  %5831 = vmatpush1.bf16.msra.mxu0 %v2113_v41  ;;  %v6725_v44 = vrot.slane %v20512_v51, %v16132_v52 }
 0x61a   : > { %v5002_v8 = vpop.f32.mrb[143].mxu1  ;;  %v10175_v37 = vadd.f32 1.0, %v14739_v2  ;;  %v11352_v39 = vmul.f32 %v17296_v60, %v11150_v24  ;;  %14744 = vrcp.f32 %v10173_v63  ;;  %5872 = vmatpush1.bf16.msra.mxu1 %v2115_v48  ;;  %5906 = vmatprep.subr.bf16.mxu0 %v1530_v34  ;;  %v8996_v1 = vrot.slane %v8016_v35, %v16121_v40 }
 0x61b   : > { %v14741_v47 = vpop.eup %14740  ;;  %v11555_v16 = vadd.f32 %v17464_v12, %v11353_v33  ;;  %v11152_v21 = vmin.f32 %v10956_v26, 1.0  ;;  %5947 = vmatprep.subr.bf16.mxu1 %v1532_v3  ;;  %v8024_v8 = vrot.slane %v20531_v32, %v16135_v53  ;;  %v7312_v34 = vmul.f32 %v6725_v44, %v20319_v45  ;;  %v1336_v33 = vld [vmem:[%s15596_s26 + $0xbf8] sm:$0xff]  ;;  %v20585_v26 = vld [vmem:[%s15596_s26 + $0xbe0] sm:$0xff]  ;;  %v20592_v44 = vld [vmem:[%s15596_s26 + $0xbf0] sm:$0xff] }
 0x61c   : > { %14746 = vrcp.f32 %v10175_v37  ;;  %v11554_v41 = vadd.f32 %v17464_v12, %v11352_v39  ;;  %v10174_v4 = vadd.f32 1.0, %v14741_v47  ;;  %13582 = vmatmul.mubr.msk.bf16.vlgmr.msra.gmra.mrb[196].mxu0 %vm2130_vm2, %v15852_v11  ;;  %v20556_v48 = vadd.f32 %v8996_v1, %v7310_v58 }
 0x61d   : > { %v14743_v19 = vpop.eup %14742  ;;  %v11354_v54 = vmul.f32 %v17296_v60, %v11152_v21  ;;  %13583 = vmatmul.mubr.msk.bf16.vlgmr.msra.gmra.mrb[184].mxu1 %vm2130_vm2, %v15852_v11  ;;  %5907 = vmatpush1.bf16.msra.mxu0 %v1529_v14  ;;  %v9004_v3 = vrot.slane %v8024_v8, %v16121_v40  ;;  %v6721_v10 = vrot.slane %v20512_v51, %v16161_v13  ;;  %v1726_v36 = vunpack.c.h.s8.bf16 %v20496_v18 }
 0x61e   : > { %v13846_v25 = vpack.c.bf16 %v11554_v41, %v11553_v17  ;;  %14748 = vrcp.f32 %v10174_v4  ;;  %v10176_v29 = vadd.f32 1.0, %v14743_v19  ;;  %5948 = vmatpush1.bf16.msra.mxu1 %v1531_v59  ;;  %v13718_v45 = vmul.f32 -1.442695, %v20556_v48  ;;  %5938 = vmatprep.mubr.bf16.mxu0 %v22080_v55  ;;  %v1334_v17 = vld [vmem:[%s15596_s26 + $0xbe8] sm:$0xff] }
 0x61f   : > { %v11556_v2 = vadd.f32 %v17464_v12, %v11354_v54  ;;  %v20569_v14 = vadd.f32 %v9004_v3, %v7312_v34  ;;  %v7311_v24 = vmul.f32 %v6721_v10, %v20311_v27  ;;  %v8020_v18 = vrot.slane %v20531_v32, %v16132_v52  ;;  %5908 = vmatprep.subr.bf16.mxu0 %v1726_v36  ;;  %v20605_v3 = vld [vmem:[%s15596_s26 + $0x5e8] sm:$0xff] }
 0x620   : > { %v12766_v63 = vrot.slane %v13846_v25, %v22351_v30  ;;  %14750 = vrcp.f32 %v10176_v29  ;;  %v6729_v59 = vrot.slane %v20512_v51, %v16174_v23  ;;  %v8028_v58 = vrot.slane %v20531_v32, %v16138_v42  ;;  %5979 = vmatprep.mubr.bf16.mxu1 %v22080_v55 }
 0x621   : > { %v13847_v35 = vpack.c.bf16 %v11556_v2, %v11555_v16  ;;  %14752 = vpow2.f32 %v13718_v45  ;;  %v13720_v27 = vmul.f32 -1.442695, %v20569_v14  ;;  %v9000_v56 = vrot.slane %v8020_v18, %v16121_v40  ;;  %v20610_v45 = vld [vmem:[%s15596_s26 + $0x5f8] sm:$0xff]  ;;  %v20613_v2 = vld [vmem:[%s15596_s26 + $0x5e0] sm:$0xff] }
 0x622   : > { %v7313_v37 = vmul.f32 %v6729_v59, %v20323_v43  ;;  %v9008_v39 = vrot.slane %v8028_v58, %v16121_v40  ;;  %v1728_v1 = vunpack.c.h.s8.bf16 %v20499_v50  ;;  %v1725_v32 = vunpack.c.h.s8.bf16 %v20505_v6 }
 0x623   : > { %v12773_v47 = vrot.slane %v13847_v35, %v22351_v30  ;;  %14754 = vpow2.f32 %v13720_v27  ;;  %v20595_v16 = vadd.f32 %v9000_v56, %v7311_v24  ;;  %v1727_v21 = vunpack.c.h.s8.bf16 %v20509_v31 }
 0x624   : > { %v14745_v8 = vpop.eup %14744  ;;  %v20598_v41 = vadd.f32 %v9008_v39, %v7313_v37  ;;  %5949 = vmatprep.subr.bf16.mxu1 %v1728_v1  ;;  %5909 = vmatpush1.bf16.msra.mxu0 %v1725_v32  ;;  %v1922_v43 = vunpack.c.l.s8.bf16 %v1334_v17  ;;  %v1924_v50 = vunpack.c.l.s8.bf16 %v1336_v33  ;;  %v1921_v6 = vunpack.c.l.s8.bf16 %v20585_v26 }
 0x625   : > { %v12788_v34 = vcombine.low %v12766_v63, %v12773_v47  ;;  %v10761_v19 = vmul.f32 %v14745_v8, %v20450_v0  ;;  %v13719_v54 = vmul.f32 -1.442695, %v20595_v16  ;;  %5950 = vmatpush1.bf16.msra.mxu1 %v1727_v21  ;;  %v1923_v31 = vunpack.c.l.s8.bf16 %v20592_v44  ;;  %v20620_v63 = vld [vmem:[%s15596_s26 + $0x5f0] sm:$0xff] }
 0x626   : > { %v14747_v4 = vpop.eup %14746  ;;  %v13721_v36 = vmul.f32 -1.442695, %v20598_v41  ;;  %5910 = vmatprep.subr.bf16.mxu0 %v1922_v43  ;;  %5951 = vmatprep.subr.bf16.mxu1 %v1924_v50  ;;  %v2118_v25 = vunpack.c.h.s8.bf16 %v1334_v17  ;;  %v2120_v29 = vunpack.c.h.s8.bf16 %v1336_v33  ;;  %v2117_v18 = vunpack.c.h.s8.bf16 %v20585_v26 }
 0x627   : > { %v10763_v10 = vmul.f32 %v14747_v4, %v20456_v62  ;;  %v20616_v0 = vrot.slane %v12788_v34, %v22351_v30  ;;  %v10957_v24 = vmax.f32 %v10761_v19, 0.0  ;;  %14756 = vpow2.f32 %v13719_v54 }
 0x628   : > { %v14749_v62 = vpop.eup %14748  ;;  %14758 = vpow2.f32 %v13721_v36  ;;  %5911 = vmatpush1.bf16.msra.mxu0 %v1921_v6  ;;  %v2119_v58 = vunpack.c.h.s8.bf16 %v20592_v44  ;;  %v1534_v35 = vunpack.c.l.s8.bf16 %v20605_v3  ;;  %v20624_v27 = vpop.f32.mrb[156].mxu0  ;;  %v1536_v33 = vunpack.c.l.s8.bf16 %v20610_v45 }
 0x629   : > { %v10959_v59 = vmax.f32 %v10763_v10, 0.0  ;;  %v11153_v56 = vmin.f32 %v10957_v24, 1.0  ;;  %v10762_v17 = vmul.f32 %v14749_v62, %v20469_v7  ;;  %5952 = vmatpush1.bf16.msra.mxu1 %v1923_v31  ;;  %5912 = vmatprep.subr.bf16.mxu0 %v2118_v25  ;;  %v1533_v26 = vunpack.c.l.s8.bf16 %v20613_v2  ;;  %v20629_v37 = vpop.f32.mrb[144].mxu1  ;;  %v20631_v39 = vpop.f32.mrb[157].mxu0 }
 0x62a   : > { %v14751_v1 = vpop.eup %14750  ;;  %5953 = vmatprep.subr.bf16.mxu1 %v2120_v29  ;;  %v1535_v44 = vunpack.c.l.s8.bf16 %v20620_v63  ;;  %v6733_v47 = vrot.slane %v20512_v51, %v16135_v53  ;;  %v20637_v7 = vunpack.c.h.bf16 %v20515_v28  ;;  %v20639_v21 = vpop.f32.mrb[145].mxu1  ;;  %v6741_v34 = vrot.slane %v20512_v51, %v16138_v42 }
 0x62b   : > { %v11155_v32 = vmin.f32 %v10959_v59, 1.0  ;;  %v5042_v8 = vpop.f32.mrb[158].mxu0  ;;  %v14753_v43 = vpop.eup %14752  ;;  %v11355_v50 = vmul.f32 %v17296_v60, %v11153_v56  ;;  %v10958_v6 = vmax.f32 %v10762_v17, 0.0  ;;  %v10764_v4 = vmul.f32 %v14751_v1, %v20483_v22 }
 0x62c   : > { %v5083_v19 = vpop.f32.mrb[146].mxu1  ;;  %v5043_v54 = vpop.f32.mrb[159].mxu0  ;;  %v10177_v10 = vadd.f32 1.0, %v14753_v43  ;;  %5913 = vmatpush1.bf16.msra.mxu0 %v2117_v18  ;;  %v7314_v28 = vmul.f32 %v6733_v47, %v20410_v20  ;;  %v8032_v36 = vrot.slane %v20637_v7, %v16121_v40  ;;  %v7316_v59 = vmul.f32 %v6741_v34, %v20417_v46 }
 0x62d   : > { %v11357_v31 = vmul.f32 %v17296_v60, %v11155_v32  ;;  %v5084_v25 = vpop.f32.mrb[147].mxu1  ;;  %v14755_v29 = vpop.eup %14754  ;;  %v11557_v24 = vadd.f32 %v17464_v12, %v11355_v50  ;;  %v11154_v62 = vmin.f32 %v10958_v6, 1.0  ;;  %v10960_v22 = vmax.f32 %v10764_v4, 0.0  ;;  %5954 = vmatpush1.bf16.msra.mxu1 %v2119_v58  ;;  %5988 = vmatprep.subr.bf16.mxu0 %v1534_v35 }
 0x62e   : > { %14760 = vrcp.f32 %v10177_v10  ;;  %v10179_v17 = vadd.f32 1.0, %v14755_v29  ;;  %6029 = vmatprep.subr.bf16.mxu1 %v1536_v33  ;;  %v9012_v20 = vrot.slane %v8032_v36, %v16121_v40  ;;  %v8040_v32 = vrot.slane %v20637_v7, %v16135_v53 }
 0x62f   : > { %v11559_v56 = vadd.f32 %v17464_v12, %v11357_v31  ;;  %v11356_v18 = vmul.f32 %v17296_v60, %v11154_v62  ;;  %v11156_v1 = vmin.f32 %v10960_v22, 1.0  ;;  %13584 = vmatmul.mubr.msk.bf16.vlgmr.msra.gmra.mrb[200].mxu0 %vm2130_vm2, %v15852_v11  ;;  %v6737_v58 = vrot.slane %v20512_v51, %v16261_v5  ;;  %v1340_v62 = vld [vmem:[%s15596_s26 + $0xc18] sm:$0xff] }
 0x630   : > { %14762 = vrcp.f32 %v10179_v17  ;;  %13585 = vmatmul.mubr.msk.bf16.vlgmr.msra.gmra.mrb[188].mxu1 %vm2130_vm2, %v15852_v11  ;;  %5989 = vmatpush1.bf16.msra.mxu0 %v1533_v26  ;;  %v20662_v46 = vadd.f32 %v9012_v20, %v7314_v28  ;;  %v8036_v35 = vrot.slane %v20637_v7, %v16132_v52  ;;  %v6745_v33 = vrot.slane %v20512_v51, %v16268_v57  ;;  %v20693_v20 = vld [vmem:[%s15596_s26 + $0xc00] sm:$0xff] }
 0x631   : > { %v14757_v47 = vpop.eup %14756  ;;  %v11558_v8 = vadd.f32 %v17464_v12, %v11356_v18  ;;  %v11358_v43 = vmul.f32 %v17296_v60, %v11156_v1  ;;  %6030 = vmatpush1.bf16.msra.mxu1 %v1535_v44  ;;  %v9020_v50 = vrot.slane %v8040_v32, %v16121_v40  ;;  %v7315_v6 = vmul.f32 %v6737_v58, %v20419_v49 }
 0x632   : > { %v14759_v4 = vpop.eup %14758  ;;  %v10178_v26 = vadd.f32 1.0, %v14757_v47  ;;  %v13722_v34 = vmul.f32 -1.442695, %v20662_v46  ;;  %v9016_v19 = vrot.slane %v8036_v35, %v16121_v40  ;;  %v7317_v54 = vmul.f32 %v6745_v33, %v20424_v61  ;;  %6020 = vmatprep.mubr.bf16.mxu0 %v22080_v55  ;;  %6061 = vmatprep.mubr.bf16.mxu1 %v22080_v55 }
 0x633   : > { %v13848_v51 = vpack.c.bf16 %v11558_v8, %v11557_v24  ;;  %v11560_v44 = vadd.f32 %v17464_v12, %v11358_v43  ;;  %v10180_v31 = vadd.f32 1.0, %v14759_v4  ;;  %v20678_v10 = vadd.f32 %v9020_v50, %v7316_v59  ;;  %v1338_v24 = vld [vmem:[%s15596_s26 + $0xc08] sm:$0xff]  ;;  %v20713_v43 = vld [vmem:[%s15596_s26 + $0x600] sm:$0xff] }
 0x634   : > { %14764 = vrcp.f32 %v10178_v26  ;;  %v20680_v49 = vadd.f32 %v9016_v19, %v7315_v6  ;;  %v8044_v28 = vrot.slane %v20637_v7, %v16138_v42  ;;  %v1730_v61 = vunpack.c.h.s8.bf16 %v20605_v3  ;;  %v20696_v7 = vld [vmem:[%s15596_s26 + $0xc10] sm:$0xff]  ;;  %v20707_v8 = vld [vmem:[%s15596_s26 + $0x608] sm:$0xff] }
 0x635   : > { %v12780_v36 = vrot.slane %v13848_v51, %v22351_v30  ;;  %v13849_v25 = vpack.c.bf16 %v11560_v44, %v11559_v56  ;;  %14766 = vrcp.f32 %v10180_v31  ;;  %v13724_v29 = vmul.f32 -1.442695, %v20678_v10  ;;  %v20724_v31 = vld [vmem:[%s15606_s3 + $0x88] sm:$0xff] }
 0x636   : > { %14768 = vpow2.f32 %v13722_v34  ;;  %v13723_v22 = vmul.f32 -1.442695, %v20680_v49  ;;  %v9024_v59 = vrot.slane %v8044_v28, %v16121_v40  ;;  %5990 = vmatprep.subr.bf16.mxu0 %v1730_v61  ;;  %v1732_v17 = vunpack.c.h.s8.bf16 %v20610_v45  ;;  %v20718_v34 = vld [vmem:[%s15596_s26 + $0x610] sm:$0xff] }
 0x637   : > { %v12787_v3 = vrot.slane %v13849_v25, %v22351_v30  ;;  %14770 = vpow2.f32 %v13724_v29  ;;  %v1729_v56 = vunpack.c.h.s8.bf16 %v20613_v2  ;;  %v1731_v18 = vunpack.c.h.s8.bf16 %v20620_v63  ;;  %v20710_v63 = vld [vmem:[%s15596_s26 + $0x618] sm:$0xff] }
 0x638   : > { %v14761_v1 = vpop.eup %14760  ;;  %14772 = vpow2.f32 %v13723_v22  ;;  %v20701_v32 = vadd.f32 %v9024_v59, %v7317_v54  ;;  %6031 = vmatprep.subr.bf16.mxu1 %v1732_v17  ;;  %v1926_v45 = vunpack.c.l.s8.bf16 %v1338_v24  ;;  %v1928_v58 = vunpack.c.l.s8.bf16 %v1340_v62  ;;  %v20727_v28 = vld [vmem:[%s15610_s17 + $0x88] sm:$0xff] }
 0x639   : > { %v12789_v35 = vcombine.low %v12780_v36, %v12787_v3  ;;  %v10765_v33 = vmul.f32 %v14761_v1, %v20556_v48  ;;  %5991 = vmatpush1.bf16.msra.mxu0 %v1729_v56  ;;  %6032 = vmatpush1.bf16.msra.mxu1 %v1731_v18  ;;  %v1925_v47 = vunpack.c.l.s8.bf16 %v20693_v20  ;;  %v1927_v2 = vunpack.c.l.s8.bf16 %v20696_v7 }
 0x63a   : > { %v14763_v50 = vpop.eup %14762  ;;  %v13725_v6 = vmul.f32 -1.442695, %v20701_v32  ;;  %5992 = vmatprep.subr.bf16.mxu0 %v1926_v45  ;;  %6033 = vmatprep.subr.bf16.mxu1 %v1928_v58  ;;  %v2122_v48 = vunpack.c.h.s8.bf16 %v1338_v24  ;;  %v2124_v4 = vunpack.c.h.s8.bf16 %v1340_v62  ;;  %v2121_v26 = vunpack.c.h.s8.bf16 %v20693_v20 }
 0x63b   : > { %v12803_v19 = vrot.slane %v12789_v35, %v22351_v30  ;;  %v10961_v54 = vmax.f32 %v10765_v33, 0.0  ;;  %v10767_v51 = vmul.f32 %v14763_v50, %v20569_v14  ;;  %v2123_v44 = vunpack.c.h.s8.bf16 %v20696_v7 }
 0x63c   : > { %14774 = vpow2.f32 %v13725_v6  ;;  %v1538_v61 = vunpack.c.l.s8.bf16 %v20707_v8  ;;  %v1540_v36 = vunpack.c.l.s8.bf16 %v20710_v63  ;;  %v1537_v25 = vunpack.c.l.s8.bf16 %v20713_v43  ;;  %v20732_v29 = vpop.f32.mrb[160].mxu0  ;;  %v20734_v24 = vpop.f32.mrb[148].mxu1 }
 0x63d   : > { %v12804_v62 = vcombine.low %v20616_v0, %v12803_v19  ;;  %v11157_v14 = vmin.f32 %v10961_v54, 1.0  ;;  %v10963_v22 = vmax.f32 %v10767_v51, 0.0  ;;  %5993 = vmatpush1.bf16.msra.mxu0 %v1925_v47  ;;  %6034 = vmatpush1.bf16.msra.mxu1 %v1927_v2  ;;  %v1539_v59 = vunpack.c.l.s8.bf16 %v20718_v34  ;;  %v20738_v17 = vpop.f32.mrb[161].mxu0  ;;  %v20740_v20 = vpop.f32.mrb[149].mxu1 }
 0x63e   : > { %v14765_v7 = vpop.eup %14764  ;;  %5994 = vmatprep.subr.bf16.mxu0 %v2122_v48  ;;  %6035 = vmatprep.subr.bf16.mxu1 %v2124_v4  ;;  %v6749_v3 = vrot.slane %v20724_v31, %v16121_v40  ;;  %v20745_v56 = vunpack.c.l.bf16 %v20727_v28  ;;  %v6757_v0 = vrot.slane %v20724_v31, %v16132_v52  ;;  %v6753_v18 = vrot.slane %v20724_v31, %v16161_v13  ;;  %v5124_v1 = vpop.f32.mrb[162].mxu0 }
 0x63f   : > { %v5165_v45 = vpop.f32.mrb[150].mxu1  ;;  %v14767_v58 = vpop.eup %14766  ;;  %13261 = vst [vmem:[%s17723_s8 + $0x78] sm:$0xff] %v12804_v62  ;;  %v11359_v35 = vmul.f32 %v17296_v60, %v11157_v14  ;;  %v11159_v33 = vmin.f32 %v10963_v22, 1.0  ;;  %v10766_v47 = vmul.f32 %v14765_v7, %v20595_v16  ;;  %v6761_v2 = vrot.slane %v20724_v31, %v16174_v23 }
 0x640   : > { %v5125_v50 = vpop.f32.mrb[163].mxu0  ;;  %v5166_v6 = vpop.f32.mrb[151].mxu1  ;;  %v10768_v4 = vmul.f32 %v14767_v58, %v20598_v41  ;;  %v7318_v19 = vmul.f32 %v6749_v3, %v20523_v15  ;;  %v8048_v54 = vrot.slane %v20745_v56, %v16121_v40  ;;  %v7320_v51 = vmul.f32 %v6757_v0, %v20525_v38 }
 0x641   : > { %v14769_v48 = vpop.eup %14768  ;;  %v11561_v14 = vadd.f32 %v17464_v12, %v11359_v35  ;;  %v11361_v16 = vmul.f32 %v17296_v60, %v11159_v33  ;;  %v10962_v22 = vmax.f32 %v10766_v47, 0.0  ;;  %5995 = vmatpush1.bf16.msra.mxu0 %v2121_v26  ;;  %6036 = vmatpush1.bf16.msra.mxu1 %v2123_v44  ;;  %v8056_v41 = vrot.slane %v20745_v56, %v16135_v53 }
 0x642   : > { %v14771_v62 = vpop.eup %14770  ;;  %v10181_v7 = vadd.f32 1.0, %v14769_v48  ;;  %v10964_v45 = vmax.f32 %v10768_v4, 0.0  ;;  %6070 = vmatprep.subr.bf16.mxu0 %v1538_v61  ;;  %6111 = vmatprep.subr.bf16.mxu1 %v1540_v36  ;;  %v9028_v15 = vrot.slane %v8048_v54, %v16121_v40  ;;  %v7319_v36 = vmul.f32 %v6753_v18, %v20533_v9  ;;  %v22737_v4 = vld [vmem:[#allocation85_spill] sm:$0xff] }
 0x643   : > { %v14773_v1 = vpop.eup %14772  ;;  %v10183_v50 = vadd.f32 1.0, %v14771_v62  ;;  %v11563_v38 = vadd.f32 %v17464_v12, %v11361_v16  ;;  %v11158_v3 = vmin.f32 %v10962_v22, 1.0  ;;  %v9036_v44 = vrot.slane %v8056_v41, %v16121_v40  ;;  %v1342_v22 = vld [vmem:[%s15596_s26 + $0xc28] sm:$0xff] }
 0x644   : > { %14776 = vrcp.f32 %v10181_v7  ;;  %v10182_v0 = vadd.f32 1.0, %v14773_v1  ;;  %v11160_v58 = vmin.f32 %v10964_v45, 1.0  ;;  %13586 = vmatmul.mubr.msk.bf16.vlgmr.msra.gmra.mrb[204].mxu0 %vm2130_vm2, %v15852_v11  ;;  %13587 = vmatmul.mubr.msk.bf16.vlgmr.msra.gmra.mrb[192].mxu1 %vm2130_vm2, %v15852_v11  ;;  %v20771_v26 = vadd.f32 %v9028_v15, %v7318_v19  ;;  %v1344_v7 = vld [vmem:[%s15596_s26 + $0xc38] sm:$0xff]  ;;  %v20798_v1 = vld [vmem:[%s15596_s26 + $0xc20] sm:$0xff]  ;;  %v20803_v15 = vld [vmem:[%s15596_s26 + $0xc30] sm:$0xff]  ;;  %s22748_s26 = sld [smem:[#allocation23_spill]] }
 0x645   : > { %14778 = vrcp.f32 %v10183_v50  ;;  %v11360_v61 = vmul.f32 %v17296_v60, %v11158_v3  ;;  %6071 = vmatpush1.bf16.msra.mxu0 %v1537_v25  ;;  %6112 = vmatpush1.bf16.msra.mxu1 %v1539_v59  ;;  %v8052_v35 = vrot.slane %v20745_v56, %v16132_v52  ;;  %v20780_v48 = vadd.f32 %v9036_v44, %v7320_v51 }
 0x646   : > { %14780 = vrcp.f32 %v10182_v0  ;;  %v14775_v33 = vpop.eup %14774  ;;  %v11362_v47 = vmul.f32 %v17296_v60, %v11160_v58  ;;  %v13726_v6 = vmul.f32 -1.442695, %v20771_v26  ;;  %v7321_v19 = vmul.f32 %v6761_v2, %v22737_v4  ;;  %6102 = vmatprep.mubr.bf16.mxu0 %v22080_v55  ;;  %6143 = vmatprep.mubr.bf16.mxu1 %v22080_v55 }
 0x647   : > { %v11562_v9 = vadd.f32 %v17464_v12, %v11360_v61  ;;  %v10184_v25 = vadd.f32 1.0, %v14775_v33  ;;  %v9032_v59 = vrot.slane %v8052_v35, %v16121_v40  ;;  %v8060_v18 = vrot.slane %v20745_v56, %v16138_v42 }
 0x648   : > { %v11564_v54 = vadd.f32 %v17464_v12, %v11362_v47  ;;  %14782 = vpow2.f32 %v13726_v6  ;;  %v13728_v2 = vmul.f32 -1.442695, %v20780_v48  ;;  %v1734_v51 = vunpack.c.h.s8.bf16 %v20707_v8 }
 0x649   : > { %v13850_v62 = vpack.c.bf16 %v11562_v9, %v11561_v14  ;;  %14784 = vrcp.f32 %v10184_v25  ;;  %v20792_v16 = vadd.f32 %v9032_v59, %v7319_v36  ;;  %v9040_v55 = vrot.slane %v8060_v18, %v16121_v40 }
 0x64a   : > { %v13851_v45 = vpack.c.bf16 %v11564_v54, %v11563_v38  ;;  %14786 = vpow2.f32 %v13728_v2  ;;  %6072 = vmatprep.subr.bf16.mxu0 %v1734_v51  ;;  %v1736_v56 = vunpack.c.h.s8.bf16 %v20710_v63  ;;  %v1733_v50 = vunpack.c.h.s8.bf16 %v20713_v43  ;;  %p22750_p9 = scmp.ne.s32.totalorder %s22748_s26, 0 }
 0x64b   : > { %v12815_v8 = vrot.slane %v13850_v62, %v22351_v30  ;;  %v13727_v14 = vmul.f32 -1.442695, %v20792_v16  ;;  %v20807_v41 = vadd.f32 %v9040_v55, %v7321_v19  ;;  %v1735_v3 = vunpack.c.h.s8.bf16 %v20718_v34 }
 0x64c   : > { %v12822_v0 = vrot.slane %v13851_v45, %v22351_v30  ;;  %6113 = vmatprep.subr.bf16.mxu1 %v1736_v56  ;;  %6073 = vmatpush1.bf16.msra.mxu0 %v1733_v50  ;;  %v1930_v38 = vunpack.c.l.s8.bf16 %v1342_v22  ;;  %v1932_v58 = vunpack.c.l.s8.bf16 %v1344_v7  ;;  %v1929_v63 = vunpack.c.l.s8.bf16 %v20798_v1 }
 0x64d   : > { %14788 = vpow2.f32 %v13727_v14  ;;  %v13729_v43 = vmul.f32 -1.442695, %v20807_v41  ;;  %6114 = vmatpush1.bf16.msra.mxu1 %v1735_v3  ;;  %v1931_v61 = vunpack.c.l.s8.bf16 %v20803_v15  ;;  %v2126_v36 = vunpack.c.h.s8.bf16 %v1342_v22 }
 0x64e   : > { %v14777_v44 = vpop.eup %14776  ;;  %v12837_v33 = vcombine.low %v12815_v8, %v12822_v0  ;;  %6074 = vmatprep.subr.bf16.mxu0 %v1930_v38  ;;  %6115 = vmatprep.subr.bf16.mxu1 %v1932_v58  ;;  %v2128_v47 = vunpack.c.h.s8.bf16 %v1344_v7  ;;  %v2125_v6 = vunpack.c.h.s8.bf16 %v20798_v1  ;;  %v2127_v9 = vunpack.c.h.s8.bf16 %v20803_v15 }
 0x64f   : > { %v14779_v35 = vpop.eup %14778  ;;  %v10769_v34 = vmul.f32 %v14777_v44, %v20662_v46  ;;  %14790 = vpow2.f32 %v13729_v43  ;;  %v6765_v25 = vrot.slane %v20724_v31, %v16135_v53  ;;  %v20825_v54 = vunpack.c.h.bf16 %v20727_v28 }
 0x650   : > { %v14781_v4 = vpop.eup %14780  ;;  %v10771_v19 = vmul.f32 %v14779_v35, %v20678_v10  ;;  %v20821_v59 = vrot.slane %v12837_v33, %v22351_v30  ;;  %6075 = vmatpush1.bf16.msra.mxu0 %v1929_v63  ;;  %v20827_v2 = vpop.f32.mrb[164].mxu0  ;;  %v6773_v62 = vrot.slane %v20724_v31, %v16138_v42  ;;  %v6769_v55 = vrot.slane %v20724_v31, %v16261_v5 }
 0x651   : > { %v10965_v18 = vmax.f32 %v10769_v34, 0.0  ;;  %v10770_v46 = vmul.f32 %v14781_v4, %v20680_v49  ;;  %6116 = vmatpush1.bf16.msra.mxu1 %v1931_v61  ;;  %6076 = vmatprep.subr.bf16.mxu0 %v2126_v36  ;;  %v7322_v10 = vmul.f32 %v6765_v25, %v20624_v27  ;;  %v20834_v22 = vpop.f32.mrb[152].mxu1  ;;  %v20836_v49 = vpop.f32.mrb[165].mxu0  ;;  %v8064_v45 = vrot.slane %v20825_v54, %v16121_v40 }
 0x652   : > { %v10967_v51 = vmax.f32 %v10771_v19, 0.0  ;;  %v14783_v7 = vpop.eup %14782  ;;  %6117 = vmatprep.subr.bf16.mxu1 %v2128_v47  ;;  %v8072_v27 = vrot.slane %v20825_v54, %v16135_v53  ;;  %v20842_v56 = vpop.f32.mrb[153].mxu1  ;;  %v7324_v3 = vmul.f32 %v6773_v62, %v20629_v37  ;;  %v7323_v0 = vmul.f32 %v6769_v55, %v20631_v39 }
 0x653   : > { %v11161_v28 = vmin.f32 %v10965_v18, 1.0  ;;  %v10966_v1 = vmax.f32 %v10770_v46, 0.0  ;;  %v5206_v50 = vpop.f32.mrb[166].mxu0  ;;  %v14785_v15 = vpop.eup %14784  ;;  %v10185_v14 = vadd.f32 1.0, %v14783_v7  ;;  %v9044_v36 = vrot.slane %v8064_v45, %v16121_v40  ;;  %v20873_v45 = vld [vmem:[%s15606_s3 + $0x90] sm:$0xff] }
 0x654   : > { %v11163_v8 = vmin.f32 %v10967_v51, 1.0  ;;  %v5247_v38 = vpop.f32.mrb[154].mxu1  ;;  %v5207_v58 = vpop.f32.mrb[167].mxu0  ;;  %v10772_v61 = vmul.f32 %v14785_v15, %v20701_v32  ;;  %6077 = vmatpush1.bf16.msra.mxu0 %v2125_v6  ;;  %v9052_v37 = vrot.slane %v8072_v27, %v16121_v40  ;;  %v20877_v15 = vld [vmem:[%s15610_s17 + $0x90] sm:$0xff] }
 0x655   : > { %v14787_v63 = vpop.eup %14786  ;;  %v11363_v44 = vmul.f32 %v17296_v60, %v11161_v28  ;;  %v11162_v43 = vmin.f32 %v10966_v1, 1.0  ;;  %v5248_v35 = vpop.f32.mrb[155].mxu1  ;;  %14792 = vrcp.f32 %v10185_v14  ;;  %6118 = vmatpush1.bf16.msra.mxu1 %v2127_v9  ;;  %v20853_v19 = vadd.f32 %v9044_v36, %v7322_v10 }
 0x656   : > { %v11365_v33 = vmul.f32 %v17296_v60, %v11163_v8  ;;  %v10187_v34 = vadd.f32 1.0, %v14787_v63  ;;  %v10968_v4 = vmax.f32 %v10772_v61, 0.0  ;;  %v20858_v6 = vadd.f32 %v9052_v37, %v7324_v3 }
 0x657   : > { %v11565_v39 = vadd.f32 %v17464_v12, %v11363_v44  ;;  %v11364_v47 = vmul.f32 %v17296_v60, %v11162_v43  ;;  %v14789_v25 = vpop.eup %14788  ;;  %13588 = vmatmul.mubr.msk.bf16.vlgmr.msra.gmra.mrb[208].mxu0 %vm2130_vm2, %v15852_v11  ;;  %v8068_v9 = vrot.slane %v20825_v54, %v16132_v52  ;;  %v13730_v10 = vmul.f32 -1.442695, %v20853_v19 }
 0x658   : > { %v11567_v32 = vadd.f32 %v17464_v12, %v11365_v33  ;;  %14794 = vrcp.f32 %v10187_v34  ;;  %v11164_v46 = vmin.f32 %v10968_v4, 1.0  ;;  %v10186_v51 = vadd.f32 1.0, %v14789_v25  ;;  %13589 = vmatmul.mubr.msk.bf16.vlgmr.msra.gmra.mrb[196].mxu1 %vm2130_vm2, %v15852_v11 }
 0x659   : > { %v11566_v18 = vadd.f32 %v17464_v12, %v11364_v47  ;;  %v14791_v62 = vpop.eup %14790  ;;  %v13732_v55 = vmul.f32 -1.442695, %v20858_v6  ;;  %v9048_v7 = vrot.slane %v8068_v9, %v16121_v40  ;;  %v6777_v28 = vrot.slane %v20724_v31, %v16268_v57 }
 0x65a   : > { %v8076_v1 = vrot.slane %v20825_v54, %v16138_v42  ;;  %v11366_v50 = vmul.f32 %v17296_v60, %v11164_v46  ;;  %14796 = vrcp.f32 %v10186_v51  ;;  %v10188_v11 = vadd.f32 1.0, %v14791_v62 }
 0x65b   : > { %v13852_v27 = vpack.c.bf16 %v11566_v18, %v11565_v39  ;;  %14798 = vpow2.f32 %v13730_v10  ;;  %v20879_v8 = vadd.f32 %v9048_v7, %v7323_v0  ;;  %v7325_v14 = vmul.f32 %v6777_v28, %v20639_v21 }
 0x65c   : > { %v9056_v3 = vrot.slane %v8076_v1, %v16121_v40  ;;  %v11568_v54 = vadd.f32 %v17464_v12, %v11366_v50  ;;  %14800 = vrcp.f32 %v10188_v11  ;;  %v6781_v38 = vrot.slane %v20873_v45, %v16121_v40 }
 0x65d   : > { %v12829_v31 = vrot.slane %v13852_v27, %v22351_v30  ;;  %14802 = vpow2.f32 %v13732_v55  ;;  %v13731_v58 = vmul.f32 -1.442695, %v20879_v8  ;;  %v20891_v0 = vunpack.c.l.bf16 %v20877_v15 }
 0x65e   : > { %v20888_v63 = vadd.f32 %v9056_v3, %v7325_v14  ;;  %v13853_v44 = vpack.c.bf16 %v11568_v54, %v11567_v32  ;;  %v7326_v21 = vmul.f32 %v6781_v38, %v20732_v29  ;;  %v6789_v43 = vrot.slane %v20873_v45, %v16132_v52 }
 0x65f   : > { %v6785_v61 = vrot.slane %v20873_v45, %v16161_v13  ;;  %v14793_v36 = vpop.eup %14792  ;;  %14804 = vpow2.f32 %v13731_v58  ;;  %v8080_v33 = vrot.slane %v20891_v0, %v16121_v40  ;;  %v8088_v34 = vrot.slane %v20891_v0, %v16135_v53 }
 0x660   : > { %v13733_v35 = vmul.f32 -1.442695, %v20888_v63  ;;  %v12836_v37 = vrot.slane %v13853_v44, %v22351_v30  ;;  %v10773_v29 = vmul.f32 %v14793_v36, %v20771_v26  ;;  %v7328_v39 = vmul.f32 %v6789_v43, %v20734_v24 }
 0x661   : > { %v7327_v47 = vmul.f32 %v6785_v61, %v20738_v17  ;;  %v9060_v25 = vrot.slane %v8080_v33, %v16121_v40  ;;  %v9068_v32 = vrot.slane %v8088_v34, %v16121_v40  ;;  %v8084_v9 = vrot.slane %v20891_v0, %v16132_v52 }
 0x662   : > { %v14795_v4 = vpop.eup %14794  ;;  %14806 = vpow2.f32 %v13733_v35  ;;  %v12838_v18 = vcombine.low %v12829_v31, %v12836_v37  ;;  %v10969_v46 = vmax.f32 %v10773_v29, 0.0  ;;  %v6793_v26 = vrot.slane %v20873_v45, %v16174_v23 }
 0x663   : > { %v10775_v51 = vmul.f32 %v14795_v4, %v20780_v48  ;;  %v20914_v10 = vadd.f32 %v9060_v25, %v7326_v21  ;;  %v20916_v24 = vadd.f32 %v9068_v32, %v7328_v39  ;;  %v9064_v17 = vrot.slane %v8084_v9, %v16121_v40 }
 0x664   : > { %v8092_v62 = vrot.slane %v20891_v0, %v16138_v42  ;;  %v14797_v55 = vpop.eup %14796  ;;  %v12852_v7 = vrot.slane %v12838_v18, %v22351_v30  ;;  %v11165_v28 = vmin.f32 %v10969_v46, 1.0  ;;  %v7329_v27 = vmul.f32 %v6793_v26, %v20740_v20  ;;  %v20923_v48 = vpop.f32.mrb[168].mxu0 }
 0x665   : > { %v10971_v1 = vmax.f32 %v10775_v51, 0.0  ;;  %v14799_v50 = vpop.eup %14798  ;;  %v10774_v11 = vmul.f32 %v14797_v55, %v20792_v16  ;;  %v13734_v14 = vmul.f32 -1.442695, %v20914_v10  ;;  %v13736_v3 = vmul.f32 -1.442695, %v20916_v24  ;;  %v20930_v54 = vpop.f32.mrb[156].mxu1 }
 0x666   : > { %v20928_v31 = vadd.f32 %v9064_v17, %v7327_v47  ;;  %v20932_v38 = vpop.f32.mrb[169].mxu0  ;;  %v14801_v58 = vpop.eup %14800  ;;  %v12853_v0 = vcombine.low %v20821_v59, %v12852_v7  ;;  %v11367_v20 = vmul.f32 %v17296_v60, %v11165_v28  ;;  %v10189_v21 = vadd.f32 1.0, %v14799_v50 }
 0x667   : > { %v11167_v44 = vmin.f32 %v10971_v1, 1.0  ;;  %v20936_v43 = vpop.f32.mrb[157].mxu1  ;;  %v5288_v16 = vpop.f32.mrb[170].mxu0  ;;  %v10970_v36 = vmax.f32 %v10774_v11, 0.0  ;;  %v10776_v35 = vmul.f32 %v14801_v58, %v20807_v41  ;;  %14808 = vpow2.f32 %v13734_v14 }
 0x668   : > { %v14803_v61 = vpop.eup %14802  ;;  %v13735_v33 = vmul.f32 -1.442695, %v20928_v31  ;;  %v5329_v34 = vpop.f32.mrb[158].mxu1  ;;  %13262 = vst [vmem:[%s17723_s8 + $0x80] sm:$0xff] %v12853_v0  ;;  %v11569_v29 = vadd.f32 %v17464_v12, %v11367_v20  ;;  %14810 = vrcp.f32 %v10189_v21  ;;  %v9072_v9 = vrot.slane %v8092_v62, %v16121_v40 }
 0x669   : > { %v5289_v37 = vpop.f32.mrb[171].mxu0  ;;  %v11369_v59 = vmul.f32 %v17296_v60, %v11167_v44  ;;  %v10191_v39 = vadd.f32 1.0, %v14803_v61  ;;  %v5330_v47 = vpop.f32.mrb[159].mxu1  ;;  %v11166_v25 = vmin.f32 %v10970_v36, 1.0  ;;  %v10972_v32 = vmax.f32 %v10776_v35, 0.0 }
 0x66a   : > { %v14805_v4 = vpop.eup %14804  ;;  %14812 = vpow2.f32 %v13736_v3  ;;  %v6797_v46 = vrot.slane %v20873_v45, %v16135_v53  ;;  %v20948_v55 = vadd.f32 %v9072_v9, %v7329_v27  ;;  %v7440_v62 = vunpack.c.h.bf16 %v20877_v15 }
 0x66b   : > { %v11571_v41 = vadd.f32 %v17464_v12, %v11369_v59  ;;  %14814 = vrcp.f32 %v10191_v39  ;;  %v10190_v18 = vadd.f32 1.0, %v14805_v4  ;;  %v11368_v26 = vmul.f32 %v17296_v60, %v11166_v25 }
 0x66c   : > { %v14807_v51 = vpop.eup %14806  ;;  %v11168_v17 = vmin.f32 %v10972_v32, 1.0  ;;  %14816 = vpow2.f32 %v13735_v33  ;;  %v7330_v28 = vmul.f32 %v6797_v46, %v20827_v2  ;;  %v13737_v11 = vmul.f32 -1.442695, %v20948_v55 }
 0x66d   : > { %14818 = vrcp.f32 %v10190_v18  ;;  %v10192_v7 = vadd.f32 1.0, %v14807_v51  ;;  %v11570_v1 = vadd.f32 %v17464_v12, %v11368_v26  ;;  %v6805_v14 = vrot.slane %v20873_v45, %v16138_v42 }
 0x66e   : > { %v11370_v50 = vmul.f32 %v17296_v60, %v11168_v17  ;;  %v8096_v3 = vrot.slane %v7440_v62, %v16121_v40  ;;  %v8104_v27 = vrot.slane %v7440_v62, %v16135_v53  ;;  %v6801_v58 = vrot.slane %v20873_v45, %v16261_v5 }
 0x66f   : > { %14820 = vrcp.f32 %v10192_v7  ;;  %v13854_v2 = vpack.c.bf16 %v11570_v1, %v11569_v29  ;;  %v7332_v0 = vmul.f32 %v6805_v14, %v20834_v22  ;;  %v8100_v16 = vrot.slane %v7440_v62, %v16132_v52 }
 0x670   : > { %v11572_v15 = vadd.f32 %v17464_v12, %v11370_v50  ;;  %14822 = vpow2.f32 %v13737_v11  ;;  %v9076_v20 = vrot.slane %v8096_v3, %v16121_v40  ;;  %v9084_v44 = vrot.slane %v8104_v27, %v16121_v40  ;;  %v20997_v27 = vld [vmem:[%s15610_s17 + $0x98] sm:$0xff] }
 0x671   : > { %v7331_v21 = vmul.f32 %v6801_v58, %v20836_v49  ;;  %v14809_v61 = vpop.eup %14808  ;;  %v12864_v36 = vrot.slane %v13854_v2, %v22351_v30  ;;  %v6809_v33 = vrot.slane %v20873_v45, %v16268_v57  ;;  %v8108_v34 = vrot.slane %v7440_v62, %v16138_v42  ;;  %v20981_v45 = vld [vmem:[%s15606_s3 + $0x98] sm:$0xff] }
 0x672   : > { %v13855_v35 = vpack.c.bf16 %v11572_v15, %v11571_v41  ;;  %v14811_v37 = vpop.eup %14810  ;;  %v10193_v22 = vadd.f32 1.0, %v14809_v61  ;;  %v20971_v29 = vadd.f32 %v9076_v20, %v7330_v28  ;;  %v20973_v59 = vadd.f32 %v9084_v44, %v7332_v0 }
 0x673   : > { %v9080_v49 = vrot.slane %v8100_v16, %v16121_v40  ;;  %v10777_v4 = vmul.f32 %v14811_v37, %v20853_v19  ;;  %v7333_v25 = vmul.f32 %v6809_v33, %v20842_v56  ;;  %v9088_v32 = vrot.slane %v8108_v34, %v16121_v40 }
 0x674   : > { %v14813_v39 = vpop.eup %14812  ;;  %v12871_v47 = vrot.slane %v13855_v35, %v22351_v30  ;;  %14824 = vrcp.f32 %v10193_v22  ;;  %v13738_v18 = vmul.f32 -1.442695, %v20971_v29  ;;  %v13740_v46 = vmul.f32 -1.442695, %v20973_v59 }
 0x675   : > { %v14815_v9 = vpop.eup %14814  ;;  %v10195_v41 = vadd.f32 1.0, %v14813_v39  ;;  %v10973_v17 = vmax.f32 %v10777_v4, 0.0  ;;  %v20986_v19 = vadd.f32 %v9080_v49, %v7331_v21  ;;  %v20988_v62 = vadd.f32 %v9088_v32, %v7333_v25 }
 0x676   : > { %v14817_v51 = vpop.eup %14816  ;;  %v12886_v26 = vcombine.low %v12864_v36, %v12871_v47  ;;  %v10779_v7 = vmul.f32 %v14815_v9, %v20858_v6  ;;  %v6813_v1 = vrot.slane %v20981_v45, %v16121_v40  ;;  %v21013_v34 = vunpack.c.l.bf16 %v20997_v27 }
 0x677   : > { %v14819_v56 = vpop.eup %14818  ;;  %14826 = vrcp.f32 %v10195_v41  ;;  %v10194_v28 = vadd.f32 1.0, %v14817_v51  ;;  %v11169_v11 = vmin.f32 %v10973_v17, 1.0  ;;  %v13739_v58 = vmul.f32 -1.442695, %v20986_v19 }
 0x678   : > { %v20993_v50 = vrot.slane %v12886_v26, %v22351_v30  ;;  %v10975_v14 = vmax.f32 %v10779_v7, 0.0  ;;  %v10778_v3 = vmul.f32 %v14819_v56, %v20879_v8  ;;  %v13741_v2 = vmul.f32 -1.442695, %v20988_v62  ;;  %v21002_v0 = vpop.f32.mrb[172].mxu0  ;;  %v21004_v20 = vpop.f32.mrb[160].mxu1 }
 0x679   : > { %v14821_v6 = vpop.eup %14820  ;;  %14828 = vrcp.f32 %v10194_v28  ;;  %v7334_v15 = vmul.f32 %v6813_v1, %v20923_v48  ;;  %v11371_v21 = vmul.f32 %v17296_v60, %v11169_v11  ;;  %v21008_v36 = vpop.f32.mrb[173].mxu0  ;;  %v6821_v48 = vrot.slane %v20981_v45, %v16132_v52 }
 0x67a   : > { %v14823_v44 = vpop.eup %14822  ;;  %v11171_v16 = vmin.f32 %v10975_v14, 1.0  ;;  %v10974_v61 = vmax.f32 %v10778_v3, 0.0  ;;  %v10780_v8 = vmul.f32 %v14821_v6, %v20888_v63  ;;  %v21010_v35 = vpop.f32.mrb[161].mxu1  ;;  %14830 = vpow2.f32 %v13738_v18 }
 0x67b   : > { %v10196_v33 = vadd.f32 1.0, %v14823_v44  ;;  %v5370_v37 = vpop.f32.mrb[174].mxu0  ;;  %v5411_v22 = vpop.f32.mrb[162].mxu1  ;;  %v11573_v49 = vadd.f32 %v17464_v12, %v11371_v21  ;;  %v8112_v32 = vrot.slane %v21013_v34, %v16121_v40  ;;  %v7336_v9 = vmul.f32 %v6821_v48, %v20930_v54 }
 0x67c   : > { %v11373_v39 = vmul.f32 %v17296_v60, %v11171_v16  ;;  %v11170_v47 = vmin.f32 %v10974_v61, 1.0  ;;  %v10976_v63 = vmax.f32 %v10780_v8, 0.0  ;;  %v5371_v4 = vpop.f32.mrb[175].mxu0  ;;  %v5412_v25 = vpop.f32.mrb[163].mxu1  ;;  %v8120_v41 = vrot.slane %v21013_v34, %v16135_v53 }
 0x67d   : > { %14832 = vrcp.f32 %v10196_v33  ;;  %v9092_v7 = vrot.slane %v8112_v32, %v16121_v40  ;;  %v6817_v28 = vrot.slane %v20981_v45, %v16161_v13  ;;  %v6825_v33 = vrot.slane %v20981_v45, %v16174_v23 }
 0x67e   : > { %v11575_v18 = vadd.f32 %v17464_v12, %v11373_v39  ;;  %v11372_v51 = vmul.f32 %v17296_v60, %v11170_v47  ;;  %v11172_v26 = vmin.f32 %v10976_v63, 1.0  ;;  %14834 = vpow2.f32 %v13740_v46  ;;  %v14825_v17 = vpop.eup %14824 }
 0x67f   : > { %14836 = vpow2.f32 %v13739_v58  ;;  %v9100_v56 = vrot.slane %v8120_v41, %v16121_v40  ;;  %v10781_v11 = vmul.f32 %v14825_v17, %v20914_v10  ;;  %v21033_v3 = vadd.f32 %v9092_v7, %v7334_v15 }
 0x680   : > { %v11574_v54 = vadd.f32 %v17464_v12, %v11372_v51  ;;  %v11374_v1 = vmul.f32 %v17296_v60, %v11172_v26  ;;  %14838 = vpow2.f32 %v13741_v2  ;;  %v7335_v6 = vmul.f32 %v6817_v28, %v20932_v38 }
 0x681   : > { %v14827_v14 = vpop.eup %14826  ;;  %v21035_v46 = vadd.f32 %v9100_v56, %v7336_v9  ;;  %v8116_v58 = vrot.slane %v21013_v34, %v16132_v52  ;;  %v10977_v16 = vmax.f32 %v10781_v11, 0.0  ;;  %v13742_v10 = vmul.f32 -1.442695, %v21033_v3 }
 0x682   : > { %v13856_v44 = vpack.c.bf16 %v11574_v54, %v11573_v49  ;;  %v11576_v21 = vadd.f32 %v17464_v12, %v11374_v1  ;;  %v10783_v61 = vmul.f32 %v14827_v14, %v20916_v24  ;;  %v7337_v47 = vmul.f32 %v6825_v33, %v20936_v43 }
 0x683   : > { %v14829_v8 = vpop.eup %14828  ;;  %v13744_v2 = vmul.f32 -1.442695, %v21035_v46  ;;  %v9096_v15 = vrot.slane %v8116_v58, %v16121_v40  ;;  %v11173_v37 = vmin.f32 %v10977_v16, 1.0  ;;  %14840 = vpow2.f32 %v13742_v10 }
 0x684   : > { %v12878_v38 = vrot.slane %v13856_v44, %v22351_v30  ;;  %v13857_v48 = vpack.c.bf16 %v11576_v21, %v11575_v18  ;;  %v10979_v22 = vmax.f32 %v10783_v61, 0.0  ;;  %v14831_v49 = vpop.eup %14830  ;;  %v10782_v39 = vmul.f32 %v14829_v8, %v20928_v31 }
 0x685   : > { %v21049_v24 = vadd.f32 %v9096_v15, %v7335_v6  ;;  %v11375_v4 = vmul.f32 %v17296_v60, %v11173_v37  ;;  %v10197_v32 = vadd.f32 1.0, %v14831_v49  ;;  %14842 = vpow2.f32 %v13744_v2 }
 0x686   : > { %v12885_v63 = vrot.slane %v13857_v48, %v22351_v30  ;;  %v11175_v25 = vmin.f32 %v10979_v22, 1.0  ;;  %v10978_v41 = vmax.f32 %v10782_v39, 0.0  ;;  %v8124_v51 = vrot.slane %v21013_v34, %v16138_v42 }
 0x687   : > { %v14833_v9 = vpop.eup %14832  ;;  %v13743_v18 = vmul.f32 -1.442695, %v21049_v24  ;;  %v11577_v17 = vadd.f32 %v17464_v12, %v11375_v4  ;;  %14844 = vrcp.f32 %v10197_v32  ;;  %v6829_v8 = vrot.slane %v20981_v45, %v16135_v53 }
 0x688   : > { %v14835_v31 = vpop.eup %14834  ;;  %v12887_v26 = vcombine.low %v12878_v38, %v12885_v63  ;;  %v11377_v43 = vmul.f32 %v17296_v60, %v11175_v25  ;;  %v10784_v7 = vmul.f32 %v14833_v9, %v20948_v55  ;;  %v11174_v28 = vmin.f32 %v10978_v41, 1.0 }
 0x689   : > { %v14837_v56 = vpop.eup %14836  ;;  %v10199_v54 = vadd.f32 1.0, %v14835_v31  ;;  %v9104_v1 = vrot.slane %v8124_v51, %v16121_v40  ;;  %v7442_v15 = vunpack.c.h.bf16 %v20997_v27  ;;  %v6837_v37 = vrot.slane %v20981_v45, %v16138_v42 }
 0x68a   : > { %v14839_v11 = vpop.eup %14838  ;;  %v12901_v14 = vrot.slane %v12887_v26, %v22351_v30  ;;  %v11579_v6 = vadd.f32 %v17464_v12, %v11377_v43  ;;  %v10980_v34 = vmax.f32 %v10784_v7, 0.0  ;;  %v10198_v58 = vadd.f32 1.0, %v14837_v56 }
 0x68b   : > { %v11376_v44 = vmul.f32 %v17296_v60, %v11174_v28  ;;  %14846 = vrcp.f32 %v10199_v54  ;;  %v10200_v21 = vadd.f32 1.0, %v14839_v11  ;;  %v21064_v16 = vadd.f32 %v9104_v1, %v7337_v47 }
 0x68c   : > { %v12902_v55 = vcombine.low %v20993_v50, %v12901_v14  ;;  %v11176_v61 = vmin.f32 %v10980_v34, 1.0  ;;  %14848 = vrcp.f32 %v10198_v58  ;;  %v21072_v33 = vpop.f32.mrb[176].mxu0  ;;  %v21074_v38 = vpop.f32.mrb[164].mxu1  ;;  %v7338_v50 = vmul.f32 %v6829_v8, %v21002_v0 }
 0x68d   : > { %v11578_v10 = vadd.f32 %v17464_v12, %v11376_v44  ;;  %14850 = vrcp.f32 %v10200_v21  ;;  %v13745_v2 = vmul.f32 -1.442695, %v21064_v16  ;;  %v21081_v22 = vpop.f32.mrb[177].mxu0  ;;  %v21083_v49 = vpop.f32.mrb[165].mxu1  ;;  %v8128_v27 = vrot.slane %v7442_v15, %v16121_v40  ;;  %v21107_v21 = vld [vmem:[%s15606_s3 + $0xa0] sm:$0xff] }
 0x68e   : > { %13263 = vst [vmem:[%s17723_s8 + $0x88] sm:$0xff] %v12902_v55  ;;  %v11378_v48 = vmul.f32 %v17296_v60, %v11176_v61  ;;  %14852 = vpow2.f32 %v13743_v18  ;;  %v14841_v39 = vpop.eup %14840  ;;  %v8136_v63 = vrot.slane %v7442_v15, %v16135_v53  ;;  %v5452_v4 = vpop.f32.mrb[178].mxu0  ;;  %v7340_v0 = vmul.f32 %v6837_v37, %v21004_v20 }
 0x68f   : > { %v13858_v47 = vpack.c.bf16 %v11578_v10, %v11577_v17  ;;  %14854 = vpow2.f32 %v13745_v2  ;;  %v5493_v25 = vpop.f32.mrb[166].mxu1  ;;  %v10201_v9 = vadd.f32 1.0, %v14841_v39  ;;  %v6833_v41 = vrot.slane %v20981_v45, %v16261_v5  ;;  %v5453_v18 = vpop.f32.mrb[179].mxu0 }
 0x690   : > { %v11580_v32 = vadd.f32 %v17464_v12, %v11378_v48  ;;  %v5494_v51 = vpop.f32.mrb[167].mxu1  ;;  %v14843_v31 = vpop.eup %14842  ;;  %v9108_v17 = vrot.slane %v8128_v27, %v16121_v40  ;;  %v9116_v43 = vrot.slane %v8136_v63, %v16121_v40  ;;  %v8132_v7 = vrot.slane %v7442_v15, %v16132_v52 }
 0x691   : > { %v12913_v26 = vrot.slane %v13858_v47, %v22351_v30  ;;  %14856 = vrcp.f32 %v10201_v9  ;;  %v10203_v28 = vadd.f32 1.0, %v14843_v31  ;;  %v7339_v20 = vmul.f32 %v6833_v41, %v21008_v36  ;;  %v14845_v54 = vpop.eup %14844  ;;  %v21128_v31 = vld [vmem:[%s15610_s17 + $0xa0] sm:$0xff] }
 0x692   : > { %v13859_v56 = vpack.c.bf16 %v11580_v32, %v11579_v6  ;;  %v21096_v1 = vadd.f32 %v9108_v17, %v7338_v50  ;;  %v21098_v11 = vadd.f32 %v9116_v43, %v7340_v0  ;;  %v9112_v14 = vrot.slane %v8132_v7, %v16121_v40 }
 0x693   : > { %v6841_v34 = vrot.slane %v20981_v45, %v16268_v57  ;;  %v10785_v44 = vmul.f32 %v14845_v54, %v20971_v29  ;;  %14858 = vrcp.f32 %v10203_v28  ;;  %v8140_v6 = vrot.slane %v7442_v15, %v16138_v42 }
 0x694   : > { %v12920_v58 = vrot.slane %v13859_v56, %v22351_v30  ;;  %v13746_v55 = vmul.f32 -1.442695, %v21096_v1  ;;  %v13748_v61 = vmul.f32 -1.442695, %v21098_v11  ;;  %v21111_v8 = vadd.f32 %v9112_v14, %v7339_v20 }
 0x695   : > { %v14847_v36 = vpop.eup %14846  ;;  %v7341_v10 = vmul.f32 %v6841_v34, %v21010_v35  ;;  %v10981_v48 = vmax.f32 %v10785_v44, 0.0  ;;  %v9120_v29 = vrot.slane %v8140_v6, %v16121_v40  ;;  %v6845_v47 = vrot.slane %v21107_v21, %v16121_v40 }
 0x696   : > { %v14849_v2 = vpop.eup %14848  ;;  %v12935_v45 = vcombine.low %v12913_v26, %v12920_v58  ;;  %v10787_v50 = vmul.f32 %v14847_v36, %v20973_v59  ;;  %14860 = vpow2.f32 %v13746_v55  ;;  %v13747_v39 = vmul.f32 -1.442695, %v21111_v8 }
 0x697   : > { %v14851_v37 = vpop.eup %14850  ;;  %v10786_v15 = vmul.f32 %v14849_v2, %v20986_v19  ;;  %v11177_v63 = vmin.f32 %v10981_v48, 1.0  ;;  %14862 = vpow2.f32 %v13748_v61  ;;  %v21124_v19 = vadd.f32 %v9120_v29, %v7341_v10 }
 0x698   : > { %v14853_v27 = vpop.eup %14852  ;;  %v21121_v35 = vrot.slane %v12935_v45, %v22351_v30  ;;  %v10983_v4 = vmax.f32 %v10787_v50, 0.0  ;;  %v10788_v59 = vmul.f32 %v14851_v37, %v20988_v62  ;;  %v7342_v43 = vmul.f32 %v6845_v47, %v21072_v33 }
 0x699   : > { %v14855_v25 = vpop.eup %14854  ;;  %v10982_v32 = vmax.f32 %v10786_v15, 0.0  ;;  %v10202_v9 = vadd.f32 1.0, %v14853_v27  ;;  %v11379_v0 = vmul.f32 %v17296_v60, %v11177_v63  ;;  %v13749_v17 = vmul.f32 -1.442695, %v21124_v19 }
 0x69a   : > { %v11179_v41 = vmin.f32 %v10983_v4, 1.0  ;;  %v10984_v18 = vmax.f32 %v10788_v59, 0.0  ;;  %v10204_v51 = vadd.f32 1.0, %v14855_v25  ;;  %v21137_v14 = vunpack.c.l.bf16 %v21128_v31 }
 0x69b   : > { %v11178_v26 = vmin.f32 %v10982_v32, 1.0  ;;  %14864 = vrcp.f32 %v10202_v9  ;;  %v14857_v62 = vpop.eup %14856  ;;  %v11581_v7 = vadd.f32 %v17464_v12, %v11379_v0  ;;  %v6853_v44 = vrot.slane %v21107_v21, %v16132_v52 }
 0x69c   : > { %v11381_v56 = vmul.f32 %v17296_v60, %v11179_v41  ;;  %v11180_v28 = vmin.f32 %v10984_v18, 1.0  ;;  %14866 = vrcp.f32 %v10204_v51  ;;  %v10789_v54 = vmul.f32 %v14857_v62, %v21033_v3 }
 0x69d   : > { %v11380_v20 = vmul.f32 %v17296_v60, %v11178_v26  ;;  %14868 = vpow2.f32 %v13747_v39  ;;  %v14859_v34 = vpop.eup %14858  ;;  %v8144_v3 = vrot.slane %v21137_v14, %v16121_v40  ;;  %v7344_v10 = vmul.f32 %v6853_v44, %v21074_v38 }
 0x69e   : > { %v11583_v58 = vadd.f32 %v17464_v12, %v11381_v56  ;;  %v11382_v33 = vmul.f32 %v17296_v60, %v11180_v28  ;;  %14870 = vpow2.f32 %v13749_v17  ;;  %v10985_v36 = vmax.f32 %v10789_v54, 0.0 }
 0x69f   : > { %v11582_v6 = vadd.f32 %v17464_v12, %v11380_v20  ;;  %v10791_v55 = vmul.f32 %v14859_v34, %v21035_v46  ;;  %v8152_v2 = vrot.slane %v21137_v14, %v16135_v53  ;;  %v6849_v45 = vrot.slane %v21107_v21, %v16161_v13  ;;  %v21153_v48 = vpop.f32.mrb[180].mxu0 }
 0x6a0   : > { %v11584_v61 = vadd.f32 %v17464_v12, %v11382_v33  ;;  %v14861_v50 = vpop.eup %14860  ;;  %v11181_v37 = vmin.f32 %v10985_v36, 1.0  ;;  %v9124_v46 = vrot.slane %v8144_v3, %v16121_v40  ;;  %v21156_v39 = vpop.f32.mrb[168].mxu1 }
 0x6a1   : > { %v13860_v29 = vpack.c.bf16 %v11582_v6, %v11581_v7  ;;  %v10987_v15 = vmax.f32 %v10791_v55, 0.0  ;;  %v21158_v47 = vpop.f32.mrb[181].mxu0  ;;  %v10205_v38 = vadd.f32 1.0, %v14861_v50  ;;  %v9132_v63 = vrot.slane %v8152_v2, %v16121_v40  ;;  %v21162_v59 = vpop.f32.mrb[169].mxu1 }
 0x6a2   : > { %v13861_v27 = vpack.c.bf16 %v11584_v61, %v11583_v58  ;;  %v7343_v4 = vmul.f32 %v6849_v45, %v21081_v22  ;;  %v5534_v25 = vpop.f32.mrb[182].mxu0  ;;  %v14863_v32 = vpop.eup %14862  ;;  %v11383_v0 = vmul.f32 %v17296_v60, %v11181_v37  ;;  %v21166_v18 = vadd.f32 %v9124_v46, %v7342_v43 }
 0x6a3   : > { %v12927_v9 = vrot.slane %v13860_v29, %v22351_v30  ;;  %v11183_v41 = vmin.f32 %v10987_v15, 1.0  ;;  %v5575_v51 = vpop.f32.mrb[170].mxu1  ;;  %v5535_v26 = vpop.f32.mrb[183].mxu0  ;;  %14872 = vrcp.f32 %v10205_v38  ;;  %v10207_v62 = vadd.f32 1.0, %v14863_v32 }
 0x6a4   : > { %v12934_v17 = vrot.slane %v13861_v27, %v22351_v30  ;;  %v21169_v7 = vadd.f32 %v9132_v63, %v7344_v10  ;;  %v5576_v22 = vpop.f32.mrb[171].mxu1  ;;  %v11585_v28 = vadd.f32 %v17464_v12, %v11383_v0  ;;  %v13750_v54 = vmul.f32 -1.442695, %v21166_v18 }
 0x6a5   : > { %v14865_v56 = vpop.eup %14864  ;;  %v11385_v20 = vmul.f32 %v17296_v60, %v11183_v41  ;;  %v8148_v43 = vrot.slane %v21137_v14, %v16132_v52  ;;  %14874 = vrcp.f32 %v10207_v62  ;;  %v6857_v37 = vrot.slane %v21107_v21, %v16174_v23 }
 0x6a6   : > { %v14867_v34 = vpop.eup %14866  ;;  %v12936_v58 = vcombine.low %v12927_v9, %v12934_v17  ;;  %v10790_v33 = vmul.f32 %v14865_v56, %v21049_v24  ;;  %v13752_v44 = vmul.f32 -1.442695, %v21169_v7  ;;  %14876 = vpow2.f32 %v13750_v54 }
 0x6a7   : > { %v14869_v6 = vpop.eup %14868  ;;  %v11587_v36 = vadd.f32 %v17464_v12, %v11385_v20  ;;  %v10792_v55 = vmul.f32 %v14867_v34, %v21064_v16  ;;  %v9128_v3 = vrot.slane %v8148_v43, %v16121_v40  ;;  %v8156_v46 = vrot.slane %v21137_v14, %v16138_v42 }
 0x6a8   : > { %v14871_v61 = vpop.eup %14870  ;;  %v12950_v10 = vrot.slane %v12936_v58, %v22351_v30  ;;  %v10986_v2 = vmax.f32 %v10790_v33, 0.0  ;;  %v10206_v45 = vadd.f32 1.0, %v14869_v6  ;;  %14878 = vpow2.f32 %v13752_v44 }
 0x6a9   : > { %v10988_v50 = vmax.f32 %v10792_v55, 0.0  ;;  %v10208_v24 = vadd.f32 1.0, %v14871_v61  ;;  %v21182_v29 = vadd.f32 %v9128_v3, %v7343_v4  ;;  %v7345_v63 = vmul.f32 %v6857_v37, %v21083_v49 }
 0x6aa   : > { %v12951_v15 = vcombine.low %v21121_v35, %v12950_v10  ;;  %v11182_v16 = vmin.f32 %v10986_v2, 1.0  ;;  %14880 = vrcp.f32 %v10206_v45  ;;  %v9136_v25 = vrot.slane %v8156_v46, %v16121_v40 }
 0x6ab   : > { %v11184_v27 = vmin.f32 %v10988_v50, 1.0  ;;  %14882 = vrcp.f32 %v10208_v24  ;;  %v13751_v38 = vmul.f32 -1.442695, %v21182_v29  ;;  %v6861_v32 = vrot.slane %v21107_v21, %v16135_v53 }
 0x6ac   : > { %13264 = vst [vmem:[%s17723_s8 + $0x90] sm:$0xff] %v12951_v15  ;;  %v11384_v4 = vmul.f32 %v17296_v60, %v11182_v16  ;;  %v21197_v35 = vunpack.c.h.bf16 %v21128_v31  ;;  %v6869_v14 = vrot.slane %v21107_v21, %v16138_v42  ;;  %v6865_v49 = vrot.slane %v21107_v21, %v16261_v5 }
 0x6ad   : > { %v11386_v9 = vmul.f32 %v17296_v60, %v11184_v27  ;;  %14884 = vpow2.f32 %v13751_v38  ;;  %v14873_v0 = vpop.eup %14872  ;;  %v21205_v51 = vadd.f32 %v9136_v25, %v7345_v63  ;;  %v7346_v26 = vmul.f32 %v6861_v32, %v21153_v48 }
 0x6ae   : > { %v11586_v41 = vadd.f32 %v17464_v12, %v11384_v4  ;;  %v8160_v31 = vrot.slane %v21197_v35, %v16121_v40  ;;  %v10793_v62 = vmul.f32 %v14873_v0, %v21096_v1  ;;  %v7348_v22 = vmul.f32 %v6869_v14, %v21156_v39 }
 0x6af   : > { %v11588_v17 = vadd.f32 %v17464_v12, %v11386_v9  ;;  %v8168_v56 = vrot.slane %v21197_v35, %v16135_v53  ;;  %v14875_v20 = vpop.eup %14874  ;;  %v13753_v43 = vmul.f32 -1.442695, %v21205_v51  ;;  %v7347_v48 = vmul.f32 %v6865_v49, %v21158_v47 }
 0x6b0   : > { %v13862_v54 = vpack.c.bf16 %v11586_v41, %v11585_v28  ;;  %v9140_v34 = vrot.slane %v8160_v31, %v16121_v40  ;;  %v14877_v58 = vpop.eup %14876  ;;  %v10989_v44 = vmax.f32 %v10793_v62, 0.0  ;;  %v10795_v6 = vmul.f32 %v14875_v20, %v21098_v11  ;;  %v21249_v20 = vld [vmem:[%s15610_s17 + $0xa8] sm:$0xff] }
 0x6b1   : > { %v13863_v33 = vpack.c.bf16 %v11588_v17, %v11587_v36  ;;  %v9148_v1 = vrot.slane %v8168_v56, %v16121_v40  ;;  %v10209_v3 = vadd.f32 1.0, %v14877_v58  ;;  %14886 = vpow2.f32 %v13753_v43  ;;  %v21246_v56 = vld [vmem:[%s15606_s3 + $0xa8] sm:$0xff] }
 0x6b2   : > { %v14879_v55 = vpop.eup %14878  ;;  %v12962_v39 = vrot.slane %v13862_v54, %v22351_v30  ;;  %v21221_v61 = vadd.f32 %v9140_v34, %v7346_v26  ;;  %v11185_v10 = vmin.f32 %v10989_v44, 1.0  ;;  %v10991_v2 = vmax.f32 %v10795_v6, 0.0 }
 0x6b3   : > { %v12969_v28 = vrot.slane %v13863_v33, %v22351_v30  ;;  %v10211_v45 = vadd.f32 1.0, %v14879_v55  ;;  %14888 = vrcp.f32 %v10209_v3  ;;  %v21225_v50 = vadd.f32 %v9148_v1, %v7348_v22  ;;  %v5612_v24 = vpop.f32.mrb[184].mxu0 }
 0x6b4   : > { %v14881_v47 = vpop.eup %14880  ;;  %v13754_v36 = vmul.f32 -1.442695, %v21221_v61  ;;  %v8164_v11 = vrot.slane %v21197_v35, %v16132_v52  ;;  %v11387_v16 = vmul.f32 %v17296_v60, %v11185_v10  ;;  %v11187_v46 = vmin.f32 %v10991_v2, 1.0  ;;  %v5653_v38 = vpop.f32.mrb[172].mxu1 }
 0x6b5   : > { %v14883_v37 = vpop.eup %14882  ;;  %v12984_v15 = vcombine.low %v12962_v39, %v12969_v28  ;;  %v10794_v27 = vmul.f32 %v14881_v47, %v21111_v8  ;;  %v21231_v63 = vpop.f32.mrb[185].mxu0  ;;  %14890 = vrcp.f32 %v10211_v45  ;;  %v13756_v25 = vmul.f32 -1.442695, %v21225_v50 }
 0x6b6   : > { %v10796_v4 = vmul.f32 %v14883_v37, %v21124_v19  ;;  %v9144_v32 = vrot.slane %v8164_v11, %v16121_v40  ;;  %v21236_v9 = vpop.f32.mrb[173].mxu1  ;;  %v5616_v14 = vpop.f32.mrb[186].mxu0  ;;  %v11589_v8 = vadd.f32 %v17464_v12, %v11387_v16  ;;  %v11389_v41 = vmul.f32 %v17296_v60, %v11187_v46 }
 0x6b7   : > { %v14885_v49 = vpop.eup %14884  ;;  %v21239_v0 = vrot.slane %v12984_v15, %v22351_v30  ;;  %v10990_v26 = vmax.f32 %v10794_v27, 0.0  ;;  %v5657_v19 = vpop.f32.mrb[174].mxu1  ;;  %14892 = vpow2.f32 %v13754_v36  ;;  %v6873_v58 = vrot.slane %v21107_v21, %v16268_v57 }
 0x6b8   : > { %v5617_v31 = vpop.f32.mrb[187].mxu0  ;;  %v10992_v17 = vmax.f32 %v10796_v4, 0.0  ;;  %v10210_v62 = vadd.f32 1.0, %v14885_v49  ;;  %v21243_v22 = vadd.f32 %v9144_v32, %v7347_v48  ;;  %v5658_v54 = vpop.f32.mrb[175].mxu1  ;;  %v11591_v43 = vadd.f32 %v17464_v12, %v11389_v41 }
 0x6b9   : > { %v11186_v34 = vmin.f32 %v10990_v26, 1.0  ;;  %14894 = vpow2.f32 %v13756_v25  ;;  %v8172_v48 = vrot.slane %v21197_v35, %v16138_v42  ;;  %v7349_v1 = vmul.f32 %v6873_v58, %v21162_v59 }
 0x6ba   : > { %v11188_v33 = vmin.f32 %v10992_v17, 1.0  ;;  %14896 = vrcp.f32 %v10210_v62  ;;  %v13755_v44 = vmul.f32 -1.442695, %v21243_v22  ;;  %v6877_v55 = vrot.slane %v21246_v56, %v16121_v40 }
 0x6bb   : > { %v11388_v6 = vmul.f32 %v17296_v60, %v11186_v34  ;;  %v21262_v39 = vunpack.c.l.bf16 %v21249_v20  ;;  %v14887_v3 = vpop.eup %14886  ;;  %v9152_v28 = vrot.slane %v8172_v48, %v16121_v40  ;;  %v6885_v10 = vrot.slane %v21246_v56, %v16132_v52 }
 0x6bc   : > { %v11390_v21 = vmul.f32 %v17296_v60, %v11188_v33  ;;  %14898 = vpow2.f32 %v13755_v44  ;;  %v10212_v2 = vadd.f32 1.0, %v14887_v3  ;;  %v7350_v45 = vmul.f32 %v6877_v55, %v5612_v24 }
 0x6bd   : > { %v11590_v35 = vadd.f32 %v17464_v12, %v11388_v6  ;;  %v8176_v59 = vrot.slane %v21262_v39, %v16121_v40  ;;  %v14889_v47 = vpop.eup %14888  ;;  %v21272_v11 = vadd.f32 %v9152_v28, %v7349_v1  ;;  %v7352_v37 = vmul.f32 %v6885_v10, %v5653_v38 }
 0x6be   : > { %v11592_v36 = vadd.f32 %v17464_v12, %v11390_v21  ;;  %v8184_v15 = vrot.slane %v21262_v39, %v16135_v53  ;;  %v10797_v46 = vmul.f32 %v14889_v47, %v21166_v18  ;;  %14900 = vrcp.f32 %v10212_v2 }
 0x6bf   : > { %v13864_v16 = vpack.c.bf16 %v11590_v35, %v11589_v8  ;;  %v9156_v27 = vrot.slane %v8176_v59, %v16121_v40  ;;  %v14891_v4 = vpop.eup %14890  ;;  %v13757_v25 = vmul.f32 -1.442695, %v21272_v11  ;;  %v6881_v14 = vrot.slane %v21246_v56, %v16161_v13 }
 0x6c0   : > { %v13865_v24 = vpack.c.bf16 %v11592_v36, %v11591_v43  ;;  %v9164_v32 = vrot.slane %v8184_v15, %v16121_v40  ;;  %v10993_v49 = vmax.f32 %v10797_v46, 0.0  ;;  %v10799_v41 = vmul.f32 %v14891_v4, %v21169_v7 }
 0x6c1   : > { %v12976_v38 = vrot.slane %v13864_v16, %v22351_v30  ;;  %v21284_v8 = vadd.f32 %v9156_v27, %v7350_v45  ;;  %v14893_v18 = vpop.eup %14892  ;;  %14902 = vpow2.f32 %v13757_v25  ;;  %v7351_v31 = vmul.f32 %v6881_v14, %v21231_v63 }
 0x6c2   : > { %v12983_v26 = vrot.slane %v13865_v24, %v22351_v30  ;;  %v21287_v19 = vadd.f32 %v9164_v32, %v7352_v37  ;;  %v11189_v62 = vmin.f32 %v10993_v49, 1.0  ;;  %v10995_v54 = vmax.f32 %v10799_v41, 0.0 }
 0x6c3   : > { %v14895_v17 = vpop.eup %14894  ;;  %v10213_v43 = vadd.f32 1.0, %v14893_v18  ;;  %v13758_v34 = vmul.f32 -1.442695, %v21284_v8  ;;  %v8180_v48 = vrot.slane %v21262_v39, %v16132_v52  ;;  %v6889_v28 = vrot.slane %v21246_v56, %v16174_v23 }
 0x6c4   : > { %v14897_v58 = vpop.eup %14896  ;;  %v12985_v33 = vcombine.low %v12976_v38, %v12983_v26  ;;  %v10215_v44 = vadd.f32 1.0, %v14895_v17  ;;  %v13760_v7 = vmul.f32 -1.442695, %v21287_v19  ;;  %v11391_v6 = vmul.f32 %v17296_v60, %v11189_v62 }
 0x6c5   : > { %v11191_v1 = vmin.f32 %v10995_v54, 1.0  ;;  %v10798_v55 = vmul.f32 %v14897_v58, %v21182_v29  ;;  %14904 = vrcp.f32 %v10213_v43  ;;  %v9160_v21 = vrot.slane %v8180_v48, %v16121_v40 }
 0x6c6   : > { %v14899_v63 = vpop.eup %14898  ;;  %v12999_v3 = vrot.slane %v12985_v33, %v22351_v30  ;;  %14906 = vrcp.f32 %v10215_v44  ;;  %v11593_v10 = vadd.f32 %v17464_v12, %v11391_v6  ;;  %v7353_v47 = vmul.f32 %v6889_v28, %v21236_v9 }
 0x6c7   : > { %v11393_v35 = vmul.f32 %v17296_v60, %v11191_v1  ;;  %v10994_v2 = vmax.f32 %v10798_v55, 0.0  ;;  %v10214_v45 = vadd.f32 1.0, %v14899_v63  ;;  %14908 = vpow2.f32 %v13758_v34  ;;  %v5694_v36 = vpop.f32.mrb[188].mxu0  ;;  %v5735_v37 = vpop.f32.mrb[176].mxu1 }
 0x6c8   : > { %v13000_v59 = vcombine.low %v21239_v0, %v12999_v3  ;;  %v21303_v29 = vadd.f32 %v9160_v21, %v7351_v31  ;;  %v14901_v15 = vpop.eup %14900  ;;  %v8188_v27 = vrot.slane %v21262_v39, %v16138_v42  ;;  %v5696_v4 = vpop.f32.mrb[189].mxu0  ;;  %v6893_v25 = vrot.slane %v21246_v56, %v16135_v53 }
 0x6c9   : > { %v21307_v16 = vadd.f32 %v17464_v12, %v11393_v35  ;;  %v11190_v46 = vmin.f32 %v10994_v2, 1.0  ;;  %14910 = vrcp.f32 %v10214_v45  ;;  %v21311_v24 = vpop.f32.mrb[177].mxu1  ;;  %v10800_v0 = vmul.f32 %v14901_v15, %v21205_v51  ;;  %v5698_v32 = vpop.f32.mrb[190].mxu0 }
 0x6ca   : > { %13265 = vst [vmem:[%s17723_s8 + $0x98] sm:$0xff] %v13000_v59  ;;  %14912 = vpow2.f32 %v13760_v7  ;;  %v13759_v9 = vmul.f32 -1.442695, %v21303_v29  ;;  %v5739_v14 = vpop.f32.mrb[178].mxu1  ;;  %v9168_v49 = vrot.slane %v8188_v27, %v16121_v40  ;;  %v21321_v39 = vunpack.c.h.bf16 %v21249_v20  ;;  %v5699_v18 = vpop.f32.mrb[191].mxu0 }
 0x6cb   : > { %v11392_v38 = vmul.f32 %v17296_v60, %v11190_v46  ;;  %v6901_v41 = vrot.slane %v21246_v56, %v16138_v42  ;;  %v5740_v51 = vpop.f32.mrb[179].mxu1  ;;  %v14903_v26 = vpop.eup %14902  ;;  %v10996_v31 = vmax.f32 %v10800_v0, 0.0  ;;  %v7354_v17 = vmul.f32 %v6893_v25, %v5694_v36 }
 0x6cc   : > { %14914 = vpow2.f32 %v13759_v9  ;;  %v6897_v62 = vrot.slane %v21246_v56, %v16261_v5  ;;  %v10216_v43 = vadd.f32 1.0, %v14903_v26  ;;  %v21328_v34 = vadd.f32 %v9168_v49, %v7353_v47 }
 0x6cd   : > { %v11594_v54 = vadd.f32 %v17464_v12, %v11392_v38  ;;  %v8192_v20 = vrot.slane %v21321_v39, %v16121_v40  ;;  %v11192_v58 = vmin.f32 %v10996_v31, 1.0  ;;  %v7356_v33 = vmul.f32 %v6901_v41, %v5735_v37 }
 0x6ce   : > { %v8200_v44 = vrot.slane %v21321_v39, %v16135_v53  ;;  %v7355_v7 = vmul.f32 %v6897_v62, %v5696_v4  ;;  %14916 = vrcp.f32 %v10216_v43  ;;  %v13761_v1 = vmul.f32 -1.442695, %v21328_v34 }
 0x6cf   : > { %v14905_v48 = vpop.eup %14904  ;;  %v13866_v6 = vpack.c.bf16 %v11594_v54, %v11593_v10  ;;  %v9172_v55 = vrot.slane %v8192_v20, %v16121_v40  ;;  %v11394_v3 = vmul.f32 %v17296_v60, %v11192_v58  ;;  %v8196_v35 = vrot.slane %v21321_v39, %v16132_v52  ;;  %v21372_v58 = vld [vmem:[%s15606_s3 + $0xb0] sm:$0xff] }
 0x6d0   : > { %v14907_v63 = vpop.eup %14906  ;;  %v10801_v21 = vmul.f32 %v14905_v48, %v21221_v61  ;;  %v9180_v28 = vrot.slane %v8200_v44, %v16121_v40  ;;  %14918 = vpow2.f32 %v13761_v1  ;;  %v6905_v0 = vrot.slane %v21246_v56, %v16268_v57 }
 0x6d1   : > { %v21342_v2 = vrot.slane %v13866_v6, %v22351_v30  ;;  %v10803_v10 = vmul.f32 %v14907_v63, %v21225_v50  ;;  %v21345_v45 = vadd.f32 %v9172_v55, %v7354_v17  ;;  %v14909_v59 = vpop.eup %14908  ;;  %v11596_v47 = vadd.f32 %v17464_v12, %v11394_v3  ;;  %v22738_v17 = vld [vmem:[#allocation104_spill] sm:$0xff] }
 0x6d2   : > { %v10997_v36 = vmax.f32 %v10801_v21, 0.0  ;;  %v21348_v37 = vadd.f32 %v9180_v28, %v7356_v33  ;;  %v9176_v61 = vrot.slane %v8196_v35, %v16121_v40  ;;  %v10217_v27 = vadd.f32 1.0, %v14909_v59  ;;  %v21375_v33 = vld [vmem:[%s15610_s17 + $0xb0] sm:$0xff] }
 0x6d3   : > { %v14911_v15 = vpop.eup %14910  ;;  %v10999_v46 = vmax.f32 %v10803_v10, 0.0  ;;  %v13762_v4 = vmul.f32 -1.442695, %v21345_v45  ;;  %v13867_v9 = vpack.c.bf16 %v11596_v47, %v21307_v16  ;;  %v22739_v62 = vmax.f32 %v22738_v17, 0.0 }
 0x6d4   : > { %v14913_v50 = vpop.eup %14912  ;;  %v11193_v25 = vmin.f32 %v10997_v36, 1.0  ;;  %v10802_v32 = vmul.f32 %v14911_v15, %v21243_v22  ;;  %v13764_v14 = vmul.f32 -1.442695, %v21348_v37  ;;  %14920 = vrcp.f32 %v10217_v27 }
 0x6d5   : > { %v11195_v38 = vmin.f32 %v10999_v46, 1.0  ;;  %v10219_v49 = vadd.f32 1.0, %v14913_v50  ;;  %v21357_v41 = vadd.f32 %v9176_v61, %v7355_v7  ;;  %v21360_v51 = vrot.slane %v13867_v9, %v22351_v30 }
 0x6d6   : > { %v14915_v18 = vpop.eup %14914  ;;  %v11395_v56 = vmul.f32 %v17296_v60, %v11193_v25  ;;  %v10998_v26 = vmax.f32 %v10802_v32, 0.0  ;;  %14922 = vpow2.f32 %v13762_v4  ;;  %v21367_v54 = vmin.f32 %v22739_v62, 1.0 }
 0x6d7   : > { %v11397_v16 = vmul.f32 %v17296_v60, %v11195_v38  ;;  %14924 = vrcp.f32 %v10219_v49  ;;  %v10218_v22 = vadd.f32 1.0, %v14915_v18  ;;  %v13763_v31 = vmul.f32 -1.442695, %v21357_v41 }
 0x6d8   : > { %v13033_v43 = vcombine.low %v21342_v2, %v21360_v51  ;;  %v11194_v20 = vmin.f32 %v10998_v26, 1.0  ;;  %14926 = vpow2.f32 %v13764_v14  ;;  %v14917_v44 = vpop.eup %14916  ;;  %v11597_v7 = vadd.f32 %v17464_v12, %v11395_v56 }
 0x6d9   : > { %14928 = vrcp.f32 %v10218_v22  ;;  %v7357_v48 = vmul.f32 %v6905_v0, %v21311_v24  ;;  %v8204_v6 = vrot.slane %v21321_v39, %v16138_v42  ;;  %v21382_v1 = vadd.f32 %v17464_v12, %v11397_v16 }
 0x6da   : > { %v11396_v55 = vmul.f32 %v17296_v60, %v11194_v20  ;;  %v10804_v63 = vmul.f32 %v14917_v44, %v21272_v11  ;;  %14930 = vpow2.f32 %v13763_v31  ;;  %v14919_v3 = vpop.eup %14918  ;;  %v6909_v28 = vrot.slane %v21372_v58, %v16121_v40 }
 0x6db   : > { %v9184_v21 = vrot.slane %v8204_v6, %v16121_v40  ;;  %v21390_v35 = vunpack.c.l.bf16 %v21375_v33  ;;  %v6917_v24 = vrot.slane %v21372_v58, %v16132_v52  ;;  %v10220_v59 = vadd.f32 1.0, %v14919_v3 }
 0x6dc   : > { %v11598_v39 = vadd.f32 %v17464_v12, %v11396_v55  ;;  %v11000_v10 = vmax.f32 %v10804_v63, 0.0  ;;  %v6913_v11 = vrot.slane %v21372_v58, %v16161_v13  ;;  %v5776_v36 = vpop.f32.mrb[192].mxu0  ;;  %v6925_v2 = vrot.slane %v21372_v58, %v16135_v53 }
 0x6dd   : > { %v21397_v47 = vadd.f32 %v9184_v21, %v7357_v48  ;;  %v8208_v61 = vrot.slane %v21390_v35, %v16121_v40  ;;  %v8216_v15 = vrot.slane %v21390_v35, %v16135_v53  ;;  %v8212_v46 = vrot.slane %v21390_v35, %v16132_v52  ;;  %v5817_v50 = vpop.f32.mrb[180].mxu1  ;;  %v5778_v9 = vpop.f32.mrb[193].mxu0 }
 0x6de   : > { %v13868_v27 = vpack.c.bf16 %v11598_v39, %v11597_v7  ;;  %v11196_v4 = vmin.f32 %v11000_v10, 1.0  ;;  %14932 = vrcp.f32 %v10220_v59  ;;  %v7358_v0 = vmul.f32 %v6909_v28, %v5776_v36  ;;  %v14921_v25 = vpop.eup %14920  ;;  %v5819_v18 = vpop.f32.mrb[181].mxu1 }
 0x6df   : > { %v13765_v32 = vmul.f32 -1.442695, %v21397_v47  ;;  %v9188_v14 = vrot.slane %v8208_v61, %v16121_v40  ;;  %v7360_v38 = vmul.f32 %v6917_v24, %v5817_v50  ;;  %v9196_v49 = vrot.slane %v8216_v15, %v16121_v40  ;;  %v5780_v56 = vpop.f32.mrb[194].mxu0  ;;  %v5821_v62 = vpop.f32.mrb[182].mxu1 }
 0x6e0   : > { %v14923_v26 = vpop.eup %14922  ;;  %v13025_v16 = vrot.slane %v13868_v27, %v22351_v30  ;;  %v11398_v22 = vmul.f32 %v17296_v60, %v11196_v4  ;;  %v10805_v31 = vmul.f32 %v14921_v25, %v21284_v8  ;;  %v7359_v17 = vmul.f32 %v6913_v11, %v5778_v9  ;;  %v5781_v20 = vpop.f32.mrb[195].mxu0 }
 0x6e1   : > { %v14925_v44 = vpop.eup %14924  ;;  %v10221_v7 = vadd.f32 1.0, %v14923_v26  ;;  %14934 = vpow2.f32 %v13765_v32  ;;  %v21411_v48 = vadd.f32 %v9188_v14, %v7358_v0  ;;  %v21413_v6 = vadd.f32 %v9196_v49, %v7360_v38  ;;  %v5822_v55 = vpop.f32.mrb[183].mxu1 }
 0x6e2   : > { %v14927_v63 = vpop.eup %14926  ;;  %v11600_v3 = vadd.f32 %v17464_v12, %v11398_v22  ;;  %v11001_v21 = vmax.f32 %v10805_v31, 0.0  ;;  %v10807_v28 = vmul.f32 %v14925_v44, %v21287_v19  ;;  %v9192_v24 = vrot.slane %v8212_v46, %v16121_v40 }
 0x6e3   : > { %v14929_v8 = vpop.eup %14928  ;;  %14936 = vrcp.f32 %v10221_v7  ;;  %v10223_v39 = vadd.f32 1.0, %v14927_v63  ;;  %v13766_v10 = vmul.f32 -1.442695, %v21411_v48  ;;  %v13768_v59 = vmul.f32 -1.442695, %v21413_v6 }
 0x6e4   : > { %v14931_v11 = vpop.eup %14930  ;;  %v13869_v36 = vpack.c.bf16 %v11600_v3, %v21382_v1  ;;  %v11197_v61 = vmin.f32 %v11001_v21, 1.0  ;;  %v11003_v15 = vmax.f32 %v10807_v28, 0.0  ;;  %v10806_v27 = vmul.f32 %v14929_v8, %v21303_v29 }
 0x6e5   : > { %14938 = vrcp.f32 %v10223_v39  ;;  %v10222_v4 = vadd.f32 1.0, %v14931_v11  ;;  %v21422_v0 = vadd.f32 %v9192_v24, %v7359_v17  ;;  %v6921_v19 = vrot.slane %v21372_v58, %v16174_v23 }
 0x6e6   : > { %v13032_v46 = vrot.slane %v13869_v36, %v22351_v30  ;;  %v11399_v50 = vmul.f32 %v17296_v60, %v11197_v61  ;;  %v11199_v9 = vmin.f32 %v11003_v15, 1.0  ;;  %v11002_v25 = vmax.f32 %v10806_v27, 0.0 }
 0x6e7   : > { %14940 = vrcp.f32 %v10222_v4  ;;  %v13767_v1 = vmul.f32 -1.442695, %v21422_v0  ;;  %v7361_v32 = vmul.f32 %v6921_v19, %v5819_v18  ;;  %v8220_v29 = vrot.slane %v21390_v35, %v16138_v42 }
 0x6e8   : > { %v14933_v14 = vpop.eup %14932  ;;  %v13041_v38 = vrot.slane %v13033_v43, %v22351_v30  ;;  %v13034_v49 = vcombine.low %v13025_v16, %v13032_v46  ;;  %v11401_v56 = vmul.f32 %v17296_v60, %v11199_v9  ;;  %v11198_v26 = vmin.f32 %v11002_v25, 1.0 }
 0x6e9   : > { %v11601_v22 = vadd.f32 %v17464_v12, %v11399_v50  ;;  %v10808_v31 = vmul.f32 %v14933_v14, %v21328_v34  ;;  %14942 = vpow2.f32 %v13766_v10  ;;  %v9200_v18 = vrot.slane %v8220_v29, %v16121_v40 }
 0x6ea   : > { %v13048_v17 = vrot.slane %v13034_v49, %v22351_v30  ;;  %v11400_v35 = vmul.f32 %v17296_v60, %v11198_v26  ;;  %14944 = vpow2.f32 %v13768_v59  ;;  %v21446_v62 = vunpack.c.h.bf16 %v21375_v33 }
 0x6eb   : > { %v14935_v51 = vpop.eup %14934  ;;  %v11004_v43 = vmax.f32 %v10808_v31, 0.0  ;;  %14946 = vpow2.f32 %v13767_v1  ;;  %v21443_v16 = vadd.f32 %v9200_v18, %v7361_v32  ;;  %v11603_v20 = vadd.f32 %v17464_v12, %v11401_v56 }
 0x6ec   : > { %v13049_v34 = vcombine.low %v13041_v38, %v13048_v17  ;;  %v11602_v44 = vadd.f32 %v17464_v12, %v11400_v35  ;;  %v10224_v7 = vadd.f32 1.0, %v14935_v51  ;;  %v8224_v21 = vrot.slane %v21446_v62, %v16121_v40 }
 0x6ed   : > { %v14937_v55 = vpop.eup %14936  ;;  %v11200_v63 = vmin.f32 %v11004_v43, 1.0  ;;  %v13769_v3 = vmul.f32 -1.442695, %v21443_v16  ;;  %v8232_v28 = vrot.slane %v21446_v62, %v16135_v53  ;;  %v6933_v8 = vrot.slane %v21372_v58, %v16138_v42 }
 0x6ee   : > { %13266 = vst [vmem:[%s17723_s8 + $0xa0] sm:$0xff] %v13049_v34  ;;  %v13870_v24 = vpack.c.bf16 %v11602_v44, %v11601_v22  ;;  %v10809_v33 = vmul.f32 %v14937_v55, %v21345_v45  ;;  %14948 = vrcp.f32 %v10224_v7  ;;  %v9204_v59 = vrot.slane %v8224_v21, %v16121_v40 }
 0x6ef   : > { %v14939_v39 = vpop.eup %14938  ;;  %v11402_v10 = vmul.f32 %v17296_v60, %v11200_v63  ;;  %14950 = vpow2.f32 %v13769_v3  ;;  %v6929_v11 = vrot.slane %v21372_v58, %v16261_v5  ;;  %v5858_v15 = vpop.f32.mrb[196].mxu0  ;;  %v9212_v27 = vrot.slane %v8232_v28, %v16121_v40 }
 0x6f0   : > { %v11005_v36 = vmax.f32 %v10809_v33, 0.0  ;;  %v10811_v61 = vmul.f32 %v14939_v39, %v21348_v37  ;;  %v8228_v45 = vrot.slane %v21446_v62, %v16132_v52  ;;  %v13060_v19 = vrot.slane %v13870_v24, %v22351_v30  ;;  %v5899_v9 = vpop.f32.mrb[184].mxu1  ;;  %v5860_v25 = vpop.f32.mrb[197].mxu0 }
 0x6f1   : > { %v14941_v4 = vpop.eup %14940  ;;  %v11604_v46 = vadd.f32 %v17464_v12, %v11402_v10  ;;  %v7362_v50 = vmul.f32 %v6925_v2, %v5858_v15  ;;  %v6937_v1 = vrot.slane %v21372_v58, %v16268_v57  ;;  %v7364_v14 = vmul.f32 %v6933_v8, %v5899_v9  ;;  %v5901_v38 = vpop.f32.mrb[185].mxu1  ;;  %v22740_v15 = vld [vmem:[#allocation105_spill] sm:$0xff] }
 0x6f2   : > { %v11201_v32 = vmin.f32 %v11005_v36, 1.0  ;;  %v11007_v29 = vmax.f32 %v10811_v61, 0.0  ;;  %v10810_v37 = vmul.f32 %v14941_v4, %v21357_v41  ;;  %v5862_v49 = vpop.f32.mrb[198].mxu0  ;;  %v7363_v31 = vmul.f32 %v6929_v11, %v5860_v25  ;;  %v5903_v17 = vpop.f32.mrb[186].mxu1  ;;  %v7401_v36 = vld [vmem:[%s15610_s17 + $0xb8] sm:$0xff] }
 0x6f3   : > { %v14943_v56 = vpop.eup %14942  ;;  %v13871_v26 = vpack.c.bf16 %v11604_v46, %v11603_v20  ;;  %v21472_v22 = vadd.f32 %v9204_v59, %v7362_v50  ;;  %v9208_v18 = vrot.slane %v8228_v45, %v16121_v40  ;;  %v5863_v35 = vpop.f32.mrb[199].mxu0  ;;  %v21478_v63 = vadd.f32 %v9212_v27, %v7364_v14 }
 0x6f4   : > { %v14945_v2 = vpop.eup %14944  ;;  %v11403_v51 = vmul.f32 %v17296_v60, %v11201_v32  ;;  %v11203_v58 = vmin.f32 %v11007_v29, 1.0  ;;  %v11006_v43 = vmax.f32 %v10810_v37, 0.0  ;;  %v10225_v34 = vadd.f32 1.0, %v14943_v56  ;;  %v5904_v44 = vpop.f32.mrb[187].mxu1 }
 0x6f5   : > { %v14947_v41 = vpop.eup %14946  ;;  %v13067_v7 = vrot.slane %v13871_v26, %v22351_v30  ;;  %v10227_v55 = vadd.f32 1.0, %v14945_v2  ;;  %v13770_v20 = vmul.f32 -1.442695, %v21472_v22  ;;  %v8236_v28 = vrot.slane %v21446_v62, %v16138_v42 }
 0x6f6   : > { %v11405_v3 = vmul.f32 %v17296_v60, %v11203_v58  ;;  %v11202_v21 = vmin.f32 %v11006_v43, 1.0  ;;  %14952 = vrcp.f32 %v10225_v34  ;;  %v10226_v33 = vadd.f32 1.0, %v14947_v41 }
 0x6f7   : > { %v13082_v24 = vcombine.low %v13060_v19, %v13067_v7  ;;  %14954 = vrcp.f32 %v10227_v55  ;;  %v13772_v8 = vmul.f32 -1.442695, %v21478_v63  ;;  %v11605_v10 = vadd.f32 %v17464_v12, %v11403_v51  ;;  %v21495_v19 = vld [vmem:[%s15606_s3 + $0xb8] sm:$0xff] }
 0x6f8   : > { %v14949_v39 = vpop.eup %14948  ;;  %v11404_v59 = vmul.f32 %v17296_v60, %v11202_v21  ;;  %14956 = vpow2.f32 %v13770_v20  ;;  %v21486_v11 = vadd.f32 %v9208_v18, %v7363_v31  ;;  %v22741_v27 = vmax.f32 %v22740_v15, 0.0 }
 0x6f9   : > { %v14951_v61 = vpop.eup %14950  ;;  %v10812_v62 = vmul.f32 %v14949_v39, %v21397_v47  ;;  %14958 = vrcp.f32 %v10226_v33  ;;  %v7365_v4 = vmul.f32 %v6937_v1, %v5901_v38  ;;  %v11607_v25 = vadd.f32 %v17464_v12, %v11405_v3 }
 0x6fa   : > { %v21491_v45 = vmin.f32 %v22741_v27, 1.0  ;;  %v11606_v46 = vadd.f32 %v17464_v12, %v11404_v59  ;;  %v10228_v50 = vadd.f32 1.0, %v14951_v61  ;;  %14960 = vpow2.f32 %v13772_v8 }
 0x6fb   : > { %v13771_v9 = vmul.f32 -1.442695, %v21486_v11  ;;  %v11008_v32 = vmax.f32 %v10812_v62, 0.0  ;;  %v9216_v29 = vrot.slane %v8236_v28, %v16121_v40  ;;  %v7449_v37 = vunpack.c.l.bf16 %v7401_v36 }
 0x6fc   : > { %v21502_v14 = vrot.slane %v13082_v24, %v22351_v30  ;;  %v13872_v47 = vpack.c.bf16 %v11606_v46, %v11605_v10  ;;  %14962 = vrcp.f32 %v10228_v50  ;;  %v6941_v1 = vrot.slane %v21495_v19, %v16121_v40 }
 0x6fd   : > { %v11204_v38 = vmin.f32 %v11008_v32, 1.0  ;;  %14964 = vpow2.f32 %v13771_v9  ;;  %v21506_v49 = vadd.f32 %v9216_v29, %v7365_v4  ;;  %v8240_v56 = vrot.slane %v7449_v37, %v16121_v40 }
 0x6fe   : > { %v6949_v26 = vrot.slane %v21495_v19, %v16132_v52  ;;  %v8248_v31 = vrot.slane %v7449_v37, %v16135_v53  ;;  %v6945_v18 = vrot.slane %v21495_v19, %v16161_v13  ;;  %v8244_v17 = vrot.slane %v7449_v37, %v16132_v52 }
 0x6ff   : > { %v13074_v35 = vrot.slane %v13872_v47, %v22351_v30  ;;  %v11406_v2 = vmul.f32 %v17296_v60, %v11204_v38  ;;  %v13773_v51 = vmul.f32 -1.442695, %v21506_v49  ;;  %v8252_v58 = vrot.slane %v7449_v37, %v16138_v42 }
 0x700   : > { %v14953_v43 = vpop.eup %14952  ;;  %v9220_v34 = vrot.slane %v8240_v56, %v16121_v40  ;;  %v9228_v44 = vrot.slane %v8248_v31, %v16121_v40  ;;  %v6953_v41 = vrot.slane %v21495_v19, %v16174_v23  ;;  %v21523_v7 = vunpack.c.h.bf16 %v7401_v36 }
 0x701   : > { %v14955_v55 = vpop.eup %14954  ;;  %v11608_v20 = vadd.f32 %v17464_v12, %v11406_v2  ;;  %v10813_v3 = vmul.f32 %v14953_v43, %v21411_v48  ;;  %14966 = vpow2.f32 %v13773_v51  ;;  %v9224_v21 = vrot.slane %v8244_v17, %v16121_v40 }
 0x702   : > { %v14957_v28 = vpop.eup %14956  ;;  %v10815_v24 = vmul.f32 %v14955_v55, %v21413_v6  ;;  %v21530_v33 = vrot.slane %v8252_v58, %v16121_v40  ;;  %v6957_v8 = vrot.slane %v21495_v19, %v16135_v53  ;;  %v8256_v39 = vrot.slane %v21523_v7, %v16121_v40  ;;  %v5940_v48 = vpop.f32.mrb[200].mxu0 }
 0x703   : > { %v14959_v10 = vpop.eup %14958  ;;  %v13873_v59 = vpack.c.bf16 %v11608_v20, %v11607_v25  ;;  %v11009_v36 = vmax.f32 %v10813_v3, 0.0  ;;  %v10229_v61 = vadd.f32 1.0, %v14957_v28  ;;  %v6965_v15 = vrot.slane %v21495_v19, %v16138_v42  ;;  %v5981_v46 = vpop.f32.mrb[188].mxu1 }
 0x704   : > { %v14961_v27 = vpop.eup %14960  ;;  %v11011_v62 = vmax.f32 %v10815_v24, 0.0  ;;  %v10814_v6 = vmul.f32 %v14959_v10, %v21422_v0  ;;  %v7366_v4 = vmul.f32 %v6941_v1, %v5940_v48  ;;  %v5942_v50 = vpop.f32.mrb[201].mxu0  ;;  %v8264_v9 = vrot.slane %v21523_v7, %v16135_v53 }
 0x705   : > { %v13081_v32 = vrot.slane %v13873_v59, %v22351_v30  ;;  %v11205_v29 = vmin.f32 %v11009_v36, 1.0  ;;  %14968 = vrcp.f32 %v10229_v61  ;;  %v10231_v25 = vadd.f32 1.0, %v14961_v27  ;;  %v5983_v37 = vpop.f32.mrb[189].mxu1  ;;  %v5944_v47 = vpop.f32.mrb[202].mxu0 }
 0x706   : > { %v14963_v38 = vpop.eup %14962  ;;  %v11207_v56 = vmin.f32 %v11011_v62, 1.0  ;;  %v11010_v31 = vmax.f32 %v10814_v6, 0.0  ;;  %v21542_v17 = vadd.f32 %v9220_v34, %v7366_v4  ;;  %v7368_v2 = vmul.f32 %v6949_v26, %v5981_v46  ;;  %v5985_v0 = vpop.f32.mrb[190].mxu1  ;;  %v7402_v47 = vld [vmem:[%s15610_s17 + $0xc0] sm:$0xf] }
 0x707   : > { %v5945_v1 = vpop.f32.mrb[203].mxu0  ;;  %v14965_v51 = vpop.eup %14964  ;;  %v13083_v58 = vcombine.low %v13074_v35, %v13081_v32  ;;  %v11407_v43 = vmul.f32 %v17296_v60, %v11205_v29  ;;  %v10816_v55 = vmul.f32 %v14963_v38, %v21443_v16  ;;  %14970 = vrcp.f32 %v10231_v25 }
 0x708   : > { %v5986_v20 = vpop.f32.mrb[191].mxu1  ;;  %v11206_v3 = vmin.f32 %v11010_v31, 1.0  ;;  %v10230_v28 = vadd.f32 1.0, %v14965_v51  ;;  %v13774_v24 = vmul.f32 -1.442695, %v21542_v17  ;;  %v6961_v10 = vrot.slane %v21495_v19, %v16261_v5 }
 0x709   : > { %v13097_v34 = vrot.slane %v13083_v58, %v22351_v30  ;;  %v11409_v26 = vmul.f32 %v17296_v60, %v11207_v56  ;;  %v11012_v59 = vmax.f32 %v10816_v55, 0.0  ;;  %v21551_v35 = vadd.f32 %v9228_v44, %v7368_v2  ;;  %v21594_v1 = vld [vmem:[%s15606_s3 + $0xc0] sm:$0xf]  ;;  %s13286_s3 = sshll.u32 %s17723_s8, 4  ;;  %s21790_s3 = int_to_ptr.vmem [resolvable:$true] %s13286_s3 }
 0x70a   : > { %v11609_v36 = vadd.f32 %v17464_v12, %v11407_v43  ;;  %v11408_v16 = vmul.f32 %v17296_v60, %v11206_v3  ;;  %14972 = vrcp.f32 %v10230_v28  ;;  %v7367_v61 = vmul.f32 %v6945_v18, %v5942_v50  ;;  %s15198_s12 = scalar_lea.vmem %s21790_s3, 3136  ;;  %p15205_p4 = scmp.lt.s32.totalorder %s21790_s3, %s15203_s23 }
 0x70b   : > { %v14967_v48 = vpop.eup %14966  ;;  %v13098_v27 = vcombine.low %v21502_v14, %v13097_v34  ;;  %v11208_v62 = vmin.f32 %v11012_v59, 1.0  ;;  %14974 = vpow2.f32 %v13774_v24  ;;  %v13776_v6 = vmul.f32 -1.442695, %v21551_v35  ;;  %p15199_p1 = scmp.ne.s32.totalorder %s21790_s3, %s15198_s12  ;;  %p15206_p10 = scmp.lt.s32.totalorder %s15204_s16, %s15198_s12 }
 0x70c   : > { %v11610_v44 = vadd.f32 %v17464_v12, %v11408_v16  ;;  %v10232_v4 = vadd.f32 1.0, %v14967_v48  ;;  %v21561_v46 = vadd.f32 %v9224_v21, %v7367_v61  ;;  %v7369_v32 = vmul.f32 %v6953_v41, %v5983_v37 }
 0x70d   : > { %13267 = vst [vmem:[%s17723_s8 + $0xa8] sm:$0xff] %v13098_v27  ;;  %v11611_v18 = vadd.f32 %v17464_v12, %v11409_v26  ;;  %v11410_v50 = vmul.f32 %v17296_v60, %v11208_v62  ;;  %14976 = vpow2.f32 %v13776_v6  ;;  %v8260_v14 = vrot.slane %v21523_v7, %v16132_v52  ;;  %p15200_p7 = pnand %p15199_p1, %p22750_p9  ;;  %p15207_p0 = por %p15206_p10, %p15205_p4 }
 0x70e   : > { %v13874_v29 = vpack.c.bf16 %v11610_v44, %v11609_v36  ;;  %14978 = vrcp.f32 %v10232_v4  ;;  %v13775_v25 = vmul.f32 -1.442695, %v21561_v46  ;;  %v21573_v21 = vadd.f32 %v21530_v33, %v7369_v32 }
 0x70f   : > { %v14969_v38 = vpop.eup %14968  ;;  %v11612_v41 = vadd.f32 %v17464_v12, %v11410_v50  ;;  %v21581_v37 = vrot.slane %v8256_v39, %v16121_v40  ;;  %v21584_v56 = vrot.slane %v8264_v9, %v16121_v40  ;;  %v8268_v31 = vrot.slane %v21523_v7, %v16138_v42  ;;  %p15201_p5 = pneg %p15200_p7 }
 0x710   : > { %v10817_v2 = vmul.f32 %v14969_v38, %v21472_v22  ;;  %14980 = vpow2.f32 %v13775_v25  ;;  %v13777_v33 = vmul.f32 -1.442695, %v21573_v21  ;;  %v21591_v0 = vrot.slane %v8260_v14, %v16121_v40 }
 0x711   : > { %v14971_v51 = vpop.eup %14970  ;;  %v21597_v39 = vrot.slane %v13874_v29, %v22351_v30  ;;  %v13875_v58 = vpack.c.bf16 %v11612_v41, %v11611_v18  ;;  %v6969_v9 = vrot.slane %v21495_v19, %v16268_v57  ;;  %v21601_v43 = vunpack.c.l.bf16 %v7402_v47  ;;  %p15208_p6 = pnand %p15207_p0, %p15201_p5 }
 0x712   : > { %v11013_v7 = vmax.f32 %v10817_v2, 0.0  ;;  %v10819_v22 = vmul.f32 %v14971_v51, %v21478_v63  ;;  %14982 = vpow2.f32 %v13777_v33  ;;  %v9248_v55 = vrot.slane %v8268_v31, %v16121_v40  ;;  %v22742_v31 = vld [vmem:[#allocation37_spill] sm:$0xff] }
 0x713   : > { %v21606_v20 = vrot.slane %v13875_v58, %v22351_v30  ;;  %v6973_v3 = vrot.slane %v21594_v1, %v16121_v40  ;;  %v8272_v28 = vrot.slane %v21601_v43, %v16121_v40  ;;  %v8280_v57 = vrot.slane %v21601_v43, %v16135_v53 }
 0x714   : > { %v14973_v24 = vpop.eup %14972  ;;  %v11209_v34 = vmin.f32 %v11013_v7, 1.0  ;;  %v11015_v26 = vmax.f32 %v10819_v22, 0.0  ;;  %v6981_v63 = vrot.slane %v21594_v1, %v16132_v52  ;;  %v8276_v59 = vrot.slane %v21601_v43, %v16132_v52 }
 0x715   : > { %v14975_v36 = vpop.eup %14974  ;;  %v13131_v16 = vcombine.low %v21597_v39, %v21606_v20  ;;  %v10818_v61 = vmul.f32 %v14973_v24, %v21486_v11  ;;  %v6977_v48 = vrot.slane %v21594_v1, %v16161_v13  ;;  %v6985_v27 = vrot.slane %v21594_v1, %v16174_v23 }
 0x716   : > { %v11411_v62 = vmul.f32 %v17296_v60, %v11209_v34  ;;  %v11211_v6 = vmin.f32 %v11015_v26, 1.0  ;;  %v10233_v44 = vadd.f32 1.0, %v14975_v36  ;;  %v21627_v4 = vrot.slane %v8272_v28, %v16121_v40 }
 0x717   : > { %v14977_v32 = vpop.eup %14976  ;;  %v11014_v18 = vmax.f32 %v10818_v61, 0.0  ;;  %v21630_v50 = vrot.slane %v8280_v57, %v16121_v40  ;;  %v21633_v11 = vrot.slane %v8276_v59, %v16121_v40  ;;  %v8284_v14 = vrot.slane %v21601_v43, %v16138_v42  ;;  %v6022_v38 = vpop.f32.mrb[204].mxu0 }
 0x718   : > { %v14979_v29 = vpop.eup %14978  ;;  %v11413_v25 = vmul.f32 %v17296_v60, %v11211_v6  ;;  %14984 = vrcp.f32 %v10233_v44  ;;  %v10235_v47 = vadd.f32 1.0, %v14977_v32  ;;  %v6063_v41 = vpop.f32.mrb[192].mxu1  ;;  %v11232_v2 = vmul.f32 %v17296_v60, %v22742_v31 }
 0x719   : > { %v11210_v33 = vmin.f32 %v11014_v18, 1.0  ;;  %v10820_v51 = vmul.f32 %v14979_v29, %v21506_v49  ;;  %v7370_v58 = vmul.f32 %v6957_v8, %v6022_v38  ;;  %v7372_v7 = vmul.f32 %v6965_v15, %v6063_v41  ;;  %v6024_v22 = vpop.f32.mrb[205].mxu0  ;;  %v6065_v28 = vpop.f32.mrb[193].mxu1  ;;  %v22744_v41 = vld [vmem:[#allocation35_spill] sm:$0xff] }
 0x71a   : > { %v14981_v57 = vpop.eup %14980  ;;  %v11613_v24 = vadd.f32 %v17464_v12, %v11411_v62  ;;  %14986 = vrcp.f32 %v10235_v47  ;;  %v7371_v34 = vmul.f32 %v6961_v10, %v6024_v22  ;;  %v7373_v26 = vmul.f32 %v6969_v9, %v6065_v28  ;;  %v6026_v49 = vpop.f32.mrb[206].mxu0  ;;  %v22746_v28 = vld [vmem:[#allocation48_spill] sm:$0xff] }
 0x71b   : > { %v6067_v59 = vpop.f32.mrb[194].mxu1  ;;  %v11412_v53 = vmul.f32 %v17296_v60, %v11210_v33  ;;  %v11016_v8 = vmax.f32 %v10820_v51, 0.0  ;;  %v10234_v36 = vadd.f32 1.0, %v14981_v57  ;;  %v21653_v61 = vadd.f32 %v21581_v37, %v7370_v58  ;;  %v6027_v15 = vpop.f32.mrb[207].mxu0  ;;  %v22745_v33 = vld [vmem:[#allocation46_spill] sm:$0xff] }
 0x71c   : > { %v6068_v6 = vpop.f32.mrb[195].mxu1  ;;  %v14983_v44 = vpop.eup %14982  ;;  %v11615_v62 = vadd.f32 %v17464_v12, %v11413_v25  ;;  %v21657_v32 = vadd.f32 %v21584_v56, %v7372_v7  ;;  %v21660_v5 = vadd.f32 %v21591_v0, %v7371_v34  ;;  %v21662_v19 = vadd.f32 %v9248_v55, %v7373_v26  ;;  %v22743_v25 = vld [vmem:[#allocation32_spill] sm:$0xff]  ;;  %v22747_v26 = vld [vmem:[#allocation43_spill] sm:$0xff] }
 0x71d   : > { %v11614_v10 = vadd.f32 %v17464_v12, %v11412_v53  ;;  %v11212_v9 = vmin.f32 %v11016_v8, 1.0  ;;  %14988 = vrcp.f32 %v10234_v36  ;;  %v10236_v18 = vadd.f32 1.0, %v14983_v44 }
 0x71e   : > { %v13778_v37 = vmul.f32 -1.442695, %v21653_v61  ;;  %v13780_v29 = vmul.f32 -1.442695, %v21657_v32  ;;  %v13779_v47 = vmul.f32 -1.442695, %v21660_v5  ;;  %v11233_v56 = vmul.f32 %v17296_v60, %v22743_v25 }
 0x71f   : > { %v13876_v38 = vpack.c.bf16 %v11614_v10, %v11613_v24  ;;  %v11414_v0 = vmul.f32 %v17296_v60, %v11212_v9  ;;  %14990 = vrcp.f32 %v10236_v18  ;;  %v13781_v55 = vmul.f32 -1.442695, %v21662_v19 }
 0x720   : > { %14992 = vpow2.f32 %v13778_v37  ;;  %v11234_v31 = vmul.f32 %v17296_v60, %v22744_v41  ;;  %v11235_v51 = vmul.f32 %v17296_v60, %v22745_v33  ;;  %v11236_v58 = vmul.f32 %v17296_v60, %v21367_v54 }
 0x721   : > { %v13123_v7 = vrot.slane %v13876_v38, %v22351_v30  ;;  %v11616_v22 = vadd.f32 %v17464_v12, %v11414_v0  ;;  %14994 = vpow2.f32 %v13780_v29  ;;  %v11237_v57 = vmul.f32 %v17296_v60, %v22746_v28 }
 0x722   : > { %v14985_v24 = vpop.eup %14984  ;;  %14996 = vpow2.f32 %v13779_v47  ;;  %v11238_v34 = vmul.f32 %v17296_v60, %v21491_v45  ;;  %v11433_v49 = vadd.f32 %v17464_v12, %v22747_v26  ;;  %v11434_v59 = vadd.f32 %v17464_v12, %v11232_v2 }
 0x723   : > { %v13877_v53 = vpack.c.bf16 %v11616_v22, %v11615_v62  ;;  %v10821_v54 = vmul.f32 %v14985_v24, %v21542_v17  ;;  %14998 = vpow2.f32 %v13781_v55  ;;  %v11435_v8 = vadd.f32 %v17464_v12, %v11233_v56 }
 0x724   : > { %v14987_v36 = vpop.eup %14986  ;;  %v11436_v15 = vadd.f32 %v17464_v12, %v11234_v31  ;;  %v11437_v6 = vadd.f32 %v17464_v12, %v11235_v51  ;;  %v11438_v44 = vadd.f32 %v17464_v12, %v11236_v58  ;;  %v11439_v45 = vadd.f32 %v17464_v12, %v11237_v57 }
 0x725   : > { %v13130_v10 = vrot.slane %v13877_v53, %v22351_v30  ;;  %v11017_v9 = vmax.f32 %v10821_v54, 0.0  ;;  %v10823_v2 = vmul.f32 %v14987_v36, %v21551_v35  ;;  %v11440_v62 = vadd.f32 %v17464_v12, %v11238_v34 }
 0x726   : > { %v13139_v17 = vrot.slane %v13131_v16, %v22351_v30  ;;  %v13786_v18 = vpack.c.bf16 %v11434_v59, %v11433_v49  ;;  %v13787_v37 = vpack.c.bf16 %v11436_v15, %v11435_v8  ;;  %v13788_v29 = vpack.c.bf16 %v11438_v44, %v11437_v6 }
 0x727   : > { %v14989_v47 = vpop.eup %14988  ;;  %v13132_v25 = vcombine.low %v13123_v7, %v13130_v10  ;;  %v11213_v56 = vmin.f32 %v11017_v9, 1.0  ;;  %v11019_v38 = vmax.f32 %v10823_v2, 0.0  ;;  %v13789_v0 = vpack.c.bf16 %v11440_v62, %v11439_v45 }
 0x728   : > { %v10822_v55 = vmul.f32 %v14989_v47, %v21561_v46  ;;  %v9264_v35 = vrot.slane %v8284_v14, %v16121_v40  ;;  %v12031_v41 = vrot.slane %v13786_v18, %v22351_v30  ;;  %v12038_v39 = vrot.slane %v13787_v37, %v22351_v30 }
 0x729   : > { %v14991_v20 = vpop.eup %14990  ;;  %v13146_v16 = vrot.slane %v13132_v25, %v22351_v30  ;;  %v11415_v31 = vmul.f32 %v17296_v60, %v11213_v56  ;;  %v11215_v33 = vmin.f32 %v11019_v38, 1.0  ;;  %v12045_v51 = vrot.slane %v13788_v29, %v22351_v30 }
 0x72a   : > { %v14993_v58 = vpop.eup %14992  ;;  %v11018_v7 = vmax.f32 %v10822_v55, 0.0  ;;  %v10824_v46 = vmul.f32 %v14991_v20, %v21573_v21  ;;  %v12052_v22 = vrot.slane %v13789_v0, %v22351_v30  ;;  %v12053_v42 = vcombine.low %v12031_v41, %v12038_v39  ;;  %v6104_v34 = vpop.f32.mrb[208].mxu0 }
 0x72b   : > { %v14995_v43 = vpop.eup %14994  ;;  %v13147_v14 = vcombine.low %v13139_v17, %v13146_v16  ;;  %v11617_v28 = vadd.f32 %v17464_v12, %v11415_v31  ;;  %v11417_v57 = vmul.f32 %v17296_v60, %v11215_v33  ;;  %v10237_v24 = vadd.f32 1.0, %v14993_v58  ;;  %v6145_v54 = vpop.f32.mrb[196].mxu1 }
 0x72c   : > { %v14997_v26 = vpop.eup %14996  ;;  %v11214_v49 = vmin.f32 %v11018_v7, 1.0  ;;  %v11020_v59 = vmax.f32 %v10824_v46, 0.0  ;;  %v10239_v53 = vadd.f32 1.0, %v14995_v43  ;;  %v7374_v21 = vmul.f32 %v6973_v3, %v6104_v34  ;;  %v6106_v8 = vpop.f32.mrb[209].mxu0 }
 0x72d   : > { %v14999_v36 = vpop.eup %14998  ;;  %13268 = vst [vmem:[%s17723_s8 + $0xb0] sm:$0xff] %v13147_v14  ;;  %v11619_v15 = vadd.f32 %v17464_v12, %v11417_v57  ;;  %15000 = vrcp.f32 %v10237_v24  ;;  %v10238_v6 = vadd.f32 1.0, %v14997_v26  ;;  %v7376_v44 = vmul.f32 %v6981_v63, %v6145_v54  ;;  %v6147_v45 = vpop.f32.mrb[197].mxu1 }
 0x72e   : > { %v6108_v10 = vpop.f32.mrb[210].mxu0  ;;  %v11416_v9 = vmul.f32 %v17296_v60, %v11214_v49  ;;  %v11216_v2 = vmin.f32 %v11020_v59, 1.0  ;;  %15002 = vrcp.f32 %v10239_v53  ;;  %v10240_v40 = vadd.f32 1.0, %v14999_v36  ;;  %v6149_v3 = vpop.f32.mrb[198].mxu1 }
 0x72f   : > { %v6109_v62 = vpop.f32.mrb[211].mxu0  ;;  %15004 = vrcp.f32 %v10238_v6  ;;  %v21724_v17 = vadd.f32 %v21627_v4, %v7374_v21  ;;  %v21727_v18 = vadd.f32 %v21630_v50, %v7376_v44  ;;  %v7375_v52 = vmul.f32 %v6977_v48, %v6106_v8  ;;  %v6150_v63 = vpop.f32.mrb[199].mxu1 }
 0x730   : > { %v11618_v37 = vadd.f32 %v17464_v12, %v11416_v9  ;;  %v11418_v29 = vmul.f32 %v17296_v60, %v11216_v2  ;;  %15006 = vrcp.f32 %v10240_v40  ;;  %v7377_v47 = vmul.f32 %v6985_v27, %v6147_v45 }
 0x731   : > { %v13782_v4 = vmul.f32 -1.442695, %v21724_v17  ;;  %v13784_v25 = vmul.f32 -1.442695, %v21727_v18  ;;  %v21740_v50 = vadd.f32 %v21633_v11, %v7375_v52  ;;  %v12054_v56 = vcombine.low %v12045_v51, %v12052_v22 }
 0x732   : > { %v13878_v13 = vpack.c.bf16 %v11618_v37, %v11617_v28  ;;  %v11620_v48 = vadd.f32 %v17464_v12, %v11418_v29  ;;  %v21743_v38 = vadd.f32 %v9264_v35, %v7377_v47  ;;  %v12061_v23 = vrot.slane %v12053_v42, %v22351_v30 }
 0x733   : > { %15008 = vpow2.f32 %v13782_v4  ;;  %v13783_v0 = vmul.f32 -1.442695, %v21740_v50  ;;  %v12068_v1 = vrot.slane %v12054_v56, %v22351_v30 }
 0x734   : > { %v13158_v27 = vrot.slane %v13878_v13, %v22351_v30  ;;  %v13879_v55 = vpack.c.bf16 %v11620_v48, %v11619_v15  ;;  %15010 = vpow2.f32 %v13784_v25  ;;  %v13785_v11 = vmul.f32 -1.442695, %v21743_v38 }
 0x735   : > { %15012 = vpow2.f32 %v13783_v0  ;;  %v12069_v41 = vcombine.low %v12061_v23, %v12068_v1 }
 0x736   : > { %v13165_v39 = vrot.slane %v13879_v55, %v22351_v30  ;;  %15014 = vpow2.f32 %v13785_v11 }
 0x737   : > { %v15001_v35 = vpop.eup %15000  ;;  %13246 = vst [vmem:[%s17723_s8] sm:$0xff] %v12069_v41 }
 0x738   : > { %v15003_v20 = vpop.eup %15002  ;;  %v13180_v16 = vcombine.low %v13158_v27, %v13165_v39  ;;  %v10825_v31 = vmul.f32 %v15001_v35, %v21653_v61 }
 0x739   : > { %v15005_v33 = vpop.eup %15004  ;;  %v10827_v51 = vmul.f32 %v15003_v20, %v21657_v32 }
 0x73a   : > { %v15007_v58 = vpop.eup %15006  ;;  %v11021_v7 = vmax.f32 %v10825_v31, 0.0  ;;  %v10826_v46 = vmul.f32 %v15005_v33, %v21660_v5  ;;  %v13188_v63 = vrot.slane %v13180_v16, %v22351_v30 }
 0x73b   : > { %v11023_v22 = vmax.f32 %v10827_v51, 0.0  ;;  %v10828_v42 = vmul.f32 %v15007_v58, %v21662_v19 }
 0x73c   : > { %v11217_v43 = vmin.f32 %v11021_v7, 1.0  ;;  %v11022_v14 = vmax.f32 %v10826_v46, 0.0 }
 0x73d   : > { %v15009_v28 = vpop.eup %15008  ;;  %v11219_v57 = vmin.f32 %v11023_v22, 1.0  ;;  %v11024_v24 = vmax.f32 %v10828_v42, 0.0 }
 0x73e   : > { %v15011_v34 = vpop.eup %15010  ;;  %v11419_v26 = vmul.f32 %v17296_v60, %v11217_v43  ;;  %v11218_v49 = vmin.f32 %v11022_v14, 1.0  ;;  %v10241_v61 = vadd.f32 1.0, %v15009_v28 }
 0x73f   : > { %v15013_v59 = vpop.eup %15012  ;;  %v11421_v32 = vmul.f32 %v17296_v60, %v11219_v57  ;;  %v11220_v53 = vmin.f32 %v11024_v24, 1.0  ;;  %v10243_v21 = vadd.f32 1.0, %v15011_v34 }
 0x740   : > { %v15015_v54 = vpop.eup %15014  ;;  %v11621_v5 = vadd.f32 %v17464_v12, %v11419_v26  ;;  %v11420_v19 = vmul.f32 %v17296_v60, %v11218_v49  ;;  %15016 = vrcp.f32 %v10241_v61  ;;  %v10242_v8 = vadd.f32 1.0, %v15013_v59 }
 0x741   : > { %v11623_v36 = vadd.f32 %v17464_v12, %v11421_v32  ;;  %v11422_v15 = vmul.f32 %v17296_v60, %v11220_v53  ;;  %15018 = vrcp.f32 %v10243_v21  ;;  %v10244_v6 = vadd.f32 1.0, %v15015_v54 }
 0x742   : > { %v11622_v44 = vadd.f32 %v17464_v12, %v11420_v19  ;;  %15020 = vrcp.f32 %v10242_v8 }
 0x743   : > { %v11624_v45 = vadd.f32 %v17464_v12, %v11422_v15  ;;  %15022 = vrcp.f32 %v10244_v6 }
 0x744   : > { %v13880_v10 = vpack.c.bf16 %v11622_v44, %v11621_v5 }
 0x745   : > { %v13881_v9 = vpack.c.bf16 %v11624_v45, %v11623_v36 }
 0x746   : > { %v13172_v2 = vrot.slane %v13880_v10, %v22351_v30 }
 0x747   : > { %v13179_v40 = vrot.slane %v13881_v9, %v22351_v30 }
 0x749   : > { %v13181_v3 = vcombine.low %v13172_v2, %v13179_v40 }
 0x74a   : > { %v15017_v62 = vpop.eup %15016 }
 0x74b   : > { %v15019_v52 = vpop.eup %15018  ;;  %v13195_v37 = vrot.slane %v13181_v3, %v22351_v30  ;;  %v10829_v29 = vmul.f32 %v15017_v62, %v21724_v17 }
 0x74c   : > { %v15021_v47 = vpop.eup %15020  ;;  %v10831_v4 = vmul.f32 %v15019_v52, %v21727_v18 }
 0x74d   : > { %v15023_v25 = vpop.eup %15022  ;;  %v13196_v56 = vcombine.low %v13188_v63, %v13195_v37  ;;  %v11025_v13 = vmax.f32 %v10829_v29, 0.0  ;;  %v10830_v48 = vmul.f32 %v15021_v47, %v21740_v50 }
 0x74e   : > { %v11027_v0 = vmax.f32 %v10831_v4, 0.0  ;;  %v10832_v23 = vmul.f32 %v15023_v25, %v21743_v38 }
 0x74f   : > { %13269 = vst [vmem:[%s17723_s8 + $0xb8] sm:$0xff] %v13196_v56  ;;  %v11221_v1 = vmin.f32 %v11025_v13, 1.0  ;;  %v11026_v27 = vmax.f32 %v10830_v48, 0.0 }
 0x750   : > { %v11223_v55 = vmin.f32 %v11027_v0, 1.0  ;;  %v11028_v11 = vmax.f32 %v10832_v23, 0.0 }
 0x751   : > { %v11423_v17 = vmul.f32 %v17296_v60, %v11221_v1  ;;  %v11222_v41 = vmin.f32 %v11026_v27, 1.0 }
 0x752   : > { %v11425_v18 = vmul.f32 %v17296_v60, %v11223_v55  ;;  %v11224_v39 = vmin.f32 %v11028_v11, 1.0 }
 0x753   : > { %v11625_v35 = vadd.f32 %v17464_v12, %v11423_v17  ;;  %v11424_v50 = vmul.f32 %v17296_v60, %v11222_v41 }
 0x754   : > { %v11627_v38 = vadd.f32 %v17464_v12, %v11425_v18  ;;  %v11426_v20 = vmul.f32 %v17296_v60, %v11224_v39 }
 0x755   : > { %v11626_v16 = vadd.f32 %v17464_v12, %v11424_v50 }
 0x756   : > { %v11628_v31 = vadd.f32 %v17464_v12, %v11426_v20 }
 0x757   : > { %v13882_v33 = vpack.c.bf16 %v11626_v16, %v11625_v35 }
 0x758   : > { %v13883_v51 = vpack.c.bf16 %v11628_v31, %v11627_v38 }
 0x759   : > { %v13205_v58 = vrot.slane %v13882_v33, %v22351_v30 }
 0x75a   : > { %v13212_v7 = vrot.slane %v13883_v51, %v22351_v30 }
 0x75c   : > { %v13213_v46 = vcombine.low %v13205_v58, %v13212_v7 }
 0x75e   : > { %13884 = vst.sshfl [vmem:[%s17723_s8 + $0xc0] sm:$0x55 pattern:$0x73625140] %v13213_v46 }
 0x75f   : > { %15211 = shalt.err (!%p15208_p6)
}
 0x760   : > { %s15212_s21 = scalar_lea.hbm %s21788_s29, 3136  ;;  %s15216_s15 = scalar_lea.hbm %s22749_s13, 6272 }
 0x761   : > { %p15213_p2 = scmp.ne.s32.totalorder %s21788_s29, %s15212_s21  ;;  %p15217_p3 = scmp.lt.u32.totalorder %s21788_s29, %s22749_s13 }
 0x762   : > { %p15218_p8 = scmp.lt.u32.totalorder %s15216_s15, %s15212_s21  ;;  %p15220_p1 = scmp.lt.u32.totalorder %s15212_s21, %s21788_s29 }
 0x763   : > { %p15214_p13 = pnand %p15213_p2, %p22750_p9 }
 0x764   : > { %p15219_p11 = por %p15218_p8, %p15217_p3 }
 0x765   : > { %p15215_p12 = pneg %p15214_p13 }
 0x766   : > { %p15221_p7 = por %p15220_p1, %p15219_p11 }
 0x768   : > { %p15222_p5 = pnand %p15221_p7, %p15215_p12 }
 0x76a   : > { %15225 = shalt.err (!%p15222_p5)
}
 0x76b   : > { %14034 = dma.vmem_to_hbm [thread:$0]  (%p22750_p9), %s21790_s3, 3136, %s21788_s29, %s13272_s27  }
 0x76c PF: > { %s22751_s14 = sld [smem:[#allocation19_spill]]  ;;  %s22752_s2 = sld [smem:[#allocation24_spill]] }
 0x76d   : > { %p22754_p10 = scmp.ge.s32.totalorder %s15276_s30, 2 }
 0x772   : > { %s13298_s24 = sand.u32 1, %s22751_s14   ;;  %p22753_p4 = scmp.ne.s32.totalorder %s22752_s2, 0 }
 0x773   : > { %s13299_s19 = scalar_lea.sflag [#allocation4], %s13298_s24 }
 0x774   : > { %p14057_p0 = pnand %p22754_p10, %p22753_p4 }
 0x776   : > { %15259 = dma.done.wait (!%p14057_p0), %s13299_s19, 3136  }
 0x777   : > { %15261 = vsyncadd (!%p14057_p0), %s13299_s19, 4294964160  ;;  %s22755_s30 = sld [smem:[#allocation21_spill]]  ;;  %s22756_s18 = sld [smem:[#allocation20_spill]] }
 0x778   : > { %s22757_s29 = sld [smem:[#allocation22_spill]]  ;;  %s22758_s27 = smov %s15268_s28 }
 0x77d   : > { %p26_p6 = scmp.ge.s32.totalorder %s22755_s30, 4   ;;  %s22759_s28 = smov %s22756_s18 }
 0x77f   :  { %28 = sbr.rel (!%p26_p6) target bundleno = 14 (0xe), region = 134 }
 0x786   :  { %13304 = vsyncpa [#allocation3], 1 }
 0x787   :  { %13306 = vsyncpa [#allocation3 + $0x1], 1 }
 0x788   :  { %13307 = vsyncpa [#allocation6], 1 }
 0x789   :  { %13308 = vsyncpa [#allocation9], 1 }
 0x78a   :  { %13310 = vsyncpa [#allocation9 + $0x1], 1 }
 0x78b   :  { %13311 = vsyncpa [#allocation12], 1 }
 0x78c   :  { %13313 = vsyncpa [#allocation12 + $0x1], 1 }
 0x78d   :  { %13314 = vsyncpa [#allocation4], 1 }
 0x78e   :  { %13316 = vsyncpa [#allocation4 + $0x1], 1 }

</bundles_post_ra>
